<compile_context>
chip_gen: v7x
topology: tpu7x:2x2x1
jax: 0.10.0
libtpu: 0.0.40
codegen_flags: <defaults>
</compile_context>

<pallas_src>
import jax
import jax.numpy as jnp
from jax import lax
from jax.experimental import pallas as pl
from jax.experimental.pallas import tpu as pltpu

KH, KW = 15, 15          # Conv2d kernel size
STRIDE = 2
HID = 512                # fc1 out_features
OUT = 54                 # fc2 out_features
CHUNK = 512              # lanes per in-kernel accumulator tile (multiple of 128)
HALO = 8                 # extra lanes per chunk so the kw lane shifts (<=7) stay in-bounds


def _round_up(n, m):
    return ((n + m - 1) // m) * m


class LayerMeta:
    """Static geometry of one conv+LIF layer in the packed lane layout."""

    def __init__(self, Hin, Win, Cin, Cout):
        self.Hin, self.Win, self.Cin, self.Cout = Hin, Win, Cin, Cout
        self.Ho = (Hin - KH) // STRIDE + 1
        self.Wo = (Win - KW) // STRIDE + 1
        self.Wh = self.Wo + (KW - 1) // 2        # per-row lane window (Wo + 7 tail cols)
        self.K = Cin * KH
        self.L = self.Ho * self.Wh               # valid flat lanes per image
        self.NL = _round_up(self.L, CHUNK)
        self.NCH = self.NL // CHUNK


# ---------------------------------------------------------------------------
# Wrapper-side data prep (kh-only im2col, parity split, lane packing) -- bf16
# ---------------------------------------------------------------------------
def _make_cols(x, meta):
    """x: (B, Cin, Hin, Win) -> cols: (B, NCH, 2, K, CHUNK+HALO) bf16.

    Flat lane l = ho*Wh + wh holds x[b, ci, 2*ho+kh, 2*wh+p] at row k=ci*KH+kh,
    parity p; chunk c carries lanes [c*CHUNK, c*CHUNK+CHUNK+HALO).
    """
    B = x.shape[0]
    Ho, Wh, K = meta.Ho, meta.Wh, meta.K
    L, NL, NCH = meta.L, meta.NL, meta.NCH

    x = x.astype(jnp.bfloat16)
    rows = [x[:, :, kh: kh + STRIDE * (Ho - 1) + 1: STRIDE, :] for kh in range(KH)]
    xs = jnp.stack(rows, axis=2).reshape(B, K, Ho, x.shape[-1])     # k = ci*KH + kh

    par = []
    for p in range(2):                                              # width parity split
        xp = xs[..., p::2]
        pad = Wh - xp.shape[-1]
        if pad > 0:
            xp = jnp.pad(xp, ((0, 0), (0, 0), (0, 0), (0, pad)))
        par.append(xp[..., :Wh])
    cols = jnp.stack(par, axis=1)                                   # (B, 2, K, Ho, Wh)

    flat = cols.reshape(B, 2, K, L)
    flat = jnp.pad(flat, ((0, 0), (0, 0), (0, 0), (0, NL + CHUNK - L)))
    main = flat[..., :NL].reshape(B, 2, K, NCH, CHUNK)
    halo = flat[..., CHUNK:CHUNK + NL].reshape(B, 2, K, NCH, CHUNK)[..., :HALO]
    chunked = jnp.concatenate([main, halo], axis=-1)                # (B,2,K,NCH,CHUNK+HALO)
    return chunked.transpose(0, 3, 1, 2, 4)                         # (B,NCH,2,K,CHUNK+HALO)


def _spk_unpack(spk, meta):
    """spk: (B, NCH, C, CHUNK) packed -> (B, C, Ho, Wo) torch activation layout."""
    B, _, C, _ = spk.shape
    s = spk.transpose(0, 2, 1, 3).reshape(B, C, meta.NL)[..., :meta.L]
    s = s.reshape(B, C, meta.Ho, meta.Wh)[..., :meta.Wo]
    return s


# ---------------------------------------------------------------------------
# Fused Conv2d(15x15, stride 2) + membrane accumulation + LIF Pallas kernel
# ---------------------------------------------------------------------------
def conv_lif_layer(x, mem, w_taps, bias, meta):
    """x: (B, Cin, Hin, Win); mem: (B, NCH, Cout, CHUNK) f32 packed membranes.

    Returns (new_mem f32, spikes bf16), both in the packed (B, NCH, Cout, CHUNK)
    layout.  Valid entries live at lane r*Wh + wo (wo < Wo); tail/pad lanes hold
    bounded garbage that is never read back.
    """
    B = x.shape[0]
    Cout, K, NCH = meta.Cout, meta.K, meta.NCH
    cols = _make_cols(x, meta)

    def kernel(cols_ref, w_ref, b_ref, mem_ref, mem_out_ref, spk_ref):
        # loop-invariant bias broadcast, hoisted (acc starts from it)
        bias_b = jnp.broadcast_to(b_ref[...], (Cout, CHUNK))

        def body(c, carry):
            acc = bias_b
            for kw in range(KW):                         # 15 taps, unrolled
                p, m = kw % 2, kw // 2
                # (K, CHUNK) bf16 slab: static lane slice thanks to the halo
                xs = cols_ref[0, c, p, :, pl.ds(m, CHUNK)]
                acc = acc + jnp.dot(w_ref[kw, :, :], xs,
                                    preferred_element_type=jnp.float32)
            mem_new = mem_ref[0, c, :, :] + acc          # membrane += conv + bias
            spike = mem_new > 1.0                        # LIF: strict '>', threshold 1
            mem_out_ref[0, c, :, :] = jnp.where(spike, 0.0, mem_new)   # reset-to-zero
            spk_ref[0, c, :, :] = spike.astype(spk_ref.dtype)
            return carry

        lax.fori_loop(0, NCH, body, 0)

    new_mem, spk = pl.pallas_call(
        kernel,
        out_shape=(jax.ShapeDtypeStruct((B, NCH, Cout, CHUNK), jnp.float32),
                   jax.ShapeDtypeStruct((B, NCH, Cout, CHUNK), jnp.bfloat16)),
        grid_spec=pltpu.PrefetchScalarGridSpec(
            num_scalar_prefetch=0,
            grid=(B,),
            in_specs=[
                pl.BlockSpec((1, NCH, 2, K, CHUNK + HALO),
                             lambda b: (b, 0, 0, 0, 0)),
                pl.BlockSpec((KW, Cout, K), lambda b: (0, 0, 0)),
                pl.BlockSpec((Cout, 1), lambda b: (0, 0)),
                pl.BlockSpec((1, NCH, Cout, CHUNK), lambda b: (b, 0, 0, 0)),
            ],
            out_specs=[
                pl.BlockSpec((1, NCH, Cout, CHUNK), lambda b: (b, 0, 0, 0)),
                pl.BlockSpec((1, NCH, Cout, CHUNK), lambda b: (b, 0, 0, 0)),
            ],
        ),
        compiler_params=pltpu.CompilerParams(
            dimension_semantics=("parallel",)),
    )(cols, w_taps, bias, mem)
    return new_mem, spk


# ---------------------------------------------------------------------------
# Fused fc1 -> LIF -> fc2 -> LIF -> spike_sum Pallas kernel (per frame)
# ---------------------------------------------------------------------------
def _fc_lif_kernel(x_ref, w1_ref, b1_ref, w2_ref, b2_ref,
                   m0_ref, m1_ref, ss_ref, m0_out, m1_out, ss_out):
    x = x_ref[...]                                        # (B, F) bf16 spikes
    m0 = (m0_ref[...]
          + jnp.dot(x, w1_ref[...], preferred_element_type=jnp.float32)
          + b1_ref[...])
    s0 = m0 > 1.0
    m0_out[...] = jnp.where(s0, 0.0, m0)
    m1 = (m1_ref[...]
          + jnp.dot(s0.astype(jnp.bfloat16), w2_ref[...],
                    preferred_element_type=jnp.float32)
          + b2_ref[...])
    s1 = m1 > 1.0
    m1_out[...] = jnp.where(s1, 0.0, m1)
    ss_out[...] = ss_ref[...] + s1.astype(jnp.float32)


def fc_lif_step(x_flat, m_f0, m_f1, ss, w1_t, b1, w2_t, b2):
    B, F = x_flat.shape
    return pl.pallas_call(
        _fc_lif_kernel,
        out_shape=(jax.ShapeDtypeStruct((B, HID), jnp.float32),
                   jax.ShapeDtypeStruct((B, OUT), jnp.float32),
                   jax.ShapeDtypeStruct((B, OUT), jnp.float32)),
        grid_spec=pltpu.PrefetchScalarGridSpec(
            num_scalar_prefetch=0,
            grid=(1,),
            in_specs=[
                pl.BlockSpec((B, F), lambda i: (0, 0)),
                pl.BlockSpec((F, HID), lambda i: (0, 0)),
                pl.BlockSpec((1, HID), lambda i: (0, 0)),
                pl.BlockSpec((HID, OUT), lambda i: (0, 0)),
                pl.BlockSpec((1, OUT), lambda i: (0, 0)),
                pl.BlockSpec((B, HID), lambda i: (0, 0)),
                pl.BlockSpec((B, OUT), lambda i: (0, 0)),
                pl.BlockSpec((B, OUT), lambda i: (0, 0)),
            ],
            out_specs=[
                pl.BlockSpec((B, HID), lambda i: (0, 0)),
                pl.BlockSpec((B, OUT), lambda i: (0, 0)),
                pl.BlockSpec((B, OUT), lambda i: (0, 0)),
            ],
        ),
        compiler_params=pltpu.CompilerParams(
            dimension_semantics=("arbitrary",)),
    )(x_flat, w1_t, b1, w2_t, b2, m_f0, m_f1, ss)


# ---------------------------------------------------------------------------
# Full forward pass (mirrors snn_grating.forward)
# ---------------------------------------------------------------------------
def forward(x, params):
    B, T, H, W = x.shape

    # F.avg_pool2d(x, 2): the T frames play the channel role (wrapper glue)
    xp = x.reshape(B, T, H // 2, 2, W // 2, 2).mean(axis=(3, 5))    # (B, T, Hp, Wp)
    frames = jnp.moveaxis(xp, 1, 0)[:, :, None, :, :]               # (T, B, 1, Hp, Wp)
    Hp, Wp = H // 2, W // 2

    c0 = params["w_c1"].shape[0]
    c1 = params["w_c2"].shape[0]
    c2 = params["w_c3"].shape[0]
    meta1 = LayerMeta(Hp, Wp, 1, c0)          # 143x143
    meta2 = LayerMeta(meta1.Ho, meta1.Wo, c0, c1)   # 65x65
    meta3 = LayerMeta(meta2.Ho, meta2.Wo, c1, c2)   # 26x26

    def prep_w(w):
        cout, cin = w.shape[0], w.shape[1]
        # w_taps[kw, co, ci*KH + kh] = w[co, ci, kh, kw]
        return jnp.transpose(w, (3, 0, 1, 2)).reshape(KW, cout, cin * KH).astype(jnp.bfloat16)

    w1t = prep_w(params["w_c1"]); b1c = params["b_c1"].reshape(c0, 1).astype(jnp.float32)
    w2t = prep_w(params["w_c2"]); b2c = params["b_c2"].reshape(c1, 1).astype(jnp.float32)
    w3t = prep_w(params["w_c3"]); b3c = params["b_c3"].reshape(c2, 1).astype(jnp.float32)

    wf1 = params["w_fc1"].T.astype(jnp.bfloat16)            # (F_in, HID) bf16 stream
    bf1 = params["b_fc1"].reshape(1, HID).astype(jnp.float32)
    wf2 = params["w_fc2"].T.astype(jnp.bfloat16)            # (HID, OUT)
    bf2 = params["b_fc2"].reshape(1, OUT).astype(jnp.float32)

    # Membranes in the packed lane-dense layout (init to zero, as in PyTorch)
    mem_c1 = jnp.zeros((B, meta1.NCH, c0, CHUNK), jnp.float32)
    mem_c2 = jnp.zeros((B, meta2.NCH, c1, CHUNK), jnp.float32)
    mem_c3 = jnp.zeros((B, meta3.NCH, c2, CHUNK), jnp.float32)
    m_f0 = jnp.zeros((B, HID), jnp.float32)
    m_f1 = jnp.zeros((B, OUT), jnp.float32)
    ss = jnp.zeros((B, OUT), jnp.float32)

    def step(carry, frame):
        mc1, mc2, mc3, mf0, mf1, s_sum = carry
        mc1, sp1 = conv_lif_layer(frame, mc1, w1t, b1c, meta1)
        x1 = _spk_unpack(sp1, meta1)                         # (B, c0, 143, 143) bf16
        mc2, sp2 = conv_lif_layer(x1, mc2, w2t, b2c, meta2)
        x2 = _spk_unpack(sp2, meta2)                         # (B, c1, 65, 65) bf16
        mc3, sp3 = conv_lif_layer(x2, mc3, w3t, b3c, meta3)
        # torch.flatten(out, 1): (B, C, H, W) -> (B, C*H*W)
        x3 = _spk_unpack(sp3, meta3).reshape(frame.shape[0], -1)
        mf0, mf1, s_sum = fc_lif_step(x3, mf0, mf1, s_sum, wf1, bf1, wf2, bf2)
        return (mc1, mc2, mc3, mf0, mf1, s_sum), None

    (_, _, _, _, _, ss), _ = lax.scan(
        step, (mem_c1, mem_c2, mem_c3, m_f0, m_f1, ss), frames)
    return ss


# ---------------------------------------------------------------------------
# Deterministic parameter init (shapes match snn_grating.__init__)
# ---------------------------------------------------------------------------
def init_params(key, channel):
    c0, c1, c2 = channel
    f_in = int(10816 * c2 / 16)                  # fc1 in_features = 26*26*c2
    ks = jax.random.split(key, 10)

    def w_init(k, shape, fan_in):
        return jax.random.normal(k, shape, jnp.float32) / jnp.sqrt(float(fan_in))

    return dict(
        w_c1=w_init(ks[0], (c0, 1, KH, KW), KH * KW),
        b_c1=0.05 * jax.random.normal(ks[1], (c0,), jnp.float32),
        w_c2=w_init(ks[2], (c1, c0, KH, KW), c0 * KH * KW),
        b_c2=0.05 * jax.random.normal(ks[3], (c1,), jnp.float32),
        w_c3=w_init(ks[4], (c2, c1, KH, KW), c1 * KH * KW),
        b_c3=0.05 * jax.random.normal(ks[5], (c2,), jnp.float32),
        w_fc1=w_init(ks[6], (HID, f_in), f_in),
        b_fc1=0.05 * jax.random.normal(ks[7], (HID,), jnp.float32),
        w_fc2=w_init(ks[8], (OUT, HID), HID),
        b_fc2=0.05 * jax.random.normal(ks[9], (OUT,), jnp.float32),
    )


if __name__ == "__main__":
    key = jax.random.PRNGKey(0)
    k_x, k_p = jax.random.split(key)

    channel = (4, 4, 4)                          # small channel config; fc1 in = 2704
    params = init_params(k_p, channel)

    # The module hard-codes membrane sizes 143/65/26 and fc1 in_features,
    # which implies 600x600 inputs (300x300 after avg_pool2d).  Keep the
    # batch and number of frames small instead.
    B, T = 2, 3
    x = jax.random.normal(k_x, (B, T, 600, 600), dtype=jnp.float32)

    out = jax.jit(forward)(x, params)
    out = jax.block_until_ready(out)

    assert out.shape == (B, OUT), out.shape
    assert bool(jnp.all(jnp.isfinite(out)))
    print("KERNEL_OK")
</pallas_src>

<mosaic_0001>
module attributes {stable_mosaic.version = 11 : i64} {
  func.func @kernel(%arg0: i32, %arg1: memref<1x42x2x15x520xbf16, #tpu.memory_space<vmem>>, %arg2: memref<15x4x15xbf16, #tpu.memory_space<vmem>>, %arg3: memref<4x1xf32, #tpu.memory_space<vmem>>, %arg4: memref<1x42x4x512xf32, #tpu.memory_space<vmem>>, %arg5: memref<1x42x4x512xf32, #tpu.memory_space<vmem>>, %arg6: memref<1x42x4x512xbf16, #tpu.memory_space<vmem>>) attributes {dimension_semantics = [#tpu.dimension_semantics<parallel>], iteration_bounds = array<i64: 2>, scalar_prefetch = 0 : i64, scratch_operands = 0 : i64, tpu.core_type = #tpu.core_type<tc>, window_params = [{transform_indices = @transform_0, window_bounds = array<i64: 1, 42, 2, 15, 520>}, {pipeline_mode = #tpu.pipeline_mode<synchronous>, transform_indices = @transform_1, window_bounds = array<i64: 15, 4, 15>}, {pipeline_mode = #tpu.pipeline_mode<synchronous>, transform_indices = @transform_2, window_bounds = array<i64: 4, 1>}, {transform_indices = @transform_3, window_bounds = array<i64: 1, 42, 4, 512>}, {transform_indices = @transform_4, window_bounds = array<i64: 1, 42, 4, 512>}, {transform_indices = @transform_5, window_bounds = array<i64: 1, 42, 4, 512>}]} {
    %c0 = arith.constant 0 : index
    %c0_0 = arith.constant 0 : index
    %0 = vector.load %arg3[%c0, %c0_0] : memref<4x1xf32, #tpu.memory_space<vmem>>, vector<4x1xf32>
    %1 = vector.shape_cast %0 : vector<4x1xf32> to vector<4x1xf32>
    %2 = vector.broadcast %1 : vector<4x1xf32> to vector<4x512xf32>
    %c0_i32 = arith.constant 0 : i32
    %c42_i32 = arith.constant 42 : i32
    %3 = arith.addi %c0_i32, %c42_i32 : i32
    %c1_i32 = arith.constant 1 : i32
    scf.for %arg7 = %c0_i32 to %3 step %c1_i32  : i32 {
      %c0_2 = arith.constant 0 : index
      %4 = arith.index_cast %arg7 : i32 to index
      %c0_3 = arith.constant 0 : index
      %c0_4 = arith.constant 0 : index
      %c0_5 = arith.constant 0 : index
      %5 = vector.load %arg1[%c0_2, %4, %c0_3, %c0_4, %c0_5] : memref<1x42x2x15x520xbf16, #tpu.memory_space<vmem>>, vector<1x1x1x15x512xbf16>
      %6 = vector.shape_cast %5 : vector<1x1x1x15x512xbf16> to vector<15x512xbf16>
      %c0_6 = arith.constant 0 : index
      %c0_7 = arith.constant 0 : index
      %c0_8 = arith.constant 0 : index
      %7 = vector.load %arg2[%c0_6, %c0_7, %c0_8] : memref<15x4x15xbf16, #tpu.memory_space<vmem>>, vector<1x4x15xbf16>
      %8 = vector.shape_cast %7 : vector<1x4x15xbf16> to vector<4x15xbf16>
      %cst = arith.constant dense<0.000000e+00> : vector<4x512xf32>
      %9 = tpu.matmul %8, %6, %cst {dimension_numbers = #tpu.dot_dimension_numbers<[1], [0], [0], [1], [0, 0, 1, 1], [], []>} : vector<4x15xbf16>, vector<15x512xbf16>, vector<4x512xf32> -> vector<4x512xf32>
      %10 = arith.addf %2, %9 : vector<4x512xf32>
      %c0_9 = arith.constant 0 : index
      %11 = arith.index_cast %arg7 : i32 to index
      %c1 = arith.constant 1 : index
      %c0_10 = arith.constant 0 : index
      %c0_11 = arith.constant 0 : index
      %12 = vector.load %arg1[%c0_9, %11, %c1, %c0_10, %c0_11] : memref<1x42x2x15x520xbf16, #tpu.memory_space<vmem>>, vector<1x1x1x15x512xbf16>
      %13 = vector.shape_cast %12 : vector<1x1x1x15x512xbf16> to vector<15x512xbf16>
      %c1_12 = arith.constant 1 : index
      %c0_13 = arith.constant 0 : index
      %c0_14 = arith.constant 0 : index
      %14 = vector.load %arg2[%c1_12, %c0_13, %c0_14] : memref<15x4x15xbf16, #tpu.memory_space<vmem>>, vector<1x4x15xbf16>
      %15 = vector.shape_cast %14 : vector<1x4x15xbf16> to vector<4x15xbf16>
      %cst_15 = arith.constant dense<0.000000e+00> : vector<4x512xf32>
      %16 = tpu.matmul %15, %13, %cst_15 {dimension_numbers = #tpu.dot_dimension_numbers<[1], [0], [0], [1], [0, 0, 1, 1], [], []>} : vector<4x15xbf16>, vector<15x512xbf16>, vector<4x512xf32> -> vector<4x512xf32>
      %17 = arith.addf %10, %16 : vector<4x512xf32>
      %c0_16 = arith.constant 0 : index
      %18 = arith.index_cast %arg7 : i32 to index
      %c0_17 = arith.constant 0 : index
      %c0_18 = arith.constant 0 : index
      %c1_19 = arith.constant 1 : index
      %19 = vector.load %arg1[%c0_16, %18, %c0_17, %c0_18, %c1_19] : memref<1x42x2x15x520xbf16, #tpu.memory_space<vmem>>, vector<1x1x1x15x512xbf16>
      %20 = vector.shape_cast %19 : vector<1x1x1x15x512xbf16> to vector<15x512xbf16>
      %c2 = arith.constant 2 : index
      %c0_20 = arith.constant 0 : index
      %c0_21 = arith.constant 0 : index
      %21 = vector.load %arg2[%c2, %c0_20, %c0_21] : memref<15x4x15xbf16, #tpu.memory_space<vmem>>, vector<1x4x15xbf16>
      %22 = vector.shape_cast %21 : vector<1x4x15xbf16> to vector<4x15xbf16>
      %cst_22 = arith.constant dense<0.000000e+00> : vector<4x512xf32>
      %23 = tpu.matmul %22, %20, %cst_22 {dimension_numbers = #tpu.dot_dimension_numbers<[1], [0], [0], [1], [0, 0, 1, 1], [], []>} : vector<4x15xbf16>, vector<15x512xbf16>, vector<4x512xf32> -> vector<4x512xf32>
      %24 = arith.addf %17, %23 : vector<4x512xf32>
      %c0_23 = arith.constant 0 : index
      %25 = arith.index_cast %arg7 : i32 to index
      %c1_24 = arith.constant 1 : index
      %c0_25 = arith.constant 0 : index
      %c1_26 = arith.constant 1 : index
      %26 = vector.load %arg1[%c0_23, %25, %c1_24, %c0_25, %c1_26] : memref<1x42x2x15x520xbf16, #tpu.memory_space<vmem>>, vector<1x1x1x15x512xbf16>
      %27 = vector.shape_cast %26 : vector<1x1x1x15x512xbf16> to vector<15x512xbf16>
      %c3 = arith.constant 3 : index
      %c0_27 = arith.constant 0 : index
      %c0_28 = arith.constant 0 : index
      %28 = vector.load %arg2[%c3, %c0_27, %c0_28] : memref<15x4x15xbf16, #tpu.memory_space<vmem>>, vector<1x4x15xbf16>
      %29 = vector.shape_cast %28 : vector<1x4x15xbf16> to vector<4x15xbf16>
      %cst_29 = arith.constant dense<0.000000e+00> : vector<4x512xf32>
      %30 = tpu.matmul %29, %27, %cst_29 {dimension_numbers = #tpu.dot_dimension_numbers<[1], [0], [0], [1], [0, 0, 1, 1], [], []>} : vector<4x15xbf16>, vector<15x512xbf16>, vector<4x512xf32> -> vector<4x512xf32>
      %31 = arith.addf %24, %30 : vector<4x512xf32>
      %c0_30 = arith.constant 0 : index
      %32 = arith.index_cast %arg7 : i32 to index
      %c0_31 = arith.constant 0 : index
      %c0_32 = arith.constant 0 : index
      %c2_33 = arith.constant 2 : index
      %33 = vector.load %arg1[%c0_30, %32, %c0_31, %c0_32, %c2_33] : memref<1x42x2x15x520xbf16, #tpu.memory_space<vmem>>, vector<1x1x1x15x512xbf16>
      %34 = vector.shape_cast %33 : vector<1x1x1x15x512xbf16> to vector<15x512xbf16>
      %c4 = arith.constant 4 : index
      %c0_34 = arith.constant 0 : index
      %c0_35 = arith.constant 0 : index
      %35 = vector.load %arg2[%c4, %c0_34, %c0_35] : memref<15x4x15xbf16, #tpu.memory_space<vmem>>, vector<1x4x15xbf16>
      %36 = vector.shape_cast %35 : vector<1x4x15xbf16> to vector<4x15xbf16>
      %cst_36 = arith.constant dense<0.000000e+00> : vector<4x512xf32>
      %37 = tpu.matmul %36, %34, %cst_36 {dimension_numbers = #tpu.dot_dimension_numbers<[1], [0], [0], [1], [0, 0, 1, 1], [], []>} : vector<4x15xbf16>, vector<15x512xbf16>, vector<4x512xf32> -> vector<4x512xf32>
      %38 = arith.addf %31, %37 : vector<4x512xf32>
      %c0_37 = arith.constant 0 : index
      %39 = arith.index_cast %arg7 : i32 to index
      %c1_38 = arith.constant 1 : index
      %c0_39 = arith.constant 0 : index
      %c2_40 = arith.constant 2 : index
      %40 = vector.load %arg1[%c0_37, %39, %c1_38, %c0_39, %c2_40] : memref<1x42x2x15x520xbf16, #tpu.memory_space<vmem>>, vector<1x1x1x15x512xbf16>
      %41 = vector.shape_cast %40 : vector<1x1x1x15x512xbf16> to vector<15x512xbf16>
      %c5 = arith.constant 5 : index
      %c0_41 = arith.constant 0 : index
      %c0_42 = arith.constant 0 : index
      %42 = vector.load %arg2[%c5, %c0_41, %c0_42] : memref<15x4x15xbf16, #tpu.memory_space<vmem>>, vector<1x4x15xbf16>
      %43 = vector.shape_cast %42 : vector<1x4x15xbf16> to vector<4x15xbf16>
      %cst_43 = arith.constant dense<0.000000e+00> : vector<4x512xf32>
      %44 = tpu.matmul %43, %41, %cst_43 {dimension_numbers = #tpu.dot_dimension_numbers<[1], [0], [0], [1], [0, 0, 1, 1], [], []>} : vector<4x15xbf16>, vector<15x512xbf16>, vector<4x512xf32> -> vector<4x512xf32>
      %45 = arith.addf %38, %44 : vector<4x512xf32>
      %c0_44 = arith.constant 0 : index
      %46 = arith.index_cast %arg7 : i32 to index
      %c0_45 = arith.constant 0 : index
      %c0_46 = arith.constant 0 : index
      %c3_47 = arith.constant 3 : index
      %47 = vector.load %arg1[%c0_44, %46, %c0_45, %c0_46, %c3_47] : memref<1x42x2x15x520xbf16, #tpu.memory_space<vmem>>, vector<1x1x1x15x512xbf16>
      %48 = vector.shape_cast %47 : vector<1x1x1x15x512xbf16> to vector<15x512xbf16>
      %c6 = arith.constant 6 : index
      %c0_48 = arith.constant 0 : index
      %c0_49 = arith.constant 0 : index
      %49 = vector.load %arg2[%c6, %c0_48, %c0_49] : memref<15x4x15xbf16, #tpu.memory_space<vmem>>, vector<1x4x15xbf16>
      %50 = vector.shape_cast %49 : vector<1x4x15xbf16> to vector<4x15xbf16>
      %cst_50 = arith.constant dense<0.000000e+00> : vector<4x512xf32>
      %51 = tpu.matmul %50, %48, %cst_50 {dimension_numbers = #tpu.dot_dimension_numbers<[1], [0], [0], [1], [0, 0, 1, 1], [], []>} : vector<4x15xbf16>, vector<15x512xbf16>, vector<4x512xf32> -> vector<4x512xf32>
      %52 = arith.addf %45, %51 : vector<4x512xf32>
      %c0_51 = arith.constant 0 : index
      %53 = arith.index_cast %arg7 : i32 to index
      %c1_52 = arith.constant 1 : index
      %c0_53 = arith.constant 0 : index
      %c3_54 = arith.constant 3 : index
      %54 = vector.load %arg1[%c0_51, %53, %c1_52, %c0_53, %c3_54] : memref<1x42x2x15x520xbf16, #tpu.memory_space<vmem>>, vector<1x1x1x15x512xbf16>
      %55 = vector.shape_cast %54 : vector<1x1x1x15x512xbf16> to vector<15x512xbf16>
      %c7 = arith.constant 7 : index
      %c0_55 = arith.constant 0 : index
      %c0_56 = arith.constant 0 : index
      %56 = vector.load %arg2[%c7, %c0_55, %c0_56] : memref<15x4x15xbf16, #tpu.memory_space<vmem>>, vector<1x4x15xbf16>
      %57 = vector.shape_cast %56 : vector<1x4x15xbf16> to vector<4x15xbf16>
      %cst_57 = arith.constant dense<0.000000e+00> : vector<4x512xf32>
      %58 = tpu.matmul %57, %55, %cst_57 {dimension_numbers = #tpu.dot_dimension_numbers<[1], [0], [0], [1], [0, 0, 1, 1], [], []>} : vector<4x15xbf16>, vector<15x512xbf16>, vector<4x512xf32> -> vector<4x512xf32>
      %59 = arith.addf %52, %58 : vector<4x512xf32>
      %c0_58 = arith.constant 0 : index
      %60 = arith.index_cast %arg7 : i32 to index
      %c0_59 = arith.constant 0 : index
      %c0_60 = arith.constant 0 : index
      %c4_61 = arith.constant 4 : index
      %61 = vector.load %arg1[%c0_58, %60, %c0_59, %c0_60, %c4_61] : memref<1x42x2x15x520xbf16, #tpu.memory_space<vmem>>, vector<1x1x1x15x512xbf16>
      %62 = vector.shape_cast %61 : vector<1x1x1x15x512xbf16> to vector<15x512xbf16>
      %c8 = arith.constant 8 : index
      %c0_62 = arith.constant 0 : index
      %c0_63 = arith.constant 0 : index
      %63 = vector.load %arg2[%c8, %c0_62, %c0_63] : memref<15x4x15xbf16, #tpu.memory_space<vmem>>, vector<1x4x15xbf16>
      %64 = vector.shape_cast %63 : vector<1x4x15xbf16> to vector<4x15xbf16>
      %cst_64 = arith.constant dense<0.000000e+00> : vector<4x512xf32>
      %65 = tpu.matmul %64, %62, %cst_64 {dimension_numbers = #tpu.dot_dimension_numbers<[1], [0], [0], [1], [0, 0, 1, 1], [], []>} : vector<4x15xbf16>, vector<15x512xbf16>, vector<4x512xf32> -> vector<4x512xf32>
      %66 = arith.addf %59, %65 : vector<4x512xf32>
      %c0_65 = arith.constant 0 : index
      %67 = arith.index_cast %arg7 : i32 to index
      %c1_66 = arith.constant 1 : index
      %c0_67 = arith.constant 0 : index
      %c4_68 = arith.constant 4 : index
      %68 = vector.load %arg1[%c0_65, %67, %c1_66, %c0_67, %c4_68] : memref<1x42x2x15x520xbf16, #tpu.memory_space<vmem>>, vector<1x1x1x15x512xbf16>
      %69 = vector.shape_cast %68 : vector<1x1x1x15x512xbf16> to vector<15x512xbf16>
      %c9 = arith.constant 9 : index
      %c0_69 = arith.constant 0 : index
      %c0_70 = arith.constant 0 : index
      %70 = vector.load %arg2[%c9, %c0_69, %c0_70] : memref<15x4x15xbf16, #tpu.memory_space<vmem>>, vector<1x4x15xbf16>
      %71 = vector.shape_cast %70 : vector<1x4x15xbf16> to vector<4x15xbf16>
      %cst_71 = arith.constant dense<0.000000e+00> : vector<4x512xf32>
      %72 = tpu.matmul %71, %69, %cst_71 {dimension_numbers = #tpu.dot_dimension_numbers<[1], [0], [0], [1], [0, 0, 1, 1], [], []>} : vector<4x15xbf16>, vector<15x512xbf16>, vector<4x512xf32> -> vector<4x512xf32>
      %73 = arith.addf %66, %72 : vector<4x512xf32>
      %c0_72 = arith.constant 0 : index
      %74 = arith.index_cast %arg7 : i32 to index
      %c0_73 = arith.constant 0 : index
      %c0_74 = arith.constant 0 : index
      %c5_75 = arith.constant 5 : index
      %75 = vector.load %arg1[%c0_72, %74, %c0_73, %c0_74, %c5_75] : memref<1x42x2x15x520xbf16, #tpu.memory_space<vmem>>, vector<1x1x1x15x512xbf16>
      %76 = vector.shape_cast %75 : vector<1x1x1x15x512xbf16> to vector<15x512xbf16>
      %c10 = arith.constant 10 : index
      %c0_76 = arith.constant 0 : index
      %c0_77 = arith.constant 0 : index
      %77 = vector.load %arg2[%c10, %c0_76, %c0_77] : memref<15x4x15xbf16, #tpu.memory_space<vmem>>, vector<1x4x15xbf16>
      %78 = vector.shape_cast %77 : vector<1x4x15xbf16> to vector<4x15xbf16>
      %cst_78 = arith.constant dense<0.000000e+00> : vector<4x512xf32>
      %79 = tpu.matmul %78, %76, %cst_78 {dimension_numbers = #tpu.dot_dimension_numbers<[1], [0], [0], [1], [0, 0, 1, 1], [], []>} : vector<4x15xbf16>, vector<15x512xbf16>, vector<4x512xf32> -> vector<4x512xf32>
      %80 = arith.addf %73, %79 : vector<4x512xf32>
      %c0_79 = arith.constant 0 : index
      %81 = arith.index_cast %arg7 : i32 to index
      %c1_80 = arith.constant 1 : index
      %c0_81 = arith.constant 0 : index
      %c5_82 = arith.constant 5 : index
      %82 = vector.load %arg1[%c0_79, %81, %c1_80, %c0_81, %c5_82] : memref<1x42x2x15x520xbf16, #tpu.memory_space<vmem>>, vector<1x1x1x15x512xbf16>
      %83 = vector.shape_cast %82 : vector<1x1x1x15x512xbf16> to vector<15x512xbf16>
      %c11 = arith.constant 11 : index
      %c0_83 = arith.constant 0 : index
      %c0_84 = arith.constant 0 : index
      %84 = vector.load %arg2[%c11, %c0_83, %c0_84] : memref<15x4x15xbf16, #tpu.memory_space<vmem>>, vector<1x4x15xbf16>
      %85 = vector.shape_cast %84 : vector<1x4x15xbf16> to vector<4x15xbf16>
      %cst_85 = arith.constant dense<0.000000e+00> : vector<4x512xf32>
      %86 = tpu.matmul %85, %83, %cst_85 {dimension_numbers = #tpu.dot_dimension_numbers<[1], [0], [0], [1], [0, 0, 1, 1], [], []>} : vector<4x15xbf16>, vector<15x512xbf16>, vector<4x512xf32> -> vector<4x512xf32>
      %87 = arith.addf %80, %86 : vector<4x512xf32>
      %c0_86 = arith.constant 0 : index
      %88 = arith.index_cast %arg7 : i32 to index
      %c0_87 = arith.constant 0 : index
      %c0_88 = arith.constant 0 : index
      %c6_89 = arith.constant 6 : index
      %89 = vector.load %arg1[%c0_86, %88, %c0_87, %c0_88, %c6_89] : memref<1x42x2x15x520xbf16, #tpu.memory_space<vmem>>, vector<1x1x1x15x512xbf16>
      %90 = vector.shape_cast %89 : vector<1x1x1x15x512xbf16> to vector<15x512xbf16>
      %c12 = arith.constant 12 : index
      %c0_90 = arith.constant 0 : index
      %c0_91 = arith.constant 0 : index
      %91 = vector.load %arg2[%c12, %c0_90, %c0_91] : memref<15x4x15xbf16, #tpu.memory_space<vmem>>, vector<1x4x15xbf16>
      %92 = vector.shape_cast %91 : vector<1x4x15xbf16> to vector<4x15xbf16>
      %cst_92 = arith.constant dense<0.000000e+00> : vector<4x512xf32>
      %93 = tpu.matmul %92, %90, %cst_92 {dimension_numbers = #tpu.dot_dimension_numbers<[1], [0], [0], [1], [0, 0, 1, 1], [], []>} : vector<4x15xbf16>, vector<15x512xbf16>, vector<4x512xf32> -> vector<4x512xf32>
      %94 = arith.addf %87, %93 : vector<4x512xf32>
      %c0_93 = arith.constant 0 : index
      %95 = arith.index_cast %arg7 : i32 to index
      %c1_94 = arith.constant 1 : index
      %c0_95 = arith.constant 0 : index
      %c6_96 = arith.constant 6 : index
      %96 = vector.load %arg1[%c0_93, %95, %c1_94, %c0_95, %c6_96] : memref<1x42x2x15x520xbf16, #tpu.memory_space<vmem>>, vector<1x1x1x15x512xbf16>
      %97 = vector.shape_cast %96 : vector<1x1x1x15x512xbf16> to vector<15x512xbf16>
      %c13 = arith.constant 13 : index
      %c0_97 = arith.constant 0 : index
      %c0_98 = arith.constant 0 : index
      %98 = vector.load %arg2[%c13, %c0_97, %c0_98] : memref<15x4x15xbf16, #tpu.memory_space<vmem>>, vector<1x4x15xbf16>
      %99 = vector.shape_cast %98 : vector<1x4x15xbf16> to vector<4x15xbf16>
      %cst_99 = arith.constant dense<0.000000e+00> : vector<4x512xf32>
      %100 = tpu.matmul %99, %97, %cst_99 {dimension_numbers = #tpu.dot_dimension_numbers<[1], [0], [0], [1], [0, 0, 1, 1], [], []>} : vector<4x15xbf16>, vector<15x512xbf16>, vector<4x512xf32> -> vector<4x512xf32>
      %101 = arith.addf %94, %100 : vector<4x512xf32>
      %c0_100 = arith.constant 0 : index
      %102 = arith.index_cast %arg7 : i32 to index
      %c0_101 = arith.constant 0 : index
      %c0_102 = arith.constant 0 : index
      %c7_103 = arith.constant 7 : index
      %103 = vector.load %arg1[%c0_100, %102, %c0_101, %c0_102, %c7_103] : memref<1x42x2x15x520xbf16, #tpu.memory_space<vmem>>, vector<1x1x1x15x512xbf16>
      %104 = vector.shape_cast %103 : vector<1x1x1x15x512xbf16> to vector<15x512xbf16>
      %c14 = arith.constant 14 : index
      %c0_104 = arith.constant 0 : index
      %c0_105 = arith.constant 0 : index
      %105 = vector.load %arg2[%c14, %c0_104, %c0_105] : memref<15x4x15xbf16, #tpu.memory_space<vmem>>, vector<1x4x15xbf16>
      %106 = vector.shape_cast %105 : vector<1x4x15xbf16> to vector<4x15xbf16>
      %cst_106 = arith.constant dense<0.000000e+00> : vector<4x512xf32>
      %107 = tpu.matmul %106, %104, %cst_106 {dimension_numbers = #tpu.dot_dimension_numbers<[1], [0], [0], [1], [0, 0, 1, 1], [], []>} : vector<4x15xbf16>, vector<15x512xbf16>, vector<4x512xf32> -> vector<4x512xf32>
      %108 = arith.addf %101, %107 : vector<4x512xf32>
      %c0_107 = arith.constant 0 : index
      %109 = arith.index_cast %arg7 : i32 to index
      %c0_108 = arith.constant 0 : index
      %c0_109 = arith.constant 0 : index
      %110 = vector.load %arg4[%c0_107, %109, %c0_108, %c0_109] : memref<1x42x4x512xf32, #tpu.memory_space<vmem>>, vector<1x1x4x512xf32>
      %111 = vector.shape_cast %110 : vector<1x1x4x512xf32> to vector<4x512xf32>
      %112 = arith.addf %111, %108 : vector<4x512xf32>
      %cst_110 = arith.constant 1.000000e+00 : f32
      %113 = vector.broadcast %cst_110 : f32 to vector<4x512xf32>
      %114 = arith.cmpf ogt, %112, %113 : vector<4x512xf32>
      %cst_111 = arith.constant 0.000000e+00 : f32
      %115 = vector.broadcast %cst_111 : f32 to vector<4x512xf32>
      %116 = arith.select %114, %115, %112 : vector<4x512xi1>, vector<4x512xf32>
      %c0_112 = arith.constant 0 : index
      %117 = arith.index_cast %arg7 : i32 to index
      %c0_113 = arith.constant 0 : index
      %c0_114 = arith.constant 0 : index
      %118 = vector.load %arg5[%c0_112, %117, %c0_113, %c0_114] : memref<1x42x4x512xf32, #tpu.memory_space<vmem>>, vector<1x1x4x512xf32>
      %119 = vector.shape_cast %118 : vector<1x1x4x512xf32> to vector<4x512xf32>
      %120 = vector.shape_cast %116 : vector<4x512xf32> to vector<1x1x4x512xf32>
      tpu.vector_store %arg5[%c0_112, %117, %c0_113, %c0_114], %120 {strides = array<i32>} : memref<1x42x4x512xf32, #tpu.memory_space<vmem>>, vector<1x1x4x512xf32>,
      %121 = arith.extui %114 : vector<4x512xi1> to vector<4x512xi32>
      %122 = arith.sitofp %121 : vector<4x512xi32> to vector<4x512xf32>
      %123 = arith.truncf %122 : vector<4x512xf32> to vector<4x512xbf16>
      %c0_115 = arith.constant 0 : index
      %124 = arith.index_cast %arg7 : i32 to index
      %c0_116 = arith.constant 0 : index
      %c0_117 = arith.constant 0 : index
      %125 = vector.load %arg6[%c0_115, %124, %c0_116, %c0_117] : memref<1x42x4x512xbf16, #tpu.memory_space<vmem>>, vector<1x1x4x512xbf16>
      %126 = vector.shape_cast %125 : vector<1x1x4x512xbf16> to vector<4x512xbf16>
      %127 = vector.shape_cast %123 : vector<4x512xbf16> to vector<1x1x4x512xbf16>
      tpu.vector_store %arg6[%c0_115, %124, %c0_116, %c0_117], %127 {strides = array<i32>} : memref<1x42x4x512xbf16, #tpu.memory_space<vmem>>, vector<1x1x4x512xbf16>,
    }
    %c42_i32_1 = arith.constant 42 : i32
    return
  }
  func.func @transform_0(%arg0: i32) -> (i32, i32, i32, i32, i32) {
    %c0_i32 = arith.constant 0 : i32
    %c0_i32_0 = arith.constant 0 : i32
    %c0_i32_1 = arith.constant 0 : i32
    %c0_i32_2 = arith.constant 0 : i32
    %c0_i32_3 = arith.constant 0 : i32
    return %arg0, %c0_i32, %c0_i32_0, %c0_i32_1, %c0_i32_2 : i32, i32, i32, i32, i32
  }
  func.func @transform_1(%arg0: i32) -> (i32, i32, i32) {
    %c0_i32 = arith.constant 0 : i32
    %c0_i32_0 = arith.constant 0 : i32
    %c0_i32_1 = arith.constant 0 : i32
    %c0_i32_2 = arith.constant 0 : i32
    return %c0_i32, %c0_i32_0, %c0_i32_1 : i32, i32, i32
  }
  func.func @transform_2(%arg0: i32) -> (i32, i32) {
    %c0_i32 = arith.constant 0 : i32
    %c0_i32_0 = arith.constant 0 : i32
    %c0_i32_1 = arith.constant 0 : i32
    return %c0_i32, %c0_i32_0 : i32, i32
  }
  func.func @transform_3(%arg0: i32) -> (i32, i32, i32, i32) {
    %c0_i32 = arith.constant 0 : i32
    %c0_i32_0 = arith.constant 0 : i32
    %c0_i32_1 = arith.constant 0 : i32
    %c0_i32_2 = arith.constant 0 : i32
    return %arg0, %c0_i32, %c0_i32_0, %c0_i32_1 : i32, i32, i32, i32
  }
  func.func @transform_4(%arg0: i32) -> (i32, i32, i32, i32) {
    %c0_i32 = arith.constant 0 : i32
    %c0_i32_0 = arith.constant 0 : i32
    %c0_i32_1 = arith.constant 0 : i32
    %c0_i32_2 = arith.constant 0 : i32
    return %arg0, %c0_i32, %c0_i32_0, %c0_i32_1 : i32, i32, i32, i32
  }
  func.func @transform_5(%arg0: i32) -> (i32, i32, i32, i32) {
    %c0_i32 = arith.constant 0 : i32
    %c0_i32_0 = arith.constant 0 : i32
    %c0_i32_1 = arith.constant 0 : i32
    %c0_i32_2 = arith.constant 0 : i32
    return %arg0, %c0_i32, %c0_i32_0, %c0_i32_1 : i32, i32, i32, i32
  }
}

module attributes {stable_mosaic.version = 11 : i64} {
  func.func @kernel(%arg0: i32, %arg1: memref<1x10x2x60x520xbf16, #tpu.memory_space<vmem>>, %arg2: memref<15x4x60xbf16, #tpu.memory_space<vmem>>, %arg3: memref<4x1xf32, #tpu.memory_space<vmem>>, %arg4: memref<1x10x4x512xf32, #tpu.memory_space<vmem>>, %arg5: memref<1x10x4x512xf32, #tpu.memory_space<vmem>>, %arg6: memref<1x10x4x512xbf16, #tpu.memory_space<vmem>>) attributes {dimension_semantics = [#tpu.dimension_semantics<parallel>], iteration_bounds = array<i64: 2>, scalar_prefetch = 0 : i64, scratch_operands = 0 : i64, tpu.core_type = #tpu.core_type<tc>, window_params = [{transform_indices = @transform_0, window_bounds = array<i64: 1, 10, 2, 60, 520>}, {pipeline_mode = #tpu.pipeline_mode<synchronous>, transform_indices = @transform_1, window_bounds = array<i64: 15, 4, 60>}, {pipeline_mode = #tpu.pipeline_mode<synchronous>, transform_indices = @transform_2, window_bounds = array<i64: 4, 1>}, {transform_indices = @transform_3, window_bounds = array<i64: 1, 10, 4, 512>}, {transform_indices = @transform_4, window_bounds = array<i64: 1, 10, 4, 512>}, {transform_indices = @transform_5, window_bounds = array<i64: 1, 10, 4, 512>}]} {
    %c0 = arith.constant 0 : index
    %c0_0 = arith.constant 0 : index
    %0 = vector.load %arg3[%c0, %c0_0] : memref<4x1xf32, #tpu.memory_space<vmem>>, vector<4x1xf32>
    %1 = vector.shape_cast %0 : vector<4x1xf32> to vector<4x1xf32>
    %2 = vector.broadcast %1 : vector<4x1xf32> to vector<4x512xf32>
    %c0_i32 = arith.constant 0 : i32
    %c10_i32 = arith.constant 10 : i32
    %3 = arith.addi %c0_i32, %c10_i32 : i32
    %c1_i32 = arith.constant 1 : i32
    scf.for %arg7 = %c0_i32 to %3 step %c1_i32  : i32 {
      %c0_2 = arith.constant 0 : index
      %4 = arith.index_cast %arg7 : i32 to index
      %c0_3 = arith.constant 0 : index
      %c0_4 = arith.constant 0 : index
      %c0_5 = arith.constant 0 : index
      %5 = vector.load %arg1[%c0_2, %4, %c0_3, %c0_4, %c0_5] : memref<1x10x2x60x520xbf16, #tpu.memory_space<vmem>>, vector<1x1x1x60x512xbf16>
      %6 = vector.shape_cast %5 : vector<1x1x1x60x512xbf16> to vector<60x512xbf16>
      %c0_6 = arith.constant 0 : index
      %c0_7 = arith.constant 0 : index
      %c0_8 = arith.constant 0 : index
      %7 = vector.load %arg2[%c0_6, %c0_7, %c0_8] : memref<15x4x60xbf16, #tpu.memory_space<vmem>>, vector<1x4x60xbf16>
      %8 = vector.shape_cast %7 : vector<1x4x60xbf16> to vector<4x60xbf16>
      %cst = arith.constant dense<0.000000e+00> : vector<4x512xf32>
      %9 = tpu.matmul %8, %6, %cst {dimension_numbers = #tpu.dot_dimension_numbers<[1], [0], [0], [1], [0, 0, 1, 1], [], []>} : vector<4x60xbf16>, vector<60x512xbf16>, vector<4x512xf32> -> vector<4x512xf32>
      %10 = arith.addf %2, %9 : vector<4x512xf32>
      %c0_9 = arith.constant 0 : index
      %11 = arith.index_cast %arg7 : i32 to index
      %c1 = arith.constant 1 : index
      %c0_10 = arith.constant 0 : index
      %c0_11 = arith.constant 0 : index
      %12 = vector.load %arg1[%c0_9, %11, %c1, %c0_10, %c0_11] : memref<1x10x2x60x520xbf16, #tpu.memory_space<vmem>>, vector<1x1x1x60x512xbf16>
      %13 = vector.shape_cast %12 : vector<1x1x1x60x512xbf16> to vector<60x512xbf16>
      %c1_12 = arith.constant 1 : index
      %c0_13 = arith.constant 0 : index
      %c0_14 = arith.constant 0 : index
      %14 = vector.load %arg2[%c1_12, %c0_13, %c0_14] : memref<15x4x60xbf16, #tpu.memory_space<vmem>>, vector<1x4x60xbf16>
      %15 = vector.shape_cast %14 : vector<1x4x60xbf16> to vector<4x60xbf16>
      %cst_15 = arith.constant dense<0.000000e+00> : vector<4x512xf32>
      %16 = tpu.matmul %15, %13, %cst_15 {dimension_numbers = #tpu.dot_dimension_numbers<[1], [0], [0], [1], [0, 0, 1, 1], [], []>} : vector<4x60xbf16>, vector<60x512xbf16>, vector<4x512xf32> -> vector<4x512xf32>
      %17 = arith.addf %10, %16 : vector<4x512xf32>
      %c0_16 = arith.constant 0 : index
      %18 = arith.index_cast %arg7 : i32 to index
      %c0_17 = arith.constant 0 : index
      %c0_18 = arith.constant 0 : index
      %c1_19 = arith.constant 1 : index
      %19 = vector.load %arg1[%c0_16, %18, %c0_17, %c0_18, %c1_19] : memref<1x10x2x60x520xbf16, #tpu.memory_space<vmem>>, vector<1x1x1x60x512xbf16>
      %20 = vector.shape_cast %19 : vector<1x1x1x60x512xbf16> to vector<60x512xbf16>
      %c2 = arith.constant 2 : index
      %c0_20 = arith.constant 0 : index
      %c0_21 = arith.constant 0 : index
      %21 = vector.load %arg2[%c2, %c0_20, %c0_21] : memref<15x4x60xbf16, #tpu.memory_space<vmem>>, vector<1x4x60xbf16>
      %22 = vector.shape_cast %21 : vector<1x4x60xbf16> to vector<4x60xbf16>
      %cst_22 = arith.constant dense<0.000000e+00> : vector<4x512xf32>
      %23 = tpu.matmul %22, %20, %cst_22 {dimension_numbers = #tpu.dot_dimension_numbers<[1], [0], [0], [1], [0, 0, 1, 1], [], []>} : vector<4x60xbf16>, vector<60x512xbf16>, vector<4x512xf32> -> vector<4x512xf32>
      %24 = arith.addf %17, %23 : vector<4x512xf32>
      %c0_23 = arith.constant 0 : index
      %25 = arith.index_cast %arg7 : i32 to index
      %c1_24 = arith.constant 1 : index
      %c0_25 = arith.constant 0 : index
      %c1_26 = arith.constant 1 : index
      %26 = vector.load %arg1[%c0_23, %25, %c1_24, %c0_25, %c1_26] : memref<1x10x2x60x520xbf16, #tpu.memory_space<vmem>>, vector<1x1x1x60x512xbf16>
      %27 = vector.shape_cast %26 : vector<1x1x1x60x512xbf16> to vector<60x512xbf16>
      %c3 = arith.constant 3 : index
      %c0_27 = arith.constant 0 : index
      %c0_28 = arith.constant 0 : index
      %28 = vector.load %arg2[%c3, %c0_27, %c0_28] : memref<15x4x60xbf16, #tpu.memory_space<vmem>>, vector<1x4x60xbf16>
      %29 = vector.shape_cast %28 : vector<1x4x60xbf16> to vector<4x60xbf16>
      %cst_29 = arith.constant dense<0.000000e+00> : vector<4x512xf32>
      %30 = tpu.matmul %29, %27, %cst_29 {dimension_numbers = #tpu.dot_dimension_numbers<[1], [0], [0], [1], [0, 0, 1, 1], [], []>} : vector<4x60xbf16>, vector<60x512xbf16>, vector<4x512xf32> -> vector<4x512xf32>
      %31 = arith.addf %24, %30 : vector<4x512xf32>
      %c0_30 = arith.constant 0 : index
      %32 = arith.index_cast %arg7 : i32 to index
      %c0_31 = arith.constant 0 : index
      %c0_32 = arith.constant 0 : index
      %c2_33 = arith.constant 2 : index
      %33 = vector.load %arg1[%c0_30, %32, %c0_31, %c0_32, %c2_33] : memref<1x10x2x60x520xbf16, #tpu.memory_space<vmem>>, vector<1x1x1x60x512xbf16>
      %34 = vector.shape_cast %33 : vector<1x1x1x60x512xbf16> to vector<60x512xbf16>
      %c4 = arith.constant 4 : index
      %c0_34 = arith.constant 0 : index
      %c0_35 = arith.constant 0 : index
      %35 = vector.load %arg2[%c4, %c0_34, %c0_35] : memref<15x4x60xbf16, #tpu.memory_space<vmem>>, vector<1x4x60xbf16>
      %36 = vector.shape_cast %35 : vector<1x4x60xbf16> to vector<4x60xbf16>
      %cst_36 = arith.constant dense<0.000000e+00> : vector<4x512xf32>
      %37 = tpu.matmul %36, %34, %cst_36 {dimension_numbers = #tpu.dot_dimension_numbers<[1], [0], [0], [1], [0, 0, 1, 1], [], []>} : vector<4x60xbf16>, vector<60x512xbf16>, vector<4x512xf32> -> vector<4x512xf32>
      %38 = arith.addf %31, %37 : vector<4x512xf32>
      %c0_37 = arith.constant 0 : index
      %39 = arith.index_cast %arg7 : i32 to index
      %c1_38 = arith.constant 1 : index
      %c0_39 = arith.constant 0 : index
      %c2_40 = arith.constant 2 : index
      %40 = vector.load %arg1[%c0_37, %39, %c1_38, %c0_39, %c2_40] : memref<1x10x2x60x520xbf16, #tpu.memory_space<vmem>>, vector<1x1x1x60x512xbf16>
      %41 = vector.shape_cast %40 : vector<1x1x1x60x512xbf16> to vector<60x512xbf16>
      %c5 = arith.constant 5 : index
      %c0_41 = arith.constant 0 : index
      %c0_42 = arith.constant 0 : index
      %42 = vector.load %arg2[%c5, %c0_41, %c0_42] : memref<15x4x60xbf16, #tpu.memory_space<vmem>>, vector<1x4x60xbf16>
      %43 = vector.shape_cast %42 : vector<1x4x60xbf16> to vector<4x60xbf16>
      %cst_43 = arith.constant dense<0.000000e+00> : vector<4x512xf32>
      %44 = tpu.matmul %43, %41, %cst_43 {dimension_numbers = #tpu.dot_dimension_numbers<[1], [0], [0], [1], [0, 0, 1, 1], [], []>} : vector<4x60xbf16>, vector<60x512xbf16>, vector<4x512xf32> -> vector<4x512xf32>
      %45 = arith.addf %38, %44 : vector<4x512xf32>
      %c0_44 = arith.constant 0 : index
      %46 = arith.index_cast %arg7 : i32 to index
      %c0_45 = arith.constant 0 : index
      %c0_46 = arith.constant 0 : index
      %c3_47 = arith.constant 3 : index
      %47 = vector.load %arg1[%c0_44, %46, %c0_45, %c0_46, %c3_47] : memref<1x10x2x60x520xbf16, #tpu.memory_space<vmem>>, vector<1x1x1x60x512xbf16>
      %48 = vector.shape_cast %47 : vector<1x1x1x60x512xbf16> to vector<60x512xbf16>
      %c6 = arith.constant 6 : index
      %c0_48 = arith.constant 0 : index
      %c0_49 = arith.constant 0 : index
      %49 = vector.load %arg2[%c6, %c0_48, %c0_49] : memref<15x4x60xbf16, #tpu.memory_space<vmem>>, vector<1x4x60xbf16>
      %50 = vector.shape_cast %49 : vector<1x4x60xbf16> to vector<4x60xbf16>
      %cst_50 = arith.constant dense<0.000000e+00> : vector<4x512xf32>
      %51 = tpu.matmul %50, %48, %cst_50 {dimension_numbers = #tpu.dot_dimension_numbers<[1], [0], [0], [1], [0, 0, 1, 1], [], []>} : vector<4x60xbf16>, vector<60x512xbf16>, vector<4x512xf32> -> vector<4x512xf32>
      %52 = arith.addf %45, %51 : vector<4x512xf32>
      %c0_51 = arith.constant 0 : index
      %53 = arith.index_cast %arg7 : i32 to index
      %c1_52 = arith.constant 1 : index
      %c0_53 = arith.constant 0 : index
      %c3_54 = arith.constant 3 : index
      %54 = vector.load %arg1[%c0_51, %53, %c1_52, %c0_53, %c3_54] : memref<1x10x2x60x520xbf16, #tpu.memory_space<vmem>>, vector<1x1x1x60x512xbf16>
      %55 = vector.shape_cast %54 : vector<1x1x1x60x512xbf16> to vector<60x512xbf16>
      %c7 = arith.constant 7 : index
      %c0_55 = arith.constant 0 : index
      %c0_56 = arith.constant 0 : index
      %56 = vector.load %arg2[%c7, %c0_55, %c0_56] : memref<15x4x60xbf16, #tpu.memory_space<vmem>>, vector<1x4x60xbf16>
      %57 = vector.shape_cast %56 : vector<1x4x60xbf16> to vector<4x60xbf16>
      %cst_57 = arith.constant dense<0.000000e+00> : vector<4x512xf32>
      %58 = tpu.matmul %57, %55, %cst_57 {dimension_numbers = #tpu.dot_dimension_numbers<[1], [0], [0], [1], [0, 0, 1, 1], [], []>} : vector<4x60xbf16>, vector<60x512xbf16>, vector<4x512xf32> -> vector<4x512xf32>
      %59 = arith.addf %52, %58 : vector<4x512xf32>
      %c0_58 = arith.constant 0 : index
      %60 = arith.index_cast %arg7 : i32 to index
      %c0_59 = arith.constant 0 : index
      %c0_60 = arith.constant 0 : index
      %c4_61 = arith.constant 4 : index
      %61 = vector.load %arg1[%c0_58, %60, %c0_59, %c0_60, %c4_61] : memref<1x10x2x60x520xbf16, #tpu.memory_space<vmem>>, vector<1x1x1x60x512xbf16>
      %62 = vector.shape_cast %61 : vector<1x1x1x60x512xbf16> to vector<60x512xbf16>
      %c8 = arith.constant 8 : index
      %c0_62 = arith.constant 0 : index
      %c0_63 = arith.constant 0 : index
      %63 = vector.load %arg2[%c8, %c0_62, %c0_63] : memref<15x4x60xbf16, #tpu.memory_space<vmem>>, vector<1x4x60xbf16>
      %64 = vector.shape_cast %63 : vector<1x4x60xbf16> to vector<4x60xbf16>
      %cst_64 = arith.constant dense<0.000000e+00> : vector<4x512xf32>
      %65 = tpu.matmul %64, %62, %cst_64 {dimension_numbers = #tpu.dot_dimension_numbers<[1], [0], [0], [1], [0, 0, 1, 1], [], []>} : vector<4x60xbf16>, vector<60x512xbf16>, vector<4x512xf32> -> vector<4x512xf32>
      %66 = arith.addf %59, %65 : vector<4x512xf32>
      %c0_65 = arith.constant 0 : index
      %67 = arith.index_cast %arg7 : i32 to index
      %c1_66 = arith.constant 1 : index
      %c0_67 = arith.constant 0 : index
      %c4_68 = arith.constant 4 : index
      %68 = vector.load %arg1[%c0_65, %67, %c1_66, %c0_67, %c4_68] : memref<1x10x2x60x520xbf16, #tpu.memory_space<vmem>>, vector<1x1x1x60x512xbf16>
      %69 = vector.shape_cast %68 : vector<1x1x1x60x512xbf16> to vector<60x512xbf16>
      %c9 = arith.constant 9 : index
      %c0_69 = arith.constant 0 : index
      %c0_70 = arith.constant 0 : index
      %70 = vector.load %arg2[%c9, %c0_69, %c0_70] : memref<15x4x60xbf16, #tpu.memory_space<vmem>>, vector<1x4x60xbf16>
      %71 = vector.shape_cast %70 : vector<1x4x60xbf16> to vector<4x60xbf16>
      %cst_71 = arith.constant dense<0.000000e+00> : vector<4x512xf32>
      %72 = tpu.matmul %71, %69, %cst_71 {dimension_numbers = #tpu.dot_dimension_numbers<[1], [0], [0], [1], [0, 0, 1, 1], [], []>} : vector<4x60xbf16>, vector<60x512xbf16>, vector<4x512xf32> -> vector<4x512xf32>
      %73 = arith.addf %66, %72 : vector<4x512xf32>
      %c0_72 = arith.constant 0 : index
      %74 = arith.index_cast %arg7 : i32 to index
      %c0_73 = arith.constant 0 : index
      %c0_74 = arith.constant 0 : index
      %c5_75 = arith.constant 5 : index
      %75 = vector.load %arg1[%c0_72, %74, %c0_73, %c0_74, %c5_75] : memref<1x10x2x60x520xbf16, #tpu.memory_space<vmem>>, vector<1x1x1x60x512xbf16>
      %76 = vector.shape_cast %75 : vector<1x1x1x60x512xbf16> to vector<60x512xbf16>
      %c10 = arith.constant 10 : index
      %c0_76 = arith.constant 0 : index
      %c0_77 = arith.constant 0 : index
      %77 = vector.load %arg2[%c10, %c0_76, %c0_77] : memref<15x4x60xbf16, #tpu.memory_space<vmem>>, vector<1x4x60xbf16>
      %78 = vector.shape_cast %77 : vector<1x4x60xbf16> to vector<4x60xbf16>
      %cst_78 = arith.constant dense<0.000000e+00> : vector<4x512xf32>
      %79 = tpu.matmul %78, %76, %cst_78 {dimension_numbers = #tpu.dot_dimension_numbers<[1], [0], [0], [1], [0, 0, 1, 1], [], []>} : vector<4x60xbf16>, vector<60x512xbf16>, vector<4x512xf32> -> vector<4x512xf32>
      %80 = arith.addf %73, %79 : vector<4x512xf32>
      %c0_79 = arith.constant 0 : index
      %81 = arith.index_cast %arg7 : i32 to index
      %c1_80 = arith.constant 1 : index
      %c0_81 = arith.constant 0 : index
      %c5_82 = arith.constant 5 : index
      %82 = vector.load %arg1[%c0_79, %81, %c1_80, %c0_81, %c5_82] : memref<1x10x2x60x520xbf16, #tpu.memory_space<vmem>>, vector<1x1x1x60x512xbf16>
      %83 = vector.shape_cast %82 : vector<1x1x1x60x512xbf16> to vector<60x512xbf16>
      %c11 = arith.constant 11 : index
      %c0_83 = arith.constant 0 : index
      %c0_84 = arith.constant 0 : index
      %84 = vector.load %arg2[%c11, %c0_83, %c0_84] : memref<15x4x60xbf16, #tpu.memory_space<vmem>>, vector<1x4x60xbf16>
      %85 = vector.shape_cast %84 : vector<1x4x60xbf16> to vector<4x60xbf16>
      %cst_85 = arith.constant dense<0.000000e+00> : vector<4x512xf32>
      %86 = tpu.matmul %85, %83, %cst_85 {dimension_numbers = #tpu.dot_dimension_numbers<[1], [0], [0], [1], [0, 0, 1, 1], [], []>} : vector<4x60xbf16>, vector<60x512xbf16>, vector<4x512xf32> -> vector<4x512xf32>
      %87 = arith.addf %80, %86 : vector<4x512xf32>
      %c0_86 = arith.constant 0 : index
      %88 = arith.index_cast %arg7 : i32 to index
      %c0_87 = arith.constant 0 : index
      %c0_88 = arith.constant 0 : index
      %c6_89 = arith.constant 6 : index
      %89 = vector.load %arg1[%c0_86, %88, %c0_87, %c0_88, %c6_89] : memref<1x10x2x60x520xbf16, #tpu.memory_space<vmem>>, vector<1x1x1x60x512xbf16>
      %90 = vector.shape_cast %89 : vector<1x1x1x60x512xbf16> to vector<60x512xbf16>
      %c12 = arith.constant 12 : index
      %c0_90 = arith.constant 0 : index
      %c0_91 = arith.constant 0 : index
      %91 = vector.load %arg2[%c12, %c0_90, %c0_91] : memref<15x4x60xbf16, #tpu.memory_space<vmem>>, vector<1x4x60xbf16>
      %92 = vector.shape_cast %91 : vector<1x4x60xbf16> to vector<4x60xbf16>
      %cst_92 = arith.constant dense<0.000000e+00> : vector<4x512xf32>
      %93 = tpu.matmul %92, %90, %cst_92 {dimension_numbers = #tpu.dot_dimension_numbers<[1], [0], [0], [1], [0, 0, 1, 1], [], []>} : vector<4x60xbf16>, vector<60x512xbf16>, vector<4x512xf32> -> vector<4x512xf32>
      %94 = arith.addf %87, %93 : vector<4x512xf32>
      %c0_93 = arith.constant 0 : index
      %95 = arith.index_cast %arg7 : i32 to index
      %c1_94 = arith.constant 1 : index
      %c0_95 = arith.constant 0 : index
      %c6_96 = arith.constant 6 : index
      %96 = vector.load %arg1[%c0_93, %95, %c1_94, %c0_95, %c6_96] : memref<1x10x2x60x520xbf16, #tpu.memory_space<vmem>>, vector<1x1x1x60x512xbf16>
      %97 = vector.shape_cast %96 : vector<1x1x1x60x512xbf16> to vector<60x512xbf16>
      %c13 = arith.constant 13 : index
      %c0_97 = arith.constant 0 : index
      %c0_98 = arith.constant 0 : index
      %98 = vector.load %arg2[%c13, %c0_97, %c0_98] : memref<15x4x60xbf16, #tpu.memory_space<vmem>>, vector<1x4x60xbf16>
      %99 = vector.shape_cast %98 : vector<1x4x60xbf16> to vector<4x60xbf16>
      %cst_99 = arith.constant dense<0.000000e+00> : vector<4x512xf32>
      %100 = tpu.matmul %99, %97, %cst_99 {dimension_numbers = #tpu.dot_dimension_numbers<[1], [0], [0], [1], [0, 0, 1, 1], [], []>} : vector<4x60xbf16>, vector<60x512xbf16>, vector<4x512xf32> -> vector<4x512xf32>
      %101 = arith.addf %94, %100 : vector<4x512xf32>
      %c0_100 = arith.constant 0 : index
      %102 = arith.index_cast %arg7 : i32 to index
      %c0_101 = arith.constant 0 : index
      %c0_102 = arith.constant 0 : index
      %c7_103 = arith.constant 7 : index
      %103 = vector.load %arg1[%c0_100, %102, %c0_101, %c0_102, %c7_103] : memref<1x10x2x60x520xbf16, #tpu.memory_space<vmem>>, vector<1x1x1x60x512xbf16>
      %104 = vector.shape_cast %103 : vector<1x1x1x60x512xbf16> to vector<60x512xbf16>
      %c14 = arith.constant 14 : index
      %c0_104 = arith.constant 0 : index
      %c0_105 = arith.constant 0 : index
      %105 = vector.load %arg2[%c14, %c0_104, %c0_105] : memref<15x4x60xbf16, #tpu.memory_space<vmem>>, vector<1x4x60xbf16>
      %106 = vector.shape_cast %105 : vector<1x4x60xbf16> to vector<4x60xbf16>
      %cst_106 = arith.constant dense<0.000000e+00> : vector<4x512xf32>
      %107 = tpu.matmul %106, %104, %cst_106 {dimension_numbers = #tpu.dot_dimension_numbers<[1], [0], [0], [1], [0, 0, 1, 1], [], []>} : vector<4x60xbf16>, vector<60x512xbf16>, vector<4x512xf32> -> vector<4x512xf32>
      %108 = arith.addf %101, %107 : vector<4x512xf32>
      %c0_107 = arith.constant 0 : index
      %109 = arith.index_cast %arg7 : i32 to index
      %c0_108 = arith.constant 0 : index
      %c0_109 = arith.constant 0 : index
      %110 = vector.load %arg4[%c0_107, %109, %c0_108, %c0_109] : memref<1x10x4x512xf32, #tpu.memory_space<vmem>>, vector<1x1x4x512xf32>
      %111 = vector.shape_cast %110 : vector<1x1x4x512xf32> to vector<4x512xf32>
      %112 = arith.addf %111, %108 : vector<4x512xf32>
      %cst_110 = arith.constant 1.000000e+00 : f32
      %113 = vector.broadcast %cst_110 : f32 to vector<4x512xf32>
      %114 = arith.cmpf ogt, %112, %113 : vector<4x512xf32>
      %cst_111 = arith.constant 0.000000e+00 : f32
      %115 = vector.broadcast %cst_111 : f32 to vector<4x512xf32>
      %116 = arith.select %114, %115, %112 : vector<4x512xi1>, vector<4x512xf32>
      %c0_112 = arith.constant 0 : index
      %117 = arith.index_cast %arg7 : i32 to index
      %c0_113 = arith.constant 0 : index
      %c0_114 = arith.constant 0 : index
      %118 = vector.load %arg5[%c0_112, %117, %c0_113, %c0_114] : memref<1x10x4x512xf32, #tpu.memory_space<vmem>>, vector<1x1x4x512xf32>
      %119 = vector.shape_cast %118 : vector<1x1x4x512xf32> to vector<4x512xf32>
      %120 = vector.shape_cast %116 : vector<4x512xf32> to vector<1x1x4x512xf32>
      tpu.vector_store %arg5[%c0_112, %117, %c0_113, %c0_114], %120 {strides = array<i32>} : memref<1x10x4x512xf32, #tpu.memory_space<vmem>>, vector<1x1x4x512xf32>,
      %121 = arith.extui %114 : vector<4x512xi1> to vector<4x512xi32>
      %122 = arith.sitofp %121 : vector<4x512xi32> to vector<4x512xf32>
      %123 = arith.truncf %122 : vector<4x512xf32> to vector<4x512xbf16>
      %c0_115 = arith.constant 0 : index
      %124 = arith.index_cast %arg7 : i32 to index
      %c0_116 = arith.constant 0 : index
      %c0_117 = arith.constant 0 : index
      %125 = vector.load %arg6[%c0_115, %124, %c0_116, %c0_117] : memref<1x10x4x512xbf16, #tpu.memory_space<vmem>>, vector<1x1x4x512xbf16>
      %126 = vector.shape_cast %125 : vector<1x1x4x512xbf16> to vector<4x512xbf16>
      %127 = vector.shape_cast %123 : vector<4x512xbf16> to vector<1x1x4x512xbf16>
      tpu.vector_store %arg6[%c0_115, %124, %c0_116, %c0_117], %127 {strides = array<i32>} : memref<1x10x4x512xbf16, #tpu.memory_space<vmem>>, vector<1x1x4x512xbf16>,
    }
    %c10_i32_1 = arith.constant 10 : i32
    return
  }
  func.func @transform_0(%arg0: i32) -> (i32, i32, i32, i32, i32) {
    %c0_i32 = arith.constant 0 : i32
    %c0_i32_0 = arith.constant 0 : i32
    %c0_i32_1 = arith.constant 0 : i32
    %c0_i32_2 = arith.constant 0 : i32
    %c0_i32_3 = arith.constant 0 : i32
    return %arg0, %c0_i32, %c0_i32_0, %c0_i32_1, %c0_i32_2 : i32, i32, i32, i32, i32
  }
  func.func @transform_1(%arg0: i32) -> (i32, i32, i32) {
    %c0_i32 = arith.constant 0 : i32
    %c0_i32_0 = arith.constant 0 : i32
    %c0_i32_1 = arith.constant 0 : i32
    %c0_i32_2 = arith.constant 0 : i32
    return %c0_i32, %c0_i32_0, %c0_i32_1 : i32, i32, i32
  }
  func.func @transform_2(%arg0: i32) -> (i32, i32) {
    %c0_i32 = arith.constant 0 : i32
    %c0_i32_0 = arith.constant 0 : i32
    %c0_i32_1 = arith.constant 0 : i32
    return %c0_i32, %c0_i32_0 : i32, i32
  }
  func.func @transform_3(%arg0: i32) -> (i32, i32, i32, i32) {
    %c0_i32 = arith.constant 0 : i32
    %c0_i32_0 = arith.constant 0 : i32
    %c0_i32_1 = arith.constant 0 : i32
    %c0_i32_2 = arith.constant 0 : i32
    return %arg0, %c0_i32, %c0_i32_0, %c0_i32_1 : i32, i32, i32, i32
  }
  func.func @transform_4(%arg0: i32) -> (i32, i32, i32, i32) {
    %c0_i32 = arith.constant 0 : i32
    %c0_i32_0 = arith.constant 0 : i32
    %c0_i32_1 = arith.constant 0 : i32
    %c0_i32_2 = arith.constant 0 : i32
    return %arg0, %c0_i32, %c0_i32_0, %c0_i32_1 : i32, i32, i32, i32
  }
  func.func @transform_5(%arg0: i32) -> (i32, i32, i32, i32) {
    %c0_i32 = arith.constant 0 : i32
    %c0_i32_0 = arith.constant 0 : i32
    %c0_i32_1 = arith.constant 0 : i32
    %c0_i32_2 = arith.constant 0 : i32
    return %arg0, %c0_i32, %c0_i32_0, %c0_i32_1 : i32, i32, i32, i32
  }
}

module attributes {stable_mosaic.version = 11 : i64} {
  func.func @kernel(%arg0: i32, %arg1: memref<1x2x2x60x520xbf16, #tpu.memory_space<vmem>>, %arg2: memref<15x4x60xbf16, #tpu.memory_space<vmem>>, %arg3: memref<4x1xf32, #tpu.memory_space<vmem>>, %arg4: memref<1x2x4x512xf32, #tpu.memory_space<vmem>>, %arg5: memref<1x2x4x512xf32, #tpu.memory_space<vmem>>, %arg6: memref<1x2x4x512xbf16, #tpu.memory_space<vmem>>) attributes {dimension_semantics = [#tpu.dimension_semantics<parallel>], iteration_bounds = array<i64: 2>, scalar_prefetch = 0 : i64, scratch_operands = 0 : i64, tpu.core_type = #tpu.core_type<tc>, window_params = [{transform_indices = @transform_0, window_bounds = array<i64: 1, 2, 2, 60, 520>}, {pipeline_mode = #tpu.pipeline_mode<synchronous>, transform_indices = @transform_1, window_bounds = array<i64: 15, 4, 60>}, {pipeline_mode = #tpu.pipeline_mode<synchronous>, transform_indices = @transform_2, window_bounds = array<i64: 4, 1>}, {transform_indices = @transform_3, window_bounds = array<i64: 1, 2, 4, 512>}, {transform_indices = @transform_4, window_bounds = array<i64: 1, 2, 4, 512>}, {transform_indices = @transform_5, window_bounds = array<i64: 1, 2, 4, 512>}]} {
    %c0 = arith.constant 0 : index
    %c0_0 = arith.constant 0 : index
    %0 = vector.load %arg3[%c0, %c0_0] : memref<4x1xf32, #tpu.memory_space<vmem>>, vector<4x1xf32>
    %1 = vector.shape_cast %0 : vector<4x1xf32> to vector<4x1xf32>
    %2 = vector.broadcast %1 : vector<4x1xf32> to vector<4x512xf32>
    %c0_i32 = arith.constant 0 : i32
    %c2_i32 = arith.constant 2 : i32
    %3 = arith.addi %c0_i32, %c2_i32 : i32
    %c1_i32 = arith.constant 1 : i32
    scf.for %arg7 = %c0_i32 to %3 step %c1_i32  : i32 {
      %c0_2 = arith.constant 0 : index
      %4 = arith.index_cast %arg7 : i32 to index
      %c0_3 = arith.constant 0 : index
      %c0_4 = arith.constant 0 : index
      %c0_5 = arith.constant 0 : index
      %5 = vector.load %arg1[%c0_2, %4, %c0_3, %c0_4, %c0_5] : memref<1x2x2x60x520xbf16, #tpu.memory_space<vmem>>, vector<1x1x1x60x512xbf16>
      %6 = vector.shape_cast %5 : vector<1x1x1x60x512xbf16> to vector<60x512xbf16>
      %c0_6 = arith.constant 0 : index
      %c0_7 = arith.constant 0 : index
      %c0_8 = arith.constant 0 : index
      %7 = vector.load %arg2[%c0_6, %c0_7, %c0_8] : memref<15x4x60xbf16, #tpu.memory_space<vmem>>, vector<1x4x60xbf16>
      %8 = vector.shape_cast %7 : vector<1x4x60xbf16> to vector<4x60xbf16>
      %cst = arith.constant dense<0.000000e+00> : vector<4x512xf32>
      %9 = tpu.matmul %8, %6, %cst {dimension_numbers = #tpu.dot_dimension_numbers<[1], [0], [0], [1], [0, 0, 1, 1], [], []>} : vector<4x60xbf16>, vector<60x512xbf16>, vector<4x512xf32> -> vector<4x512xf32>
      %10 = arith.addf %2, %9 : vector<4x512xf32>
      %c0_9 = arith.constant 0 : index
      %11 = arith.index_cast %arg7 : i32 to index
      %c1 = arith.constant 1 : index
      %c0_10 = arith.constant 0 : index
      %c0_11 = arith.constant 0 : index
      %12 = vector.load %arg1[%c0_9, %11, %c1, %c0_10, %c0_11] : memref<1x2x2x60x520xbf16, #tpu.memory_space<vmem>>, vector<1x1x1x60x512xbf16>
      %13 = vector.shape_cast %12 : vector<1x1x1x60x512xbf16> to vector<60x512xbf16>
      %c1_12 = arith.constant 1 : index
      %c0_13 = arith.constant 0 : index
      %c0_14 = arith.constant 0 : index
      %14 = vector.load %arg2[%c1_12, %c0_13, %c0_14] : memref<15x4x60xbf16, #tpu.memory_space<vmem>>, vector<1x4x60xbf16>
      %15 = vector.shape_cast %14 : vector<1x4x60xbf16> to vector<4x60xbf16>
      %cst_15 = arith.constant dense<0.000000e+00> : vector<4x512xf32>
      %16 = tpu.matmul %15, %13, %cst_15 {dimension_numbers = #tpu.dot_dimension_numbers<[1], [0], [0], [1], [0, 0, 1, 1], [], []>} : vector<4x60xbf16>, vector<60x512xbf16>, vector<4x512xf32> -> vector<4x512xf32>
      %17 = arith.addf %10, %16 : vector<4x512xf32>
      %c0_16 = arith.constant 0 : index
      %18 = arith.index_cast %arg7 : i32 to index
      %c0_17 = arith.constant 0 : index
      %c0_18 = arith.constant 0 : index
      %c1_19 = arith.constant 1 : index
      %19 = vector.load %arg1[%c0_16, %18, %c0_17, %c0_18, %c1_19] : memref<1x2x2x60x520xbf16, #tpu.memory_space<vmem>>, vector<1x1x1x60x512xbf16>
      %20 = vector.shape_cast %19 : vector<1x1x1x60x512xbf16> to vector<60x512xbf16>
      %c2 = arith.constant 2 : index
      %c0_20 = arith.constant 0 : index
      %c0_21 = arith.constant 0 : index
      %21 = vector.load %arg2[%c2, %c0_20, %c0_21] : memref<15x4x60xbf16, #tpu.memory_space<vmem>>, vector<1x4x60xbf16>
      %22 = vector.shape_cast %21 : vector<1x4x60xbf16> to vector<4x60xbf16>
      %cst_22 = arith.constant dense<0.000000e+00> : vector<4x512xf32>
      %23 = tpu.matmul %22, %20, %cst_22 {dimension_numbers = #tpu.dot_dimension_numbers<[1], [0], [0], [1], [0, 0, 1, 1], [], []>} : vector<4x60xbf16>, vector<60x512xbf16>, vector<4x512xf32> -> vector<4x512xf32>
      %24 = arith.addf %17, %23 : vector<4x512xf32>
      %c0_23 = arith.constant 0 : index
      %25 = arith.index_cast %arg7 : i32 to index
      %c1_24 = arith.constant 1 : index
      %c0_25 = arith.constant 0 : index
      %c1_26 = arith.constant 1 : index
      %26 = vector.load %arg1[%c0_23, %25, %c1_24, %c0_25, %c1_26] : memref<1x2x2x60x520xbf16, #tpu.memory_space<vmem>>, vector<1x1x1x60x512xbf16>
      %27 = vector.shape_cast %26 : vector<1x1x1x60x512xbf16> to vector<60x512xbf16>
      %c3 = arith.constant 3 : index
      %c0_27 = arith.constant 0 : index
      %c0_28 = arith.constant 0 : index
      %28 = vector.load %arg2[%c3, %c0_27, %c0_28] : memref<15x4x60xbf16, #tpu.memory_space<vmem>>, vector<1x4x60xbf16>
      %29 = vector.shape_cast %28 : vector<1x4x60xbf16> to vector<4x60xbf16>
      %cst_29 = arith.constant dense<0.000000e+00> : vector<4x512xf32>
      %30 = tpu.matmul %29, %27, %cst_29 {dimension_numbers = #tpu.dot_dimension_numbers<[1], [0], [0], [1], [0, 0, 1, 1], [], []>} : vector<4x60xbf16>, vector<60x512xbf16>, vector<4x512xf32> -> vector<4x512xf32>
      %31 = arith.addf %24, %30 : vector<4x512xf32>
      %c0_30 = arith.constant 0 : index
      %32 = arith.index_cast %arg7 : i32 to index
      %c0_31 = arith.constant 0 : index
      %c0_32 = arith.constant 0 : index
      %c2_33 = arith.constant 2 : index
      %33 = vector.load %arg1[%c0_30, %32, %c0_31, %c0_32, %c2_33] : memref<1x2x2x60x520xbf16, #tpu.memory_space<vmem>>, vector<1x1x1x60x512xbf16>
      %34 = vector.shape_cast %33 : vector<1x1x1x60x512xbf16> to vector<60x512xbf16>
      %c4 = arith.constant 4 : index
      %c0_34 = arith.constant 0 : index
      %c0_35 = arith.constant 0 : index
      %35 = vector.load %arg2[%c4, %c0_34, %c0_35] : memref<15x4x60xbf16, #tpu.memory_space<vmem>>, vector<1x4x60xbf16>
      %36 = vector.shape_cast %35 : vector<1x4x60xbf16> to vector<4x60xbf16>
      %cst_36 = arith.constant dense<0.000000e+00> : vector<4x512xf32>
      %37 = tpu.matmul %36, %34, %cst_36 {dimension_numbers = #tpu.dot_dimension_numbers<[1], [0], [0], [1], [0, 0, 1, 1], [], []>} : vector<4x60xbf16>, vector<60x512xbf16>, vector<4x512xf32> -> vector<4x512xf32>
      %38 = arith.addf %31, %37 : vector<4x512xf32>
      %c0_37 = arith.constant 0 : index
      %39 = arith.index_cast %arg7 : i32 to index
      %c1_38 = arith.constant 1 : index
      %c0_39 = arith.constant 0 : index
      %c2_40 = arith.constant 2 : index
      %40 = vector.load %arg1[%c0_37, %39, %c1_38, %c0_39, %c2_40] : memref<1x2x2x60x520xbf16, #tpu.memory_space<vmem>>, vector<1x1x1x60x512xbf16>
      %41 = vector.shape_cast %40 : vector<1x1x1x60x512xbf16> to vector<60x512xbf16>
      %c5 = arith.constant 5 : index
      %c0_41 = arith.constant 0 : index
      %c0_42 = arith.constant 0 : index
      %42 = vector.load %arg2[%c5, %c0_41, %c0_42] : memref<15x4x60xbf16, #tpu.memory_space<vmem>>, vector<1x4x60xbf16>
      %43 = vector.shape_cast %42 : vector<1x4x60xbf16> to vector<4x60xbf16>
      %cst_43 = arith.constant dense<0.000000e+00> : vector<4x512xf32>
      %44 = tpu.matmul %43, %41, %cst_43 {dimension_numbers = #tpu.dot_dimension_numbers<[1], [0], [0], [1], [0, 0, 1, 1], [], []>} : vector<4x60xbf16>, vector<60x512xbf16>, vector<4x512xf32> -> vector<4x512xf32>
      %45 = arith.addf %38, %44 : vector<4x512xf32>
      %c0_44 = arith.constant 0 : index
      %46 = arith.index_cast %arg7 : i32 to index
      %c0_45 = arith.constant 0 : index
      %c0_46 = arith.constant 0 : index
      %c3_47 = arith.constant 3 : index
      %47 = vector.load %arg1[%c0_44, %46, %c0_45, %c0_46, %c3_47] : memref<1x2x2x60x520xbf16, #tpu.memory_space<vmem>>, vector<1x1x1x60x512xbf16>
      %48 = vector.shape_cast %47 : vector<1x1x1x60x512xbf16> to vector<60x512xbf16>
      %c6 = arith.constant 6 : index
      %c0_48 = arith.constant 0 : index
      %c0_49 = arith.constant 0 : index
      %49 = vector.load %arg2[%c6, %c0_48, %c0_49] : memref<15x4x60xbf16, #tpu.memory_space<vmem>>, vector<1x4x60xbf16>
      %50 = vector.shape_cast %49 : vector<1x4x60xbf16> to vector<4x60xbf16>
      %cst_50 = arith.constant dense<0.000000e+00> : vector<4x512xf32>
      %51 = tpu.matmul %50, %48, %cst_50 {dimension_numbers = #tpu.dot_dimension_numbers<[1], [0], [0], [1], [0, 0, 1, 1], [], []>} : vector<4x60xbf16>, vector<60x512xbf16>, vector<4x512xf32> -> vector<4x512xf32>
      %52 = arith.addf %45, %51 : vector<4x512xf32>
      %c0_51 = arith.constant 0 : index
      %53 = arith.index_cast %arg7 : i32 to index
      %c1_52 = arith.constant 1 : index
      %c0_53 = arith.constant 0 : index
      %c3_54 = arith.constant 3 : index
      %54 = vector.load %arg1[%c0_51, %53, %c1_52, %c0_53, %c3_54] : memref<1x2x2x60x520xbf16, #tpu.memory_space<vmem>>, vector<1x1x1x60x512xbf16>
      %55 = vector.shape_cast %54 : vector<1x1x1x60x512xbf16> to vector<60x512xbf16>
      %c7 = arith.constant 7 : index
      %c0_55 = arith.constant 0 : index
      %c0_56 = arith.constant 0 : index
      %56 = vector.load %arg2[%c7, %c0_55, %c0_56] : memref<15x4x60xbf16, #tpu.memory_space<vmem>>, vector<1x4x60xbf16>
      %57 = vector.shape_cast %56 : vector<1x4x60xbf16> to vector<4x60xbf16>
      %cst_57 = arith.constant dense<0.000000e+00> : vector<4x512xf32>
      %58 = tpu.matmul %57, %55, %cst_57 {dimension_numbers = #tpu.dot_dimension_numbers<[1], [0], [0], [1], [0, 0, 1, 1], [], []>} : vector<4x60xbf16>, vector<60x512xbf16>, vector<4x512xf32> -> vector<4x512xf32>
      %59 = arith.addf %52, %58 : vector<4x512xf32>
      %c0_58 = arith.constant 0 : index
      %60 = arith.index_cast %arg7 : i32 to index
      %c0_59 = arith.constant 0 : index
      %c0_60 = arith.constant 0 : index
      %c4_61 = arith.constant 4 : index
      %61 = vector.load %arg1[%c0_58, %60, %c0_59, %c0_60, %c4_61] : memref<1x2x2x60x520xbf16, #tpu.memory_space<vmem>>, vector<1x1x1x60x512xbf16>
      %62 = vector.shape_cast %61 : vector<1x1x1x60x512xbf16> to vector<60x512xbf16>
      %c8 = arith.constant 8 : index
      %c0_62 = arith.constant 0 : index
      %c0_63 = arith.constant 0 : index
      %63 = vector.load %arg2[%c8, %c0_62, %c0_63] : memref<15x4x60xbf16, #tpu.memory_space<vmem>>, vector<1x4x60xbf16>
      %64 = vector.shape_cast %63 : vector<1x4x60xbf16> to vector<4x60xbf16>
      %cst_64 = arith.constant dense<0.000000e+00> : vector<4x512xf32>
      %65 = tpu.matmul %64, %62, %cst_64 {dimension_numbers = #tpu.dot_dimension_numbers<[1], [0], [0], [1], [0, 0, 1, 1], [], []>} : vector<4x60xbf16>, vector<60x512xbf16>, vector<4x512xf32> -> vector<4x512xf32>
      %66 = arith.addf %59, %65 : vector<4x512xf32>
      %c0_65 = arith.constant 0 : index
      %67 = arith.index_cast %arg7 : i32 to index
      %c1_66 = arith.constant 1 : index
      %c0_67 = arith.constant 0 : index
      %c4_68 = arith.constant 4 : index
      %68 = vector.load %arg1[%c0_65, %67, %c1_66, %c0_67, %c4_68] : memref<1x2x2x60x520xbf16, #tpu.memory_space<vmem>>, vector<1x1x1x60x512xbf16>
      %69 = vector.shape_cast %68 : vector<1x1x1x60x512xbf16> to vector<60x512xbf16>
      %c9 = arith.constant 9 : index
      %c0_69 = arith.constant 0 : index
      %c0_70 = arith.constant 0 : index
      %70 = vector.load %arg2[%c9, %c0_69, %c0_70] : memref<15x4x60xbf16, #tpu.memory_space<vmem>>, vector<1x4x60xbf16>
      %71 = vector.shape_cast %70 : vector<1x4x60xbf16> to vector<4x60xbf16>
      %cst_71 = arith.constant dense<0.000000e+00> : vector<4x512xf32>
      %72 = tpu.matmul %71, %69, %cst_71 {dimension_numbers = #tpu.dot_dimension_numbers<[1], [0], [0], [1], [0, 0, 1, 1], [], []>} : vector<4x60xbf16>, vector<60x512xbf16>, vector<4x512xf32> -> vector<4x512xf32>
      %73 = arith.addf %66, %72 : vector<4x512xf32>
      %c0_72 = arith.constant 0 : index
      %74 = arith.index_cast %arg7 : i32 to index
      %c0_73 = arith.constant 0 : index
      %c0_74 = arith.constant 0 : index
      %c5_75 = arith.constant 5 : index
      %75 = vector.load %arg1[%c0_72, %74, %c0_73, %c0_74, %c5_75] : memref<1x2x2x60x520xbf16, #tpu.memory_space<vmem>>, vector<1x1x1x60x512xbf16>
      %76 = vector.shape_cast %75 : vector<1x1x1x60x512xbf16> to vector<60x512xbf16>
      %c10 = arith.constant 10 : index
      %c0_76 = arith.constant 0 : index
      %c0_77 = arith.constant 0 : index
      %77 = vector.load %arg2[%c10, %c0_76, %c0_77] : memref<15x4x60xbf16, #tpu.memory_space<vmem>>, vector<1x4x60xbf16>
      %78 = vector.shape_cast %77 : vector<1x4x60xbf16> to vector<4x60xbf16>
      %cst_78 = arith.constant dense<0.000000e+00> : vector<4x512xf32>
      %79 = tpu.matmul %78, %76, %cst_78 {dimension_numbers = #tpu.dot_dimension_numbers<[1], [0], [0], [1], [0, 0, 1, 1], [], []>} : vector<4x60xbf16>, vector<60x512xbf16>, vector<4x512xf32> -> vector<4x512xf32>
      %80 = arith.addf %73, %79 : vector<4x512xf32>
      %c0_79 = arith.constant 0 : index
      %81 = arith.index_cast %arg7 : i32 to index
      %c1_80 = arith.constant 1 : index
      %c0_81 = arith.constant 0 : index
      %c5_82 = arith.constant 5 : index
      %82 = vector.load %arg1[%c0_79, %81, %c1_80, %c0_81, %c5_82] : memref<1x2x2x60x520xbf16, #tpu.memory_space<vmem>>, vector<1x1x1x60x512xbf16>
      %83 = vector.shape_cast %82 : vector<1x1x1x60x512xbf16> to vector<60x512xbf16>
      %c11 = arith.constant 11 : index
      %c0_83 = arith.constant 0 : index
      %c0_84 = arith.constant 0 : index
      %84 = vector.load %arg2[%c11, %c0_83, %c0_84] : memref<15x4x60xbf16, #tpu.memory_space<vmem>>, vector<1x4x60xbf16>
      %85 = vector.shape_cast %84 : vector<1x4x60xbf16> to vector<4x60xbf16>
      %cst_85 = arith.constant dense<0.000000e+00> : vector<4x512xf32>
      %86 = tpu.matmul %85, %83, %cst_85 {dimension_numbers = #tpu.dot_dimension_numbers<[1], [0], [0], [1], [0, 0, 1, 1], [], []>} : vector<4x60xbf16>, vector<60x512xbf16>, vector<4x512xf32> -> vector<4x512xf32>
      %87 = arith.addf %80, %86 : vector<4x512xf32>
      %c0_86 = arith.constant 0 : index
      %88 = arith.index_cast %arg7 : i32 to index
      %c0_87 = arith.constant 0 : index
      %c0_88 = arith.constant 0 : index
      %c6_89 = arith.constant 6 : index
      %89 = vector.load %arg1[%c0_86, %88, %c0_87, %c0_88, %c6_89] : memref<1x2x2x60x520xbf16, #tpu.memory_space<vmem>>, vector<1x1x1x60x512xbf16>
      %90 = vector.shape_cast %89 : vector<1x1x1x60x512xbf16> to vector<60x512xbf16>
      %c12 = arith.constant 12 : index
      %c0_90 = arith.constant 0 : index
      %c0_91 = arith.constant 0 : index
      %91 = vector.load %arg2[%c12, %c0_90, %c0_91] : memref<15x4x60xbf16, #tpu.memory_space<vmem>>, vector<1x4x60xbf16>
      %92 = vector.shape_cast %91 : vector<1x4x60xbf16> to vector<4x60xbf16>
      %cst_92 = arith.constant dense<0.000000e+00> : vector<4x512xf32>
      %93 = tpu.matmul %92, %90, %cst_92 {dimension_numbers = #tpu.dot_dimension_numbers<[1], [0], [0], [1], [0, 0, 1, 1], [], []>} : vector<4x60xbf16>, vector<60x512xbf16>, vector<4x512xf32> -> vector<4x512xf32>
      %94 = arith.addf %87, %93 : vector<4x512xf32>
      %c0_93 = arith.constant 0 : index
      %95 = arith.index_cast %arg7 : i32 to index
      %c1_94 = arith.constant 1 : index
      %c0_95 = arith.constant 0 : index
      %c6_96 = arith.constant 6 : index
      %96 = vector.load %arg1[%c0_93, %95, %c1_94, %c0_95, %c6_96] : memref<1x2x2x60x520xbf16, #tpu.memory_space<vmem>>, vector<1x1x1x60x512xbf16>
      %97 = vector.shape_cast %96 : vector<1x1x1x60x512xbf16> to vector<60x512xbf16>
      %c13 = arith.constant 13 : index
      %c0_97 = arith.constant 0 : index
      %c0_98 = arith.constant 0 : index
      %98 = vector.load %arg2[%c13, %c0_97, %c0_98] : memref<15x4x60xbf16, #tpu.memory_space<vmem>>, vector<1x4x60xbf16>
      %99 = vector.shape_cast %98 : vector<1x4x60xbf16> to vector<4x60xbf16>
      %cst_99 = arith.constant dense<0.000000e+00> : vector<4x512xf32>
      %100 = tpu.matmul %99, %97, %cst_99 {dimension_numbers = #tpu.dot_dimension_numbers<[1], [0], [0], [1], [0, 0, 1, 1], [], []>} : vector<4x60xbf16>, vector<60x512xbf16>, vector<4x512xf32> -> vector<4x512xf32>
      %101 = arith.addf %94, %100 : vector<4x512xf32>
      %c0_100 = arith.constant 0 : index
      %102 = arith.index_cast %arg7 : i32 to index
      %c0_101 = arith.constant 0 : index
      %c0_102 = arith.constant 0 : index
      %c7_103 = arith.constant 7 : index
      %103 = vector.load %arg1[%c0_100, %102, %c0_101, %c0_102, %c7_103] : memref<1x2x2x60x520xbf16, #tpu.memory_space<vmem>>, vector<1x1x1x60x512xbf16>
      %104 = vector.shape_cast %103 : vector<1x1x1x60x512xbf16> to vector<60x512xbf16>
      %c14 = arith.constant 14 : index
      %c0_104 = arith.constant 0 : index
      %c0_105 = arith.constant 0 : index
      %105 = vector.load %arg2[%c14, %c0_104, %c0_105] : memref<15x4x60xbf16, #tpu.memory_space<vmem>>, vector<1x4x60xbf16>
      %106 = vector.shape_cast %105 : vector<1x4x60xbf16> to vector<4x60xbf16>
      %cst_106 = arith.constant dense<0.000000e+00> : vector<4x512xf32>
      %107 = tpu.matmul %106, %104, %cst_106 {dimension_numbers = #tpu.dot_dimension_numbers<[1], [0], [0], [1], [0, 0, 1, 1], [], []>} : vector<4x60xbf16>, vector<60x512xbf16>, vector<4x512xf32> -> vector<4x512xf32>
      %108 = arith.addf %101, %107 : vector<4x512xf32>
      %c0_107 = arith.constant 0 : index
      %109 = arith.index_cast %arg7 : i32 to index
      %c0_108 = arith.constant 0 : index
      %c0_109 = arith.constant 0 : index
      %110 = vector.load %arg4[%c0_107, %109, %c0_108, %c0_109] : memref<1x2x4x512xf32, #tpu.memory_space<vmem>>, vector<1x1x4x512xf32>
      %111 = vector.shape_cast %110 : vector<1x1x4x512xf32> to vector<4x512xf32>
      %112 = arith.addf %111, %108 : vector<4x512xf32>
      %cst_110 = arith.constant 1.000000e+00 : f32
      %113 = vector.broadcast %cst_110 : f32 to vector<4x512xf32>
      %114 = arith.cmpf ogt, %112, %113 : vector<4x512xf32>
      %cst_111 = arith.constant 0.000000e+00 : f32
      %115 = vector.broadcast %cst_111 : f32 to vector<4x512xf32>
      %116 = arith.select %114, %115, %112 : vector<4x512xi1>, vector<4x512xf32>
      %c0_112 = arith.constant 0 : index
      %117 = arith.index_cast %arg7 : i32 to index
      %c0_113 = arith.constant 0 : index
      %c0_114 = arith.constant 0 : index
      %118 = vector.load %arg5[%c0_112, %117, %c0_113, %c0_114] : memref<1x2x4x512xf32, #tpu.memory_space<vmem>>, vector<1x1x4x512xf32>
      %119 = vector.shape_cast %118 : vector<1x1x4x512xf32> to vector<4x512xf32>
      %120 = vector.shape_cast %116 : vector<4x512xf32> to vector<1x1x4x512xf32>
      tpu.vector_store %arg5[%c0_112, %117, %c0_113, %c0_114], %120 {strides = array<i32>} : memref<1x2x4x512xf32, #tpu.memory_space<vmem>>, vector<1x1x4x512xf32>,
      %121 = arith.extui %114 : vector<4x512xi1> to vector<4x512xi32>
      %122 = arith.sitofp %121 : vector<4x512xi32> to vector<4x512xf32>
      %123 = arith.truncf %122 : vector<4x512xf32> to vector<4x512xbf16>
      %c0_115 = arith.constant 0 : index
      %124 = arith.index_cast %arg7 : i32 to index
      %c0_116 = arith.constant 0 : index
      %c0_117 = arith.constant 0 : index
      %125 = vector.load %arg6[%c0_115, %124, %c0_116, %c0_117] : memref<1x2x4x512xbf16, #tpu.memory_space<vmem>>, vector<1x1x4x512xbf16>
      %126 = vector.shape_cast %125 : vector<1x1x4x512xbf16> to vector<4x512xbf16>
      %127 = vector.shape_cast %123 : vector<4x512xbf16> to vector<1x1x4x512xbf16>
      tpu.vector_store %arg6[%c0_115, %124, %c0_116, %c0_117], %127 {strides = array<i32>} : memref<1x2x4x512xbf16, #tpu.memory_space<vmem>>, vector<1x1x4x512xbf16>,
    }
    %c2_i32_1 = arith.constant 2 : i32
    return
  }
  func.func @transform_0(%arg0: i32) -> (i32, i32, i32, i32, i32) {
    %c0_i32 = arith.constant 0 : i32
    %c0_i32_0 = arith.constant 0 : i32
    %c0_i32_1 = arith.constant 0 : i32
    %c0_i32_2 = arith.constant 0 : i32
    %c0_i32_3 = arith.constant 0 : i32
    return %arg0, %c0_i32, %c0_i32_0, %c0_i32_1, %c0_i32_2 : i32, i32, i32, i32, i32
  }
  func.func @transform_1(%arg0: i32) -> (i32, i32, i32) {
    %c0_i32 = arith.constant 0 : i32
    %c0_i32_0 = arith.constant 0 : i32
    %c0_i32_1 = arith.constant 0 : i32
    %c0_i32_2 = arith.constant 0 : i32
    return %c0_i32, %c0_i32_0, %c0_i32_1 : i32, i32, i32
  }
  func.func @transform_2(%arg0: i32) -> (i32, i32) {
    %c0_i32 = arith.constant 0 : i32
    %c0_i32_0 = arith.constant 0 : i32
    %c0_i32_1 = arith.constant 0 : i32
    return %c0_i32, %c0_i32_0 : i32, i32
  }
  func.func @transform_3(%arg0: i32) -> (i32, i32, i32, i32) {
    %c0_i32 = arith.constant 0 : i32
    %c0_i32_0 = arith.constant 0 : i32
    %c0_i32_1 = arith.constant 0 : i32
    %c0_i32_2 = arith.constant 0 : i32
    return %arg0, %c0_i32, %c0_i32_0, %c0_i32_1 : i32, i32, i32, i32
  }
  func.func @transform_4(%arg0: i32) -> (i32, i32, i32, i32) {
    %c0_i32 = arith.constant 0 : i32
    %c0_i32_0 = arith.constant 0 : i32
    %c0_i32_1 = arith.constant 0 : i32
    %c0_i32_2 = arith.constant 0 : i32
    return %arg0, %c0_i32, %c0_i32_0, %c0_i32_1 : i32, i32, i32, i32
  }
  func.func @transform_5(%arg0: i32) -> (i32, i32, i32, i32) {
    %c0_i32 = arith.constant 0 : i32
    %c0_i32_0 = arith.constant 0 : i32
    %c0_i32_1 = arith.constant 0 : i32
    %c0_i32_2 = arith.constant 0 : i32
    return %arg0, %c0_i32, %c0_i32_0, %c0_i32_1 : i32, i32, i32, i32
  }
}

module attributes {stable_mosaic.version = 11 : i64} {
  func.func @_fc_lif_kernel(%arg0: i32, %arg1: memref<2x2704xbf16, #tpu.memory_space<vmem>>, %arg2: memref<2704x512xbf16, #tpu.memory_space<vmem>>, %arg3: memref<1x512xf32, #tpu.memory_space<vmem>>, %arg4: memref<512x54xbf16, #tpu.memory_space<vmem>>, %arg5: memref<1x54xf32, #tpu.memory_space<vmem>>, %arg6: memref<2x512xf32, #tpu.memory_space<vmem>>, %arg7: memref<2x54xf32, #tpu.memory_space<vmem>>, %arg8: memref<2x54xf32, #tpu.memory_space<vmem>>, %arg9: memref<2x512xf32, #tpu.memory_space<vmem>>, %arg10: memref<2x54xf32, #tpu.memory_space<vmem>>, %arg11: memref<2x54xf32, #tpu.memory_space<vmem>>) attributes {dimension_semantics = [#tpu.dimension_semantics<arbitrary>], iteration_bounds = array<i64: 1>, scalar_prefetch = 0 : i64, scratch_operands = 0 : i64, tpu.core_type = #tpu.core_type<tc>, window_params = [{pipeline_mode = #tpu.pipeline_mode<synchronous>, transform_indices = @transform_0, window_bounds = array<i64: 2, 2704>}, {pipeline_mode = #tpu.pipeline_mode<synchronous>, transform_indices = @transform_1, window_bounds = array<i64: 2704, 512>}, {pipeline_mode = #tpu.pipeline_mode<synchronous>, transform_indices = @transform_2, window_bounds = array<i64: 1, 512>}, {pipeline_mode = #tpu.pipeline_mode<synchronous>, transform_indices = @transform_3, window_bounds = array<i64: 512, 54>}, {pipeline_mode = #tpu.pipeline_mode<synchronous>, transform_indices = @transform_4, window_bounds = array<i64: 1, 54>}, {pipeline_mode = #tpu.pipeline_mode<synchronous>, transform_indices = @transform_5, window_bounds = array<i64: 2, 512>}, {pipeline_mode = #tpu.pipeline_mode<synchronous>, transform_indices = @transform_6, window_bounds = array<i64: 2, 54>}, {pipeline_mode = #tpu.pipeline_mode<synchronous>, transform_indices = @transform_7, window_bounds = array<i64: 2, 54>}, {pipeline_mode = #tpu.pipeline_mode<synchronous>, transform_indices = @transform_8, window_bounds = array<i64: 2, 512>}, {pipeline_mode = #tpu.pipeline_mode<synchronous>, transform_indices = @transform_9, window_bounds = array<i64: 2, 54>}, {pipeline_mode = #tpu.pipeline_mode<synchronous>, transform_indices = @transform_10, window_bounds = array<i64: 2, 54>}]} {
    %c0 = arith.constant 0 : index
    %c0_0 = arith.constant 0 : index
    %0 = vector.load %arg1[%c0, %c0_0] : memref<2x2704xbf16, #tpu.memory_space<vmem>>, vector<2x2704xbf16>
    %c0_1 = arith.constant 0 : index
    %c0_2 = arith.constant 0 : index
    %1 = vector.load %arg6[%c0_1, %c0_2] : memref<2x512xf32, #tpu.memory_space<vmem>>, vector<2x512xf32>
    %c0_3 = arith.constant 0 : index
    %c0_4 = arith.constant 0 : index
    %2 = vector.load %arg2[%c0_3, %c0_4] : memref<2704x512xbf16, #tpu.memory_space<vmem>>, vector<2704x512xbf16>
    %cst = arith.constant dense<0.000000e+00> : vector<2x512xf32>
    %3 = tpu.matmul %0, %2, %cst {dimension_numbers = #tpu.dot_dimension_numbers<[1], [0], [0], [1], [0, 0, 1, 1], [], []>} : vector<2x2704xbf16>, vector<2704x512xbf16>, vector<2x512xf32> -> vector<2x512xf32>
    %4 = arith.addf %1, %3 : vector<2x512xf32>
    %c0_5 = arith.constant 0 : index
    %c0_6 = arith.constant 0 : index
    %5 = vector.load %arg3[%c0_5, %c0_6] : memref<1x512xf32, #tpu.memory_space<vmem>>, vector<1x512xf32>
    %6 = vector.broadcast %5 : vector<1x512xf32> to vector<2x512xf32>
    %7 = arith.addf %4, %6 : vector<2x512xf32>
    %cst_7 = arith.constant 1.000000e+00 : f32
    %8 = vector.broadcast %cst_7 : f32 to vector<2x512xf32>
    %9 = arith.cmpf ogt, %7, %8 : vector<2x512xf32>
    %cst_8 = arith.constant 0.000000e+00 : f32
    %10 = vector.broadcast %cst_8 : f32 to vector<2x512xf32>
    %11 = arith.select %9, %10, %7 : vector<2x512xi1>, vector<2x512xf32>
    %c0_9 = arith.constant 0 : index
    %c0_10 = arith.constant 0 : index
    %12 = vector.load %arg9[%c0_9, %c0_10] : memref<2x512xf32, #tpu.memory_space<vmem>>, vector<2x512xf32>
    tpu.vector_store %arg9[%c0_9, %c0_10], %11 {strides = array<i32>} : memref<2x512xf32, #tpu.memory_space<vmem>>, vector<2x512xf32>,
    %c0_11 = arith.constant 0 : index
    %c0_12 = arith.constant 0 : index
    %13 = vector.load %arg7[%c0_11, %c0_12] : memref<2x54xf32, #tpu.memory_space<vmem>>, vector<2x54xf32>
    %14 = arith.extui %9 : vector<2x512xi1> to vector<2x512xi32>
    %15 = arith.sitofp %14 : vector<2x512xi32> to vector<2x512xf32>
    %16 = arith.truncf %15 : vector<2x512xf32> to vector<2x512xbf16>
    %c0_13 = arith.constant 0 : index
    %c0_14 = arith.constant 0 : index
    %17 = vector.load %arg4[%c0_13, %c0_14] : memref<512x54xbf16, #tpu.memory_space<vmem>>, vector<512x54xbf16>
    %cst_15 = arith.constant dense<0.000000e+00> : vector<2x54xf32>
    %18 = tpu.matmul %16, %17, %cst_15 {dimension_numbers = #tpu.dot_dimension_numbers<[1], [0], [0], [1], [0, 0, 1, 1], [], []>} : vector<2x512xbf16>, vector<512x54xbf16>, vector<2x54xf32> -> vector<2x54xf32>
    %19 = arith.addf %13, %18 : vector<2x54xf32>
    %c0_16 = arith.constant 0 : index
    %c0_17 = arith.constant 0 : index
    %20 = vector.load %arg5[%c0_16, %c0_17] : memref<1x54xf32, #tpu.memory_space<vmem>>, vector<1x54xf32>
    %21 = vector.broadcast %20 : vector<1x54xf32> to vector<2x54xf32>
    %22 = arith.addf %19, %21 : vector<2x54xf32>
    %cst_18 = arith.constant 1.000000e+00 : f32
    %23 = vector.broadcast %cst_18 : f32 to vector<2x54xf32>
    %24 = arith.cmpf ogt, %22, %23 : vector<2x54xf32>
    %cst_19 = arith.constant 0.000000e+00 : f32
    %25 = vector.broadcast %cst_19 : f32 to vector<2x54xf32>
    %26 = arith.select %24, %25, %22 : vector<2x54xi1>, vector<2x54xf32>
    %c0_20 = arith.constant 0 : index
    %c0_21 = arith.constant 0 : index
    %27 = vector.load %arg10[%c0_20, %c0_21] : memref<2x54xf32, #tpu.memory_space<vmem>>, vector<2x54xf32>
    tpu.vector_store %arg10[%c0_20, %c0_21], %26 {strides = array<i32>} : memref<2x54xf32, #tpu.memory_space<vmem>>, vector<2x54xf32>,
    %c0_22 = arith.constant 0 : index
    %c0_23 = arith.constant 0 : index
    %28 = vector.load %arg8[%c0_22, %c0_23] : memref<2x54xf32, #tpu.memory_space<vmem>>, vector<2x54xf32>
    %29 = arith.extui %24 : vector<2x54xi1> to vector<2x54xi32>
    %30 = arith.sitofp %29 : vector<2x54xi32> to vector<2x54xf32>
    %31 = arith.addf %28, %30 : vector<2x54xf32>
    %c0_24 = arith.constant 0 : index
    %c0_25 = arith.constant 0 : index
    %32 = vector.load %arg11[%c0_24, %c0_25] : memref<2x54xf32, #tpu.memory_space<vmem>>, vector<2x54xf32>
    tpu.vector_store %arg11[%c0_24, %c0_25], %31 {strides = array<i32>} : memref<2x54xf32, #tpu.memory_space<vmem>>, vector<2x54xf32>,
    return
  }
  func.func @transform_0(%arg0: i32) -> (i32, i32) {
    %c0_i32 = arith.constant 0 : i32
    %c0_i32_0 = arith.constant 0 : i32
    %c0_i32_1 = arith.constant 0 : i32
    return %c0_i32, %c0_i32_0 : i32, i32
  }
  func.func @transform_1(%arg0: i32) -> (i32, i32) {
    %c0_i32 = arith.constant 0 : i32
    %c0_i32_0 = arith.constant 0 : i32
    %c0_i32_1 = arith.constant 0 : i32
    return %c0_i32, %c0_i32_0 : i32, i32
  }
  func.func @transform_2(%arg0: i32) -> (i32, i32) {
    %c0_i32 = arith.constant 0 : i32
    %c0_i32_0 = arith.constant 0 : i32
    %c0_i32_1 = arith.constant 0 : i32
    return %c0_i32, %c0_i32_0 : i32, i32
  }
  func.func @transform_3(%arg0: i32) -> (i32, i32) {
    %c0_i32 = arith.constant 0 : i32
    %c0_i32_0 = arith.constant 0 : i32
    %c0_i32_1 = arith.constant 0 : i32
    return %c0_i32, %c0_i32_0 : i32, i32
  }
  func.func @transform_4(%arg0: i32) -> (i32, i32) {
    %c0_i32 = arith.constant 0 : i32
    %c0_i32_0 = arith.constant 0 : i32
    %c0_i32_1 = arith.constant 0 : i32
    return %c0_i32, %c0_i32_0 : i32, i32
  }
  func.func @transform_5(%arg0: i32) -> (i32, i32) {
    %c0_i32 = arith.constant 0 : i32
    %c0_i32_0 = arith.constant 0 : i32
    %c0_i32_1 = arith.constant 0 : i32
    return %c0_i32, %c0_i32_0 : i32, i32
  }
  func.func @transform_6(%arg0: i32) -> (i32, i32) {
    %c0_i32 = arith.constant 0 : i32
    %c0_i32_0 = arith.constant 0 : i32
    %c0_i32_1 = arith.constant 0 : i32
    return %c0_i32, %c0_i32_0 : i32, i32
  }
  func.func @transform_7(%arg0: i32) -> (i32, i32) {
    %c0_i32 = arith.constant 0 : i32
    %c0_i32_0 = arith.constant 0 : i32
    %c0_i32_1 = arith.constant 0 : i32
    return %c0_i32, %c0_i32_0 : i32, i32
  }
  func.func @transform_8(%arg0: i32) -> (i32, i32) {
    %c0_i32 = arith.constant 0 : i32
    %c0_i32_0 = arith.constant 0 : i32
    %c0_i32_1 = arith.constant 0 : i32
    return %c0_i32, %c0_i32_0 : i32, i32
  }
  func.func @transform_9(%arg0: i32) -> (i32, i32) {
    %c0_i32 = arith.constant 0 : i32
    %c0_i32_0 = arith.constant 0 : i32
    %c0_i32_1 = arith.constant 0 : i32
    return %c0_i32, %c0_i32_0 : i32, i32
  }
  func.func @transform_10(%arg0: i32) -> (i32, i32) {
    %c0_i32 = arith.constant 0 : i32
    %c0_i32_0 = arith.constant 0 : i32
    %c0_i32_1 = arith.constant 0 : i32
    return %c0_i32, %c0_i32_0 : i32, i32
  }
}

</mosaic_0001>

<bundles_post_ra>
// kernel: closed_call.37
= control target key start
LH: loop header
LB: loop body
LE: loop exit
PB: predicated region body
PF: predicated region fallthrough
CT: control target
= control target key end

     0   :  { %s2605_s18 = smov 0   ;;  %s2994_s0 = inlined_call_operand.vmem [shape: bf16[2,42,2,15,520], index: 0, kind: input, shape index: {}]   ;;  %s2995_s1 = inlined_call_operand.vmem [shape: bf16[15,4,15], index: 1, kind: input, shape index: {}]   ;;  %s2996_s2 = inlined_call_operand.vmem [shape: f32[4,1], index: 2, kind: input, shape index: {}]   ;;  %s2997_s3 = inlined_call_operand.vmem [shape: f32[2,42,4,512], index: 3, kind: input, shape index: {}]   ;;  %s2998_s4 = inlined_call_operand.vmem [shape: f32[2,42,4,512], index: 4, kind: output, shape index: {0}]   ;;  %s2999_s5 = inlined_call_operand.vmem [shape: bf16[2,42,4,512], index: 5, kind: output, shape index: {1}]  }
   0x1 LB: > { %s2288_s19 = sadd.s32 4294967295, %s2557_s18   ;;  %p2292_p0 = scmp.ge.s32.totalorder %s2557_s18, 1  ;;  %s2557_s18 = sphi %s2605_s18, %s16_s18  }
   0x2   : > { %p200_p1 = scmp.lt.s32.totalorder %s2557_s18, 3 }
   0x4   : > { %p201_p2 = pnand %p2292_p0, %p200_p1 }
   0x5   : > { %v259_v0 = vld [vmem:[%s2996_s2] sm:$0xf] (!%p201_p2)  ;;  %p238_p3 = scmp.lt.s32.totalorder (!%p201_p2), %s2288_s19, 1  ;;  %v2563_v1 = vmov (!%p201_p2), 0   ;;  %s2638_s12 = smov (!%p201_p2), 0  }
   0x6   : > { %204 = sbr.rel (%p201_p2) target bundleno = 642 (0x282), region = 36  ;;  %2532 = vset.pattern.permute.xlu0 (!%p201_p2), %v2563_v1 }
   0x7   : > { %262 = vperm.xlu0 (!%p201_p2), %2532, %v259_v0  }
   0xd   : > { %s3001_s19 = smov (!%p238_p3, %s2288_s19), 1 }
   0xe   : > { %s2501_s22 = smul.u32 3360, %s3001_s19 }
   0xf   : > { %s2502_s23 = smul.u32 672, %s3001_s19 }
  0x10   : > { %s2619_s26 = scalar_lea.vmem %s2994_s0, %s2501_s22  ;;  %s2503_s27 = smul.u32 336, %s3001_s19 }
  0x11   : > { %s2624_s30 = scalar_lea.vmem %s2997_s3, %s2502_s23  ;;  %s2629_s8 = scalar_lea.vmem %s2998_s4, %s2502_s23 }
  0x12   : > { %s2634_s11 = scalar_lea.vmem %s2999_s5, %s2503_s27 }
  0x86   : > { %v2636_v2 = vpop.permute.xlu0 %262 }
  0x87 LB: >> { %vm299_vm0 = vcmask 1046528   ;;  %vm300_vm1 = vcmask 1047552   ;;  %v2564_v3 = vmov 65535   ;;  %v2565_v5 = vmov 0   ;;  %s2381_s13 = smul.u32 80, %s2561_s12  ;;  %s2566_s15 = smov 127   ;;  %s2561_s12 = sphi %s2638_s12, %s270_s12  }
  0x88   : >> { %v301_v4 = vsel %vm299_vm0, 4294967295, %v2564_v3  ;;  %388 = vmatprep.mubr.bf16.mxu1 %v2565_v5  ;;  %347 = vmatprep.mubr.bf16.mxu0 %v2565_v5  ;;  %v278_v21 = vld [vmem:[%s2995_s1] sm:$0x3]  ;;  %vm295_vm2 = vcmask 121856   ;;  %v2309_v26 = vld [vmem:[%s2995_s1 + $0x2] sm:$0x3] }
  0x89   : >> { %s2647_s14 = scalar_lea.vmem %s2619_s26, %s2381_s13  ;;  %v2649_v6 = vsel %vm300_vm1, %v301_v4, 0  ;;  %s2567_s21 = smov 126   ;;  %vm566_vm3 = vcmask 1039360   ;;  %v2316_v39 = vld [vmem:[%s2995_s1 + $0x4] sm:$0x3]  ;;  %vm828_vm4 = vcmask 1031168  }
  0x8a   : >> { %v2652_v7 = vld [vmem:[%s2647_s14 + $0xc] ss:$20 sps:$4 sm:$0xff]   ;;  %v2655_v8 = vld [vmem:[%s2647_s14 + $0x4] ss:$20 sps:$4 sm:$0xff]   ;;  %v2667_v11 = vld [vmem:[%s2647_s14 + $0x8] ss:$20 sps:$4 sm:$0xff]  }
  0x8b   : >> { %562 = vrot.lane.b32.xlu1 %v2652_v7, %s2566_s15  ;;  %v2660_v9 = vld [vmem:[%s2647_s14 + $0x10] ss:$20 sps:$4 sm:$0xff]   ;;  %v313_v10 = vand.u32 %v2652_v7, %v2649_v6  ;;  %558 = vrot.lane.b32.xlu0 %v2655_v8, %s2566_s15  ;;  %v307_v12 = vand.u32 %v2655_v8, %v2649_v6  ;;  %v2672_v13 = vld [vmem:[%s2647_s14 + $0x2c] ss:$20 sps:$4 sm:$0xff]   ;;  %v310_v16 = vand.u32 %v2667_v11, %v2649_v6  ;;  %s2568_s22 = smov 125   ;;  %s2569_s23 = smov 124  }
  0x8c   : >> { %v2675_v14 = vld [vmem:[%s2647_s14] ss:$20 sps:$4 sm:$0xff]   ;;  %v2685_v17 = vld [vmem:[%s2647_s14 + $0x30] ss:$20 sps:$4 sm:$0xff]   ;;  %v433_v19 = vand.u32 %v2672_v13, %v2649_v6  ;;  %v2694_v20 = vld [vmem:[%s2647_s14 + $0x28] ss:$20 sps:$4 sm:$0xff]  }
  0x8d   : >> { %356 = vmatprep.subr.bf16.mxu1 %v313_v10  ;;  %v2678_v15 = vld [vmem:[%s2647_s14 + $0x34] ss:$20 sps:$4 sm:$0xff]   ;;  %315 = vmatprep.subr.bf16.mxu0 %v307_v12  ;;  %v304_v18 = vand.u32 %v2675_v14, %v2649_v6  ;;  %v436_v23 = vand.u32 %v2685_v17, %v2649_v6  ;;  %v430_v24 = vand.u32 %v2694_v20, %v2649_v6  ;;  %v2718_v25 = vld [vmem:[%s2647_s14 + $0x38] ss:$20 sps:$4 sm:$0xff]   ;;  %s2570_s24 = smov 123   ;;  %s2571_s25 = smov 122  }
  0x8e   : >> { %357 = vmatpush1.bf16.msra.mxu1 %v310_v16  ;;  %v439_v22 = vand.u32 %v2678_v15, %v2649_v6  ;;  %s2572_s27 = smov 121   ;;  %v2330_v57 = vld [vmem:[%s2995_s1 + $0x6] sm:$0x3]  ;;  %vm1063_vm5 = vcmask 1022976   ;;  %vm1298_vm6 = vcmask 1014784   ;;  %vm1533_vm7 = vcmask 1006592  }
  0x8f   : >> { %564 = vrot.lane.b32.xlu1 %v2660_v9, %s2566_s15  ;;  %560 = vrot.lane.b32.xlu0 %v2667_v11, %s2566_s15  ;;  %vm1768_vm8 = vcmask 998400   ;;  %vm2003_vm9 = vcmask 990208   ;;  %s2382_s14 = sshll.u32 %s2561_s12, 4  ;;  %s2384_s17 = sshll.u32 %s2561_s12, 3 }
  0x90   : >> { %316 = vmatpush1.bf16.msra.mxu0 %v304_v18  ;;  %482 = vmatprep.subr.bf16.mxu1 %v439_v22  ;;  %s2129_s16 = scalar_lea.vmem %s2629_s8, %s2382_s14  ;;  %s2169_s19 = scalar_lea.vmem %s2634_s11, %s2384_s17 }
  0x91   : >> { %441 = vmatprep.subr.bf16.mxu0 %v433_v19  ;;  %2303 = vmatmul.mubr.msk.bf16.vlgmr.msra.gmra.mrb[0].mxu1 %vm295_vm2, %v278_v21  ;;  %s270_s12 = sadd.s32 1, %s2561_s12  }
  0x92   : >> { %483 = vmatpush1.bf16.msra.mxu1 %v436_v23  ;;  %514 = vmatprep.mubr.bf16.mxu1 %v2565_v5  ;;  %p267_p4 = scmp.ge.s32.totalorder %s270_s12, 42  }
  0x93   : >> { %703 = vrot.lane.b32.xlu1 %v2672_v13, %s2566_s15  ;;  %556 = vrot.lane.b32.xlu0 %v2675_v14, %s2566_s15 }
  0x94   : >> { %2302 = vmatmul.mubr.msk.bf16.vlgmr.msra.gmra.mrb[0].mxu0 %vm295_vm2, %v278_v21 }
  0x95   : >> { %442 = vmatpush1.bf16.msra.mxu0 %v430_v24  ;;  %473 = vmatprep.mubr.bf16.mxu0 %v2565_v5 }
  0x97   : >> { %707 = vrot.lane.b32.xlu1 %v2678_v15, %s2566_s15  ;;  %705 = vrot.lane.b32.xlu0 %v2685_v17, %s2566_s15 }
  0x9b   : >> { %701 = vrot.lane.b32.xlu1 %v2694_v20, %s2566_s15  ;;  %709 = vrot.lane.b32.xlu0 %v2718_v25, %s2566_s15  ;;  %s2111_s15 = scalar_lea.vmem %s2624_s30, %s2382_s14 }
  0x9d   : >> { %2315 = vmatmul.mubr.msk.bf16.vlgmr.msra.gmra.mrb[0].mxu1 %vm295_vm2, %v2309_v26 }
  0x9e   : >> { %659 = vmatprep.mubr.bf16.mxu1 %v2565_v5 }
  0x9f   : >> { %822 = vrot.lane.b32.xlu1 %v2667_v11, %s2567_s21  ;;  %820 = vrot.lane.b32.xlu0 %v2655_v8, %s2567_s21 }
  0xa0   : >> { %2314 = vmatmul.mubr.msk.bf16.vlgmr.msra.gmra.mrb[0].mxu0 %vm295_vm2, %v2309_v26 }
  0xa1   : >> { %618 = vmatprep.mubr.bf16.mxu0 %v2565_v5 }
  0xa3   : >> { %826 = vrot.lane.b32.xlu1 %v2660_v9, %s2567_s21  ;;  %824 = vrot.lane.b32.xlu0 %v2652_v7, %s2567_s21 }
  0xa7   : >> { %938 = vrot.lane.b32.xlu1 %v2672_v13, %s2567_s21  ;;  %818 = vrot.lane.b32.xlu0 %v2675_v14, %s2567_s21 }
  0xab   : >> { %942 = vrot.lane.b32.xlu1 %v2678_v15, %s2567_s21  ;;  %940 = vrot.lane.b32.xlu0 %v2685_v17, %s2567_s21 }
  0xaf   : >> { %936 = vrot.lane.b32.xlu1 %v2694_v20, %s2567_s21  ;;  %944 = vrot.lane.b32.xlu0 %v2718_v25, %s2567_s21 }
  0xb3   : >> { %1057 = vrot.lane.b32.xlu1 %v2667_v11, %s2568_s22  ;;  %1055 = vrot.lane.b32.xlu0 %v2655_v8, %s2568_s22 }
  0xb7   : >> { %1061 = vrot.lane.b32.xlu1 %v2660_v9, %s2568_s22  ;;  %1059 = vrot.lane.b32.xlu0 %v2652_v7, %s2568_s22 }
  0xbb   : >> { %1173 = vrot.lane.b32.xlu1 %v2672_v13, %s2568_s22  ;;  %1053 = vrot.lane.b32.xlu0 %v2675_v14, %s2568_s22 }
  0xbf   : >> { %1177 = vrot.lane.b32.xlu1 %v2678_v15, %s2568_s22  ;;  %1175 = vrot.lane.b32.xlu0 %v2685_v17, %s2568_s22 }
  0xc3   : >> { %1171 = vrot.lane.b32.xlu1 %v2694_v20, %s2568_s22  ;;  %1179 = vrot.lane.b32.xlu0 %v2718_v25, %s2568_s22 }
  0xc7   : >> { %1292 = vrot.lane.b32.xlu1 %v2667_v11, %s2569_s23  ;;  %1290 = vrot.lane.b32.xlu0 %v2655_v8, %s2569_s23 }
  0xcb   : >> { %1296 = vrot.lane.b32.xlu1 %v2660_v9, %s2569_s23  ;;  %1294 = vrot.lane.b32.xlu0 %v2652_v7, %s2569_s23 }
  0xcf   : >> { %1408 = vrot.lane.b32.xlu1 %v2672_v13, %s2569_s23  ;;  %1288 = vrot.lane.b32.xlu0 %v2675_v14, %s2569_s23 }
  0xd3   : >> { %1412 = vrot.lane.b32.xlu1 %v2678_v15, %s2569_s23  ;;  %1410 = vrot.lane.b32.xlu0 %v2685_v17, %s2569_s23 }
  0xd7   : >> { %1406 = vrot.lane.b32.xlu1 %v2694_v20, %s2569_s23  ;;  %1414 = vrot.lane.b32.xlu0 %v2718_v25, %s2569_s23 }
  0xdb   : >> { %1527 = vrot.lane.b32.xlu1 %v2667_v11, %s2570_s24  ;;  %1525 = vrot.lane.b32.xlu0 %v2655_v8, %s2570_s24 }
  0xdf   : >> { %1531 = vrot.lane.b32.xlu1 %v2660_v9, %s2570_s24  ;;  %1529 = vrot.lane.b32.xlu0 %v2652_v7, %s2570_s24 }
  0xe3   : >> { %1643 = vrot.lane.b32.xlu1 %v2672_v13, %s2570_s24  ;;  %1523 = vrot.lane.b32.xlu0 %v2675_v14, %s2570_s24 }
  0xe7   : >> { %1647 = vrot.lane.b32.xlu1 %v2678_v15, %s2570_s24  ;;  %1645 = vrot.lane.b32.xlu0 %v2685_v17, %s2570_s24 }
  0xeb   : >> { %1641 = vrot.lane.b32.xlu1 %v2694_v20, %s2570_s24  ;;  %1649 = vrot.lane.b32.xlu0 %v2718_v25, %s2570_s24 }
  0xef   : >> { %1762 = vrot.lane.b32.xlu1 %v2667_v11, %s2571_s25  ;;  %1760 = vrot.lane.b32.xlu0 %v2655_v8, %s2571_s25 }
  0xf3   : >> { %1766 = vrot.lane.b32.xlu1 %v2660_v9, %s2571_s25  ;;  %1764 = vrot.lane.b32.xlu0 %v2652_v7, %s2571_s25 }
  0xf7   : >> { %1878 = vrot.lane.b32.xlu1 %v2672_v13, %s2571_s25  ;;  %1758 = vrot.lane.b32.xlu0 %v2675_v14, %s2571_s25 }
  0xfb   : >> { %1882 = vrot.lane.b32.xlu1 %v2678_v15, %s2571_s25  ;;  %1880 = vrot.lane.b32.xlu0 %v2685_v17, %s2571_s25 }
  0xfd   : >> { %v563_v27 = vpop.permute.xlu1 %562  ;;  %v559_v28 = vpop.permute.xlu0 %558 }
  0xff   : >> { %1876 = vrot.lane.b32.xlu1 %v2694_v20, %s2571_s25  ;;  %1884 = vrot.lane.b32.xlu0 %v2718_v25, %s2571_s25 }
 0x101   : >> { %v565_v29 = vpop.permute.xlu1 %564  ;;  %v561_v31 = vpop.permute.xlu0 %560 }
 0x102   : >> { %v570_v30 = vsel %vm566_vm3, %v563_v27, %v565_v29  ;;  %v568_v33 = vsel %vm566_vm3, %v559_v28, %v561_v31  ;;  %v569_v34 = vsel %vm566_vm3, %v561_v31, %v563_v27  ;;  %v2341_v29 = vld [vmem:[%s2995_s1 + $0xa] sm:$0x3] }
 0x103   : >> { %v584_v32 = vand.u32 %v570_v30, %v2649_v6  ;;  %1997 = vrot.lane.b32.xlu1 %v2667_v11, %s2572_s27  ;;  %v578_v35 = vand.u32 %v568_v33, %v2649_v6  ;;  %v581_v36 = vand.u32 %v569_v34, %v2649_v6  ;;  %1995 = vrot.lane.b32.xlu0 %v2655_v8, %s2572_s27  ;;  %v2338_v11 = vld [vmem:[%s2995_s1 + $0x8] sm:$0x3] }
 0x105   : >> { %v704_v37 = vpop.permute.xlu1 %703  ;;  %627 = vmatprep.subr.bf16.mxu1 %v584_v32  ;;  %v557_v38 = vpop.permute.xlu0 %556  ;;  %586 = vmatprep.subr.bf16.mxu0 %v578_v35 }
 0x106   : >> { %628 = vmatpush1.bf16.msra.mxu1 %v581_v36  ;;  %v567_v40 = vsel %vm566_vm3, %v557_v38, %v559_v28 }
 0x107   : >> { %2001 = vrot.lane.b32.xlu1 %v2660_v9, %s2572_s27  ;;  %v575_v41 = vand.u32 %v567_v40, %v2649_v6  ;;  %1999 = vrot.lane.b32.xlu0 %v2652_v7, %s2572_s27 }
 0x109   : >> { %v708_v42 = vpop.permute.xlu1 %707  ;;  %2323 = vmatmul.mubr.msk.bf16.vlgmr.msra.gmra.mrb[0].mxu1 %vm295_vm2, %v2316_v39  ;;  %v706_v43 = vpop.permute.xlu0 %705  ;;  %587 = vmatpush1.bf16.msra.mxu0 %v575_v41 }
 0x10a   : >> { %803 = vmatprep.mubr.bf16.mxu1 %v2565_v5  ;;  %v712_v44 = vsel %vm566_vm3, %v704_v37, %v706_v43  ;;  %v713_v47 = vsel %vm566_vm3, %v706_v43, %v708_v42 }
 0x10b   : >> { %v722_v45 = vand.u32 %v712_v44, %v2649_v6  ;;  %1993 = vrot.lane.b32.xlu0 %v2675_v14, %s2572_s27  ;;  %v725_v53 = vand.u32 %v713_v47, %v2649_v6 }
 0x10c   : >> { %2322 = vmatmul.mubr.msk.bf16.vlgmr.msra.gmra.mrb[0].mxu0 %vm295_vm2, %v2316_v39 }
 0x10d   : >> { %v702_v46 = vpop.permute.xlu1 %701  ;;  %v710_v49 = vpop.permute.xlu0 %709  ;;  %730 = vmatprep.subr.bf16.mxu0 %v722_v45  ;;  %762 = vmatprep.mubr.bf16.mxu0 %v2565_v5 }
 0x10e   : >> { %v711_v48 = vsel %vm566_vm3, %v702_v46, %v704_v37  ;;  %v714_v51 = vsel %vm566_vm3, %v708_v42, %v710_v49  ;;  %v2344_v46 = vld [vmem:[%s2995_s1 + $0xc] sm:$0x3] }
 0x10f   : >> { %v719_v50 = vand.u32 %v711_v48, %v2649_v6  ;;  %v728_v52 = vand.u32 %v714_v51, %v2649_v6 }
 0x111   : >> { %v823_v54 = vpop.permute.xlu1 %822  ;;  %731 = vmatpush1.bf16.msra.mxu0 %v719_v50  ;;  %v821_v55 = vpop.permute.xlu0 %820  ;;  %771 = vmatprep.subr.bf16.mxu1 %v728_v52 }
 0x112   : >> { %v830_v56 = vsel %vm828_vm4, %v821_v55, %v823_v54  ;;  %772 = vmatpush1.bf16.msra.mxu1 %v725_v53 }
 0x113   : >> { %v840_v58 = vand.u32 %v830_v56, %v2649_v6 }
 0x115   : >> { %v827_v59 = vpop.permute.xlu1 %826  ;;  %v825_v60 = vpop.permute.xlu0 %824  ;;  %2337 = vmatmul.mubr.msk.bf16.vlgmr.msra.gmra.mrb[0].mxu1 %vm295_vm2, %v2330_v57  ;;  %848 = vmatprep.subr.bf16.mxu0 %v840_v58 }
 0x116   : >> { %v831_v61 = vsel %vm828_vm4, %v823_v54, %v825_v60  ;;  %v832_v62 = vsel %vm828_vm4, %v825_v60, %v827_v59  ;;  %921 = vmatprep.mubr.bf16.mxu1 %v2565_v5 }
 0x117   : >> { %v843_v63 = vand.u32 %v831_v61, %v2649_v6  ;;  %v846_v0 = vand.u32 %v832_v62, %v2649_v6  ;;  %v2347_v62 = vld [vmem:[%s2995_s1 + $0xe] sm:$0x3] }
 0x118   : >> { %2336 = vmatmul.mubr.msk.bf16.vlgmr.msra.gmra.mrb[0].mxu0 %vm295_vm2, %v2330_v57 }
 0x119   : >> { %v939_v1 = vpop.permute.xlu1 %938  ;;  %v819_v3 = vpop.permute.xlu0 %818  ;;  %889 = vmatprep.subr.bf16.mxu1 %v846_v0  ;;  %880 = vmatprep.mubr.bf16.mxu0 %v2565_v5 }
 0x11a   : >> { %v829_v4 = vsel %vm828_vm4, %v819_v3, %v821_v55  ;;  %890 = vmatpush1.bf16.msra.mxu1 %v843_v63 }
 0x11b   : >> { %v837_v7 = vand.u32 %v829_v4, %v2649_v6 }
 0x11d   : >> { %v943_v8 = vpop.permute.xlu1 %942  ;;  %v941_v9 = vpop.permute.xlu0 %940  ;;  %849 = vmatpush1.bf16.msra.mxu0 %v837_v7 }
 0x11e   : >> { %v947_v10 = vsel %vm828_vm4, %v939_v1, %v941_v9  ;;  %v948_v12 = vsel %vm828_vm4, %v941_v9, %v943_v8 }
 0x11f   : >> { %v957_v13 = vand.u32 %v947_v10, %v2649_v6  ;;  %v960_v17 = vand.u32 %v948_v12, %v2649_v6 }
 0x121   : >> { %v937_v14 = vpop.permute.xlu1 %936  ;;  %v945_v16 = vpop.permute.xlu0 %944  ;;  %2340 = vmatmul.mubr.msk.bf16.vlgmr.msra.gmra.mrb[0].mxu1 %vm295_vm2, %v2338_v11  ;;  %965 = vmatprep.subr.bf16.mxu0 %v957_v13 }
 0x122   : >> { %v946_v15 = vsel %vm828_vm4, %v937_v14, %v939_v1  ;;  %v949_v19 = vsel %vm828_vm4, %v943_v8, %v945_v16  ;;  %1038 = vmatprep.mubr.bf16.mxu1 %v2565_v5  ;;  %v2350_v16 = vld [vmem:[%s2995_s1 + $0x10] sm:$0x3] }
 0x123   : >> { %v954_v18 = vand.u32 %v946_v15, %v2649_v6  ;;  %v963_v20 = vand.u32 %v949_v19, %v2649_v6 }
 0x124   : >> { %2339 = vmatmul.mubr.msk.bf16.vlgmr.msra.gmra.mrb[0].mxu0 %vm295_vm2, %v2338_v11 }
 0x125   : >> { %v1058_v21 = vpop.permute.xlu1 %1057  ;;  %v1056_v22 = vpop.permute.xlu0 %1055  ;;  %966 = vmatpush1.bf16.msra.mxu0 %v954_v18  ;;  %1006 = vmatprep.subr.bf16.mxu1 %v963_v20 }
 0x126   : >> { %1007 = vmatpush1.bf16.msra.mxu1 %v960_v17  ;;  %v1065_v23 = vsel %vm1063_vm5, %v1056_v22, %v1058_v21  ;;  %997 = vmatprep.mubr.bf16.mxu0 %v2565_v5 }
 0x127   : >> { %v1075_v24 = vand.u32 %v1065_v23, %v2649_v6 }
 0x129   : >> { %v1062_v25 = vpop.permute.xlu1 %1061  ;;  %v1060_v26 = vpop.permute.xlu0 %1059  ;;  %1083 = vmatprep.subr.bf16.mxu0 %v1075_v24 }
 0x12a   : >> { %v1066_v27 = vsel %vm1063_vm5, %v1058_v21, %v1060_v26  ;;  %v1067_v28 = vsel %vm1063_vm5, %v1060_v26, %v1062_v25 }
 0x12b   : >> { %v1078_v30 = vand.u32 %v1066_v27, %v2649_v6  ;;  %v1081_v31 = vand.u32 %v1067_v28, %v2649_v6 }
 0x12d   : >> { %v1174_v32 = vpop.permute.xlu1 %1173  ;;  %v1054_v33 = vpop.permute.xlu0 %1053  ;;  %2343 = vmatmul.mubr.msk.bf16.vlgmr.msra.gmra.mrb[0].mxu1 %vm295_vm2, %v2341_v29  ;;  %1124 = vmatprep.subr.bf16.mxu1 %v1081_v31  ;;  %v2353_v31 = vld [vmem:[%s2995_s1 + $0x12] sm:$0x3] }
 0x12e   : >> { %v1064_v34 = vsel %vm1063_vm5, %v1054_v33, %v1056_v22  ;;  %1125 = vmatpush1.bf16.msra.mxu1 %v1078_v30  ;;  %1156 = vmatprep.mubr.bf16.mxu1 %v2565_v5 }
 0x12f   : >> { %v1072_v35 = vand.u32 %v1064_v34, %v2649_v6 }
 0x130   : >> { %2342 = vmatmul.mubr.msk.bf16.vlgmr.msra.gmra.mrb[0].mxu0 %vm295_vm2, %v2341_v29 }
 0x131   : >> { %v1178_v36 = vpop.permute.xlu1 %1177  ;;  %1084 = vmatpush1.bf16.msra.mxu0 %v1072_v35  ;;  %v1176_v37 = vpop.permute.xlu0 %1175  ;;  %1115 = vmatprep.mubr.bf16.mxu0 %v2565_v5 }
 0x132   : >> { %v1182_v38 = vsel %vm1063_vm5, %v1174_v32, %v1176_v37  ;;  %v1183_v39 = vsel %vm1063_vm5, %v1176_v37, %v1178_v36 }
 0x133   : >> { %v1192_v40 = vand.u32 %v1182_v38, %v2649_v6  ;;  %v1195_v43 = vand.u32 %v1183_v39, %v2649_v6 }
 0x135   : >> { %v1172_v41 = vpop.permute.xlu1 %1171  ;;  %v1180_v42 = vpop.permute.xlu0 %1179  ;;  %1200 = vmatprep.subr.bf16.mxu0 %v1192_v40 }
 0x136   : >> { %v1181_v44 = vsel %vm1063_vm5, %v1172_v41, %v1174_v32  ;;  %v1184_v45 = vsel %vm1063_vm5, %v1178_v36, %v1180_v42 }
 0x137   : >> { %v1198_v47 = vand.u32 %v1184_v45, %v2649_v6  ;;  %v1189_v49 = vand.u32 %v1181_v44, %v2649_v6 }
 0x139   : >> { %v1293_v48 = vpop.permute.xlu1 %1292  ;;  %2346 = vmatmul.mubr.msk.bf16.vlgmr.msra.gmra.mrb[0].mxu1 %vm295_vm2, %v2344_v46  ;;  %v1291_v50 = vpop.permute.xlu0 %1290  ;;  %1241 = vmatprep.subr.bf16.mxu1 %v1198_v47 }
 0x13a   : >> { %1242 = vmatpush1.bf16.msra.mxu1 %v1195_v43  ;;  %v1300_v51 = vsel %vm1298_vm6, %v1291_v50, %v1293_v48  ;;  %1273 = vmatprep.mubr.bf16.mxu1 %v2565_v5 }
 0x13b   : >> { %v1310_v52 = vand.u32 %v1300_v51, %v2649_v6 }
 0x13c   : >> { %2345 = vmatmul.mubr.msk.bf16.vlgmr.msra.gmra.mrb[0].mxu0 %vm295_vm2, %v2344_v46  ;;  %v2356_v46 = vld [vmem:[%s2995_s1 + $0x14] sm:$0x3] }
 0x13d   : >> { %v1297_v53 = vpop.permute.xlu1 %1296  ;;  %1201 = vmatpush1.bf16.msra.mxu0 %v1189_v49  ;;  %v1295_v54 = vpop.permute.xlu0 %1294  ;;  %1232 = vmatprep.mubr.bf16.mxu0 %v2565_v5 }
 0x13e   : >> { %v1302_v55 = vsel %vm1298_vm6, %v1295_v54, %v1297_v53  ;;  %1318 = vmatprep.subr.bf16.mxu0 %v1310_v52  ;;  %v1301_v56 = vsel %vm1298_vm6, %v1293_v48, %v1295_v54 }
 0x13f   : >> { %v1316_v57 = vand.u32 %v1302_v55, %v2649_v6  ;;  %v1313_v60 = vand.u32 %v1301_v56, %v2649_v6 }
 0x141   : >> { %v1409_v58 = vpop.permute.xlu1 %1408  ;;  %v1289_v59 = vpop.permute.xlu0 %1288  ;;  %1359 = vmatprep.subr.bf16.mxu1 %v1316_v57 }
 0x142   : >> { %v1299_v61 = vsel %vm1298_vm6, %v1289_v59, %v1291_v50 }
 0x143   : >> { %v1307_v0 = vand.u32 %v1299_v61, %v2649_v6  ;;  %v2359_v61 = vld [vmem:[%s2995_s1 + $0x16] sm:$0x3] }
 0x145   : >> { %v1413_v63 = vpop.permute.xlu1 %1412  ;;  %2349 = vmatmul.mubr.msk.bf16.vlgmr.msra.gmra.mrb[0].mxu1 %vm295_vm2, %v2347_v62  ;;  %v1411_v1 = vpop.permute.xlu0 %1410 }
 0x146   : >> { %1360 = vmatpush1.bf16.msra.mxu1 %v1313_v60  ;;  %v1417_v3 = vsel %vm1298_vm6, %v1409_v58, %v1411_v1  ;;  %1391 = vmatprep.mubr.bf16.mxu1 %v2565_v5  ;;  %v1418_v10 = vsel %vm1298_vm6, %v1411_v1, %v1413_v63 }
 0x147   : >> { %v1427_v4 = vand.u32 %v1417_v3, %v2649_v6  ;;  %v1430_v14 = vand.u32 %v1418_v10, %v2649_v6 }
 0x148   : >> { %2348 = vmatmul.mubr.msk.bf16.vlgmr.msra.gmra.mrb[0].mxu0 %vm295_vm2, %v2347_v62 }
 0x149   : >> { %v1407_v7 = vpop.permute.xlu1 %1406  ;;  %1319 = vmatpush1.bf16.msra.mxu0 %v1307_v0  ;;  %v1415_v8 = vpop.permute.xlu0 %1414  ;;  %1350 = vmatprep.mubr.bf16.mxu0 %v2565_v5 }
 0x14a   : >> { %v1419_v9 = vsel %vm1298_vm6, %v1413_v63, %v1415_v8  ;;  %1435 = vmatprep.subr.bf16.mxu0 %v1427_v4  ;;  %v1416_v15 = vsel %vm1298_vm6, %v1407_v7, %v1409_v58 }
 0x14b   : >> { %v1433_v11 = vand.u32 %v1419_v9, %v2649_v6  ;;  %v1424_v19 = vand.u32 %v1416_v15, %v2649_v6 }
 0x14d   : >> { %v1528_v12 = vpop.permute.xlu1 %1527  ;;  %v1526_v13 = vpop.permute.xlu0 %1525  ;;  %1476 = vmatprep.subr.bf16.mxu1 %v1433_v11 }
 0x14e   : >> { %v1535_v17 = vsel %vm1533_vm7, %v1526_v13, %v1528_v12 }
 0x14f   : >> { %v1545_v21 = vand.u32 %v1535_v17, %v2649_v6 }
 0x151   : >> { %v1532_v18 = vpop.permute.xlu1 %1531  ;;  %2352 = vmatmul.mubr.msk.bf16.vlgmr.msra.gmra.mrb[0].mxu1 %vm295_vm2, %v2350_v16  ;;  %v1530_v20 = vpop.permute.xlu0 %1529 }
 0x152   : >> { %1477 = vmatpush1.bf16.msra.mxu1 %v1430_v14  ;;  %1508 = vmatprep.mubr.bf16.mxu1 %v2565_v5  ;;  %v1537_v22 = vsel %vm1533_vm7, %v1530_v20, %v1532_v18  ;;  %v1536_v26 = vsel %vm1533_vm7, %v1528_v12, %v1530_v20  ;;  %v2362_v14 = vld [vmem:[%s2995_s1 + $0x18] sm:$0x3] }
 0x153   : >> { %v1551_v23 = vand.u32 %v1537_v22, %v2649_v6  ;;  %v1548_v29 = vand.u32 %v1536_v26, %v2649_v6 }
 0x154   : >> { %2351 = vmatmul.mubr.msk.bf16.vlgmr.msra.gmra.mrb[0].mxu0 %vm295_vm2, %v2350_v16 }
 0x155   : >> { %v1644_v24 = vpop.permute.xlu1 %1643  ;;  %1436 = vmatpush1.bf16.msra.mxu0 %v1424_v19  ;;  %v1524_v25 = vpop.permute.xlu0 %1523  ;;  %1467 = vmatprep.mubr.bf16.mxu0 %v2565_v5 }
 0x156   : >> { %1553 = vmatprep.subr.bf16.mxu0 %v1545_v21  ;;  %1594 = vmatprep.subr.bf16.mxu1 %v1551_v23  ;;  %v1534_v30 = vsel %vm1533_vm7, %v1524_v25, %v1526_v13  ;;  %v2365_v23 = vld [vmem:[%s2995_s1 + $0x1a] sm:$0x3]  ;;  %v2368_v25 = vld [vmem:[%s2995_s1 + $0x1c] sm:$0x3] }
 0x157   : >> { %v1542_v34 = vand.u32 %v1534_v30, %v2649_v6  ;;  %v2113_v30 = vld [vmem:[%s2111_s15 + $0x8] sm:$0xff] }
 0x159   : >> { %v1648_v27 = vpop.permute.xlu1 %1647  ;;  %v1646_v28 = vpop.permute.xlu0 %1645 }
 0x15a   : >> { %v1652_v32 = vsel %vm1533_vm7, %v1644_v24, %v1646_v28  ;;  %v1653_v41 = vsel %vm1533_vm7, %v1646_v28, %v1648_v27 }
 0x15b   : >> { %v1662_v36 = vand.u32 %v1652_v32, %v2649_v6  ;;  %v1665_v44 = vand.u32 %v1653_v41, %v2649_v6  ;;  %v2112_v41 = vld [vmem:[%s2111_s15] sm:$0xff] }
 0x15d   : >> { %v1642_v33 = vpop.permute.xlu1 %1641  ;;  %2355 = vmatmul.mubr.msk.bf16.vlgmr.msra.gmra.mrb[0].mxu1 %vm295_vm2, %v2353_v31  ;;  %v1650_v35 = vpop.permute.xlu0 %1649 }
 0x15e   : >> { %1595 = vmatpush1.bf16.msra.mxu1 %v1548_v29  ;;  %1626 = vmatprep.mubr.bf16.mxu1 %v2565_v5  ;;  %v1654_v37 = vsel %vm1533_vm7, %v1648_v27, %v1650_v35  ;;  %v1651_v45 = vsel %vm1533_vm7, %v1642_v33, %v1644_v24  ;;  %v2573_v33 = vmov 1983009808  }
 0x15f   : >> { %v1668_v38 = vand.u32 %v1654_v37, %v2649_v6  ;;  %v1659_v51 = vand.u32 %v1651_v45, %v2649_v6  ;;  %v2155_v37 = vlaneseq }
 0x160   : >> { %2354 = vmatmul.mubr.msk.bf16.vlgmr.msra.gmra.mrb[0].mxu0 %vm295_vm2, %v2353_v31 }
 0x161   : >> { %v1763_v39 = vpop.permute.xlu1 %1762  ;;  %1554 = vmatpush1.bf16.msra.mxu0 %v1542_v34  ;;  %1585 = vmatprep.mubr.bf16.mxu0 %v2565_v5  ;;  %v1761_v40 = vpop.permute.xlu0 %1760  ;;  %v2153_v34 = vunpack.c.l.s4 %v2573_v33 }
 0x162   : >> { %1670 = vmatprep.subr.bf16.mxu0 %v1662_v36  ;;  %1711 = vmatprep.subr.bf16.mxu1 %v1668_v38  ;;  %v1770_v48 = vsel %vm1768_vm8, %v1761_v40, %v1763_v39 }
 0x163   : >> { %v1780_v53 = vand.u32 %v1770_v48, %v2649_v6  ;;  %v2156_v48 = vshrl.u32 %v2155_v37, 7 }
 0x165   : >> { %v1767_v42 = vpop.permute.xlu1 %1766  ;;  %v1765_v43 = vpop.permute.xlu0 %1764 }
 0x166   : >> { %v1772_v47 = vsel %vm1768_vm8, %v1765_v43, %v1767_v42  ;;  %v1771_v56 = vsel %vm1768_vm8, %v1763_v39, %v1765_v43 }
 0x167   : >> { %v1786_v49 = vand.u32 %v1772_v47, %v2649_v6  ;;  %v1783_v59 = vand.u32 %v1771_v56, %v2649_v6 }
 0x169   : >> { %v1879_v50 = vpop.permute.xlu1 %1878  ;;  %2358 = vmatmul.mubr.msk.bf16.vlgmr.msra.gmra.mrb[0].mxu1 %vm295_vm2, %v2356_v46  ;;  %v1759_v52 = vpop.permute.xlu0 %1758 }
 0x16a   : >> { %1712 = vmatpush1.bf16.msra.mxu1 %v1665_v44  ;;  %1743 = vmatprep.mubr.bf16.mxu1 %v2565_v5  ;;  %v1769_v60 = vsel %vm1768_vm8, %v1759_v52, %v1761_v40  ;;  %v2154_v44 = vunpack.c.0.s8 %v2153_v34 }
 0x16b   : >> { %1829 = vmatprep.subr.bf16.mxu1 %v1786_v49  ;;  %v1777_v3 = vand.u32 %v1769_v60, %v2649_v6 }
 0x16c   : >> { %2357 = vmatmul.mubr.msk.bf16.vlgmr.msra.gmra.mrb[0].mxu0 %vm295_vm2, %v2356_v46  ;;  %v2574_v46 = vmov 0.0  }
 0x16d   : >> { %v1883_v54 = vpop.permute.xlu1 %1882  ;;  %1671 = vmatpush1.bf16.msra.mxu0 %v1659_v51  ;;  %1702 = vmatprep.mubr.bf16.mxu0 %v2565_v5  ;;  %v1881_v55 = vpop.permute.xlu0 %1880 }
 0x16e   : >> { %1788 = vmatprep.subr.bf16.mxu0 %v1780_v53  ;;  %v1887_v63 = vsel %vm1768_vm8, %v1879_v50, %v1881_v55  ;;  %v1888_v9 = vsel %vm1768_vm8, %v1881_v55, %v1883_v54 }
 0x16f   : >> { %v1897_v7 = vand.u32 %v1887_v63, %v2649_v6  ;;  %v1900_v12 = vand.u32 %v1888_v9, %v2649_v6 }
 0x171   : >> { %v1877_v57 = vpop.permute.xlu1 %1876  ;;  %v1885_v58 = vpop.permute.xlu0 %1884 }
 0x172   : >> { %v1889_v62 = vsel %vm1768_vm8, %v1883_v54, %v1885_v58  ;;  %v1886_v13 = vsel %vm1768_vm8, %v1877_v57, %v1879_v50  ;;  %v2157_v54 = vsub.s32 %v2154_v44, %v2156_v48 }
 0x173   : >> { %v1903_v0 = vand.u32 %v1889_v62, %v2649_v6  ;;  %v1894_v17 = vand.u32 %v1886_v13, %v2649_v6 }
 0x175   : >> { %v1998_v1 = vpop.permute.xlu1 %1997  ;;  %2361 = vmatmul.mubr.msk.bf16.vlgmr.msra.gmra.mrb[0].mxu1 %vm295_vm2, %v2359_v61  ;;  %v1996_v4 = vpop.permute.xlu0 %1995 }
 0x176   : >> { %1830 = vmatpush1.bf16.msra.mxu1 %v1783_v59  ;;  %1861 = vmatprep.mubr.bf16.mxu1 %v2565_v5  ;;  %v2005_v15 = vsel %vm2003_vm9, %v1996_v4, %v1998_v1 }
 0x177   : >> { %1946 = vmatprep.subr.bf16.mxu1 %v1903_v0  ;;  %v2015_v18 = vand.u32 %v2005_v15, %v2649_v6 }
 0x178   : >> { %2360 = vmatmul.mubr.msk.bf16.vlgmr.msra.gmra.mrb[0].mxu0 %vm295_vm2, %v2359_v61 }
 0x179   : >> { %1789 = vmatpush1.bf16.msra.mxu0 %v1777_v3  ;;  %1820 = vmatprep.mubr.bf16.mxu0 %v2565_v5  ;;  %v2002_v8 = vpop.permute.xlu1 %2001  ;;  %v2000_v10 = vpop.permute.xlu0 %1999 }
 0x17a   : >> { %1905 = vmatprep.subr.bf16.mxu0 %v1897_v7  ;;  %v2007_v11 = vsel %vm2003_vm9, %v2000_v10, %v2002_v8  ;;  %v2006_v19 = vsel %vm2003_vm9, %v1998_v1, %v2000_v10 }
 0x17b   : >> { %v2021_v16 = vand.u32 %v2007_v11, %v2649_v6  ;;  %v2018_v21 = vand.u32 %v2006_v19, %v2649_v6 }
 0x17d   : >> { %v1994_v20 = vpop.permute.xlu0 %1993 }
 0x17e   : >> { %v2004_v22 = vsel %vm2003_vm9, %v1994_v20, %v1996_v4 }
 0x17f   : >> { %v2012_v24 = vand.u32 %v2004_v22, %v2649_v6 }
 0x181   : >> { %2364 = vmatmul.mubr.msk.bf16.vlgmr.msra.gmra.mrb[0].mxu1 %vm295_vm2, %v2362_v14 }
 0x182   : >> { %1947 = vmatpush1.bf16.msra.mxu1 %v1900_v12  ;;  %1978 = vmatprep.mubr.bf16.mxu1 %v2565_v5 }
 0x183   : >> { %2064 = vmatprep.subr.bf16.mxu1 %v2021_v16 }
 0x184   : >> { %2363 = vmatmul.mubr.msk.bf16.vlgmr.msra.gmra.mrb[0].mxu0 %vm295_vm2, %v2362_v14 }
 0x185   : >> { %1906 = vmatpush1.bf16.msra.mxu0 %v1894_v17  ;;  %1937 = vmatprep.mubr.bf16.mxu0 %v2565_v5 }
 0x186   : >> { %2023 = vmatprep.subr.bf16.mxu0 %v2015_v18 }
 0x18d   : >> { %2367 = vmatmul.mubr.msk.bf16.vlgmr.msra.gmra.mrb[0].mxu1 %vm295_vm2, %v2365_v23 }
 0x18e   : >> { %2065 = vmatpush1.bf16.msra.mxu1 %v2018_v21  ;;  %2096 = vmatprep.mubr.bf16.mxu1 %v2565_v5 }
 0x190   : >> { %2366 = vmatmul.mubr.msk.bf16.vlgmr.msra.gmra.mrb[0].mxu0 %vm295_vm2, %v2365_v23 }
 0x191   : >> { %2024 = vmatpush1.bf16.msra.mxu0 %v2012_v24  ;;  %2055 = vmatprep.mubr.bf16.mxu0 %v2565_v5 }
 0x199   : >> { %2370 = vmatmul.mubr.msk.bf16.vlgmr.msra.gmra.mrb[0].mxu1 %vm295_vm2, %v2368_v25 }
 0x19c   : >> { %2369 = vmatmul.mubr.msk.bf16.vlgmr.msra.gmra.mrb[0].mxu0 %vm295_vm2, %v2368_v25 }
 0x26c   : >> { %v2098_v6 = vpop.f32.mrb[0].mxu1 }
 0x26d   : >> { %v2387_v26 = vadd.f32 %v2098_v6, %v2636_v2  ;;  %v2100_v27 = vpop.f32.mrb[1].mxu1 }
 0x26e   : >> { %v2388_v28 = vadd.f32 %v2100_v27, %v2636_v2  ;;  %v2102_v29 = vpop.f32.mrb[2].mxu1 }
 0x26f   : >> { %v2057_v5 = vpop.f32.mrb[0].mxu0  ;;  %v2103_v31 = vpop.f32.mrb[3].mxu1 }
 0x270   : >> { %v2119_v32 = vcombine.low %v2387_v26, %v2388_v28  ;;  %v2385_v35 = vadd.f32 %v2057_v5, %v2636_v2  ;;  %v2059_v36 = vpop.f32.mrb[1].mxu0 }
 0x271   : >> { %v2386_v38 = vadd.f32 %v2059_v36, %v2636_v2  ;;  %v2061_v39 = vpop.f32.mrb[2].mxu0 }
 0x272   : >> { %v2123_v40 = vadd.f32 %v2119_v32, %v2113_v30  ;;  %v2062_v42 = vpop.f32.mrb[3].mxu0 }
 0x273   : >> { %v2118_v43 = vcombine.low %v2385_v35, %v2386_v38 }
 0x274   : >> { %vm2125_vm10 = vcmp.gt.f32.partialorder %v2123_v40, 1.0 }
 0x275   : >> { %v2127_v45 = vsel %vm2125_vm10, 0.0, %v2123_v40  ;;  %v2375_v47 = vsel %vm2125_vm10, 1.0, %v2574_v46  ;;  %v2122_v49 = vadd.f32 %v2118_v43, %v2112_v41 }
 0x276   : >> { %2131 = vst [vmem:[%s2129_s16 + $0x8] sm:$0xff] %v2127_v45  ;;  %v2139_v50 = vcombine.high %v2375_v47, %v2375_v47 }
 0x277   : >> { %vm2124_vm11 = vcmp.gt.f32.partialorder %v2122_v49, 1.0 }
 0x278   : >> { %v2126_v51 = vsel %vm2124_vm11, 0.0, %v2122_v49  ;;  %v2374_v52 = vsel %vm2124_vm11, 1.0, %v2574_v46  ;;  %v2377_v53 = vpack.c.bf16 %v2139_v50, %v2375_v47 }
 0x279   : >> { %2130 = vst [vmem:[%s2129_s16] sm:$0xff] %v2126_v51  ;;  %v2138_v55 = vcombine.high %v2374_v52, %v2374_v52 }
 0x27a   : >> { %v2165_v57 = vrot.slane %v2377_v53, %v2157_v54 }
 0x27b   : >> { %v2376_v56 = vpack.c.bf16 %v2138_v55, %v2374_v52  ;;  %269 = sbr.rel (!%p267_p4) target bundleno = 135 (0x87), region = 107 }
 0x27d   : >> { %v2158_v58 = vrot.slane %v2376_v56, %v2157_v54 }
 0x27f   : >> { %v2166_v59 = vcombine.low %v2158_v58, %v2165_v57 }
 0x281   : >> { %2170 = vst [vmem:[%s2169_s19] sm:$0xff] %v2166_v59 }
 0x282 PF: > { %s16_s18 = sadd.s32 1, %s2557_s18  }
 0x283   : > { %p13_p5 = scmp.ge.s32.totalorder %s16_s18, 4  }
 0x285   :  { %15 = sbr.rel (!%p13_p5) target bundleno = 1 (0x1), region = 118 }

// kernel: closed_call.38
= control target key start
LH: loop header
LB: loop body
LE: loop exit
PB: predicated region body
PF: predicated region fallthrough
CT: control target
= control target key end

     0   :  { %s3800_s18 = smov 0   ;;  %s4994_s0 = inlined_call_operand.vmem [shape: bf16[2,10,2,60,520], index: 0, kind: input, shape index: {}]   ;;  %s4995_s1 = inlined_call_operand.vmem [shape: bf16[15,4,60], index: 1, kind: input, shape index: {}]   ;;  %s4996_s2 = inlined_call_operand.vmem [shape: f32[4,1], index: 2, kind: input, shape index: {}]   ;;  %s4997_s3 = inlined_call_operand.vmem [shape: f32[2,10,4,512], index: 3, kind: input, shape index: {}]   ;;  %s4998_s4 = inlined_call_operand.vmem [shape: f32[2,10,4,512], index: 4, kind: output, shape index: {0}]   ;;  %s4999_s5 = inlined_call_operand.vmem [shape: bf16[2,10,4,512], index: 5, kind: output, shape index: {1}]  }
   0x1 LB: > { %s3293_s19 = sadd.s32 4294967295, %s3753_s18   ;;  %p3297_p0 = scmp.ge.s32.totalorder %s3753_s18, 1  ;;  %s3753_s18 = sphi %s3800_s18, %s16_s18  }
   0x2   : > { %p200_p1 = scmp.lt.s32.totalorder %s3753_s18, 3 }
   0x4   : > { %p201_p2 = pnand %p3297_p0, %p200_p1 }
   0x5   : > { %v259_v0 = vld [vmem:[%s4996_s2] sm:$0xf] (!%p201_p2)  ;;  %p238_p3 = scmp.lt.s32.totalorder (!%p201_p2), %s3293_s19, 1  ;;  %v3759_v1 = vmov (!%p201_p2), 0   ;;  %s3833_s12 = smov (!%p201_p2), 0  }
   0x6   : > { %204 = sbr.rel (%p201_p2) target bundleno = 1006 (0x3ee), region = 36  ;;  %3650 = vset.pattern.permute.xlu0 (!%p201_p2), %v3759_v1 }
   0x7   : > { %262 = vperm.xlu0 (!%p201_p2), %3650, %v259_v0  }
   0xd   : > { %s5001_s19 = smov (!%p238_p3, %s3293_s19), 1 }
   0xe   : > { %s3620_s22 = smul.u32 3200, %s5001_s19 }
   0xf   : > { %s3621_s23 = smul.u32 160, %s5001_s19 }
  0x10   : > { %s3814_s26 = scalar_lea.vmem %s4994_s0, %s3620_s22  ;;  %s3622_s27 = smul.u32 80, %s5001_s19 }
  0x11   : > { %s3819_s30 = scalar_lea.vmem %s4997_s3, %s3621_s23  ;;  %s3824_s8 = scalar_lea.vmem %s4998_s4, %s3621_s23 }
  0x12   : > { %s3829_s11 = scalar_lea.vmem %s4999_s5, %s3622_s27 }
  0x86   : > { %v3831_v2 = vpop.permute.xlu0 %262 }
  0x87 LB: >> { %v3760_v3 = vmov 0   ;;  %s3500_s13 = smul.u32 320, %s3757_s12  ;;  %s3761_s15 = smov 127   ;;  %vm371_vm0 = vcmask 1045504   ;;  %v290_v35 = vld [vmem:[%s4995_s1] sm:$0x3]  ;;  %s3757_s12 = sphi %s3833_s12, %s270_s12  }
  0x88   : >> { %416 = vmatprep.mubr.bf16.mxu0 %v3760_v3  ;;  %457 = vmatprep.mubr.bf16.mxu1 %v3760_v3  ;;  %vm367_vm1 = vcmask 490496   ;;  %v3340_v59 = vld [vmem:[%s4995_s1 + $0x2] sm:$0x3]  ;;  %s3762_s21 = smov 126   ;;  %vm818_vm2 = vcmask 1039360   ;;  %s3763_s24 = smov 125  }
  0x89   : >> { %s3842_s14 = scalar_lea.vmem %s3814_s26, %s3500_s13  ;;  %vm1269_vm3 = vcmask 1031168   ;;  %s3764_s6 = smov 124   ;;  %vm1612_vm4 = vcmask 1022976   ;;  %vm1955_vm5 = vcmask 1014784   ;;  %vm2298_vm6 = vcmask 1006592  }
  0x8a   : >> { %v3845_v4 = vld [vmem:[%s3842_s14 + $0x8] ss:$20 sps:$4 sm:$0xff]   ;;  %v3848_v5 = vld [vmem:[%s3842_s14] ss:$20 sps:$4 sm:$0xff]   ;;  %v3856_v7 = vld [vmem:[%s3842_s14 + $0x4] ss:$20 sps:$4 sm:$0xff]  }
  0x8b   : >> { %782 = vrot.lane.b32.xlu1 %v3845_v4, %s3761_s15  ;;  %v3853_v6 = vld [vmem:[%s3842_s14 + $0xc] ss:$20 sps:$4 sm:$0xff]   ;;  %778 = vrot.lane.b32.xlu0 %v3848_v5, %s3761_s15  ;;  %v3863_v8 = vld [vmem:[%s3842_s14 + $0x28] ss:$20 sps:$4 sm:$0xff]   ;;  %s3767_s25 = smov 121   ;;  %vm2641_vm7 = vcmask 998400  }
  0x8c   : >> { %384 = vmatprep.subr.bf16.mxu0 %v3856_v7  ;;  %425 = vmatprep.subr.bf16.mxu1 %v3853_v6  ;;  %v3866_v9 = vld [vmem:[%s3842_s14 + $0x2c] ss:$20 sps:$4 sm:$0xff]   ;;  %v3873_v10 = vld [vmem:[%s3842_s14 + $0x10] ss:$20 sps:$4 sm:$0xff]   ;;  %v3878_v11 = vld [vmem:[%s3842_s14 + $0x34] ss:$20 sps:$4 sm:$0xff]  }
  0x8d   : >> { %385 = vmatpush1.bf16.msra.mxu0 %v3848_v5  ;;  %426 = vmatpush1.bf16.msra.mxu1 %v3845_v4  ;;  %v3882_v12 = vld [vmem:[%s3842_s14 + $0x54] ss:$20 sps:$4 sm:$0xff]   ;;  %v3885_v13 = vld [vmem:[%s3842_s14 + $0x30] ss:$20 sps:$4 sm:$0xff]   ;;  %v3903_v16 = vld [vmem:[%s3842_s14 + $0x58] ss:$20 sps:$4 sm:$0xff]  }
  0x8e   : >> { %386 = vmatprep.subr.bf16.mxu0 %v3866_v9  ;;  %427 = vmatprep.subr.bf16.mxu1 %v3878_v11  ;;  %v3892_v14 = vld [vmem:[%s3842_s14 + $0x5c] ss:$20 sps:$4 sm:$0xff]   ;;  %v3909_v17 = vld [vmem:[%s3842_s14 + $0x38] ss:$20 sps:$4 sm:$0xff]   ;;  %v3929_v21 = vld [vmem:[%s3842_s14 + $0x60] ss:$20 sps:$4 sm:$0xff]  }
  0x8f   : >> { %784 = vrot.lane.b32.xlu1 %v3853_v6, %s3761_s15  ;;  %780 = vrot.lane.b32.xlu0 %v3856_v7, %s3761_s15  ;;  %v3898_v15 = vld [vmem:[%s3842_s14 + $0x50] ss:$20 sps:$4 sm:$0xff]   ;;  %v686_v18 = vld [vmem:[%s3842_s14 + $0x78] sm:$0xff]  ;;  %vm2984_vm8 = vcmask 990208   ;;  %s3503_s19 = sshll.u32 %s3757_s12, 3 }
  0x90   : >> { %v689_v19 = vld [vmem:[%s3842_s14 + $0x8c] sm:$0x33]  ;;  %v687_v22 = vld [vmem:[%s3842_s14 + $0x80] sm:$0xff]  ;;  %v690_v23 = vld [vmem:[%s3842_s14 + $0x94] sm:$0x33]  ;;  %s3174_s20 = scalar_lea.vmem %s3829_s11, %s3503_s19 }
  0x91   : >> { %387 = vmatpush1.bf16.msra.mxu0 %v3863_v8  ;;  %428 = vmatpush1.bf16.msra.mxu1 %v3885_v13  ;;  %v3926_v20 = vcombine.low %v686_v18, %v689_v19  ;;  %v288_v24 = vld [vmem:[%s3842_s14 + $0x8c] sm:$0x33]  ;;  %v289_v25 = vld [vmem:[%s3842_s14 + $0x94] sm:$0x33]  ;;  %v3939_v30 = vcombine.low %v687_v22, %v690_v23  ;;  %v3949_v34 = vcombine.high %v686_v18, %v689_v19  ;;  %v3977_v41 = vld [vmem:[%s3842_s14 + $0xa8] ss:$20 sps:$4 sm:$0xff]  }
  0x92   : >> { %388 = vmatprep.subr.bf16.mxu0 %v3882_v12  ;;  %429 = vmatprep.subr.bf16.mxu1 %v3892_v14  ;;  %v3316_v26 = vcombine.high %v686_v18, %v288_v24  ;;  %v3315_v27 = vcombine.low %v686_v18, %v288_v24  ;;  %v3318_v28 = vcombine.high %v687_v22, %v289_v25  ;;  %v3942_v31 = vld [vmem:[%s3842_s14 + $0xa4] ss:$20 sps:$4 sm:$0xff]   ;;  %v3957_v36 = vld [vmem:[%s3842_s14 + $0x88] ss:$20 sps:$4 sm:$0x3f]  }
  0x93   : >> { %788 = vrot.lane.b32.xlu1 %v3863_v8, %s3761_s15  ;;  %786 = vrot.lane.b32.xlu0 %v3873_v10, %s3761_s15  ;;  %v3317_v29 = vcombine.low %v687_v22, %v289_v25  ;;  %v3960_v37 = vld [vmem:[%s3842_s14 + $0xa0] ss:$20 sps:$4 sm:$0xff]   ;;  %v3973_v40 = vcombine.high %v687_v22, %v690_v23  ;;  %v3982_v42 = vld [vmem:[%s3842_s14 + $0xc8] ss:$20 sps:$4 sm:$0xff]  }
  0x94   : >> { %v373_v32 = vsel %vm371_vm0, %v3315_v27, 0  ;;  %v3965_v38 = vld [vmem:[%s3842_s14 + $0xac] ss:$20 sps:$4 sm:$0xff]   ;;  %v3990_v44 = vld [vmem:[%s3842_s14 + $0xd4] ss:$20 sps:$4 sm:$0xff]   ;;  %v3404_v46 = vld [vmem:[%s3842_s14 + $0x118] sm:$0xff] }
  0x95   : >> { %389 = vmatpush1.bf16.msra.mxu0 %v3898_v15  ;;  %430 = vmatpush1.bf16.msra.mxu1 %v3903_v16  ;;  %v379_v33 = vsel %vm371_vm0, %v3317_v29, 0  ;;  %v3968_v39 = vld [vmem:[%s3842_s14 + $0xcc] ss:$20 sps:$4 sm:$0xff]   ;;  %v3993_v45 = vld [vmem:[%s3842_s14 + $0xf4] ss:$20 sps:$4 sm:$0xff]  }
  0x96   : >> { %3319 = vmatprep.subr.msk.bf16.mxu0 %vm371_vm0, %v3316_v26  ;;  %3321 = vmatprep.subr.msk.bf16.mxu1 %vm371_vm0, %v3318_v28  ;;  %v3338_v43 = vld [vmem:[%s3842_s14 + $0x12c] sm:$0x33]  ;;  %v3339_v51 = vld [vmem:[%s3842_s14 + $0x134] sm:$0x33]  ;;  %v3405_v54 = vld [vmem:[%s3842_s14 + $0x120] sm:$0xff] }
  0x97   : >> { %792 = vrot.lane.b32.xlu1 %v3885_v13, %s3761_s15  ;;  %790 = vrot.lane.b32.xlu0 %v3866_v9, %s3761_s15  ;;  %v4001_v47 = vld [vmem:[%s3842_s14 + $0xd0] ss:$20 sps:$4 sm:$0xff]   ;;  %v3354_v48 = vcombine.high %v3404_v46, %v3338_v43  ;;  %v3353_v49 = vcombine.low %v3404_v46, %v3338_v43  ;;  %v4024_v55 = vld [vmem:[%s3842_s14 + $0xf8] ss:$20 sps:$4 sm:$0xff]   ;;  %v3356_v57 = vcombine.high %v3405_v54, %v3339_v51 }
  0x98   : >> { %v4006_v50 = vld [vmem:[%s3842_s14 + $0xf0] ss:$20 sps:$4 sm:$0xff]   ;;  %v3355_v58 = vcombine.low %v3405_v54, %v3339_v51  ;;  %v4051_v61 = vld [vmem:[%s3842_s14 + $0xd8] ss:$20 sps:$4 sm:$0xff]   ;;  %v4061_v62 = vld [vmem:[%s3842_s14 + $0x100] ss:$20 sps:$4 sm:$0xff]  }
  0x99   : >> { %391 = vmatpush1.bf16.msra.mxu0 %v373_v32  ;;  %432 = vmatpush1.bf16.msra.mxu1 %v379_v33  ;;  %v4013_v52 = vld [vmem:[%s3842_s14 + $0xb0] ss:$20 sps:$4 sm:$0xff]   ;;  %v571_v56 = vsel %vm371_vm0, %v3353_v49, 0  ;;  %v3408_v1 = vld [vmem:[%s3842_s14 + $0x134] sm:$0x33] }
  0x9a   : >> { %582 = vmatprep.subr.bf16.mxu0 %v3942_v31  ;;  %623 = vmatprep.subr.bf16.mxu1 %v3965_v38  ;;  %v4016_v53 = vld [vmem:[%s3842_s14 + $0xfc] ss:$20 sps:$4 sm:$0xff]   ;;  %v577_v60 = vsel %vm371_vm0, %v3355_v58, 0  ;;  %v4075_v18 = vcombine.low %v3405_v54, %v3408_v1  ;;  %v4088_v23 = vcombine.high %v3405_v54, %v3408_v1 }
  0x9b   : >> { %796 = vrot.lane.b32.xlu1 %v3909_v17, %s3761_s15  ;;  %794 = vrot.lane.b32.xlu0 %v3878_v11, %s3761_s15  ;;  %v3407_v63 = vld [vmem:[%s3842_s14 + $0x12c] sm:$0x33]  ;;  %v4084_v22 = vld [vmem:[%s3842_s14 + $0x128] ss:$20 sps:$4 sm:$0x3f]  }
  0x9c   : >> { %3320 = vmatmul.mubr.msk.bf16.vlgmr.msra.gmra.mrb[0].mxu0 %vm367_vm1, %v290_v35  ;;  %3322 = vmatmul.mubr.msk.bf16.vlgmr.msra.gmra.mrb[0].mxu1 %vm367_vm1, %v290_v35  ;;  %v4068_v0 = vcombine.low %v3404_v46, %v3407_v63  ;;  %v4079_v19 = vcombine.high %v3404_v46, %v3407_v63 }
  0x9d   : >> { %583 = vmatpush1.bf16.msra.mxu0 %v3960_v37  ;;  %614 = vmatprep.mubr.bf16.mxu0 %v3760_v3 }
  0x9e   : >> { %584 = vmatprep.subr.bf16.mxu0 %v3968_v39  ;;  %624 = vmatpush1.bf16.msra.mxu1 %v3977_v41 }
  0x9f   : >> { %800 = vrot.lane.b32.xlu1 %v3882_v12, %s3761_s15  ;;  %798 = vrot.lane.b32.xlu0 %v3898_v15, %s3761_s15 }
  0xa0   : >> { %625 = vmatprep.subr.bf16.mxu1 %v3990_v44  ;;  %655 = vmatprep.mubr.bf16.mxu1 %v3760_v3 }
  0xa1   : >> { %585 = vmatpush1.bf16.msra.mxu0 %v3982_v42 }
  0xa2   : >> { %586 = vmatprep.subr.bf16.mxu0 %v3993_v45  ;;  %626 = vmatpush1.bf16.msra.mxu1 %v4001_v47 }
  0xa3   : >> { %804 = vrot.lane.b32.xlu1 %v3892_v14, %s3761_s15  ;;  %802 = vrot.lane.b32.xlu0 %v3903_v16, %s3761_s15 }
  0xa4   : >> { %627 = vmatprep.subr.bf16.mxu1 %v4016_v53 }
  0xa5   : >> { %587 = vmatpush1.bf16.msra.mxu0 %v4006_v50 }
  0xa6   : >> { %3357 = vmatprep.subr.msk.bf16.mxu0 %vm371_vm0, %v3354_v48  ;;  %628 = vmatpush1.bf16.msra.mxu1 %v4024_v55 }
  0xa7   : >> { %808 = vrot.lane.b32.xlu1 %v3926_v20, %s3761_s15  ;;  %806 = vrot.lane.b32.xlu0 %v3929_v21, %s3761_s15 }
  0xa8   : >> { %3359 = vmatprep.subr.msk.bf16.mxu1 %vm371_vm0, %v3356_v57 }
  0xa9   : >> { %589 = vmatpush1.bf16.msra.mxu0 %v571_v56 }
  0xaa   : >> { %630 = vmatpush1.bf16.msra.mxu1 %v577_v60 }
  0xab   : >> { %812 = vrot.lane.b32.xlu1 %v3939_v30, %s3761_s15  ;;  %810 = vrot.lane.b32.xlu0 %v3949_v34, %s3761_s15 }
  0xac   : >> { %3358 = vmatmul.mubr.msk.bf16.vlgmr.msra.gmra.mrb[0].mxu0 %vm367_vm1, %v3340_v59 }
  0xad   : >> { %894 = vmatprep.mubr.bf16.mxu0 %v3760_v3  ;;  %3360 = vmatmul.mubr.msk.bf16.vlgmr.msra.gmra.mrb[0].mxu1 %vm367_vm1, %v3340_v59 }
  0xae   : >> { %935 = vmatprep.mubr.bf16.mxu1 %v3760_v3 }
  0xaf   : >> { %816 = vrot.lane.b32.xlu1 %v3957_v36, %s3761_s15  ;;  %814 = vrot.lane.b32.xlu0 %v3973_v40, %s3761_s15 }
  0xb3   : >> { %1062 = vrot.lane.b32.xlu1 %v3977_v41, %s3761_s15  ;;  %1060 = vrot.lane.b32.xlu0 %v3942_v31, %s3761_s15 }
  0xb7   : >> { %1066 = vrot.lane.b32.xlu1 %v4013_v52, %s3761_s15  ;;  %1064 = vrot.lane.b32.xlu0 %v3965_v38, %s3761_s15 }
  0xbb   : >> { %1070 = vrot.lane.b32.xlu1 %v3968_v39, %s3761_s15  ;;  %1058 = vrot.lane.b32.xlu0 %v3960_v37, %s3761_s15 }
  0xbf   : >> { %1074 = vrot.lane.b32.xlu1 %v3990_v44, %s3761_s15  ;;  %1072 = vrot.lane.b32.xlu0 %v4001_v47, %s3761_s15 }
  0xc3   : >> { %1068 = vrot.lane.b32.xlu1 %v3982_v42, %s3761_s15  ;;  %1076 = vrot.lane.b32.xlu0 %v4051_v61, %s3761_s15 }
  0xc7   : >> { %1082 = vrot.lane.b32.xlu1 %v4024_v55, %s3761_s15  ;;  %1080 = vrot.lane.b32.xlu0 %v3993_v45, %s3761_s15 }
  0xcb   : >> { %1086 = vrot.lane.b32.xlu1 %v4061_v62, %s3761_s15  ;;  %1084 = vrot.lane.b32.xlu0 %v4016_v53, %s3761_s15 }
  0xcf   : >> { %1088 = vrot.lane.b32.xlu1 %v4068_v0, %s3761_s15  ;;  %1078 = vrot.lane.b32.xlu0 %v4006_v50, %s3761_s15 }
  0xd3   : >> { %1092 = vrot.lane.b32.xlu1 %v4075_v18, %s3761_s15  ;;  %1090 = vrot.lane.b32.xlu0 %v4079_v19, %s3761_s15 }
  0xd7   : >> { %1096 = vrot.lane.b32.xlu1 %v4084_v22, %s3761_s15  ;;  %1094 = vrot.lane.b32.xlu0 %v4088_v23, %s3761_s15  ;;  %s3765_s15 = smov 123  }
  0xdb   : >> { %1233 = vrot.lane.b32.xlu1 %v3845_v4, %s3762_s21  ;;  %1231 = vrot.lane.b32.xlu0 %v3856_v7, %s3762_s21 }
  0xdf   : >> { %1237 = vrot.lane.b32.xlu1 %v3873_v10, %s3762_s21  ;;  %1235 = vrot.lane.b32.xlu0 %v3853_v6, %s3762_s21 }
  0xe3   : >> { %1241 = vrot.lane.b32.xlu1 %v3866_v9, %s3762_s21  ;;  %1229 = vrot.lane.b32.xlu0 %v3848_v5, %s3762_s21 }
  0xe7   : >> { %1245 = vrot.lane.b32.xlu1 %v3878_v11, %s3762_s21  ;;  %1243 = vrot.lane.b32.xlu0 %v3885_v13, %s3762_s21 }
  0xeb   : >> { %1239 = vrot.lane.b32.xlu1 %v3863_v8, %s3762_s21  ;;  %1247 = vrot.lane.b32.xlu0 %v3909_v17, %s3762_s21 }
  0xef   : >> { %1253 = vrot.lane.b32.xlu1 %v3903_v16, %s3762_s21  ;;  %1251 = vrot.lane.b32.xlu0 %v3882_v12, %s3762_s21 }
  0xf3   : >> { %1257 = vrot.lane.b32.xlu1 %v3929_v21, %s3762_s21  ;;  %1255 = vrot.lane.b32.xlu0 %v3892_v14, %s3762_s21 }
  0xf7   : >> { %1259 = vrot.lane.b32.xlu1 %v3926_v20, %s3762_s21  ;;  %1249 = vrot.lane.b32.xlu0 %v3898_v15, %s3762_s21 }
  0xfb   : >> { %1263 = vrot.lane.b32.xlu1 %v3939_v30, %s3762_s21  ;;  %1261 = vrot.lane.b32.xlu0 %v3949_v34, %s3762_s21 }
  0xfd   : >> { %v783_v24 = vpop.permute.xlu1 %782  ;;  %v779_v25 = vpop.permute.xlu0 %778 }
  0xff   : >> { %1267 = vrot.lane.b32.xlu1 %v3957_v36, %s3762_s21  ;;  %1265 = vrot.lane.b32.xlu0 %v3973_v40, %s3762_s21 }
 0x101   : >> { %v785_v26 = vpop.permute.xlu1 %784  ;;  %v781_v27 = vpop.permute.xlu0 %780 }
 0x102   : >> { %v820_v28 = vsel %vm818_vm2, %v781_v27, %v783_v24  ;;  %v819_v29 = vsel %vm818_vm2, %v779_v25, %v781_v27  ;;  %v821_v43 = vsel %vm818_vm2, %v783_v24, %v785_v26 }
 0x103   : >> { %1405 = vrot.lane.b32.xlu1 %v3977_v41, %s3762_s21  ;;  %1403 = vrot.lane.b32.xlu0 %v3942_v31, %s3762_s21 }
 0x104   : >> { %862 = vmatprep.subr.bf16.mxu0 %v820_v28 }
 0x105   : >> { %863 = vmatpush1.bf16.msra.mxu0 %v819_v29  ;;  %v789_v32 = vpop.permute.xlu1 %788  ;;  %v787_v33 = vpop.permute.xlu0 %786 }
 0x106   : >> { %v822_v35 = vsel %vm818_vm2, %v785_v26, %v787_v33 }
 0x107   : >> { %1409 = vrot.lane.b32.xlu1 %v4013_v52, %s3762_s21  ;;  %1407 = vrot.lane.b32.xlu0 %v3965_v38, %s3762_s21 }
 0x108   : >> { %903 = vmatprep.subr.bf16.mxu1 %v822_v35 }
 0x109   : >> { %904 = vmatpush1.bf16.msra.mxu1 %v821_v43  ;;  %v793_v46 = vpop.permute.xlu1 %792  ;;  %v791_v48 = vpop.permute.xlu0 %790 }
 0x10a   : >> { %v824_v49 = vsel %vm818_vm2, %v791_v48, %v793_v46  ;;  %v823_v51 = vsel %vm818_vm2, %v789_v32, %v791_v48 }
 0x10b   : >> { %1413 = vrot.lane.b32.xlu1 %v3968_v39, %s3762_s21  ;;  %1401 = vrot.lane.b32.xlu0 %v3960_v37, %s3762_s21 }
 0x10c   : >> { %864 = vmatprep.subr.bf16.mxu0 %v824_v49 }
 0x10d   : >> { %865 = vmatpush1.bf16.msra.mxu0 %v823_v51  ;;  %v797_v54 = vpop.permute.xlu1 %796  ;;  %v795_v56 = vpop.permute.xlu0 %794 }
 0x10e   : >> { %v826_v57 = vsel %vm818_vm2, %v795_v56, %v797_v54  ;;  %v825_v58 = vsel %vm818_vm2, %v793_v46, %v795_v56 }
 0x10f   : >> { %1417 = vrot.lane.b32.xlu1 %v3990_v44, %s3762_s21  ;;  %1415 = vrot.lane.b32.xlu0 %v4001_v47, %s3762_s21 }
 0x110   : >> { %905 = vmatprep.subr.bf16.mxu1 %v826_v57  ;;  %v3361_v57 = vld [vmem:[%s4995_s1 + $0x4] sm:$0x3] }
 0x111   : >> { %906 = vmatpush1.bf16.msra.mxu1 %v825_v58  ;;  %v801_v59 = vpop.permute.xlu1 %800  ;;  %v799_v60 = vpop.permute.xlu0 %798 }
 0x112   : >> { %v827_v25 = vsel %vm818_vm2, %v799_v60, %v801_v59 }
 0x113   : >> { %1411 = vrot.lane.b32.xlu1 %v3982_v42, %s3762_s21  ;;  %1419 = vrot.lane.b32.xlu0 %v4051_v61, %s3762_s21 }
 0x115   : >> { %v805_v63 = vpop.permute.xlu1 %804  ;;  %v803_v1 = vpop.permute.xlu0 %802 }
 0x116   : >> { %v828_v24 = vsel %vm818_vm2, %v801_v59, %v803_v1  ;;  %v829_v29 = vsel %vm818_vm2, %v803_v1, %v805_v63 }
 0x117   : >> { %1425 = vrot.lane.b32.xlu1 %v4024_v55, %s3762_s21  ;;  %1423 = vrot.lane.b32.xlu0 %v3993_v45, %s3762_s21 }
 0x118   : >> { %866 = vmatprep.subr.bf16.mxu0 %v828_v24 }
 0x119   : >> { %867 = vmatpush1.bf16.msra.mxu0 %v827_v25  ;;  %v809_v26 = vpop.permute.xlu1 %808  ;;  %v807_v27 = vpop.permute.xlu0 %806 }
 0x11a   : >> { %v830_v28 = vsel %vm818_vm2, %v805_v63, %v807_v27 }
 0x11b   : >> { %1429 = vrot.lane.b32.xlu1 %v4061_v62, %s3762_s21  ;;  %1427 = vrot.lane.b32.xlu0 %v4016_v53, %s3762_s21 }
 0x11c   : >> { %907 = vmatprep.subr.bf16.mxu1 %v830_v28 }
 0x11d   : >> { %908 = vmatpush1.bf16.msra.mxu1 %v829_v29  ;;  %v813_v32 = vpop.permute.xlu1 %812  ;;  %v811_v33 = vpop.permute.xlu0 %810 }
 0x11e   : >> { %v831_v35 = vsel %vm818_vm2, %v809_v26, %v811_v33  ;;  %v832_v43 = vsel %vm818_vm2, %v811_v33, %v813_v32 }
 0x11f   : >> { %1431 = vrot.lane.b32.xlu1 %v4068_v0, %s3762_s21  ;;  %1421 = vrot.lane.b32.xlu0 %v4006_v50, %s3762_s21  ;;  %v851_v46 = vsel %vm371_vm0, %v831_v35, 0 }
 0x120   : >> { %3382 = vmatprep.subr.msk.bf16.mxu0 %vm371_vm0, %v832_v43 }
 0x121   : >> { %869 = vmatpush1.bf16.msra.mxu0 %v851_v46  ;;  %v817_v48 = vpop.permute.xlu1 %816  ;;  %v815_v49 = vpop.permute.xlu0 %814 }
 0x122   : >> { %v833_v51 = vsel %vm818_vm2, %v813_v32, %v815_v49  ;;  %v834_v54 = vsel %vm818_vm2, %v815_v49, %v817_v48 }
 0x123   : >> { %1435 = vrot.lane.b32.xlu1 %v4075_v18, %s3762_s21  ;;  %1433 = vrot.lane.b32.xlu0 %v4079_v19, %s3762_s21  ;;  %v857_v56 = vsel %vm371_vm0, %v833_v51, 0 }
 0x124   : >> { %3384 = vmatprep.subr.msk.bf16.mxu1 %vm371_vm0, %v834_v54  ;;  %3383 = vmatmul.mubr.msk.bf16.vlgmr.msra.gmra.mrb[0].mxu0 %vm367_vm1, %v3361_v57 }
 0x125   : >> { %910 = vmatpush1.bf16.msra.mxu1 %v857_v56  ;;  %v1063_v58 = vpop.permute.xlu1 %1062  ;;  %v1061_v59 = vpop.permute.xlu0 %1060  ;;  %1173 = vmatprep.mubr.bf16.mxu0 %v3760_v3 }
 0x126   : >> { %v1099_v60 = vsel %vm818_vm2, %v1061_v59, %v1063_v58 }
 0x127   : >> { %1439 = vrot.lane.b32.xlu1 %v4084_v22, %s3762_s21  ;;  %1437 = vrot.lane.b32.xlu0 %v4088_v23, %s3762_s21  ;;  %s3766_s21 = smov 122  }
 0x128   : >> { %1141 = vmatprep.subr.bf16.mxu0 %v1099_v60  ;;  %3385 = vmatmul.mubr.msk.bf16.vlgmr.msra.gmra.mrb[0].mxu1 %vm367_vm1, %v3361_v57 }
 0x129   : >> { %v1067_v63 = vpop.permute.xlu1 %1066  ;;  %v1065_v1 = vpop.permute.xlu0 %1064  ;;  %1214 = vmatprep.mubr.bf16.mxu1 %v3760_v3 }
 0x12a   : >> { %v1101_v24 = vsel %vm818_vm2, %v1065_v1, %v1067_v63  ;;  %v1100_v25 = vsel %vm818_vm2, %v1063_v58, %v1065_v1 }
 0x12b   : >> { %1576 = vrot.lane.b32.xlu1 %v3845_v4, %s3763_s24  ;;  %1574 = vrot.lane.b32.xlu0 %v3856_v7, %s3763_s24 }
 0x12c   : >> { %1182 = vmatprep.subr.bf16.mxu1 %v1101_v24 }
 0x12d   : >> { %1183 = vmatpush1.bf16.msra.mxu1 %v1100_v25  ;;  %v1071_v26 = vpop.permute.xlu1 %1070  ;;  %v1059_v27 = vpop.permute.xlu0 %1058 }
 0x12e   : >> { %v1098_v28 = vsel %vm818_vm2, %v1059_v27, %v1061_v59 }
 0x12f   : >> { %1580 = vrot.lane.b32.xlu1 %v3873_v10, %s3763_s24  ;;  %1578 = vrot.lane.b32.xlu0 %v3853_v6, %s3763_s24 }
 0x130   : >> { %1142 = vmatpush1.bf16.msra.mxu0 %v1098_v28 }
 0x131   : >> { %v1075_v29 = vpop.permute.xlu1 %1074  ;;  %v1073_v32 = vpop.permute.xlu0 %1072 }
 0x132   : >> { %v1103_v33 = vsel %vm818_vm2, %v1071_v26, %v1073_v32  ;;  %v1104_v49 = vsel %vm818_vm2, %v1073_v32, %v1075_v29 }
 0x133   : >> { %1584 = vrot.lane.b32.xlu1 %v3866_v9, %s3763_s24  ;;  %1572 = vrot.lane.b32.xlu0 %v3848_v5, %s3763_s24 }
 0x134   : >> { %1143 = vmatprep.subr.bf16.mxu0 %v1103_v33 }
 0x135   : >> { %v1069_v35 = vpop.permute.xlu1 %1068  ;;  %v1077_v46 = vpop.permute.xlu0 %1076 }
 0x136   : >> { %v1102_v43 = vsel %vm818_vm2, %v1069_v35, %v1071_v26  ;;  %v1105_v48 = vsel %vm818_vm2, %v1075_v29, %v1077_v46 }
 0x137   : >> { %1588 = vrot.lane.b32.xlu1 %v3878_v11, %s3763_s24  ;;  %1144 = vmatpush1.bf16.msra.mxu0 %v1102_v43 }
 0x138   : >> { %1586 = vrot.lane.b32.xlu0 %v3885_v13, %s3763_s24  ;;  %1184 = vmatprep.subr.bf16.mxu1 %v1105_v48  ;;  %v3410_v48 = vld [vmem:[%s4995_s1 + $0x6] sm:$0x3] }
 0x139   : >> { %1185 = vmatpush1.bf16.msra.mxu1 %v1104_v49  ;;  %v1083_v51 = vpop.permute.xlu1 %1082  ;;  %v1081_v54 = vpop.permute.xlu0 %1080 }
 0x13a   : >> { %v1107_v56 = vsel %vm818_vm2, %v1081_v54, %v1083_v51 }
 0x13b   : >> { %1582 = vrot.lane.b32.xlu1 %v3863_v8, %s3763_s24  ;;  %1145 = vmatprep.subr.bf16.mxu0 %v1107_v56 }
 0x13c   : >> { %1590 = vrot.lane.b32.xlu0 %v3909_v17, %s3763_s24 }
 0x13d   : >> { %v1087_v57 = vpop.permute.xlu1 %1086  ;;  %v1085_v58 = vpop.permute.xlu0 %1084 }
 0x13e   : >> { %v1109_v59 = vsel %vm818_vm2, %v1085_v58, %v1087_v57  ;;  %v1108_v60 = vsel %vm818_vm2, %v1083_v51, %v1085_v58 }
 0x13f   : >> { %1596 = vrot.lane.b32.xlu1 %v3903_v16, %s3763_s24  ;;  %1186 = vmatprep.subr.bf16.mxu1 %v1109_v59 }
 0x140   : >> { %1594 = vrot.lane.b32.xlu0 %v3882_v12, %s3763_s24  ;;  %1187 = vmatpush1.bf16.msra.mxu1 %v1108_v60 }
 0x141   : >> { %v1089_v63 = vpop.permute.xlu1 %1088  ;;  %v1079_v1 = vpop.permute.xlu0 %1078 }
 0x142   : >> { %v1106_v24 = vsel %vm818_vm2, %v1079_v1, %v1081_v54 }
 0x143   : >> { %1600 = vrot.lane.b32.xlu1 %v3929_v21, %s3763_s24  ;;  %1146 = vmatpush1.bf16.msra.mxu0 %v1106_v24 }
 0x144   : >> { %1598 = vrot.lane.b32.xlu0 %v3892_v14, %s3763_s24 }
 0x145   : >> { %v1093_v25 = vpop.permute.xlu1 %1092  ;;  %v1091_v26 = vpop.permute.xlu0 %1090 }
 0x146   : >> { %v1110_v27 = vsel %vm818_vm2, %v1089_v63, %v1091_v26  ;;  %v1111_v28 = vsel %vm818_vm2, %v1091_v26, %v1093_v25 }
 0x147   : >> { %1602 = vrot.lane.b32.xlu1 %v3926_v20, %s3763_s24  ;;  %3431 = vmatprep.subr.msk.bf16.mxu0 %vm371_vm0, %v1111_v28  ;;  %v1130_v29 = vsel %vm371_vm0, %v1110_v27, 0 }
 0x148   : >> { %1592 = vrot.lane.b32.xlu0 %v3898_v15, %s3763_s24  ;;  %1148 = vmatpush1.bf16.msra.mxu0 %v1130_v29 }
 0x149   : >> { %v1097_v32 = vpop.permute.xlu1 %1096  ;;  %v1095_v33 = vpop.permute.xlu0 %1094 }
 0x14a   : >> { %v1112_v35 = vsel %vm818_vm2, %v1093_v25, %v1095_v33  ;;  %v1113_v43 = vsel %vm818_vm2, %v1095_v33, %v1097_v32 }
 0x14b   : >> { %1606 = vrot.lane.b32.xlu1 %v3939_v30, %s3763_s24  ;;  %3433 = vmatprep.subr.msk.bf16.mxu1 %vm371_vm0, %v1113_v43  ;;  %v1136_v46 = vsel %vm371_vm0, %v1112_v35, 0 }
 0x14c   : >> { %1604 = vrot.lane.b32.xlu0 %v3949_v34, %s3763_s24  ;;  %1189 = vmatpush1.bf16.msra.mxu1 %v1136_v46 }
 0x14d   : >> { %v1234_v49 = vpop.permute.xlu1 %1233  ;;  %3432 = vmatmul.mubr.msk.bf16.vlgmr.msra.gmra.mrb[0].mxu0 %vm367_vm1, %v3410_v48  ;;  %v1232_v51 = vpop.permute.xlu0 %1231 }
 0x14e   : >> { %1345 = vmatprep.mubr.bf16.mxu0 %v3760_v3  ;;  %v1271_v54 = vsel %vm1269_vm3, %v1232_v51, %v1234_v49 }
 0x14f   : >> { %1610 = vrot.lane.b32.xlu1 %v3957_v36, %s3763_s24  ;;  %1313 = vmatprep.subr.bf16.mxu0 %v1271_v54 }
 0x150   : >> { %1608 = vrot.lane.b32.xlu0 %v3973_v40, %s3763_s24  ;;  %3434 = vmatmul.mubr.msk.bf16.vlgmr.msra.gmra.mrb[0].mxu1 %vm367_vm1, %v3410_v48 }
 0x151   : >> { %v1238_v56 = vpop.permute.xlu1 %1237  ;;  %v1236_v57 = vpop.permute.xlu0 %1235  ;;  %1386 = vmatprep.mubr.bf16.mxu1 %v3760_v3 }
 0x152   : >> { %v1273_v58 = vsel %vm1269_vm3, %v1236_v57, %v1238_v56  ;;  %v1272_v59 = vsel %vm1269_vm3, %v1234_v49, %v1236_v57 }
 0x153   : >> { %1748 = vrot.lane.b32.xlu1 %v3977_v41, %s3763_s24  ;;  %1354 = vmatprep.subr.bf16.mxu1 %v1273_v58 }
 0x154   : >> { %1746 = vrot.lane.b32.xlu0 %v3942_v31, %s3763_s24  ;;  %1355 = vmatpush1.bf16.msra.mxu1 %v1272_v59 }
 0x155   : >> { %v1242_v60 = vpop.permute.xlu1 %1241  ;;  %v1230_v63 = vpop.permute.xlu0 %1229 }
 0x156   : >> { %v1270_v1 = vsel %vm1269_vm3, %v1230_v63, %v1232_v51 }
 0x157   : >> { %1752 = vrot.lane.b32.xlu1 %v4013_v52, %s3763_s24  ;;  %1314 = vmatpush1.bf16.msra.mxu0 %v1270_v1 }
 0x158   : >> { %1750 = vrot.lane.b32.xlu0 %v3965_v38, %s3763_s24 }
 0x159   : >> { %v1246_v24 = vpop.permute.xlu1 %1245  ;;  %v1244_v25 = vpop.permute.xlu0 %1243 }
 0x15a   : >> { %v1275_v26 = vsel %vm1269_vm3, %v1242_v60, %v1244_v25  ;;  %v1276_v33 = vsel %vm1269_vm3, %v1244_v25, %v1246_v24 }
 0x15b   : >> { %1756 = vrot.lane.b32.xlu1 %v3968_v39, %s3763_s24  ;;  %1315 = vmatprep.subr.bf16.mxu0 %v1275_v26 }
 0x15c   : >> { %1744 = vrot.lane.b32.xlu0 %v3960_v37, %s3763_s24 }
 0x15d   : >> { %v1240_v27 = vpop.permute.xlu1 %1239  ;;  %v1248_v29 = vpop.permute.xlu0 %1247 }
 0x15e   : >> { %v1274_v28 = vsel %vm1269_vm3, %v1240_v27, %v1242_v60  ;;  %v1277_v32 = vsel %vm1269_vm3, %v1246_v24, %v1248_v29 }
 0x15f   : >> { %1760 = vrot.lane.b32.xlu1 %v3990_v44, %s3763_s24  ;;  %1316 = vmatpush1.bf16.msra.mxu0 %v1274_v28 }
 0x160   : >> { %1758 = vrot.lane.b32.xlu0 %v4001_v47, %s3763_s24  ;;  %1356 = vmatprep.subr.bf16.mxu1 %v1277_v32  ;;  %v3435_v32 = vld [vmem:[%s4995_s1 + $0x8] sm:$0x3] }
 0x161   : >> { %1357 = vmatpush1.bf16.msra.mxu1 %v1276_v33  ;;  %v1254_v35 = vpop.permute.xlu1 %1253  ;;  %v1252_v43 = vpop.permute.xlu0 %1251 }
 0x162   : >> { %v1279_v46 = vsel %vm1269_vm3, %v1252_v43, %v1254_v35 }
 0x163   : >> { %1754 = vrot.lane.b32.xlu1 %v3982_v42, %s3763_s24  ;;  %1317 = vmatprep.subr.bf16.mxu0 %v1279_v46 }
 0x164   : >> { %1762 = vrot.lane.b32.xlu0 %v4051_v61, %s3763_s24 }
 0x165   : >> { %v1258_v48 = vpop.permute.xlu1 %1257  ;;  %v1256_v49 = vpop.permute.xlu0 %1255 }
 0x166   : >> { %v1281_v51 = vsel %vm1269_vm3, %v1256_v49, %v1258_v48  ;;  %v1280_v54 = vsel %vm1269_vm3, %v1254_v35, %v1256_v49 }
 0x167   : >> { %1768 = vrot.lane.b32.xlu1 %v4024_v55, %s3763_s24  ;;  %1358 = vmatprep.subr.bf16.mxu1 %v1281_v51 }
 0x168   : >> { %1766 = vrot.lane.b32.xlu0 %v3993_v45, %s3763_s24  ;;  %1359 = vmatpush1.bf16.msra.mxu1 %v1280_v54 }
 0x169   : >> { %v1260_v56 = vpop.permute.xlu1 %1259  ;;  %v1250_v57 = vpop.permute.xlu0 %1249 }
 0x16a   : >> { %v1278_v58 = vsel %vm1269_vm3, %v1250_v57, %v1252_v43 }
 0x16b   : >> { %1772 = vrot.lane.b32.xlu1 %v4061_v62, %s3763_s24  ;;  %1318 = vmatpush1.bf16.msra.mxu0 %v1278_v58 }
 0x16c   : >> { %1770 = vrot.lane.b32.xlu0 %v4016_v53, %s3763_s24 }
 0x16d   : >> { %v1264_v59 = vpop.permute.xlu1 %1263  ;;  %v1262_v60 = vpop.permute.xlu0 %1261 }
 0x16e   : >> { %v1282_v63 = vsel %vm1269_vm3, %v1260_v56, %v1262_v60  ;;  %v1283_v1 = vsel %vm1269_vm3, %v1262_v60, %v1264_v59 }
 0x16f   : >> { %1774 = vrot.lane.b32.xlu1 %v4068_v0, %s3763_s24  ;;  %3436 = vmatprep.subr.msk.bf16.mxu0 %vm371_vm0, %v1283_v1  ;;  %v1302_v24 = vsel %vm371_vm0, %v1282_v63, 0 }
 0x170   : >> { %1764 = vrot.lane.b32.xlu0 %v4006_v50, %s3763_s24  ;;  %1320 = vmatpush1.bf16.msra.mxu0 %v1302_v24 }
 0x171   : >> { %v1268_v25 = vpop.permute.xlu1 %1267  ;;  %v1266_v26 = vpop.permute.xlu0 %1265 }
 0x172   : >> { %v1284_v27 = vsel %vm1269_vm3, %v1264_v59, %v1266_v26  ;;  %v1285_v28 = vsel %vm1269_vm3, %v1266_v26, %v1268_v25 }
 0x173   : >> { %1778 = vrot.lane.b32.xlu1 %v4075_v18, %s3763_s24  ;;  %3438 = vmatprep.subr.msk.bf16.mxu1 %vm371_vm0, %v1285_v28  ;;  %v1308_v29 = vsel %vm371_vm0, %v1284_v27, 0 }
 0x174   : >> { %1776 = vrot.lane.b32.xlu0 %v4079_v19, %s3763_s24  ;;  %1361 = vmatpush1.bf16.msra.mxu1 %v1308_v29 }
 0x175   : >> { %v1406_v33 = vpop.permute.xlu1 %1405  ;;  %3437 = vmatmul.mubr.msk.bf16.vlgmr.msra.gmra.mrb[0].mxu0 %vm367_vm1, %v3435_v32  ;;  %v1404_v35 = vpop.permute.xlu0 %1403 }
 0x176   : >> { %1516 = vmatprep.mubr.bf16.mxu0 %v3760_v3  ;;  %v1442_v43 = vsel %vm1269_vm3, %v1404_v35, %v1406_v33 }
 0x177   : >> { %1782 = vrot.lane.b32.xlu1 %v4084_v22, %s3763_s24  ;;  %1484 = vmatprep.subr.bf16.mxu0 %v1442_v43 }
 0x178   : >> { %1780 = vrot.lane.b32.xlu0 %v4088_v23, %s3763_s24  ;;  %3439 = vmatmul.mubr.msk.bf16.vlgmr.msra.gmra.mrb[0].mxu1 %vm367_vm1, %v3435_v32 }
 0x179   : >> { %v1410_v46 = vpop.permute.xlu1 %1409  ;;  %v1408_v48 = vpop.permute.xlu0 %1407  ;;  %1557 = vmatprep.mubr.bf16.mxu1 %v3760_v3 }
 0x17a   : >> { %v1444_v49 = vsel %vm1269_vm3, %v1408_v48, %v1410_v46  ;;  %v1443_v51 = vsel %vm1269_vm3, %v1406_v33, %v1408_v48 }
 0x17b   : >> { %1919 = vrot.lane.b32.xlu1 %v3845_v4, %s3764_s6  ;;  %1525 = vmatprep.subr.bf16.mxu1 %v1444_v49 }
 0x17c   : >> { %1917 = vrot.lane.b32.xlu0 %v3856_v7, %s3764_s6  ;;  %1526 = vmatpush1.bf16.msra.mxu1 %v1443_v51 }
 0x17d   : >> { %v1414_v54 = vpop.permute.xlu1 %1413  ;;  %v1402_v56 = vpop.permute.xlu0 %1401 }
 0x17e   : >> { %v1441_v57 = vsel %vm1269_vm3, %v1402_v56, %v1404_v35  ;;  %v3440_v35 = vld [vmem:[%s4995_s1 + $0xa] sm:$0x3] }
 0x17f   : >> { %1923 = vrot.lane.b32.xlu1 %v3873_v10, %s3764_s6  ;;  %1485 = vmatpush1.bf16.msra.mxu0 %v1441_v57 }
 0x180   : >> { %1921 = vrot.lane.b32.xlu0 %v3853_v6, %s3764_s6 }
 0x181   : >> { %v1418_v4 = vpop.permute.xlu1 %1417  ;;  %v1416_v58 = vpop.permute.xlu0 %1415 }
 0x182   : >> { %v1446_v7 = vsel %vm1269_vm3, %v1414_v54, %v1416_v58 }
 0x183   : >> { %1927 = vrot.lane.b32.xlu1 %v3866_v9, %s3764_s6  ;;  %1486 = vmatprep.subr.bf16.mxu0 %v1446_v7  ;;  %v1447_v9 = vsel %vm1269_vm3, %v1416_v58, %v1418_v4 }
 0x184   : >> { %1915 = vrot.lane.b32.xlu0 %v3848_v5, %s3764_s6 }
 0x185   : >> { %v1412_v59 = vpop.permute.xlu1 %1411  ;;  %v1420_v63 = vpop.permute.xlu0 %1419 }
 0x186   : >> { %v1445_v60 = vsel %vm1269_vm3, %v1412_v59, %v1414_v54  ;;  %v1448_v6 = vsel %vm1269_vm3, %v1418_v4, %v1420_v63 }
 0x187   : >> { %1931 = vrot.lane.b32.xlu1 %v3878_v11, %s3764_s6  ;;  %1487 = vmatpush1.bf16.msra.mxu0 %v1445_v60 }
 0x188   : >> { %1929 = vrot.lane.b32.xlu0 %v3885_v13, %s3764_s6  ;;  %1527 = vmatprep.subr.bf16.mxu1 %v1448_v6 }
 0x189   : >> { %1528 = vmatpush1.bf16.msra.mxu1 %v1447_v9  ;;  %v1426_v10 = vpop.permute.xlu1 %1425  ;;  %v1424_v5 = vpop.permute.xlu0 %1423 }
 0x18a   : >> { %v1450_v1 = vsel %vm1269_vm3, %v1424_v5, %v1426_v10 }
 0x18b   : >> { %1925 = vrot.lane.b32.xlu1 %v3863_v8, %s3764_s6  ;;  %1488 = vmatprep.subr.bf16.mxu0 %v1450_v1 }
 0x18c   : >> { %1933 = vrot.lane.b32.xlu0 %v3909_v17, %s3764_s6 }
 0x18d   : >> { %v1430_v11 = vpop.permute.xlu1 %1429  ;;  %v1428_v24 = vpop.permute.xlu0 %1427 }
 0x18e   : >> { %v1452_v13 = vsel %vm1269_vm3, %v1428_v24, %v1430_v11  ;;  %v1451_v25 = vsel %vm1269_vm3, %v1426_v10, %v1428_v24 }
 0x18f   : >> { %1939 = vrot.lane.b32.xlu1 %v3903_v16, %s3764_s6  ;;  %1529 = vmatprep.subr.bf16.mxu1 %v1452_v13 }
 0x190   : >> { %1937 = vrot.lane.b32.xlu0 %v3882_v12, %s3764_s6  ;;  %1530 = vmatpush1.bf16.msra.mxu1 %v1451_v25  ;;  %v3445_v25 = vld [vmem:[%s4995_s1 + $0xc] sm:$0x3] }
 0x191   : >> { %v1432_v8 = vpop.permute.xlu1 %1431  ;;  %v1422_v26 = vpop.permute.xlu0 %1421 }
 0x192   : >> { %v1449_v27 = vsel %vm1269_vm3, %v1422_v26, %v1424_v5 }
 0x193   : >> { %1943 = vrot.lane.b32.xlu1 %v3929_v21, %s3764_s6  ;;  %1489 = vmatpush1.bf16.msra.mxu0 %v1449_v27 }
 0x194   : >> { %1941 = vrot.lane.b32.xlu0 %v3892_v14, %s3764_s6 }
 0x195   : >> { %v1436_v16 = vpop.permute.xlu1 %1435  ;;  %v1434_v17 = vpop.permute.xlu0 %1433 }
 0x196   : >> { %v1453_v28 = vsel %vm1269_vm3, %v1432_v8, %v1434_v17  ;;  %v1454_v12 = vsel %vm1269_vm3, %v1434_v17, %v1436_v16 }
 0x197   : >> { %1945 = vrot.lane.b32.xlu1 %v3926_v20, %s3764_s6  ;;  %3441 = vmatprep.subr.msk.bf16.mxu0 %vm371_vm0, %v1454_v12  ;;  %v1473_v21 = vsel %vm371_vm0, %v1453_v28, 0  ;;  %v4471_v28 = vld [vmem:[%s3842_s14 + $0x8] ss:$20 sps:$4 sm:$0xff]  }
 0x198   : >> { %1935 = vrot.lane.b32.xlu0 %v3898_v15, %s3764_s6  ;;  %1491 = vmatpush1.bf16.msra.mxu0 %v1473_v21  ;;  %v4478_v21 = vld [vmem:[%s3842_s14 + $0x4] ss:$20 sps:$4 sm:$0xff]  }
 0x199   : >> { %v1440_v29 = vpop.permute.xlu1 %1439  ;;  %v1438_v14 = vpop.permute.xlu0 %1437 }
 0x19a   : >> { %v1455_v32 = vsel %vm1269_vm3, %v1436_v16, %v1438_v14  ;;  %v1456_v33 = vsel %vm1269_vm3, %v1438_v14, %v1440_v29 }
 0x19b   : >> { %1949 = vrot.lane.b32.xlu1 %v3939_v30, %s3764_s6  ;;  %3443 = vmatprep.subr.msk.bf16.mxu1 %vm371_vm0, %v1456_v33  ;;  %v1479_v15 = vsel %vm371_vm0, %v1455_v32, 0  ;;  %v4484_v33 = vld [vmem:[%s3842_s14 + $0x10] ss:$20 sps:$4 sm:$0xff]  }
 0x19c   : >> { %1947 = vrot.lane.b32.xlu0 %v3949_v34, %s3764_s6  ;;  %1532 = vmatpush1.bf16.msra.mxu1 %v1479_v15  ;;  %v4489_v15 = vld [vmem:[%s3842_s14 + $0xc] ss:$20 sps:$4 sm:$0xff]  }
 0x19d   : >> { %v1577_v43 = vpop.permute.xlu1 %1576  ;;  %3442 = vmatmul.mubr.msk.bf16.vlgmr.msra.gmra.mrb[0].mxu0 %vm367_vm1, %v3440_v35  ;;  %v1575_v46 = vpop.permute.xlu0 %1574 }
 0x19e   : >> { %1688 = vmatprep.mubr.bf16.mxu0 %v3760_v3  ;;  %v1614_v48 = vsel %vm1612_vm4, %v1575_v46, %v1577_v43 }
 0x19f   : >> { %1953 = vrot.lane.b32.xlu1 %v3957_v36, %s3764_s6  ;;  %1656 = vmatprep.subr.bf16.mxu0 %v1614_v48 }
 0x1a0   : >> { %1951 = vrot.lane.b32.xlu0 %v3973_v40, %s3764_s6  ;;  %3444 = vmatmul.mubr.msk.bf16.vlgmr.msra.gmra.mrb[0].mxu1 %vm367_vm1, %v3440_v35 }
 0x1a1   : >> { %v1581_v49 = vpop.permute.xlu1 %1580  ;;  %v1579_v51 = vpop.permute.xlu0 %1578  ;;  %1729 = vmatprep.mubr.bf16.mxu1 %v3760_v3 }
 0x1a2   : >> { %v1616_v54 = vsel %vm1612_vm4, %v1579_v51, %v1581_v49  ;;  %v1615_v56 = vsel %vm1612_vm4, %v1577_v43, %v1579_v51  ;;  %v4500_v49 = vld [vmem:[%s3842_s14] ss:$20 sps:$4 sm:$0xff]  }
 0x1a3   : >> { %2091 = vrot.lane.b32.xlu1 %v3977_v41, %s3764_s6  ;;  %1697 = vmatprep.subr.bf16.mxu1 %v1616_v54 }
 0x1a4   : >> { %2089 = vrot.lane.b32.xlu0 %v3942_v31, %s3764_s6  ;;  %1698 = vmatpush1.bf16.msra.mxu1 %v1615_v56 }
 0x1a5   : >> { %v1585_v36 = vpop.permute.xlu1 %1584  ;;  %v1573_v57 = vpop.permute.xlu0 %1572 }
 0x1a6   : >> { %v1613_v4 = vsel %vm1612_vm4, %v1573_v57, %v1575_v46  ;;  %v4494_v46 = vld [vmem:[%s3842_s14 + $0x2c] ss:$20 sps:$4 sm:$0xff]  }
 0x1a7   : >> { %2095 = vrot.lane.b32.xlu1 %v4013_v52, %s3764_s6  ;;  %1657 = vmatpush1.bf16.msra.mxu0 %v1613_v4  ;;  %v4512_v4 = vld [vmem:[%s3842_s14 + $0x30] ss:$20 sps:$4 sm:$0xff]  }
 0x1a8   : >> { %2093 = vrot.lane.b32.xlu0 %v3965_v38, %s3764_s6 }
 0x1a9   : >> { %v1589_v41 = vpop.permute.xlu1 %1588 }
 0x1aa   : >> { %v1587_v58 = vpop.permute.xlu0 %1586 }
 0x1ab   : >> { %2099 = vrot.lane.b32.xlu1 %v3968_v39, %s3764_s6  ;;  %v1618_v31 = vsel %vm1612_vm4, %v1585_v36, %v1587_v58  ;;  %v1619_v39 = vsel %vm1612_vm4, %v1587_v58, %v1589_v41 }
 0x1ac   : >> { %2087 = vrot.lane.b32.xlu0 %v3960_v37, %s3764_s6  ;;  %1658 = vmatprep.subr.bf16.mxu0 %v1618_v31 }
 0x1ad   : >> { %v1583_v7 = vpop.permute.xlu1 %1582 }
 0x1ae   : >> { %v1617_v59 = vsel %vm1612_vm4, %v1583_v7, %v1585_v36  ;;  %v1591_v60 = vpop.permute.xlu0 %1590  ;;  %v4506_v36 = vld [vmem:[%s3842_s14 + $0x34] ss:$20 sps:$4 sm:$0xff]  }
 0x1af   : >> { %2103 = vrot.lane.b32.xlu1 %v3990_v44, %s3764_s6  ;;  %1659 = vmatpush1.bf16.msra.mxu0 %v1617_v59  ;;  %v1620_v38 = vsel %vm1612_vm4, %v1589_v41, %v1591_v60  ;;  %v4518_v7 = vld [vmem:[%s3842_s14 + $0x28] ss:$20 sps:$4 sm:$0xff]   ;;  %v4524_v60 = vld [vmem:[%s3842_s14 + $0x38] ss:$20 sps:$4 sm:$0xff]  }
 0x1b0   : >> { %2101 = vrot.lane.b32.xlu0 %v4001_v47, %s3764_s6  ;;  %1699 = vmatprep.subr.bf16.mxu1 %v1620_v38 }
 0x1b1   : >> { %1700 = vmatpush1.bf16.msra.mxu1 %v1619_v39  ;;  %v1597_v52 = vpop.permute.xlu1 %1596 }
 0x1b2   : >> { %v1595_v37 = vpop.permute.xlu0 %1594 }
 0x1b3   : >> { %2097 = vrot.lane.b32.xlu1 %v3982_v42, %s3764_s6  ;;  %v1622_v63 = vsel %vm1612_vm4, %v1595_v37, %v1597_v52 }
 0x1b4   : >> { %2105 = vrot.lane.b32.xlu0 %v4051_v61, %s3764_s6  ;;  %1660 = vmatprep.subr.bf16.mxu0 %v1622_v63 }
 0x1b5   : >> { %v1601_v44 = vpop.permute.xlu1 %1600 }
 0x1b6   : >> { %v1599_v6 = vpop.permute.xlu0 %1598 }
 0x1b7   : >> { %2111 = vrot.lane.b32.xlu1 %v4024_v55, %s3764_s6  ;;  %v1624_v47 = vsel %vm1612_vm4, %v1599_v6, %v1601_v44  ;;  %v1623_v9 = vsel %vm1612_vm4, %v1597_v52, %v1599_v6  ;;  %v4529_v52 = vld [vmem:[%s3842_s14 + $0x58] ss:$20 sps:$4 sm:$0xff]   ;;  %v4536_v44 = vld [vmem:[%s3842_s14 + $0x54] ss:$20 sps:$4 sm:$0xff]  }
 0x1b8   : >> { %2109 = vrot.lane.b32.xlu0 %v3993_v45, %s3764_s6  ;;  %1701 = vmatprep.subr.bf16.mxu1 %v1624_v47 }
 0x1b9   : >> { %1702 = vmatpush1.bf16.msra.mxu1 %v1623_v9  ;;  %v1603_v42 = vpop.permute.xlu1 %1602 }
 0x1ba   : >> { %v1593_v10 = vpop.permute.xlu0 %1592 }
 0x1bb   : >> { %v1621_v5 = vsel %vm1612_vm4, %v1593_v10, %v1595_v37  ;;  %2115 = vrot.lane.b32.xlu1 %v4061_v62, %s3764_s6  ;;  %v4547_v10 = vld [vmem:[%s3842_s14 + $0x5c] ss:$20 sps:$4 sm:$0xff]  }
 0x1bc   : >> { %2113 = vrot.lane.b32.xlu0 %v4016_v53, %s3764_s6  ;;  %1661 = vmatpush1.bf16.msra.mxu0 %v1621_v5 }
 0x1bd   : >> { %v1607_v55 = vpop.permute.xlu1 %1606 }
 0x1be   : >> { %v1605_v61 = vpop.permute.xlu0 %1604 }
 0x1bf   : >> { %v1625_v1 = vsel %vm1612_vm4, %v1603_v42, %v1605_v61  ;;  %2117 = vrot.lane.b32.xlu1 %v4068_v0, %s3764_s6  ;;  %v1626_v45 = vsel %vm1612_vm4, %v1605_v61, %v1607_v55  ;;  %v4542_v42 = vld [vmem:[%s3842_s14 + $0x60] ss:$20 sps:$4 sm:$0xff]  }
 0x1c0   : >> { %2107 = vrot.lane.b32.xlu0 %v4006_v50, %s3764_s6  ;;  %3446 = vmatprep.subr.msk.bf16.mxu0 %vm371_vm0, %v1626_v45  ;;  %v1645_v62 = vsel %vm371_vm0, %v1625_v1, 0  ;;  %v4556_v45 = vld [vmem:[%s3842_s14 + $0x50] ss:$20 sps:$4 sm:$0xff]  }
 0x1c1   : >> { %1663 = vmatpush1.bf16.msra.mxu0 %v1645_v62  ;;  %v1611_v11 = vpop.permute.xlu1 %1610 }
 0x1c2   : >> { %v1609_v53 = vpop.permute.xlu0 %1608 }
 0x1c3   : >> { %v1627_v24 = vsel %vm1612_vm4, %v1607_v55, %v1609_v53  ;;  %2121 = vrot.lane.b32.xlu1 %v4075_v18, %s3764_s6  ;;  %v1628_v13 = vsel %vm1612_vm4, %v1609_v53, %v1611_v11 }
 0x1c4   : >> { %2119 = vrot.lane.b32.xlu0 %v4079_v19, %s3764_s6  ;;  %3448 = vmatprep.subr.msk.bf16.mxu1 %vm371_vm0, %v1628_v13  ;;  %v1651_v50 = vsel %vm371_vm0, %v1627_v24, 0 }
 0x1c5   : >> { %1704 = vmatpush1.bf16.msra.mxu1 %v1651_v50  ;;  %v1749_v8 = vpop.permute.xlu1 %1748  ;;  %3447 = vmatmul.mubr.msk.bf16.vlgmr.msra.gmra.mrb[0].mxu0 %vm367_vm1, %v3445_v25 }
 0x1c6   : >> { %v1747_v26 = vpop.permute.xlu0 %1746  ;;  %1859 = vmatprep.mubr.bf16.mxu0 %v3760_v3 }
 0x1c7   : >> { %2125 = vrot.lane.b32.xlu1 %v4084_v22, %s3764_s6  ;;  %v1785_v27 = vsel %vm1612_vm4, %v1747_v26, %v1749_v8 }
 0x1c8   : >> { %2123 = vrot.lane.b32.xlu0 %v4088_v23, %s3764_s6  ;;  %1827 = vmatprep.subr.bf16.mxu0 %v1785_v27  ;;  %v4576_v27 = vld [vmem:[%s3842_s14 + $0x88] ss:$20 sps:$4 sm:$0x3f]  }
 0x1c9   : >> { %v1753_v16 = vpop.permute.xlu1 %1752  ;;  %3449 = vmatmul.mubr.msk.bf16.vlgmr.msra.gmra.mrb[0].mxu1 %vm367_vm1, %v3445_v25  ;;  %v3450_v25 = vld [vmem:[%s4995_s1 + $0xe] sm:$0x3] }
 0x1ca   : >> { %v1751_v17 = vpop.permute.xlu0 %1750  ;;  %1900 = vmatprep.mubr.bf16.mxu1 %v3760_v3 }
 0x1cb   : >> { %2262 = vrot.lane.b32.xlu1 %v4471_v28, %s3765_s15  ;;  %v1787_v22 = vsel %vm1612_vm4, %v1751_v17, %v1753_v16  ;;  %v1786_v12 = vsel %vm1612_vm4, %v1749_v8, %v1751_v17 }
 0x1cc   : >> { %2260 = vrot.lane.b32.xlu0 %v4478_v21, %s3765_s15  ;;  %1868 = vmatprep.subr.bf16.mxu1 %v1787_v22 }
 0x1cd   : >> { %1869 = vmatpush1.bf16.msra.mxu1 %v1786_v12  ;;  %v1757_v29 = vpop.permute.xlu1 %1756  ;;  %v4586_v12 = vld [vmem:[%s3842_s14 + $0xa8] ss:$20 sps:$4 sm:$0xff]  }
 0x1ce   : >> { %v1745_v14 = vpop.permute.xlu0 %1744 }
 0x1cf   : >> { %v1784_v32 = vsel %vm1612_vm4, %v1745_v14, %v1747_v26  ;;  %2266 = vrot.lane.b32.xlu1 %v4484_v33, %s3765_s15 }
 0x1d0   : >> { %2264 = vrot.lane.b32.xlu0 %v4489_v15, %s3765_s15  ;;  %1828 = vmatpush1.bf16.msra.mxu0 %v1784_v32  ;;  %v4593_v32 = vld [vmem:[%s3842_s14 + $0xa4] ss:$20 sps:$4 sm:$0xff]  }
 0x1d1   : >> { %v1761_v35 = vpop.permute.xlu1 %1760 }
 0x1d2   : >> { %v1759_v43 = vpop.permute.xlu0 %1758 }
 0x1d3   : >> { %2270 = vrot.lane.b32.xlu1 %v4494_v46, %s3765_s15  ;;  %v1789_v48 = vsel %vm1612_vm4, %v1757_v29, %v1759_v43  ;;  %v1790_v41 = vsel %vm1612_vm4, %v1759_v43, %v1761_v35 }
 0x1d4   : >> { %2258 = vrot.lane.b32.xlu0 %v4500_v49, %s3765_s15  ;;  %1829 = vmatprep.subr.bf16.mxu0 %v1789_v48 }
 0x1d5   : >> { %v1755_v51 = vpop.permute.xlu1 %1754 }
 0x1d6   : >> { %v1788_v54 = vsel %vm1612_vm4, %v1755_v51, %v1757_v29  ;;  %v1763_v56 = vpop.permute.xlu0 %1762  ;;  %v4599_v51 = vld [vmem:[%s3842_s14 + $0xb0] ss:$20 sps:$4 sm:$0xff]  }
 0x1d7   : >> { %2274 = vrot.lane.b32.xlu1 %v4506_v36, %s3765_s15  ;;  %1830 = vmatpush1.bf16.msra.mxu0 %v1788_v54  ;;  %v1791_v57 = vsel %vm1612_vm4, %v1761_v35, %v1763_v56  ;;  %v4604_v54 = vld [vmem:[%s3842_s14 + $0xac] ss:$20 sps:$4 sm:$0xff]  }
 0x1d8   : >> { %2272 = vrot.lane.b32.xlu0 %v4512_v4, %s3765_s15  ;;  %1870 = vmatprep.subr.bf16.mxu1 %v1791_v57 }
 0x1d9   : >> { %1871 = vmatpush1.bf16.msra.mxu1 %v1790_v41  ;;  %v1769_v58 = vpop.permute.xlu1 %1768  ;;  %v4609_v41 = vld [vmem:[%s3842_s14 + $0xcc] ss:$20 sps:$4 sm:$0xff]  }
 0x1da   : >> { %v1767_v31 = vpop.permute.xlu0 %1766 }
 0x1db   : >> { %2268 = vrot.lane.b32.xlu1 %v4518_v7, %s3765_s15  ;;  %v1793_v59 = vsel %vm1612_vm4, %v1767_v31, %v1769_v58 }
 0x1dc   : >> { %2276 = vrot.lane.b32.xlu0 %v4524_v60, %s3765_s15  ;;  %1831 = vmatprep.subr.bf16.mxu0 %v1793_v59 }
 0x1dd   : >> { %v1773_v38 = vpop.permute.xlu1 %1772 }
 0x1de   : >> { %v1771_v39 = vpop.permute.xlu0 %1770 }
 0x1df   : >> { %2282 = vrot.lane.b32.xlu1 %v4529_v52, %s3765_s15  ;;  %v1795_v37 = vsel %vm1612_vm4, %v1771_v39, %v1773_v38  ;;  %v1794_v63 = vsel %vm1612_vm4, %v1769_v58, %v1771_v39 }
 0x1e0   : >> { %2280 = vrot.lane.b32.xlu0 %v4536_v44, %s3765_s15  ;;  %1872 = vmatprep.subr.bf16.mxu1 %v1795_v37  ;;  %v4621_v37 = vld [vmem:[%s3842_s14 + $0xd4] ss:$20 sps:$4 sm:$0xff]  }
 0x1e1   : >> { %1873 = vmatpush1.bf16.msra.mxu1 %v1794_v63  ;;  %v1775_v6 = vpop.permute.xlu1 %1774 }
 0x1e2   : >> { %v1765_v47 = vpop.permute.xlu0 %1764 }
 0x1e3   : >> { %v1792_v9 = vsel %vm1612_vm4, %v1765_v47, %v1767_v31  ;;  %2286 = vrot.lane.b32.xlu1 %v4542_v42, %s3765_s15  ;;  %v4615_v31 = vld [vmem:[%s3842_s14 + $0xa0] ss:$20 sps:$4 sm:$0xff]  }
 0x1e4   : >> { %2284 = vrot.lane.b32.xlu0 %v4547_v10, %s3765_s15  ;;  %1832 = vmatpush1.bf16.msra.mxu0 %v1792_v9 }
 0x1e5   : >> { %v1779_v5 = vpop.permute.xlu1 %1778 }
 0x1e6   : >> { %v1777_v55 = vpop.permute.xlu0 %1776 }
 0x1e7   : >> { %v1796_v61 = vsel %vm1612_vm4, %v1775_v6, %v1777_v55  ;;  %2288 = vrot.lane.b32.xlu1 %v3926_v20, %s3765_s15  ;;  %v1797_v1 = vsel %vm1612_vm4, %v1777_v55, %v1779_v5  ;;  %v4627_v6 = vld [vmem:[%s3842_s14 + $0xd0] ss:$20 sps:$4 sm:$0xff]   ;;  %v4633_v55 = vld [vmem:[%s3842_s14 + $0xc8] ss:$20 sps:$4 sm:$0xff]  }
 0x1e8   : >> { %2278 = vrot.lane.b32.xlu0 %v4556_v45, %s3765_s15  ;;  %3451 = vmatprep.subr.msk.bf16.mxu0 %vm371_vm0, %v1797_v1  ;;  %v1816_v62 = vsel %vm371_vm0, %v1796_v61, 0  ;;  %v4639_v1 = vld [vmem:[%s3842_s14 + $0xd8] ss:$20 sps:$4 sm:$0xff]  }
 0x1e9   : >> { %1834 = vmatpush1.bf16.msra.mxu0 %v1816_v62  ;;  %v1783_v11 = vpop.permute.xlu1 %1782 }
 0x1ea   : >> { %v1781_v53 = vpop.permute.xlu0 %1780 }
 0x1eb   : >> { %v1798_v24 = vsel %vm1612_vm4, %v1779_v5, %v1781_v53  ;;  %2292 = vrot.lane.b32.xlu1 %v3939_v30, %s3765_s15  ;;  %v1799_v13 = vsel %vm1612_vm4, %v1781_v53, %v1783_v11  ;;  %v4644_v53 = vld [vmem:[%s3842_s14 + $0xf8] ss:$20 sps:$4 sm:$0xff]  }
 0x1ec   : >> { %2290 = vrot.lane.b32.xlu0 %v3949_v34, %s3765_s15  ;;  %3453 = vmatprep.subr.msk.bf16.mxu1 %vm371_vm0, %v1799_v13  ;;  %v1822_v50 = vsel %vm371_vm0, %v1798_v24, 0 }
 0x1ed   : >> { %1875 = vmatpush1.bf16.msra.mxu1 %v1822_v50  ;;  %v1920_v8 = vpop.permute.xlu1 %1919  ;;  %3452 = vmatmul.mubr.msk.bf16.vlgmr.msra.gmra.mrb[0].mxu0 %vm367_vm1, %v3450_v25  ;;  %v4651_v50 = vld [vmem:[%s3842_s14 + $0xf4] ss:$20 sps:$4 sm:$0xff]  }
 0x1ee   : >> { %v1918_v26 = vpop.permute.xlu0 %1917  ;;  %2031 = vmatprep.mubr.bf16.mxu0 %v3760_v3 }
 0x1ef   : >> { %2296 = vrot.lane.b32.xlu1 %v4576_v27, %s3765_s15  ;;  %v1957_v16 = vsel %vm1955_vm5, %v1918_v26, %v1920_v8 }
 0x1f0   : >> { %2294 = vrot.lane.b32.xlu0 %v3973_v40, %s3765_s15  ;;  %1999 = vmatprep.subr.bf16.mxu0 %v1957_v16  ;;  %v4657_v16 = vld [vmem:[%s3842_s14 + $0x100] ss:$20 sps:$4 sm:$0xff]  }
 0x1f1   : >> { %v1924_v17 = vpop.permute.xlu1 %1923  ;;  %3454 = vmatmul.mubr.msk.bf16.vlgmr.msra.gmra.mrb[0].mxu1 %vm367_vm1, %v3450_v25 }
 0x1f2   : >> { %v1922_v22 = vpop.permute.xlu0 %1921  ;;  %2072 = vmatprep.mubr.bf16.mxu1 %v3760_v3 }
 0x1f3   : >> { %2434 = vrot.lane.b32.xlu1 %v4586_v12, %s3765_s15  ;;  %v1959_v29 = vsel %vm1955_vm5, %v1922_v22, %v1924_v17  ;;  %v1958_v14 = vsel %vm1955_vm5, %v1920_v8, %v1922_v22  ;;  %v4662_v17 = vld [vmem:[%s3842_s14 + $0xfc] ss:$20 sps:$4 sm:$0xff]  }
 0x1f4   : >> { %2432 = vrot.lane.b32.xlu0 %v4593_v32, %s3765_s15  ;;  %2040 = vmatprep.subr.bf16.mxu1 %v1959_v29 }
 0x1f5   : >> { %2041 = vmatpush1.bf16.msra.mxu1 %v1958_v14  ;;  %v1928_v35 = vpop.permute.xlu1 %1927 }
 0x1f6   : >> { %v1916_v43 = vpop.permute.xlu0 %1915 }
 0x1f7   : >> { %v1956_v48 = vsel %vm1955_vm5, %v1916_v43, %v1918_v26  ;;  %2438 = vrot.lane.b32.xlu1 %v4599_v51, %s3765_s15  ;;  %v4671_v43 = vld [vmem:[%s3842_s14 + $0xf0] ss:$20 sps:$4 sm:$0xff]  }
 0x1f8   : >> { %2436 = vrot.lane.b32.xlu0 %v4604_v54, %s3765_s15  ;;  %2000 = vmatpush1.bf16.msra.mxu0 %v1956_v48 }
 0x1f9   : >> { %v1932_v56 = vpop.permute.xlu1 %1931 }
 0x1fa   : >> { %v1930_v57 = vpop.permute.xlu0 %1929 }
 0x1fb   : >> { %2442 = vrot.lane.b32.xlu1 %v4609_v41, %s3765_s15  ;;  %v1961_v58 = vsel %vm1955_vm5, %v1928_v35, %v1930_v57  ;;  %v1962_v47 = vsel %vm1955_vm5, %v1930_v57, %v1932_v56 }
 0x1fc   : >> { %2430 = vrot.lane.b32.xlu0 %v4615_v31, %s3765_s15  ;;  %2001 = vmatprep.subr.bf16.mxu0 %v1961_v58 }
 0x1fd   : >> { %v1926_v59 = vpop.permute.xlu1 %1925 }
 0x1fe   : >> { %v1960_v38 = vsel %vm1955_vm5, %v1926_v59, %v1928_v35  ;;  %v1934_v39 = vpop.permute.xlu0 %1933 }
 0x1ff   : >> { %2446 = vrot.lane.b32.xlu1 %v4621_v37, %s3765_s15  ;;  %2002 = vmatpush1.bf16.msra.mxu0 %v1960_v38  ;;  %v1963_v63 = vsel %vm1955_vm5, %v1932_v56, %v1934_v39  ;;  %v3455_v39 = vld [vmem:[%s4995_s1 + $0x10] sm:$0x3] }
 0x200   : >> { %2444 = vrot.lane.b32.xlu0 %v4627_v6, %s3765_s15  ;;  %2042 = vmatprep.subr.bf16.mxu1 %v1963_v63 }
 0x201   : >> { %2043 = vmatpush1.bf16.msra.mxu1 %v1962_v47  ;;  %v1940_v9 = vpop.permute.xlu1 %1939 }
 0x202   : >> { %v1938_v5 = vpop.permute.xlu0 %1937 }
 0x203   : >> { %2440 = vrot.lane.b32.xlu1 %v4633_v55, %s3765_s15  ;;  %v1965_v61 = vsel %vm1955_vm5, %v1938_v5, %v1940_v9 }
 0x204   : >> { %2448 = vrot.lane.b32.xlu0 %v4639_v1, %s3765_s15  ;;  %2003 = vmatprep.subr.bf16.mxu0 %v1965_v61 }
 0x205   : >> { %v1944_v62 = vpop.permute.xlu1 %1943 }
 0x206   : >> { %v1942_v11 = vpop.permute.xlu0 %1941 }
 0x207   : >> { %2454 = vrot.lane.b32.xlu1 %v4644_v53, %s3765_s15  ;;  %v1967_v24 = vsel %vm1955_vm5, %v1942_v11, %v1944_v62  ;;  %v1966_v13 = vsel %vm1955_vm5, %v1940_v9, %v1942_v11  ;;  %v4691_v9 = vld [vmem:[%s3842_s14 + $0x128] ss:$20 sps:$4 sm:$0x3f]  }
 0x208   : >> { %2452 = vrot.lane.b32.xlu0 %v4651_v50, %s3765_s15  ;;  %2044 = vmatprep.subr.bf16.mxu1 %v1967_v24 }
 0x209   : >> { %2045 = vmatpush1.bf16.msra.mxu1 %v1966_v13  ;;  %v1946_v25 = vpop.permute.xlu1 %1945 }
 0x20a   : >> { %v1936_v8 = vpop.permute.xlu0 %1935 }
 0x20b   : >> { %v1964_v26 = vsel %vm1955_vm5, %v1936_v8, %v1938_v5  ;;  %2458 = vrot.lane.b32.xlu1 %v4657_v16, %s3765_s15 }
 0x20c   : >> { %2456 = vrot.lane.b32.xlu0 %v4662_v17, %s3765_s15  ;;  %2004 = vmatpush1.bf16.msra.mxu0 %v1964_v26 }
 0x20d   : >> { %v1950_v22 = vpop.permute.xlu1 %1949 }
 0x20e   : >> { %v1948_v29 = vpop.permute.xlu0 %1947 }
 0x20f   : >> { %v1968_v14 = vsel %vm1955_vm5, %v1946_v25, %v1948_v29  ;;  %2460 = vrot.lane.b32.xlu1 %v4068_v0, %s3765_s15  ;;  %v1969_v35 = vsel %vm1955_vm5, %v1948_v29, %v1950_v22 }
 0x210   : >> { %2450 = vrot.lane.b32.xlu0 %v4671_v43, %s3765_s15  ;;  %3456 = vmatprep.subr.msk.bf16.mxu0 %vm371_vm0, %v1969_v35  ;;  %v1988_v48 = vsel %vm371_vm0, %v1968_v14, 0 }
 0x211   : >> { %2006 = vmatpush1.bf16.msra.mxu0 %v1988_v48  ;;  %v1954_v56 = vpop.permute.xlu1 %1953 }
 0x212   : >> { %v1952_v57 = vpop.permute.xlu0 %1951 }
 0x213   : >> { %v1970_v58 = vsel %vm1955_vm5, %v1950_v22, %v1952_v57  ;;  %2464 = vrot.lane.b32.xlu1 %v4075_v18, %s3765_s15  ;;  %v1971_v59 = vsel %vm1955_vm5, %v1952_v57, %v1954_v56 }
 0x214   : >> { %2462 = vrot.lane.b32.xlu0 %v4079_v19, %s3765_s15  ;;  %3458 = vmatprep.subr.msk.bf16.mxu1 %vm371_vm0, %v1971_v59  ;;  %v1994_v38 = vsel %vm371_vm0, %v1970_v58, 0 }
 0x215   : >> { %2047 = vmatpush1.bf16.msra.mxu1 %v1994_v38  ;;  %v2092_v63 = vpop.permute.xlu1 %2091  ;;  %3457 = vmatmul.mubr.msk.bf16.vlgmr.msra.gmra.mrb[0].mxu0 %vm367_vm1, %v3455_v39 }
 0x216   : >> { %v2090_v47 = vpop.permute.xlu0 %2089  ;;  %2202 = vmatprep.mubr.bf16.mxu0 %v3760_v3 }
 0x217   : >> { %2468 = vrot.lane.b32.xlu1 %v4691_v9, %s3765_s15  ;;  %v2128_v5 = vsel %vm1955_vm5, %v2090_v47, %v2092_v63 }
 0x218   : >> { %2466 = vrot.lane.b32.xlu0 %v4088_v23, %s3765_s15  ;;  %2170 = vmatprep.subr.bf16.mxu0 %v2128_v5  ;;  %s3501_s15 = sshll.u32 %s3757_s12, 4  ;;  %s270_s12 = sadd.s32 1, %s3757_s12  }
 0x219   : >> { %v2096_v61 = vpop.permute.xlu1 %2095  ;;  %3459 = vmatmul.mubr.msk.bf16.vlgmr.msra.gmra.mrb[0].mxu1 %vm367_vm1, %v3455_v39  ;;  %s3116_s16 = scalar_lea.vmem %s3819_s30, %s3501_s15  ;;  %s3134_s17 = scalar_lea.vmem %s3824_s8, %s3501_s15 }
 0x21a   : >> { %v2094_v62 = vpop.permute.xlu0 %2093  ;;  %2243 = vmatprep.mubr.bf16.mxu1 %v3760_v3  ;;  %p267_p4 = scmp.ge.s32.totalorder %s270_s12, 10  }
 0x21b   : >> { %2605 = vrot.lane.b32.xlu1 %v4471_v28, %s3766_s21  ;;  %v2130_v11 = vsel %vm1955_vm5, %v2094_v62, %v2096_v61  ;;  %v2129_v24 = vsel %vm1955_vm5, %v2092_v63, %v2094_v62 }
 0x21c   : >> { %2603 = vrot.lane.b32.xlu0 %v4478_v21, %s3766_s21  ;;  %2211 = vmatprep.subr.bf16.mxu1 %v2130_v11 }
 0x21d   : >> { %2212 = vmatpush1.bf16.msra.mxu1 %v2129_v24  ;;  %v2100_v13 = vpop.permute.xlu1 %2099 }
 0x21e   : >> { %v2088_v25 = vpop.permute.xlu0 %2087 }
 0x21f   : >> { %v2127_v8 = vsel %vm1955_vm5, %v2088_v25, %v2090_v47  ;;  %2609 = vrot.lane.b32.xlu1 %v4484_v33, %s3766_s21 }
 0x220   : >> { %2607 = vrot.lane.b32.xlu0 %v4489_v15, %s3766_s21  ;;  %2171 = vmatpush1.bf16.msra.mxu0 %v2127_v8 }
 0x221   : >> { %v2104_v26 = vpop.permute.xlu1 %2103 }
 0x222   : >> { %v2102_v22 = vpop.permute.xlu0 %2101 }
 0x223   : >> { %2613 = vrot.lane.b32.xlu1 %v4494_v46, %s3766_s21  ;;  %v2132_v29 = vsel %vm1955_vm5, %v2100_v13, %v2102_v22  ;;  %v2133_v57 = vsel %vm1955_vm5, %v2102_v22, %v2104_v26 }
 0x224   : >> { %2601 = vrot.lane.b32.xlu0 %v4500_v49, %s3766_s21  ;;  %2172 = vmatprep.subr.bf16.mxu0 %v2132_v29 }
 0x225   : >> { %v2098_v14 = vpop.permute.xlu1 %2097 }
 0x226   : >> { %v2131_v35 = vsel %vm1955_vm5, %v2098_v14, %v2100_v13  ;;  %v2106_v48 = vpop.permute.xlu0 %2105 }
 0x227   : >> { %2617 = vrot.lane.b32.xlu1 %v4506_v36, %s3766_s21  ;;  %2173 = vmatpush1.bf16.msra.mxu0 %v2131_v35  ;;  %v2134_v56 = vsel %vm1955_vm5, %v2104_v26, %v2106_v48 }
 0x228   : >> { %2615 = vrot.lane.b32.xlu0 %v4512_v4, %s3766_s21  ;;  %2213 = vmatprep.subr.bf16.mxu1 %v2134_v56  ;;  %v3460_v56 = vld [vmem:[%s4995_s1 + $0x12] sm:$0x3] }
 0x229   : >> { %2214 = vmatpush1.bf16.msra.mxu1 %v2133_v57  ;;  %v2112_v58 = vpop.permute.xlu1 %2111 }
 0x22a   : >> { %v2110_v59 = vpop.permute.xlu0 %2109 }
 0x22b   : >> { %2611 = vrot.lane.b32.xlu1 %v4518_v7, %s3766_s21  ;;  %v2136_v38 = vsel %vm1955_vm5, %v2110_v59, %v2112_v58 }
 0x22c   : >> { %2619 = vrot.lane.b32.xlu0 %v4524_v60, %s3766_s21  ;;  %2174 = vmatprep.subr.bf16.mxu0 %v2136_v38 }
 0x22d   : >> { %v2116_v39 = vpop.permute.xlu1 %2115 }
 0x22e   : >> { %v2114_v63 = vpop.permute.xlu0 %2113 }
 0x22f   : >> { %2625 = vrot.lane.b32.xlu1 %v4529_v52, %s3766_s21  ;;  %v2138_v47 = vsel %vm1955_vm5, %v2114_v63, %v2116_v39  ;;  %v2137_v5 = vsel %vm1955_vm5, %v2112_v58, %v2114_v63 }
 0x230   : >> { %2623 = vrot.lane.b32.xlu0 %v4536_v44, %s3766_s21  ;;  %2215 = vmatprep.subr.bf16.mxu1 %v2138_v47 }
 0x231   : >> { %2216 = vmatpush1.bf16.msra.mxu1 %v2137_v5  ;;  %v2118_v61 = vpop.permute.xlu1 %2117 }
 0x232   : >> { %v2108_v62 = vpop.permute.xlu0 %2107 }
 0x233   : >> { %v2135_v11 = vsel %vm1955_vm5, %v2108_v62, %v2110_v59  ;;  %2629 = vrot.lane.b32.xlu1 %v4542_v42, %s3766_s21 }
 0x234   : >> { %2627 = vrot.lane.b32.xlu0 %v4547_v10, %s3766_s21  ;;  %2175 = vmatpush1.bf16.msra.mxu0 %v2135_v11 }
 0x235   : >> { %v2122_v24 = vpop.permute.xlu1 %2121 }
 0x236   : >> { %v2120_v13 = vpop.permute.xlu0 %2119 }
 0x237   : >> { %v2139_v25 = vsel %vm1955_vm5, %v2118_v61, %v2120_v13  ;;  %2631 = vrot.lane.b32.xlu1 %v3926_v20, %s3766_s21  ;;  %v2140_v8 = vsel %vm1955_vm5, %v2120_v13, %v2122_v24 }
 0x238   : >> { %2621 = vrot.lane.b32.xlu0 %v4556_v45, %s3766_s21  ;;  %3461 = vmatprep.subr.msk.bf16.mxu0 %vm371_vm0, %v2140_v8  ;;  %v2159_v26 = vsel %vm371_vm0, %v2139_v25, 0 }
 0x239   : >> { %2177 = vmatpush1.bf16.msra.mxu0 %v2159_v26  ;;  %v2126_v22 = vpop.permute.xlu1 %2125 }
 0x23a   : >> { %v2124_v29 = vpop.permute.xlu0 %2123 }
 0x23b   : >> { %v2141_v14 = vsel %vm1955_vm5, %v2122_v24, %v2124_v29  ;;  %2635 = vrot.lane.b32.xlu1 %v3939_v30, %s3766_s21  ;;  %v2142_v35 = vsel %vm1955_vm5, %v2124_v29, %v2126_v22 }
 0x23c   : >> { %2633 = vrot.lane.b32.xlu0 %v3949_v34, %s3766_s21  ;;  %3463 = vmatprep.subr.msk.bf16.mxu1 %vm371_vm0, %v2142_v35  ;;  %v2165_v48 = vsel %vm371_vm0, %v2141_v14, 0 }
 0x23d   : >> { %2218 = vmatpush1.bf16.msra.mxu1 %v2165_v48  ;;  %v2263_v57 = vpop.permute.xlu1 %2262  ;;  %3462 = vmatmul.mubr.msk.bf16.vlgmr.msra.gmra.mrb[0].mxu0 %vm367_vm1, %v3460_v56 }
 0x23e   : >> { %v2261_v58 = vpop.permute.xlu0 %2260  ;;  %2374 = vmatprep.mubr.bf16.mxu0 %v3760_v3 }
 0x23f   : >> { %2639 = vrot.lane.b32.xlu1 %v4576_v27, %s3766_s21  ;;  %v2300_v59 = vsel %vm2298_vm6, %v2261_v58, %v2263_v57 }
 0x240   : >> { %2637 = vrot.lane.b32.xlu0 %v3973_v40, %s3766_s21  ;;  %2342 = vmatprep.subr.bf16.mxu0 %v2300_v59 }
 0x241   : >> { %v2267_v38 = vpop.permute.xlu1 %2266  ;;  %3464 = vmatmul.mubr.msk.bf16.vlgmr.msra.gmra.mrb[0].mxu1 %vm367_vm1, %v3460_v56 }
 0x242   : >> { %v2265_v39 = vpop.permute.xlu0 %2264  ;;  %2415 = vmatprep.mubr.bf16.mxu1 %v3760_v3 }
 0x243   : >> { %v2301_v63 = vsel %vm2298_vm6, %v2263_v57, %v2265_v39  ;;  %2777 = vrot.lane.b32.xlu1 %v4586_v12, %s3766_s21  ;;  %v2302_v47 = vsel %vm2298_vm6, %v2265_v39, %v2267_v38 }
 0x244   : >> { %2775 = vrot.lane.b32.xlu0 %v4593_v32, %s3766_s21  ;;  %2383 = vmatprep.subr.bf16.mxu1 %v2302_v47 }
 0x245   : >> { %2384 = vmatpush1.bf16.msra.mxu1 %v2301_v63  ;;  %v2271_v5 = vpop.permute.xlu1 %2270 }
 0x246   : >> { %v2259_v61 = vpop.permute.xlu0 %2258 }
 0x247   : >> { %v2299_v62 = vsel %vm2298_vm6, %v2259_v61, %v2261_v58  ;;  %2781 = vrot.lane.b32.xlu1 %v4599_v51, %s3766_s21 }
 0x248   : >> { %2779 = vrot.lane.b32.xlu0 %v4604_v54, %s3766_s21  ;;  %2343 = vmatpush1.bf16.msra.mxu0 %v2299_v62 }
 0x249   : >> { %v2275_v11 = vpop.permute.xlu1 %2274 }
 0x24a   : >> { %v2273_v12 = vpop.permute.xlu0 %2272 }
 0x24b   : >> { %2785 = vrot.lane.b32.xlu1 %v4609_v41, %s3766_s21  ;;  %v2304_v32 = vsel %vm2298_vm6, %v2271_v5, %v2273_v12  ;;  %v2305_v54 = vsel %vm2298_vm6, %v2273_v12, %v2275_v11 }
 0x24c   : >> { %2773 = vrot.lane.b32.xlu0 %v4615_v31, %s3766_s21  ;;  %2344 = vmatprep.subr.bf16.mxu0 %v2304_v32 }
 0x24d   : >> { %v2269_v24 = vpop.permute.xlu1 %2268 }
 0x24e   : >> { %v2303_v13 = vsel %vm2298_vm6, %v2269_v24, %v2271_v5  ;;  %v2277_v25 = vpop.permute.xlu0 %2276 }
 0x24f   : >> { %2789 = vrot.lane.b32.xlu1 %v4621_v37, %s3766_s21  ;;  %2345 = vmatpush1.bf16.msra.mxu0 %v2303_v13  ;;  %v2306_v51 = vsel %vm2298_vm6, %v2275_v11, %v2277_v25 }
 0x250   : >> { %2787 = vrot.lane.b32.xlu0 %v4627_v6, %s3766_s21  ;;  %2385 = vmatprep.subr.bf16.mxu1 %v2306_v51 }
 0x251   : >> { %2386 = vmatpush1.bf16.msra.mxu1 %v2305_v54  ;;  %v2283_v41 = vpop.permute.xlu1 %2282 }
 0x252   : >> { %v2281_v31 = vpop.permute.xlu0 %2280 }
 0x253   : >> { %2783 = vrot.lane.b32.xlu1 %v4633_v55, %s3766_s21  ;;  %v2308_v8 = vsel %vm2298_vm6, %v2281_v31, %v2283_v41 }
 0x254   : >> { %2791 = vrot.lane.b32.xlu0 %v4639_v1, %s3766_s21  ;;  %2346 = vmatprep.subr.bf16.mxu0 %v2308_v8 }
 0x255   : >> { %v2287_v37 = vpop.permute.xlu1 %2286 }
 0x256   : >> { %v2285_v26 = vpop.permute.xlu0 %2284 }
 0x257   : >> { %v2309_v22 = vsel %vm2298_vm6, %v2283_v41, %v2285_v26  ;;  %2797 = vrot.lane.b32.xlu1 %v4644_v53, %s3766_s21  ;;  %v2310_v6 = vsel %vm2298_vm6, %v2285_v26, %v2287_v37 }
 0x258   : >> { %2795 = vrot.lane.b32.xlu0 %v4651_v50, %s3766_s21  ;;  %2387 = vmatprep.subr.bf16.mxu1 %v2310_v6 }
 0x259   : >> { %2388 = vmatpush1.bf16.msra.mxu1 %v2309_v22  ;;  %v2289_v55 = vpop.permute.xlu1 %2288 }
 0x25a   : >> { %v2279_v29 = vpop.permute.xlu0 %2278 }
 0x25b   : >> { %v2307_v14 = vsel %vm2298_vm6, %v2279_v29, %v2281_v31  ;;  %2801 = vrot.lane.b32.xlu1 %v4657_v16, %s3766_s21 }
 0x25c   : >> { %2799 = vrot.lane.b32.xlu0 %v4662_v17, %s3766_s21  ;;  %2347 = vmatpush1.bf16.msra.mxu0 %v2307_v14 }
 0x25d   : >> { %v2293_v1 = vpop.permute.xlu1 %2292 }
 0x25e   : >> { %v2291_v53 = vpop.permute.xlu0 %2290 }
 0x25f   : >> { %v2311_v35 = vsel %vm2298_vm6, %v2289_v55, %v2291_v53  ;;  %v2312_v48 = vsel %vm2298_vm6, %v2291_v53, %v2293_v1  ;;  %2803 = vrot.lane.b32.xlu1 %v4068_v0, %s3766_s21  ;;  %v3465_v0 = vld [vmem:[%s4995_s1 + $0x14] sm:$0x3] }
 0x260   : >> { %v2331_v50 = vsel %vm371_vm0, %v2311_v35, 0  ;;  %2793 = vrot.lane.b32.xlu0 %v4671_v43, %s3766_s21  ;;  %3466 = vmatprep.subr.msk.bf16.mxu0 %vm371_vm0, %v2312_v48 }
 0x261   : >> { %2349 = vmatpush1.bf16.msra.mxu0 %v2331_v50  ;;  %v2297_v16 = vpop.permute.xlu1 %2296 }
 0x262   : >> { %v2295_v17 = vpop.permute.xlu0 %2294 }
 0x263   : >> { %v2313_v56 = vsel %vm2298_vm6, %v2293_v1, %v2295_v17  ;;  %v2314_v57 = vsel %vm2298_vm6, %v2295_v17, %v2297_v16  ;;  %2807 = vrot.lane.b32.xlu1 %v4075_v18, %s3766_s21 }
 0x264   : >> { %v2337_v58 = vsel %vm371_vm0, %v2313_v56, 0  ;;  %2805 = vrot.lane.b32.xlu0 %v4079_v19, %s3766_s21  ;;  %3468 = vmatprep.subr.msk.bf16.mxu1 %vm371_vm0, %v2314_v57 }
 0x265   : >> { %2390 = vmatpush1.bf16.msra.mxu1 %v2337_v58  ;;  %v2435_v43 = vpop.permute.xlu1 %2434  ;;  %3467 = vmatmul.mubr.msk.bf16.vlgmr.msra.gmra.mrb[0].mxu0 %vm367_vm1, %v3465_v0 }
 0x266   : >> { %v2433_v59 = vpop.permute.xlu0 %2432  ;;  %2545 = vmatprep.mubr.bf16.mxu0 %v3760_v3 }
 0x267   : >> { %2811 = vrot.lane.b32.xlu1 %v4691_v9, %s3766_s21  ;;  %v2471_v18 = vsel %vm2298_vm6, %v2433_v59, %v2435_v43 }
 0x268   : >> { %2809 = vrot.lane.b32.xlu0 %v4088_v23, %s3766_s21  ;;  %2513 = vmatprep.subr.bf16.mxu0 %v2471_v18 }
 0x269   : >> { %v2439_v19 = vpop.permute.xlu1 %2438  ;;  %3469 = vmatmul.mubr.msk.bf16.vlgmr.msra.gmra.mrb[0].mxu1 %vm367_vm1, %v3465_v0 }
 0x26a   : >> { %v2437_v38 = vpop.permute.xlu0 %2436  ;;  %2586 = vmatprep.mubr.bf16.mxu1 %v3760_v3 }
 0x26b   : >> { %v2472_v39 = vsel %vm2298_vm6, %v2435_v43, %v2437_v38  ;;  %2948 = vrot.lane.b32.xlu1 %v4471_v28, %s3767_s25  ;;  %v2473_v9 = vsel %vm2298_vm6, %v2437_v38, %v2439_v19 }
 0x26c   : >> { %2946 = vrot.lane.b32.xlu0 %v4478_v21, %s3767_s25  ;;  %2554 = vmatprep.subr.bf16.mxu1 %v2473_v9 }
 0x26d   : >> { %2555 = vmatpush1.bf16.msra.mxu1 %v2472_v39  ;;  %v2443_v23 = vpop.permute.xlu1 %2442 }
 0x26e   : >> { %v2431_v63 = vpop.permute.xlu0 %2430 }
 0x26f   : >> { %v2470_v47 = vsel %vm2298_vm6, %v2431_v63, %v2433_v59  ;;  %2952 = vrot.lane.b32.xlu1 %v4484_v33, %s3767_s25 }
 0x270   : >> { %2950 = vrot.lane.b32.xlu0 %v4489_v15, %s3767_s25  ;;  %2514 = vmatpush1.bf16.msra.mxu0 %v2470_v47 }
 0x271   : >> { %v2447_v5 = vpop.permute.xlu1 %2446 }
 0x272   : >> { %v2445_v28 = vpop.permute.xlu0 %2444 }
 0x273   : >> { %2956 = vrot.lane.b32.xlu1 %v4494_v46, %s3767_s25  ;;  %v2475_v21 = vsel %vm2298_vm6, %v2443_v23, %v2445_v28  ;;  %v2476_v15 = vsel %vm2298_vm6, %v2445_v28, %v2447_v5 }
 0x274   : >> { %2944 = vrot.lane.b32.xlu0 %v4500_v49, %s3767_s25  ;;  %2515 = vmatprep.subr.bf16.mxu0 %v2475_v21 }
 0x275   : >> { %v2441_v61 = vpop.permute.xlu1 %2440 }
 0x276   : >> { %v2474_v62 = vsel %vm2298_vm6, %v2441_v61, %v2443_v23  ;;  %v2449_v11 = vpop.permute.xlu0 %2448 }
 0x277   : >> { %2960 = vrot.lane.b32.xlu1 %v4506_v36, %s3767_s25  ;;  %2516 = vmatpush1.bf16.msra.mxu0 %v2474_v62  ;;  %v2477_v33 = vsel %vm2298_vm6, %v2447_v5, %v2449_v11  ;;  %v3475_v62 = vld [vmem:[%s4995_s1 + $0x18] sm:$0x3] }
 0x278   : >> { %2958 = vrot.lane.b32.xlu0 %v4512_v4, %s3767_s25  ;;  %2556 = vmatprep.subr.bf16.mxu1 %v2477_v33 }
 0x279   : >> { %2557 = vmatpush1.bf16.msra.mxu1 %v2476_v15  ;;  %v2455_v46 = vpop.permute.xlu1 %2454 }
 0x27a   : >> { %v2453_v49 = vpop.permute.xlu0 %2452 }
 0x27b   : >> { %2954 = vrot.lane.b32.xlu1 %v4518_v7, %s3767_s25  ;;  %v2479_v12 = vsel %vm2298_vm6, %v2453_v49, %v2455_v46 }
 0x27c   : >> { %2962 = vrot.lane.b32.xlu0 %v4524_v60, %s3767_s25  ;;  %2517 = vmatprep.subr.bf16.mxu0 %v2479_v12 }
 0x27d   : >> { %v2459_v36 = vpop.permute.xlu1 %2458 }
 0x27e   : >> { %v2457_v32 = vpop.permute.xlu0 %2456 }
 0x27f   : >> { %v2480_v24 = vsel %vm2298_vm6, %v2455_v46, %v2457_v32  ;;  %2968 = vrot.lane.b32.xlu1 %v4529_v52, %s3767_s25  ;;  %v2481_v4 = vsel %vm2298_vm6, %v2457_v32, %v2459_v36 }
 0x280   : >> { %2966 = vrot.lane.b32.xlu0 %v4536_v44, %s3767_s25  ;;  %2558 = vmatprep.subr.bf16.mxu1 %v2481_v4 }
 0x281   : >> { %2559 = vmatpush1.bf16.msra.mxu1 %v2480_v24  ;;  %v2461_v7 = vpop.permute.xlu1 %2460 }
 0x282   : >> { %v2451_v13 = vpop.permute.xlu0 %2450 }
 0x283   : >> { %v2478_v25 = vsel %vm2298_vm6, %v2451_v13, %v2453_v49  ;;  %2972 = vrot.lane.b32.xlu1 %v4542_v42, %s3767_s25 }
 0x284   : >> { %2970 = vrot.lane.b32.xlu0 %v4547_v10, %s3767_s25  ;;  %2518 = vmatpush1.bf16.msra.mxu0 %v2478_v25 }
 0x285   : >> { %v2465_v60 = vpop.permute.xlu1 %2464 }
 0x286   : >> { %v2463_v52 = vpop.permute.xlu0 %2462 }
 0x287   : >> { %v2482_v51 = vsel %vm2298_vm6, %v2461_v7, %v2463_v52  ;;  %v2483_v54 = vsel %vm2298_vm6, %v2463_v52, %v2465_v60  ;;  %2974 = vrot.lane.b32.xlu1 %v3926_v20, %s3767_s25  ;;  %v3470_v20 = vld [vmem:[%s4995_s1 + $0x16] sm:$0x3] }
 0x288   : >> { %v2502_v44 = vsel %vm371_vm0, %v2482_v51, 0  ;;  %2964 = vrot.lane.b32.xlu0 %v4556_v45, %s3767_s25  ;;  %3471 = vmatprep.subr.msk.bf16.mxu0 %vm371_vm0, %v2483_v54 }
 0x289   : >> { %2520 = vmatpush1.bf16.msra.mxu0 %v2502_v44  ;;  %v2469_v42 = vpop.permute.xlu1 %2468 }
 0x28a   : >> { %v2467_v10 = vpop.permute.xlu0 %2466 }
 0x28b   : >> { %v2484_v41 = vsel %vm2298_vm6, %v2465_v60, %v2467_v10  ;;  %v2485_v31 = vsel %vm2298_vm6, %v2467_v10, %v2469_v42  ;;  %2978 = vrot.lane.b32.xlu1 %v3939_v30, %s3767_s25 }
 0x28c   : >> { %v2508_v8 = vsel %vm371_vm0, %v2484_v41, 0  ;;  %2976 = vrot.lane.b32.xlu0 %v3949_v34, %s3767_s25  ;;  %3473 = vmatprep.subr.msk.bf16.mxu1 %vm371_vm0, %v2485_v31 }
 0x28d   : >> { %2561 = vmatpush1.bf16.msra.mxu1 %v2508_v8  ;;  %v2606_v45 = vpop.permute.xlu1 %2605  ;;  %3472 = vmatmul.mubr.msk.bf16.vlgmr.msra.gmra.mrb[0].mxu0 %vm367_vm1, %v3470_v20 }
 0x28e   : >> { %v2604_v37 = vpop.permute.xlu0 %2603  ;;  %2717 = vmatprep.mubr.bf16.mxu0 %v3760_v3 }
 0x28f   : >> { %2982 = vrot.lane.b32.xlu1 %v4576_v27, %s3767_s25  ;;  %v2643_v30 = vsel %vm2641_vm7, %v2604_v37, %v2606_v45 }
 0x290   : >> { %2980 = vrot.lane.b32.xlu0 %v3973_v40, %s3767_s25  ;;  %2685 = vmatprep.subr.bf16.mxu0 %v2643_v30 }
 0x291   : >> { %v2610_v34 = vpop.permute.xlu1 %2609  ;;  %3474 = vmatmul.mubr.msk.bf16.vlgmr.msra.gmra.mrb[0].mxu1 %vm367_vm1, %v3470_v20 }
 0x292   : >> { %v2608_v26 = vpop.permute.xlu0 %2607  ;;  %2758 = vmatprep.mubr.bf16.mxu1 %v3760_v3 }
 0x293   : >> { %v2644_v22 = vsel %vm2641_vm7, %v2606_v45, %v2608_v26  ;;  %v2645_v6 = vsel %vm2641_vm7, %v2608_v26, %v2610_v34 }
 0x294   : >> { %2726 = vmatprep.subr.bf16.mxu1 %v2645_v6 }
 0x295   : >> { %2727 = vmatpush1.bf16.msra.mxu1 %v2644_v22  ;;  %v2614_v55 = vpop.permute.xlu1 %2613 }
 0x296   : >> { %v2602_v27 = vpop.permute.xlu0 %2601 }
 0x297   : >> { %v2642_v29 = vsel %vm2641_vm7, %v2602_v27, %v2604_v37 }
 0x298   : >> { %2686 = vmatpush1.bf16.msra.mxu0 %v2642_v29 }
 0x299   : >> { %v2618_v14 = vpop.permute.xlu1 %2617 }
 0x29a   : >> { %v2616_v40 = vpop.permute.xlu0 %2615 }
 0x29b   : >> { %v2647_v1 = vsel %vm2641_vm7, %v2614_v55, %v2616_v40  ;;  %v2648_v16 = vsel %vm2641_vm7, %v2616_v40, %v2618_v14 }
 0x29c   : >> { %2687 = vmatprep.subr.bf16.mxu0 %v2647_v1 }
 0x29d   : >> { %v2612_v53 = vpop.permute.xlu1 %2611 }
 0x29e   : >> { %v2646_v35 = vsel %vm2641_vm7, %v2612_v53, %v2614_v55  ;;  %v2620_v48 = vpop.permute.xlu0 %2619 }
 0x29f   : >> { %2688 = vmatpush1.bf16.msra.mxu0 %v2646_v35  ;;  %v2649_v50 = vsel %vm2641_vm7, %v2618_v14, %v2620_v48  ;;  %v3480_v35 = vld [vmem:[%s4995_s1 + $0x1a] sm:$0x3] }
 0x2a0   : >> { %2728 = vmatprep.subr.bf16.mxu1 %v2649_v50 }
 0x2a1   : >> { %2729 = vmatpush1.bf16.msra.mxu1 %v2648_v16  ;;  %v2626_v17 = vpop.permute.xlu1 %2625 }
 0x2a2   : >> { %v2624_v56 = vpop.permute.xlu0 %2623 }
 0x2a3   : >> { %v2651_v57 = vsel %vm2641_vm7, %v2624_v56, %v2626_v17 }
 0x2a4   : >> { %2689 = vmatprep.subr.bf16.mxu0 %v2651_v57 }
 0x2a5   : >> { %v2630_v58 = vpop.permute.xlu1 %2629 }
 0x2a6   : >> { %v2628_v0 = vpop.permute.xlu0 %2627 }
 0x2a7   : >> { %v2652_v43 = vsel %vm2641_vm7, %v2626_v17, %v2628_v0  ;;  %v2653_v59 = vsel %vm2641_vm7, %v2628_v0, %v2630_v58 }
 0x2a8   : >> { %2730 = vmatprep.subr.bf16.mxu1 %v2653_v59 }
 0x2a9   : >> { %2731 = vmatpush1.bf16.msra.mxu1 %v2652_v43  ;;  %v2632_v18 = vpop.permute.xlu1 %2631 }
 0x2aa   : >> { %v2622_v19 = vpop.permute.xlu0 %2621 }
 0x2ab   : >> { %v2650_v38 = vsel %vm2641_vm7, %v2622_v19, %v2624_v56 }
 0x2ac   : >> { %2690 = vmatpush1.bf16.msra.mxu0 %v2650_v38 }
 0x2ad   : >> { %v2636_v39 = vpop.permute.xlu1 %2635 }
 0x2ae   : >> { %v2634_v9 = vpop.permute.xlu0 %2633 }
 0x2af   : >> { %v2654_v23 = vsel %vm2641_vm7, %v2632_v18, %v2634_v9  ;;  %v2655_v63 = vsel %vm2641_vm7, %v2634_v9, %v2636_v39 }
 0x2b0   : >> { %v2674_v47 = vsel %vm371_vm0, %v2654_v23, 0  ;;  %3476 = vmatprep.subr.msk.bf16.mxu0 %vm371_vm0, %v2655_v63 }
 0x2b1   : >> { %2692 = vmatpush1.bf16.msra.mxu0 %v2674_v47  ;;  %v2640_v5 = vpop.permute.xlu1 %2639 }
 0x2b2   : >> { %v2638_v28 = vpop.permute.xlu0 %2637 }
 0x2b3   : >> { %v2656_v21 = vsel %vm2641_vm7, %v2636_v39, %v2638_v28  ;;  %v2657_v61 = vsel %vm2641_vm7, %v2638_v28, %v2640_v5 }
 0x2b4   : >> { %v2680_v11 = vsel %vm371_vm0, %v2656_v21, 0  ;;  %3478 = vmatprep.subr.msk.bf16.mxu1 %vm371_vm0, %v2657_v61  ;;  %3477 = vmatmul.mubr.msk.bf16.vlgmr.msra.gmra.mrb[0].mxu0 %vm367_vm1, %v3475_v62 }
 0x2b5   : >> { %2733 = vmatpush1.bf16.msra.mxu1 %v2680_v11  ;;  %v2778_v33 = vpop.permute.xlu1 %2777  ;;  %2888 = vmatprep.mubr.bf16.mxu0 %v3760_v3 }
 0x2b6   : >> { %v2776_v15 = vpop.permute.xlu0 %2775 }
 0x2b7   : >> { %v2814_v46 = vsel %vm2641_vm7, %v2776_v15, %v2778_v33 }
 0x2b8   : >> { %2856 = vmatprep.subr.bf16.mxu0 %v2814_v46  ;;  %3479 = vmatmul.mubr.msk.bf16.vlgmr.msra.gmra.mrb[0].mxu1 %vm367_vm1, %v3475_v62 }
 0x2b9   : >> { %v2782_v49 = vpop.permute.xlu1 %2781  ;;  %2929 = vmatprep.mubr.bf16.mxu1 %v3760_v3 }
 0x2ba   : >> { %v2780_v12 = vpop.permute.xlu0 %2779 }
 0x2bb   : >> { %v2815_v36 = vsel %vm2641_vm7, %v2778_v33, %v2780_v12  ;;  %v2816_v32 = vsel %vm2641_vm7, %v2780_v12, %v2782_v49 }
 0x2bc   : >> { %2897 = vmatprep.subr.bf16.mxu1 %v2816_v32 }
 0x2bd   : >> { %2898 = vmatpush1.bf16.msra.mxu1 %v2815_v36  ;;  %v2786_v24 = vpop.permute.xlu1 %2785 }
 0x2be   : >> { %v2774_v4 = vpop.permute.xlu0 %2773 }
 0x2bf   : >> { %v2813_v7 = vsel %vm2641_vm7, %v2774_v4, %v2776_v15 }
 0x2c0   : >> { %2857 = vmatpush1.bf16.msra.mxu0 %v2813_v7 }
 0x2c1   : >> { %v2790_v13 = vpop.permute.xlu1 %2789 }
 0x2c2   : >> { %v2788_v25 = vpop.permute.xlu0 %2787 }
 0x2c3   : >> { %v2818_v60 = vsel %vm2641_vm7, %v2786_v24, %v2788_v25  ;;  %v2819_v42 = vsel %vm2641_vm7, %v2788_v25, %v2790_v13 }
 0x2c4   : >> { %2858 = vmatprep.subr.bf16.mxu0 %v2818_v60 }
 0x2c5   : >> { %v2784_v52 = vpop.permute.xlu1 %2783 }
 0x2c6   : >> { %v2817_v51 = vsel %vm2641_vm7, %v2784_v52, %v2786_v24  ;;  %v2792_v54 = vpop.permute.xlu0 %2791 }
 0x2c7   : >> { %2859 = vmatpush1.bf16.msra.mxu0 %v2817_v51  ;;  %v2820_v44 = vsel %vm2641_vm7, %v2790_v13, %v2792_v54  ;;  %v3485_v13 = vld [vmem:[%s4995_s1 + $0x1c] sm:$0x3] }
 0x2c8   : >> { %2899 = vmatprep.subr.bf16.mxu1 %v2820_v44 }
 0x2c9   : >> { %2900 = vmatpush1.bf16.msra.mxu1 %v2819_v42  ;;  %v2798_v10 = vpop.permute.xlu1 %2797 }
 0x2ca   : >> { %v2796_v41 = vpop.permute.xlu0 %2795 }
 0x2cb   : >> { %v2822_v31 = vsel %vm2641_vm7, %v2796_v41, %v2798_v10 }
 0x2cc   : >> { %2860 = vmatprep.subr.bf16.mxu0 %v2822_v31  ;;  %v3117_v31 = vld [vmem:[%s3116_s16] sm:$0xff] }
 0x2cd   : >> { %v2802_v8 = vpop.permute.xlu1 %2801 }
 0x2ce   : >> { %v2800_v20 = vpop.permute.xlu0 %2799 }
 0x2cf   : >> { %v2823_v45 = vsel %vm2641_vm7, %v2798_v10, %v2800_v20  ;;  %v2824_v37 = vsel %vm2641_vm7, %v2800_v20, %v2802_v8 }
 0x2d0   : >> { %2901 = vmatprep.subr.bf16.mxu1 %v2824_v37 }
 0x2d1   : >> { %2902 = vmatpush1.bf16.msra.mxu1 %v2823_v45  ;;  %v2804_v30 = vpop.permute.xlu1 %2803 }
 0x2d2   : >> { %v2794_v34 = vpop.permute.xlu0 %2793 }
 0x2d3   : >> { %v2821_v26 = vsel %vm2641_vm7, %v2794_v34, %v2796_v41 }
 0x2d4   : >> { %2861 = vmatpush1.bf16.msra.mxu0 %v2821_v26  ;;  %v3768_v26 = vmov 1983009808  }
 0x2d5   : >> { %v2808_v22 = vpop.permute.xlu1 %2807 }
 0x2d6   : >> { %v2806_v6 = vpop.permute.xlu0 %2805 }
 0x2d7   : >> { %v2825_v55 = vsel %vm2641_vm7, %v2804_v30, %v2806_v6  ;;  %v2826_v27 = vsel %vm2641_vm7, %v2806_v6, %v2808_v22  ;;  %v3160_v6 = vlaneseq }
 0x2d8   : >> { %v2845_v29 = vsel %vm371_vm0, %v2825_v55, 0  ;;  %3481 = vmatprep.subr.msk.bf16.mxu0 %vm371_vm0, %v2826_v27 }
 0x2d9   : >> { %2863 = vmatpush1.bf16.msra.mxu0 %v2845_v29  ;;  %v2812_v14 = vpop.permute.xlu1 %2811  ;;  %v3118_v29 = vld [vmem:[%s3116_s16 + $0x8] sm:$0xff] }
 0x2da   : >> { %v2810_v40 = vpop.permute.xlu0 %2809 }
 0x2db   : >> { %v2827_v1 = vsel %vm2641_vm7, %v2808_v22, %v2810_v40  ;;  %v2828_v53 = vsel %vm2641_vm7, %v2810_v40, %v2812_v14  ;;  %v3158_v22 = vunpack.c.l.s4 %v3768_v26 }
 0x2dc   : >> { %v2851_v48 = vsel %vm371_vm0, %v2827_v1, 0  ;;  %3483 = vmatprep.subr.msk.bf16.mxu1 %vm371_vm0, %v2828_v53  ;;  %3482 = vmatmul.mubr.msk.bf16.vlgmr.msra.gmra.mrb[0].mxu0 %vm367_vm1, %v3480_v35  ;;  %v3769_v53 = vmov 0.0  }
 0x2dd   : >> { %2904 = vmatpush1.bf16.msra.mxu1 %v2851_v48  ;;  %v2949_v50 = vpop.permute.xlu1 %2948  ;;  %3060 = vmatprep.mubr.bf16.mxu0 %v3760_v3 }
 0x2de   : >> { %v2947_v16 = vpop.permute.xlu0 %2946 }
 0x2df   : >> { %v2986_v17 = vsel %vm2984_vm8, %v2947_v16, %v2949_v50 }
 0x2e0   : >> { %3028 = vmatprep.subr.bf16.mxu0 %v2986_v17  ;;  %3484 = vmatmul.mubr.msk.bf16.vlgmr.msra.gmra.mrb[0].mxu1 %vm367_vm1, %v3480_v35 }
 0x2e1   : >> { %v2953_v56 = vpop.permute.xlu1 %2952  ;;  %3101 = vmatprep.mubr.bf16.mxu1 %v3760_v3 }
 0x2e2   : >> { %v2951_v57 = vpop.permute.xlu0 %2950 }
 0x2e3   : >> { %v2987_v58 = vsel %vm2984_vm8, %v2949_v50, %v2951_v57  ;;  %v2988_v0 = vsel %vm2984_vm8, %v2951_v57, %v2953_v56  ;;  %v3159_v50 = vunpack.c.0.s8 %v3158_v22 }
 0x2e4   : >> { %3069 = vmatprep.subr.bf16.mxu1 %v2988_v0 }
 0x2e5   : >> { %3070 = vmatpush1.bf16.msra.mxu1 %v2987_v58  ;;  %v2957_v43 = vpop.permute.xlu1 %2956 }
 0x2e6   : >> { %v2945_v59 = vpop.permute.xlu0 %2944 }
 0x2e7   : >> { %v2985_v18 = vsel %vm2984_vm8, %v2945_v59, %v2947_v16  ;;  %v3161_v16 = vshrl.u32 %v3160_v6, 7 }
 0x2e8   : >> { %3029 = vmatpush1.bf16.msra.mxu0 %v2985_v18 }
 0x2e9   : >> { %v2961_v19 = vpop.permute.xlu1 %2960  ;;  %v3162_v0 = vsub.s32 %v3159_v50, %v3161_v16 }
 0x2ea   : >> { %v2959_v38 = vpop.permute.xlu0 %2958 }
 0x2eb   : >> { %v2990_v39 = vsel %vm2984_vm8, %v2957_v43, %v2959_v38  ;;  %v2991_v47 = vsel %vm2984_vm8, %v2959_v38, %v2961_v19 }
 0x2ec   : >> { %3030 = vmatprep.subr.bf16.mxu0 %v2990_v39 }
 0x2ed   : >> { %v2955_v9 = vpop.permute.xlu1 %2954 }
 0x2ee   : >> { %v2989_v3 = vsel %vm2984_vm8, %v2955_v9, %v2957_v43  ;;  %v2963_v23 = vpop.permute.xlu0 %2962 }
 0x2ef   : >> { %3031 = vmatpush1.bf16.msra.mxu0 %v2989_v3  ;;  %v2992_v63 = vsel %vm2984_vm8, %v2961_v19, %v2963_v23 }
 0x2f0   : >> { %3071 = vmatprep.subr.bf16.mxu1 %v2992_v63 }
 0x2f1   : >> { %3072 = vmatpush1.bf16.msra.mxu1 %v2991_v47  ;;  %v2969_v5 = vpop.permute.xlu1 %2968 }
 0x2f2   : >> { %v2967_v28 = vpop.permute.xlu0 %2966 }
 0x2f3   : >> { %v2994_v21 = vsel %vm2984_vm8, %v2967_v28, %v2969_v5 }
 0x2f4   : >> { %3032 = vmatprep.subr.bf16.mxu0 %v2994_v21 }
 0x2f5   : >> { %v2973_v61 = vpop.permute.xlu1 %2972 }
 0x2f6   : >> { %v2971_v62 = vpop.permute.xlu0 %2970 }
 0x2f7   : >> { %v2995_v11 = vsel %vm2984_vm8, %v2969_v5, %v2971_v62  ;;  %v2996_v33 = vsel %vm2984_vm8, %v2971_v62, %v2973_v61 }
 0x2f8   : >> { %3073 = vmatprep.subr.bf16.mxu1 %v2996_v33 }
 0x2f9   : >> { %3074 = vmatpush1.bf16.msra.mxu1 %v2995_v11  ;;  %v2975_v15 = vpop.permute.xlu1 %2974 }
 0x2fa   : >> { %v2965_v46 = vpop.permute.xlu0 %2964 }
 0x2fb   : >> { %v2993_v49 = vsel %vm2984_vm8, %v2965_v46, %v2967_v28 }
 0x2fc   : >> { %3033 = vmatpush1.bf16.msra.mxu0 %v2993_v49 }
 0x2fd   : >> { %v2979_v12 = vpop.permute.xlu1 %2978 }
 0x2fe   : >> { %v2977_v36 = vpop.permute.xlu0 %2976 }
 0x2ff   : >> { %v2997_v32 = vsel %vm2984_vm8, %v2975_v15, %v2977_v36  ;;  %v2998_v24 = vsel %vm2984_vm8, %v2977_v36, %v2979_v12 }
 0x300   : >> { %v3017_v4 = vsel %vm371_vm0, %v2997_v32, 0  ;;  %3486 = vmatprep.subr.msk.bf16.mxu0 %vm371_vm0, %v2998_v24 }
 0x301   : >> { %3035 = vmatpush1.bf16.msra.mxu0 %v3017_v4  ;;  %v2983_v7 = vpop.permute.xlu1 %2982 }
 0x302   : >> { %v2981_v25 = vpop.permute.xlu0 %2980 }
 0x303   : >> { %v2999_v60 = vsel %vm2984_vm8, %v2979_v12, %v2981_v25  ;;  %v3000_v52 = vsel %vm2984_vm8, %v2981_v25, %v2983_v7 }
 0x304   : >> { %v3023_v51 = vsel %vm371_vm0, %v2999_v60, 0  ;;  %3487 = vmatmul.mubr.msk.bf16.vlgmr.msra.gmra.mrb[0].mxu0 %vm367_vm1, %v3485_v13  ;;  %3488 = vmatprep.subr.msk.bf16.mxu1 %vm371_vm0, %v3000_v52 }
 0x305   : >> { %3076 = vmatpush1.bf16.msra.mxu1 %v3023_v51 }
 0x308   : >> { %3489 = vmatmul.mubr.msk.bf16.vlgmr.msra.gmra.mrb[0].mxu1 %vm367_vm1, %v3485_v13 }
 0x3d7   : >> { %v3062_v54 = vpop.f32.mrb[0].mxu0 }
 0x3d8   : >> { %v3504_v44 = vadd.f32 %v3062_v54, %v3831_v2  ;;  %v3064_v42 = vpop.f32.mrb[1].mxu0 }
 0x3d9   : >> { %v3505_v10 = vadd.f32 %v3064_v42, %v3831_v2  ;;  %v3066_v41 = vpop.f32.mrb[2].mxu0 }
 0x3da   : >> { %v3067_v8 = vpop.f32.mrb[3].mxu0 }
 0x3db   : >> { %v3123_v20 = vcombine.low %v3504_v44, %v3505_v10  ;;  %v3103_v45 = vpop.f32.mrb[0].mxu1 }
 0x3dc   : >> { %v3506_v37 = vadd.f32 %v3103_v45, %v3831_v2  ;;  %v3105_v30 = vpop.f32.mrb[1].mxu1 }
 0x3dd   : >> { %v3127_v34 = vadd.f32 %v3123_v20, %v3117_v31  ;;  %v3507_v55 = vadd.f32 %v3105_v30, %v3831_v2  ;;  %v3107_v27 = vpop.f32.mrb[2].mxu1 }
 0x3de   : >> { %v3108_v14 = vpop.f32.mrb[3].mxu1 }
 0x3df   : >> { %vm3129_vm9 = vcmp.gt.f32.partialorder %v3127_v34, 1.0  ;;  %v3124_v40 = vcombine.low %v3506_v37, %v3507_v55 }
 0x3e0   : >> { %v3131_v1 = vsel %vm3129_vm9, 0.0, %v3127_v34  ;;  %v3493_v35 = vsel %vm3129_vm9, 1.0, %v3769_v53 }
 0x3e1   : >> { %3135 = vst [vmem:[%s3134_s17] sm:$0xff] %v3131_v1  ;;  %v3143_v48 = vcombine.high %v3493_v35, %v3493_v35  ;;  %v3128_v17 = vadd.f32 %v3124_v40, %v3118_v29 }
 0x3e3   : >> { %vm3130_vm10 = vcmp.gt.f32.partialorder %v3128_v17, 1.0  ;;  %v3495_v58 = vpack.c.bf16 %v3143_v48, %v3493_v35 }
 0x3e4   : >> { %v3132_v56 = vsel %vm3130_vm10, 0.0, %v3128_v17  ;;  %v3494_v57 = vsel %vm3130_vm10, 1.0, %v3769_v53 }
 0x3e5   : >> { %3136 = vst [vmem:[%s3134_s17 + $0x8] sm:$0xff] %v3132_v56  ;;  %v3144_v43 = vcombine.high %v3494_v57, %v3494_v57  ;;  %v3163_v18 = vrot.slane %v3495_v58, %v3162_v0 }
 0x3e7   : >> { %v3496_v59 = vpack.c.bf16 %v3144_v43, %v3494_v57  ;;  %269 = sbr.rel (!%p267_p4) target bundleno = 135 (0x87), region = 107 }
 0x3e9   : >> { %v3170_v19 = vrot.slane %v3496_v59, %v3162_v0 }
 0x3eb   : >> { %v3171_v38 = vcombine.low %v3163_v18, %v3170_v19 }
 0x3ed   : >> { %3175 = vst [vmem:[%s3174_s20] sm:$0xff] %v3171_v38 }
 0x3ee PF: > { %s16_s18 = sadd.s32 1, %s3753_s18  }
 0x3ef   : > { %p13_p5 = scmp.ge.s32.totalorder %s16_s18, 4  }
 0x3f1   :  { %15 = sbr.rel (!%p13_p5) target bundleno = 1 (0x1), region = 118 }

// kernel: closed_call.39
= control target key start
LH: loop header
LB: loop body
LE: loop exit
PB: predicated region body
PF: predicated region fallthrough
CT: control target
= control target key end

     0   :  { %s3804_s18 = smov 0   ;;  %s4998_s0 = inlined_call_operand.vmem [shape: bf16[2,2,2,60,520], index: 0, kind: input, shape index: {}]   ;;  %s4999_s1 = inlined_call_operand.vmem [shape: bf16[15,4,60], index: 1, kind: input, shape index: {}]   ;;  %s5000_s2 = inlined_call_operand.vmem [shape: f32[4,1], index: 2, kind: input, shape index: {}]   ;;  %s5001_s3 = inlined_call_operand.vmem [shape: f32[2,2,4,512], index: 3, kind: input, shape index: {}]   ;;  %s5002_s4 = inlined_call_operand.vmem [shape: f32[2,2,4,512], index: 4, kind: output, shape index: {0}]   ;;  %s5003_s5 = inlined_call_operand.vmem [shape: bf16[2,2,4,512], index: 5, kind: output, shape index: {1}]  }
   0x1 LB: > { %s3293_s19 = sadd.s32 4294967295, %s3757_s18   ;;  %p3297_p0 = scmp.ge.s32.totalorder %s3757_s18, 1  ;;  %s3757_s18 = sphi %s3804_s18, %s16_s18  }
   0x2   : > { %p200_p1 = scmp.lt.s32.totalorder %s3757_s18, 3 }
   0x4   : > { %p201_p2 = pnand %p3297_p0, %p200_p1 }
   0x5   : > { %v259_v0 = vld [vmem:[%s5000_s2] sm:$0xf] (!%p201_p2)  ;;  %p238_p3 = scmp.lt.s32.totalorder (!%p201_p2), %s3293_s19, 1  ;;  %v3763_v1 = vmov (!%p201_p2), 0   ;;  %s3837_s12 = smov (!%p201_p2), 0  }
   0x6   : > { %204 = sbr.rel (%p201_p2) target bundleno = 1006 (0x3ee), region = 36  ;;  %3654 = vset.pattern.permute.xlu0 (!%p201_p2), %v3763_v1 }
   0x7   : > { %262 = vperm.xlu0 (!%p201_p2), %3654, %v259_v0  }
   0xd   : > { %s5005_s19 = smov (!%p238_p3, %s3293_s19), 1 }
   0xe   : > { %s3626_s22 = smul.u32 640, %s5005_s19  ;;  %s3503_s23 = sshll.u32 %s5005_s19, 5 }
   0xf   : > { %s3818_s26 = scalar_lea.vmem %s5001_s3, %s3503_s23  ;;  %s3823_s29 = scalar_lea.vmem %s5002_s4, %s3503_s23 }
  0x10   : > { %s3828_s7 = scalar_lea.vmem %s4998_s0, %s3626_s22  ;;  %s3505_s8 = sshll.u32 %s5005_s19, 4 }
  0x11   : > { %s3833_s11 = scalar_lea.vmem %s5003_s5, %s3505_s8 }
  0x86   : > { %v3835_v2 = vpop.permute.xlu0 %262 }
  0x87 LB: >> { %v3764_v3 = vmov 0   ;;  %s3506_s13 = smul.u32 320, %s3761_s12  ;;  %s3765_s15 = smov 127   ;;  %vm371_vm0 = vcmask 1045504   ;;  %v290_v35 = vld [vmem:[%s4999_s1] sm:$0x3]  ;;  %s3761_s12 = sphi %s3837_s12, %s270_s12  }
  0x88   : >> { %416 = vmatprep.mubr.bf16.mxu0 %v3764_v3  ;;  %457 = vmatprep.mubr.bf16.mxu1 %v3764_v3  ;;  %vm367_vm1 = vcmask 490496   ;;  %v3343_v59 = vld [vmem:[%s4999_s1 + $0x2] sm:$0x3]  ;;  %s3766_s21 = smov 126   ;;  %vm818_vm2 = vcmask 1039360   ;;  %s3767_s24 = smov 125  }
  0x89   : >> { %s3846_s14 = scalar_lea.vmem %s3828_s7, %s3506_s13  ;;  %vm1269_vm3 = vcmask 1031168   ;;  %s3768_s6 = smov 124   ;;  %vm1612_vm4 = vcmask 1022976   ;;  %vm1955_vm5 = vcmask 1014784   ;;  %vm2298_vm6 = vcmask 1006592  }
  0x8a   : >> { %v3849_v4 = vld [vmem:[%s3846_s14 + $0x8] ss:$20 sps:$4 sm:$0xff]   ;;  %v3852_v5 = vld [vmem:[%s3846_s14] ss:$20 sps:$4 sm:$0xff]   ;;  %v3860_v7 = vld [vmem:[%s3846_s14 + $0x4] ss:$20 sps:$4 sm:$0xff]  }
  0x8b   : >> { %782 = vrot.lane.b32.xlu1 %v3849_v4, %s3765_s15  ;;  %v3857_v6 = vld [vmem:[%s3846_s14 + $0xc] ss:$20 sps:$4 sm:$0xff]   ;;  %778 = vrot.lane.b32.xlu0 %v3852_v5, %s3765_s15  ;;  %v3867_v8 = vld [vmem:[%s3846_s14 + $0x28] ss:$20 sps:$4 sm:$0xff]   ;;  %s3771_s25 = smov 121   ;;  %vm2641_vm7 = vcmask 998400  }
  0x8c   : >> { %384 = vmatprep.subr.bf16.mxu0 %v3860_v7  ;;  %425 = vmatprep.subr.bf16.mxu1 %v3857_v6  ;;  %v3870_v9 = vld [vmem:[%s3846_s14 + $0x2c] ss:$20 sps:$4 sm:$0xff]   ;;  %v3877_v10 = vld [vmem:[%s3846_s14 + $0x10] ss:$20 sps:$4 sm:$0xff]   ;;  %v3882_v11 = vld [vmem:[%s3846_s14 + $0x34] ss:$20 sps:$4 sm:$0xff]  }
  0x8d   : >> { %385 = vmatpush1.bf16.msra.mxu0 %v3852_v5  ;;  %426 = vmatpush1.bf16.msra.mxu1 %v3849_v4  ;;  %v3886_v12 = vld [vmem:[%s3846_s14 + $0x54] ss:$20 sps:$4 sm:$0xff]   ;;  %v3889_v13 = vld [vmem:[%s3846_s14 + $0x30] ss:$20 sps:$4 sm:$0xff]   ;;  %v3907_v16 = vld [vmem:[%s3846_s14 + $0x58] ss:$20 sps:$4 sm:$0xff]  }
  0x8e   : >> { %386 = vmatprep.subr.bf16.mxu0 %v3870_v9  ;;  %427 = vmatprep.subr.bf16.mxu1 %v3882_v11  ;;  %v3896_v14 = vld [vmem:[%s3846_s14 + $0x5c] ss:$20 sps:$4 sm:$0xff]   ;;  %v3913_v17 = vld [vmem:[%s3846_s14 + $0x38] ss:$20 sps:$4 sm:$0xff]   ;;  %v3933_v21 = vld [vmem:[%s3846_s14 + $0x60] ss:$20 sps:$4 sm:$0xff]  }
  0x8f   : >> { %784 = vrot.lane.b32.xlu1 %v3857_v6, %s3765_s15  ;;  %780 = vrot.lane.b32.xlu0 %v3860_v7, %s3765_s15  ;;  %v3902_v15 = vld [vmem:[%s3846_s14 + $0x50] ss:$20 sps:$4 sm:$0xff]   ;;  %v686_v18 = vld [vmem:[%s3846_s14 + $0x78] sm:$0xff]  ;;  %vm2984_vm8 = vcmask 990208   ;;  %s3509_s19 = sshll.u32 %s3761_s12, 3 }
  0x90   : >> { %v689_v19 = vld [vmem:[%s3846_s14 + $0x8c] sm:$0x33]  ;;  %v687_v22 = vld [vmem:[%s3846_s14 + $0x80] sm:$0xff]  ;;  %v690_v23 = vld [vmem:[%s3846_s14 + $0x94] sm:$0x33]  ;;  %s3174_s20 = scalar_lea.vmem %s3833_s11, %s3509_s19 }
  0x91   : >> { %387 = vmatpush1.bf16.msra.mxu0 %v3867_v8  ;;  %428 = vmatpush1.bf16.msra.mxu1 %v3889_v13  ;;  %v3930_v20 = vcombine.low %v686_v18, %v689_v19  ;;  %v288_v24 = vld [vmem:[%s3846_s14 + $0x8c] sm:$0x33]  ;;  %v289_v25 = vld [vmem:[%s3846_s14 + $0x94] sm:$0x33]  ;;  %v3943_v30 = vcombine.low %v687_v22, %v690_v23  ;;  %v3953_v34 = vcombine.high %v686_v18, %v689_v19  ;;  %v3981_v41 = vld [vmem:[%s3846_s14 + $0xa8] ss:$20 sps:$4 sm:$0xff]  }
  0x92   : >> { %388 = vmatprep.subr.bf16.mxu0 %v3886_v12  ;;  %429 = vmatprep.subr.bf16.mxu1 %v3896_v14  ;;  %v3319_v26 = vcombine.high %v686_v18, %v288_v24  ;;  %v3318_v27 = vcombine.low %v686_v18, %v288_v24  ;;  %v3321_v28 = vcombine.high %v687_v22, %v289_v25  ;;  %v3946_v31 = vld [vmem:[%s3846_s14 + $0xa4] ss:$20 sps:$4 sm:$0xff]   ;;  %v3961_v36 = vld [vmem:[%s3846_s14 + $0x88] ss:$20 sps:$4 sm:$0x3f]  }
  0x93   : >> { %788 = vrot.lane.b32.xlu1 %v3867_v8, %s3765_s15  ;;  %786 = vrot.lane.b32.xlu0 %v3877_v10, %s3765_s15  ;;  %v3320_v29 = vcombine.low %v687_v22, %v289_v25  ;;  %v3964_v37 = vld [vmem:[%s3846_s14 + $0xa0] ss:$20 sps:$4 sm:$0xff]   ;;  %v3977_v40 = vcombine.high %v687_v22, %v690_v23  ;;  %v3986_v42 = vld [vmem:[%s3846_s14 + $0xc8] ss:$20 sps:$4 sm:$0xff]  }
  0x94   : >> { %v373_v32 = vsel %vm371_vm0, %v3318_v27, 0  ;;  %v3969_v38 = vld [vmem:[%s3846_s14 + $0xac] ss:$20 sps:$4 sm:$0xff]   ;;  %v3994_v44 = vld [vmem:[%s3846_s14 + $0xd4] ss:$20 sps:$4 sm:$0xff]   ;;  %v3407_v46 = vld [vmem:[%s3846_s14 + $0x118] sm:$0xff] }
  0x95   : >> { %389 = vmatpush1.bf16.msra.mxu0 %v3902_v15  ;;  %430 = vmatpush1.bf16.msra.mxu1 %v3907_v16  ;;  %v379_v33 = vsel %vm371_vm0, %v3320_v29, 0  ;;  %v3972_v39 = vld [vmem:[%s3846_s14 + $0xcc] ss:$20 sps:$4 sm:$0xff]   ;;  %v3997_v45 = vld [vmem:[%s3846_s14 + $0xf4] ss:$20 sps:$4 sm:$0xff]  }
  0x96   : >> { %3322 = vmatprep.subr.msk.bf16.mxu0 %vm371_vm0, %v3319_v26  ;;  %3324 = vmatprep.subr.msk.bf16.mxu1 %vm371_vm0, %v3321_v28  ;;  %v3341_v43 = vld [vmem:[%s3846_s14 + $0x12c] sm:$0x33]  ;;  %v3342_v51 = vld [vmem:[%s3846_s14 + $0x134] sm:$0x33]  ;;  %v3408_v54 = vld [vmem:[%s3846_s14 + $0x120] sm:$0xff] }
  0x97   : >> { %792 = vrot.lane.b32.xlu1 %v3889_v13, %s3765_s15  ;;  %790 = vrot.lane.b32.xlu0 %v3870_v9, %s3765_s15  ;;  %v4005_v47 = vld [vmem:[%s3846_s14 + $0xd0] ss:$20 sps:$4 sm:$0xff]   ;;  %v3357_v48 = vcombine.high %v3407_v46, %v3341_v43  ;;  %v3356_v49 = vcombine.low %v3407_v46, %v3341_v43  ;;  %v4028_v55 = vld [vmem:[%s3846_s14 + $0xf8] ss:$20 sps:$4 sm:$0xff]   ;;  %v3359_v57 = vcombine.high %v3408_v54, %v3342_v51 }
  0x98   : >> { %v4010_v50 = vld [vmem:[%s3846_s14 + $0xf0] ss:$20 sps:$4 sm:$0xff]   ;;  %v3358_v58 = vcombine.low %v3408_v54, %v3342_v51  ;;  %v4055_v61 = vld [vmem:[%s3846_s14 + $0xd8] ss:$20 sps:$4 sm:$0xff]   ;;  %v4065_v62 = vld [vmem:[%s3846_s14 + $0x100] ss:$20 sps:$4 sm:$0xff]  }
  0x99   : >> { %391 = vmatpush1.bf16.msra.mxu0 %v373_v32  ;;  %432 = vmatpush1.bf16.msra.mxu1 %v379_v33  ;;  %v4017_v52 = vld [vmem:[%s3846_s14 + $0xb0] ss:$20 sps:$4 sm:$0xff]   ;;  %v571_v56 = vsel %vm371_vm0, %v3356_v49, 0  ;;  %v3411_v1 = vld [vmem:[%s3846_s14 + $0x134] sm:$0x33] }
  0x9a   : >> { %582 = vmatprep.subr.bf16.mxu0 %v3946_v31  ;;  %623 = vmatprep.subr.bf16.mxu1 %v3969_v38  ;;  %v4020_v53 = vld [vmem:[%s3846_s14 + $0xfc] ss:$20 sps:$4 sm:$0xff]   ;;  %v577_v60 = vsel %vm371_vm0, %v3358_v58, 0  ;;  %v4079_v18 = vcombine.low %v3408_v54, %v3411_v1  ;;  %v4092_v23 = vcombine.high %v3408_v54, %v3411_v1 }
  0x9b   : >> { %796 = vrot.lane.b32.xlu1 %v3913_v17, %s3765_s15  ;;  %794 = vrot.lane.b32.xlu0 %v3882_v11, %s3765_s15  ;;  %v3410_v63 = vld [vmem:[%s3846_s14 + $0x12c] sm:$0x33]  ;;  %v4088_v22 = vld [vmem:[%s3846_s14 + $0x128] ss:$20 sps:$4 sm:$0x3f]  }
  0x9c   : >> { %3323 = vmatmul.mubr.msk.bf16.vlgmr.msra.gmra.mrb[0].mxu0 %vm367_vm1, %v290_v35  ;;  %3325 = vmatmul.mubr.msk.bf16.vlgmr.msra.gmra.mrb[0].mxu1 %vm367_vm1, %v290_v35  ;;  %v4072_v0 = vcombine.low %v3407_v46, %v3410_v63  ;;  %v4083_v19 = vcombine.high %v3407_v46, %v3410_v63 }
  0x9d   : >> { %583 = vmatpush1.bf16.msra.mxu0 %v3964_v37  ;;  %614 = vmatprep.mubr.bf16.mxu0 %v3764_v3 }
  0x9e   : >> { %584 = vmatprep.subr.bf16.mxu0 %v3972_v39  ;;  %624 = vmatpush1.bf16.msra.mxu1 %v3981_v41 }
  0x9f   : >> { %800 = vrot.lane.b32.xlu1 %v3886_v12, %s3765_s15  ;;  %798 = vrot.lane.b32.xlu0 %v3902_v15, %s3765_s15 }
  0xa0   : >> { %625 = vmatprep.subr.bf16.mxu1 %v3994_v44  ;;  %655 = vmatprep.mubr.bf16.mxu1 %v3764_v3 }
  0xa1   : >> { %585 = vmatpush1.bf16.msra.mxu0 %v3986_v42 }
  0xa2   : >> { %586 = vmatprep.subr.bf16.mxu0 %v3997_v45  ;;  %626 = vmatpush1.bf16.msra.mxu1 %v4005_v47 }
  0xa3   : >> { %804 = vrot.lane.b32.xlu1 %v3896_v14, %s3765_s15  ;;  %802 = vrot.lane.b32.xlu0 %v3907_v16, %s3765_s15 }
  0xa4   : >> { %627 = vmatprep.subr.bf16.mxu1 %v4020_v53 }
  0xa5   : >> { %587 = vmatpush1.bf16.msra.mxu0 %v4010_v50 }
  0xa6   : >> { %3360 = vmatprep.subr.msk.bf16.mxu0 %vm371_vm0, %v3357_v48  ;;  %628 = vmatpush1.bf16.msra.mxu1 %v4028_v55 }
  0xa7   : >> { %808 = vrot.lane.b32.xlu1 %v3930_v20, %s3765_s15  ;;  %806 = vrot.lane.b32.xlu0 %v3933_v21, %s3765_s15 }
  0xa8   : >> { %3362 = vmatprep.subr.msk.bf16.mxu1 %vm371_vm0, %v3359_v57 }
  0xa9   : >> { %589 = vmatpush1.bf16.msra.mxu0 %v571_v56 }
  0xaa   : >> { %630 = vmatpush1.bf16.msra.mxu1 %v577_v60 }
  0xab   : >> { %812 = vrot.lane.b32.xlu1 %v3943_v30, %s3765_s15  ;;  %810 = vrot.lane.b32.xlu0 %v3953_v34, %s3765_s15 }
  0xac   : >> { %3361 = vmatmul.mubr.msk.bf16.vlgmr.msra.gmra.mrb[0].mxu0 %vm367_vm1, %v3343_v59 }
  0xad   : >> { %894 = vmatprep.mubr.bf16.mxu0 %v3764_v3  ;;  %3363 = vmatmul.mubr.msk.bf16.vlgmr.msra.gmra.mrb[0].mxu1 %vm367_vm1, %v3343_v59 }
  0xae   : >> { %935 = vmatprep.mubr.bf16.mxu1 %v3764_v3 }
  0xaf   : >> { %816 = vrot.lane.b32.xlu1 %v3961_v36, %s3765_s15  ;;  %814 = vrot.lane.b32.xlu0 %v3977_v40, %s3765_s15 }
  0xb3   : >> { %1062 = vrot.lane.b32.xlu1 %v3981_v41, %s3765_s15  ;;  %1060 = vrot.lane.b32.xlu0 %v3946_v31, %s3765_s15 }
  0xb7   : >> { %1066 = vrot.lane.b32.xlu1 %v4017_v52, %s3765_s15  ;;  %1064 = vrot.lane.b32.xlu0 %v3969_v38, %s3765_s15 }
  0xbb   : >> { %1070 = vrot.lane.b32.xlu1 %v3972_v39, %s3765_s15  ;;  %1058 = vrot.lane.b32.xlu0 %v3964_v37, %s3765_s15 }
  0xbf   : >> { %1074 = vrot.lane.b32.xlu1 %v3994_v44, %s3765_s15  ;;  %1072 = vrot.lane.b32.xlu0 %v4005_v47, %s3765_s15 }
  0xc3   : >> { %1068 = vrot.lane.b32.xlu1 %v3986_v42, %s3765_s15  ;;  %1076 = vrot.lane.b32.xlu0 %v4055_v61, %s3765_s15 }
  0xc7   : >> { %1082 = vrot.lane.b32.xlu1 %v4028_v55, %s3765_s15  ;;  %1080 = vrot.lane.b32.xlu0 %v3997_v45, %s3765_s15 }
  0xcb   : >> { %1086 = vrot.lane.b32.xlu1 %v4065_v62, %s3765_s15  ;;  %1084 = vrot.lane.b32.xlu0 %v4020_v53, %s3765_s15 }
  0xcf   : >> { %1088 = vrot.lane.b32.xlu1 %v4072_v0, %s3765_s15  ;;  %1078 = vrot.lane.b32.xlu0 %v4010_v50, %s3765_s15 }
  0xd3   : >> { %1092 = vrot.lane.b32.xlu1 %v4079_v18, %s3765_s15  ;;  %1090 = vrot.lane.b32.xlu0 %v4083_v19, %s3765_s15 }
  0xd7   : >> { %1096 = vrot.lane.b32.xlu1 %v4088_v22, %s3765_s15  ;;  %1094 = vrot.lane.b32.xlu0 %v4092_v23, %s3765_s15  ;;  %s3769_s15 = smov 123  }
  0xdb   : >> { %1233 = vrot.lane.b32.xlu1 %v3849_v4, %s3766_s21  ;;  %1231 = vrot.lane.b32.xlu0 %v3860_v7, %s3766_s21 }
  0xdf   : >> { %1237 = vrot.lane.b32.xlu1 %v3877_v10, %s3766_s21  ;;  %1235 = vrot.lane.b32.xlu0 %v3857_v6, %s3766_s21 }
  0xe3   : >> { %1241 = vrot.lane.b32.xlu1 %v3870_v9, %s3766_s21  ;;  %1229 = vrot.lane.b32.xlu0 %v3852_v5, %s3766_s21 }
  0xe7   : >> { %1245 = vrot.lane.b32.xlu1 %v3882_v11, %s3766_s21  ;;  %1243 = vrot.lane.b32.xlu0 %v3889_v13, %s3766_s21 }
  0xeb   : >> { %1239 = vrot.lane.b32.xlu1 %v3867_v8, %s3766_s21  ;;  %1247 = vrot.lane.b32.xlu0 %v3913_v17, %s3766_s21 }
  0xef   : >> { %1253 = vrot.lane.b32.xlu1 %v3907_v16, %s3766_s21  ;;  %1251 = vrot.lane.b32.xlu0 %v3886_v12, %s3766_s21 }
  0xf3   : >> { %1257 = vrot.lane.b32.xlu1 %v3933_v21, %s3766_s21  ;;  %1255 = vrot.lane.b32.xlu0 %v3896_v14, %s3766_s21 }
  0xf7   : >> { %1259 = vrot.lane.b32.xlu1 %v3930_v20, %s3766_s21  ;;  %1249 = vrot.lane.b32.xlu0 %v3902_v15, %s3766_s21 }
  0xfb   : >> { %1263 = vrot.lane.b32.xlu1 %v3943_v30, %s3766_s21  ;;  %1261 = vrot.lane.b32.xlu0 %v3953_v34, %s3766_s21 }
  0xfd   : >> { %v783_v24 = vpop.permute.xlu1 %782  ;;  %v779_v25 = vpop.permute.xlu0 %778 }
  0xff   : >> { %1267 = vrot.lane.b32.xlu1 %v3961_v36, %s3766_s21  ;;  %1265 = vrot.lane.b32.xlu0 %v3977_v40, %s3766_s21 }
 0x101   : >> { %v785_v26 = vpop.permute.xlu1 %784  ;;  %v781_v27 = vpop.permute.xlu0 %780 }
 0x102   : >> { %v820_v28 = vsel %vm818_vm2, %v781_v27, %v783_v24  ;;  %v819_v29 = vsel %vm818_vm2, %v779_v25, %v781_v27  ;;  %v821_v43 = vsel %vm818_vm2, %v783_v24, %v785_v26 }
 0x103   : >> { %1405 = vrot.lane.b32.xlu1 %v3981_v41, %s3766_s21  ;;  %1403 = vrot.lane.b32.xlu0 %v3946_v31, %s3766_s21 }
 0x104   : >> { %862 = vmatprep.subr.bf16.mxu0 %v820_v28 }
 0x105   : >> { %863 = vmatpush1.bf16.msra.mxu0 %v819_v29  ;;  %v789_v32 = vpop.permute.xlu1 %788  ;;  %v787_v33 = vpop.permute.xlu0 %786 }
 0x106   : >> { %v822_v35 = vsel %vm818_vm2, %v785_v26, %v787_v33 }
 0x107   : >> { %1409 = vrot.lane.b32.xlu1 %v4017_v52, %s3766_s21  ;;  %1407 = vrot.lane.b32.xlu0 %v3969_v38, %s3766_s21 }
 0x108   : >> { %903 = vmatprep.subr.bf16.mxu1 %v822_v35 }
 0x109   : >> { %904 = vmatpush1.bf16.msra.mxu1 %v821_v43  ;;  %v793_v46 = vpop.permute.xlu1 %792  ;;  %v791_v48 = vpop.permute.xlu0 %790 }
 0x10a   : >> { %v824_v49 = vsel %vm818_vm2, %v791_v48, %v793_v46  ;;  %v823_v51 = vsel %vm818_vm2, %v789_v32, %v791_v48 }
 0x10b   : >> { %1413 = vrot.lane.b32.xlu1 %v3972_v39, %s3766_s21  ;;  %1401 = vrot.lane.b32.xlu0 %v3964_v37, %s3766_s21 }
 0x10c   : >> { %864 = vmatprep.subr.bf16.mxu0 %v824_v49 }
 0x10d   : >> { %865 = vmatpush1.bf16.msra.mxu0 %v823_v51  ;;  %v797_v54 = vpop.permute.xlu1 %796  ;;  %v795_v56 = vpop.permute.xlu0 %794 }
 0x10e   : >> { %v826_v57 = vsel %vm818_vm2, %v795_v56, %v797_v54  ;;  %v825_v58 = vsel %vm818_vm2, %v793_v46, %v795_v56 }
 0x10f   : >> { %1417 = vrot.lane.b32.xlu1 %v3994_v44, %s3766_s21  ;;  %1415 = vrot.lane.b32.xlu0 %v4005_v47, %s3766_s21 }
 0x110   : >> { %905 = vmatprep.subr.bf16.mxu1 %v826_v57  ;;  %v3364_v57 = vld [vmem:[%s4999_s1 + $0x4] sm:$0x3] }
 0x111   : >> { %906 = vmatpush1.bf16.msra.mxu1 %v825_v58  ;;  %v801_v59 = vpop.permute.xlu1 %800  ;;  %v799_v60 = vpop.permute.xlu0 %798 }
 0x112   : >> { %v827_v25 = vsel %vm818_vm2, %v799_v60, %v801_v59 }
 0x113   : >> { %1411 = vrot.lane.b32.xlu1 %v3986_v42, %s3766_s21  ;;  %1419 = vrot.lane.b32.xlu0 %v4055_v61, %s3766_s21 }
 0x115   : >> { %v805_v63 = vpop.permute.xlu1 %804  ;;  %v803_v1 = vpop.permute.xlu0 %802 }
 0x116   : >> { %v828_v24 = vsel %vm818_vm2, %v801_v59, %v803_v1  ;;  %v829_v29 = vsel %vm818_vm2, %v803_v1, %v805_v63 }
 0x117   : >> { %1425 = vrot.lane.b32.xlu1 %v4028_v55, %s3766_s21  ;;  %1423 = vrot.lane.b32.xlu0 %v3997_v45, %s3766_s21 }
 0x118   : >> { %866 = vmatprep.subr.bf16.mxu0 %v828_v24 }
 0x119   : >> { %867 = vmatpush1.bf16.msra.mxu0 %v827_v25  ;;  %v809_v26 = vpop.permute.xlu1 %808  ;;  %v807_v27 = vpop.permute.xlu0 %806 }
 0x11a   : >> { %v830_v28 = vsel %vm818_vm2, %v805_v63, %v807_v27 }
 0x11b   : >> { %1429 = vrot.lane.b32.xlu1 %v4065_v62, %s3766_s21  ;;  %1427 = vrot.lane.b32.xlu0 %v4020_v53, %s3766_s21 }
 0x11c   : >> { %907 = vmatprep.subr.bf16.mxu1 %v830_v28 }
 0x11d   : >> { %908 = vmatpush1.bf16.msra.mxu1 %v829_v29  ;;  %v813_v32 = vpop.permute.xlu1 %812  ;;  %v811_v33 = vpop.permute.xlu0 %810 }
 0x11e   : >> { %v831_v35 = vsel %vm818_vm2, %v809_v26, %v811_v33  ;;  %v832_v43 = vsel %vm818_vm2, %v811_v33, %v813_v32 }
 0x11f   : >> { %1431 = vrot.lane.b32.xlu1 %v4072_v0, %s3766_s21  ;;  %1421 = vrot.lane.b32.xlu0 %v4010_v50, %s3766_s21  ;;  %v851_v46 = vsel %vm371_vm0, %v831_v35, 0 }
 0x120   : >> { %3385 = vmatprep.subr.msk.bf16.mxu0 %vm371_vm0, %v832_v43 }
 0x121   : >> { %869 = vmatpush1.bf16.msra.mxu0 %v851_v46  ;;  %v817_v48 = vpop.permute.xlu1 %816  ;;  %v815_v49 = vpop.permute.xlu0 %814 }
 0x122   : >> { %v833_v51 = vsel %vm818_vm2, %v813_v32, %v815_v49  ;;  %v834_v54 = vsel %vm818_vm2, %v815_v49, %v817_v48 }
 0x123   : >> { %1435 = vrot.lane.b32.xlu1 %v4079_v18, %s3766_s21  ;;  %1433 = vrot.lane.b32.xlu0 %v4083_v19, %s3766_s21  ;;  %v857_v56 = vsel %vm371_vm0, %v833_v51, 0 }
 0x124   : >> { %3387 = vmatprep.subr.msk.bf16.mxu1 %vm371_vm0, %v834_v54  ;;  %3386 = vmatmul.mubr.msk.bf16.vlgmr.msra.gmra.mrb[0].mxu0 %vm367_vm1, %v3364_v57 }
 0x125   : >> { %910 = vmatpush1.bf16.msra.mxu1 %v857_v56  ;;  %v1063_v58 = vpop.permute.xlu1 %1062  ;;  %v1061_v59 = vpop.permute.xlu0 %1060  ;;  %1173 = vmatprep.mubr.bf16.mxu0 %v3764_v3 }
 0x126   : >> { %v1099_v60 = vsel %vm818_vm2, %v1061_v59, %v1063_v58 }
 0x127   : >> { %1439 = vrot.lane.b32.xlu1 %v4088_v22, %s3766_s21  ;;  %1437 = vrot.lane.b32.xlu0 %v4092_v23, %s3766_s21  ;;  %s3770_s21 = smov 122  }
 0x128   : >> { %1141 = vmatprep.subr.bf16.mxu0 %v1099_v60  ;;  %3388 = vmatmul.mubr.msk.bf16.vlgmr.msra.gmra.mrb[0].mxu1 %vm367_vm1, %v3364_v57 }
 0x129   : >> { %v1067_v63 = vpop.permute.xlu1 %1066  ;;  %v1065_v1 = vpop.permute.xlu0 %1064  ;;  %1214 = vmatprep.mubr.bf16.mxu1 %v3764_v3 }
 0x12a   : >> { %v1101_v24 = vsel %vm818_vm2, %v1065_v1, %v1067_v63  ;;  %v1100_v25 = vsel %vm818_vm2, %v1063_v58, %v1065_v1 }
 0x12b   : >> { %1576 = vrot.lane.b32.xlu1 %v3849_v4, %s3767_s24  ;;  %1574 = vrot.lane.b32.xlu0 %v3860_v7, %s3767_s24 }
 0x12c   : >> { %1182 = vmatprep.subr.bf16.mxu1 %v1101_v24 }
 0x12d   : >> { %1183 = vmatpush1.bf16.msra.mxu1 %v1100_v25  ;;  %v1071_v26 = vpop.permute.xlu1 %1070  ;;  %v1059_v27 = vpop.permute.xlu0 %1058 }
 0x12e   : >> { %v1098_v28 = vsel %vm818_vm2, %v1059_v27, %v1061_v59 }
 0x12f   : >> { %1580 = vrot.lane.b32.xlu1 %v3877_v10, %s3767_s24  ;;  %1578 = vrot.lane.b32.xlu0 %v3857_v6, %s3767_s24 }
 0x130   : >> { %1142 = vmatpush1.bf16.msra.mxu0 %v1098_v28 }
 0x131   : >> { %v1075_v29 = vpop.permute.xlu1 %1074  ;;  %v1073_v32 = vpop.permute.xlu0 %1072 }
 0x132   : >> { %v1103_v33 = vsel %vm818_vm2, %v1071_v26, %v1073_v32  ;;  %v1104_v49 = vsel %vm818_vm2, %v1073_v32, %v1075_v29 }
 0x133   : >> { %1584 = vrot.lane.b32.xlu1 %v3870_v9, %s3767_s24  ;;  %1572 = vrot.lane.b32.xlu0 %v3852_v5, %s3767_s24 }
 0x134   : >> { %1143 = vmatprep.subr.bf16.mxu0 %v1103_v33 }
 0x135   : >> { %v1069_v35 = vpop.permute.xlu1 %1068  ;;  %v1077_v46 = vpop.permute.xlu0 %1076 }
 0x136   : >> { %v1102_v43 = vsel %vm818_vm2, %v1069_v35, %v1071_v26  ;;  %v1105_v48 = vsel %vm818_vm2, %v1075_v29, %v1077_v46 }
 0x137   : >> { %1588 = vrot.lane.b32.xlu1 %v3882_v11, %s3767_s24  ;;  %1144 = vmatpush1.bf16.msra.mxu0 %v1102_v43 }
 0x138   : >> { %1586 = vrot.lane.b32.xlu0 %v3889_v13, %s3767_s24  ;;  %1184 = vmatprep.subr.bf16.mxu1 %v1105_v48  ;;  %v3413_v48 = vld [vmem:[%s4999_s1 + $0x6] sm:$0x3] }
 0x139   : >> { %1185 = vmatpush1.bf16.msra.mxu1 %v1104_v49  ;;  %v1083_v51 = vpop.permute.xlu1 %1082  ;;  %v1081_v54 = vpop.permute.xlu0 %1080 }
 0x13a   : >> { %v1107_v56 = vsel %vm818_vm2, %v1081_v54, %v1083_v51 }
 0x13b   : >> { %1582 = vrot.lane.b32.xlu1 %v3867_v8, %s3767_s24  ;;  %1145 = vmatprep.subr.bf16.mxu0 %v1107_v56 }
 0x13c   : >> { %1590 = vrot.lane.b32.xlu0 %v3913_v17, %s3767_s24 }
 0x13d   : >> { %v1087_v57 = vpop.permute.xlu1 %1086  ;;  %v1085_v58 = vpop.permute.xlu0 %1084 }
 0x13e   : >> { %v1109_v59 = vsel %vm818_vm2, %v1085_v58, %v1087_v57  ;;  %v1108_v60 = vsel %vm818_vm2, %v1083_v51, %v1085_v58 }
 0x13f   : >> { %1596 = vrot.lane.b32.xlu1 %v3907_v16, %s3767_s24  ;;  %1186 = vmatprep.subr.bf16.mxu1 %v1109_v59 }
 0x140   : >> { %1594 = vrot.lane.b32.xlu0 %v3886_v12, %s3767_s24  ;;  %1187 = vmatpush1.bf16.msra.mxu1 %v1108_v60 }
 0x141   : >> { %v1089_v63 = vpop.permute.xlu1 %1088  ;;  %v1079_v1 = vpop.permute.xlu0 %1078 }
 0x142   : >> { %v1106_v24 = vsel %vm818_vm2, %v1079_v1, %v1081_v54 }
 0x143   : >> { %1600 = vrot.lane.b32.xlu1 %v3933_v21, %s3767_s24  ;;  %1146 = vmatpush1.bf16.msra.mxu0 %v1106_v24 }
 0x144   : >> { %1598 = vrot.lane.b32.xlu0 %v3896_v14, %s3767_s24 }
 0x145   : >> { %v1093_v25 = vpop.permute.xlu1 %1092  ;;  %v1091_v26 = vpop.permute.xlu0 %1090 }
 0x146   : >> { %v1110_v27 = vsel %vm818_vm2, %v1089_v63, %v1091_v26  ;;  %v1111_v28 = vsel %vm818_vm2, %v1091_v26, %v1093_v25 }
 0x147   : >> { %1602 = vrot.lane.b32.xlu1 %v3930_v20, %s3767_s24  ;;  %3434 = vmatprep.subr.msk.bf16.mxu0 %vm371_vm0, %v1111_v28  ;;  %v1130_v29 = vsel %vm371_vm0, %v1110_v27, 0 }
 0x148   : >> { %1592 = vrot.lane.b32.xlu0 %v3902_v15, %s3767_s24  ;;  %1148 = vmatpush1.bf16.msra.mxu0 %v1130_v29 }
 0x149   : >> { %v1097_v32 = vpop.permute.xlu1 %1096  ;;  %v1095_v33 = vpop.permute.xlu0 %1094 }
 0x14a   : >> { %v1112_v35 = vsel %vm818_vm2, %v1093_v25, %v1095_v33  ;;  %v1113_v43 = vsel %vm818_vm2, %v1095_v33, %v1097_v32 }
 0x14b   : >> { %1606 = vrot.lane.b32.xlu1 %v3943_v30, %s3767_s24  ;;  %3436 = vmatprep.subr.msk.bf16.mxu1 %vm371_vm0, %v1113_v43  ;;  %v1136_v46 = vsel %vm371_vm0, %v1112_v35, 0 }
 0x14c   : >> { %1604 = vrot.lane.b32.xlu0 %v3953_v34, %s3767_s24  ;;  %1189 = vmatpush1.bf16.msra.mxu1 %v1136_v46 }
 0x14d   : >> { %v1234_v49 = vpop.permute.xlu1 %1233  ;;  %3435 = vmatmul.mubr.msk.bf16.vlgmr.msra.gmra.mrb[0].mxu0 %vm367_vm1, %v3413_v48  ;;  %v1232_v51 = vpop.permute.xlu0 %1231 }
 0x14e   : >> { %1345 = vmatprep.mubr.bf16.mxu0 %v3764_v3  ;;  %v1271_v54 = vsel %vm1269_vm3, %v1232_v51, %v1234_v49 }
 0x14f   : >> { %1610 = vrot.lane.b32.xlu1 %v3961_v36, %s3767_s24  ;;  %1313 = vmatprep.subr.bf16.mxu0 %v1271_v54 }
 0x150   : >> { %1608 = vrot.lane.b32.xlu0 %v3977_v40, %s3767_s24  ;;  %3437 = vmatmul.mubr.msk.bf16.vlgmr.msra.gmra.mrb[0].mxu1 %vm367_vm1, %v3413_v48 }
 0x151   : >> { %v1238_v56 = vpop.permute.xlu1 %1237  ;;  %v1236_v57 = vpop.permute.xlu0 %1235  ;;  %1386 = vmatprep.mubr.bf16.mxu1 %v3764_v3 }
 0x152   : >> { %v1273_v58 = vsel %vm1269_vm3, %v1236_v57, %v1238_v56  ;;  %v1272_v59 = vsel %vm1269_vm3, %v1234_v49, %v1236_v57 }
 0x153   : >> { %1748 = vrot.lane.b32.xlu1 %v3981_v41, %s3767_s24  ;;  %1354 = vmatprep.subr.bf16.mxu1 %v1273_v58 }
 0x154   : >> { %1746 = vrot.lane.b32.xlu0 %v3946_v31, %s3767_s24  ;;  %1355 = vmatpush1.bf16.msra.mxu1 %v1272_v59 }
 0x155   : >> { %v1242_v60 = vpop.permute.xlu1 %1241  ;;  %v1230_v63 = vpop.permute.xlu0 %1229 }
 0x156   : >> { %v1270_v1 = vsel %vm1269_vm3, %v1230_v63, %v1232_v51 }
 0x157   : >> { %1752 = vrot.lane.b32.xlu1 %v4017_v52, %s3767_s24  ;;  %1314 = vmatpush1.bf16.msra.mxu0 %v1270_v1 }
 0x158   : >> { %1750 = vrot.lane.b32.xlu0 %v3969_v38, %s3767_s24 }
 0x159   : >> { %v1246_v24 = vpop.permute.xlu1 %1245  ;;  %v1244_v25 = vpop.permute.xlu0 %1243 }
 0x15a   : >> { %v1275_v26 = vsel %vm1269_vm3, %v1242_v60, %v1244_v25  ;;  %v1276_v33 = vsel %vm1269_vm3, %v1244_v25, %v1246_v24 }
 0x15b   : >> { %1756 = vrot.lane.b32.xlu1 %v3972_v39, %s3767_s24  ;;  %1315 = vmatprep.subr.bf16.mxu0 %v1275_v26 }
 0x15c   : >> { %1744 = vrot.lane.b32.xlu0 %v3964_v37, %s3767_s24 }
 0x15d   : >> { %v1240_v27 = vpop.permute.xlu1 %1239  ;;  %v1248_v29 = vpop.permute.xlu0 %1247 }
 0x15e   : >> { %v1274_v28 = vsel %vm1269_vm3, %v1240_v27, %v1242_v60  ;;  %v1277_v32 = vsel %vm1269_vm3, %v1246_v24, %v1248_v29 }
 0x15f   : >> { %1760 = vrot.lane.b32.xlu1 %v3994_v44, %s3767_s24  ;;  %1316 = vmatpush1.bf16.msra.mxu0 %v1274_v28 }
 0x160   : >> { %1758 = vrot.lane.b32.xlu0 %v4005_v47, %s3767_s24  ;;  %1356 = vmatprep.subr.bf16.mxu1 %v1277_v32  ;;  %v3438_v32 = vld [vmem:[%s4999_s1 + $0x8] sm:$0x3] }
 0x161   : >> { %1357 = vmatpush1.bf16.msra.mxu1 %v1276_v33  ;;  %v1254_v35 = vpop.permute.xlu1 %1253  ;;  %v1252_v43 = vpop.permute.xlu0 %1251 }
 0x162   : >> { %v1279_v46 = vsel %vm1269_vm3, %v1252_v43, %v1254_v35 }
 0x163   : >> { %1754 = vrot.lane.b32.xlu1 %v3986_v42, %s3767_s24  ;;  %1317 = vmatprep.subr.bf16.mxu0 %v1279_v46 }
 0x164   : >> { %1762 = vrot.lane.b32.xlu0 %v4055_v61, %s3767_s24 }
 0x165   : >> { %v1258_v48 = vpop.permute.xlu1 %1257  ;;  %v1256_v49 = vpop.permute.xlu0 %1255 }
 0x166   : >> { %v1281_v51 = vsel %vm1269_vm3, %v1256_v49, %v1258_v48  ;;  %v1280_v54 = vsel %vm1269_vm3, %v1254_v35, %v1256_v49 }
 0x167   : >> { %1768 = vrot.lane.b32.xlu1 %v4028_v55, %s3767_s24  ;;  %1358 = vmatprep.subr.bf16.mxu1 %v1281_v51 }
 0x168   : >> { %1766 = vrot.lane.b32.xlu0 %v3997_v45, %s3767_s24  ;;  %1359 = vmatpush1.bf16.msra.mxu1 %v1280_v54 }
 0x169   : >> { %v1260_v56 = vpop.permute.xlu1 %1259  ;;  %v1250_v57 = vpop.permute.xlu0 %1249 }
 0x16a   : >> { %v1278_v58 = vsel %vm1269_vm3, %v1250_v57, %v1252_v43 }
 0x16b   : >> { %1772 = vrot.lane.b32.xlu1 %v4065_v62, %s3767_s24  ;;  %1318 = vmatpush1.bf16.msra.mxu0 %v1278_v58 }
 0x16c   : >> { %1770 = vrot.lane.b32.xlu0 %v4020_v53, %s3767_s24 }
 0x16d   : >> { %v1264_v59 = vpop.permute.xlu1 %1263  ;;  %v1262_v60 = vpop.permute.xlu0 %1261 }
 0x16e   : >> { %v1282_v63 = vsel %vm1269_vm3, %v1260_v56, %v1262_v60  ;;  %v1283_v1 = vsel %vm1269_vm3, %v1262_v60, %v1264_v59 }
 0x16f   : >> { %1774 = vrot.lane.b32.xlu1 %v4072_v0, %s3767_s24  ;;  %3439 = vmatprep.subr.msk.bf16.mxu0 %vm371_vm0, %v1283_v1  ;;  %v1302_v24 = vsel %vm371_vm0, %v1282_v63, 0 }
 0x170   : >> { %1764 = vrot.lane.b32.xlu0 %v4010_v50, %s3767_s24  ;;  %1320 = vmatpush1.bf16.msra.mxu0 %v1302_v24 }
 0x171   : >> { %v1268_v25 = vpop.permute.xlu1 %1267  ;;  %v1266_v26 = vpop.permute.xlu0 %1265 }
 0x172   : >> { %v1284_v27 = vsel %vm1269_vm3, %v1264_v59, %v1266_v26  ;;  %v1285_v28 = vsel %vm1269_vm3, %v1266_v26, %v1268_v25 }
 0x173   : >> { %1778 = vrot.lane.b32.xlu1 %v4079_v18, %s3767_s24  ;;  %3441 = vmatprep.subr.msk.bf16.mxu1 %vm371_vm0, %v1285_v28  ;;  %v1308_v29 = vsel %vm371_vm0, %v1284_v27, 0 }
 0x174   : >> { %1776 = vrot.lane.b32.xlu0 %v4083_v19, %s3767_s24  ;;  %1361 = vmatpush1.bf16.msra.mxu1 %v1308_v29 }
 0x175   : >> { %v1406_v33 = vpop.permute.xlu1 %1405  ;;  %3440 = vmatmul.mubr.msk.bf16.vlgmr.msra.gmra.mrb[0].mxu0 %vm367_vm1, %v3438_v32  ;;  %v1404_v35 = vpop.permute.xlu0 %1403 }
 0x176   : >> { %1516 = vmatprep.mubr.bf16.mxu0 %v3764_v3  ;;  %v1442_v43 = vsel %vm1269_vm3, %v1404_v35, %v1406_v33 }
 0x177   : >> { %1782 = vrot.lane.b32.xlu1 %v4088_v22, %s3767_s24  ;;  %1484 = vmatprep.subr.bf16.mxu0 %v1442_v43 }
 0x178   : >> { %1780 = vrot.lane.b32.xlu0 %v4092_v23, %s3767_s24  ;;  %3442 = vmatmul.mubr.msk.bf16.vlgmr.msra.gmra.mrb[0].mxu1 %vm367_vm1, %v3438_v32 }
 0x179   : >> { %v1410_v46 = vpop.permute.xlu1 %1409  ;;  %v1408_v48 = vpop.permute.xlu0 %1407  ;;  %1557 = vmatprep.mubr.bf16.mxu1 %v3764_v3 }
 0x17a   : >> { %v1444_v49 = vsel %vm1269_vm3, %v1408_v48, %v1410_v46  ;;  %v1443_v51 = vsel %vm1269_vm3, %v1406_v33, %v1408_v48 }
 0x17b   : >> { %1919 = vrot.lane.b32.xlu1 %v3849_v4, %s3768_s6  ;;  %1525 = vmatprep.subr.bf16.mxu1 %v1444_v49 }
 0x17c   : >> { %1917 = vrot.lane.b32.xlu0 %v3860_v7, %s3768_s6  ;;  %1526 = vmatpush1.bf16.msra.mxu1 %v1443_v51 }
 0x17d   : >> { %v1414_v54 = vpop.permute.xlu1 %1413  ;;  %v1402_v56 = vpop.permute.xlu0 %1401 }
 0x17e   : >> { %v1441_v57 = vsel %vm1269_vm3, %v1402_v56, %v1404_v35  ;;  %v3443_v35 = vld [vmem:[%s4999_s1 + $0xa] sm:$0x3] }
 0x17f   : >> { %1923 = vrot.lane.b32.xlu1 %v3877_v10, %s3768_s6  ;;  %1485 = vmatpush1.bf16.msra.mxu0 %v1441_v57 }
 0x180   : >> { %1921 = vrot.lane.b32.xlu0 %v3857_v6, %s3768_s6 }
 0x181   : >> { %v1418_v4 = vpop.permute.xlu1 %1417  ;;  %v1416_v58 = vpop.permute.xlu0 %1415 }
 0x182   : >> { %v1446_v7 = vsel %vm1269_vm3, %v1414_v54, %v1416_v58 }
 0x183   : >> { %1927 = vrot.lane.b32.xlu1 %v3870_v9, %s3768_s6  ;;  %1486 = vmatprep.subr.bf16.mxu0 %v1446_v7  ;;  %v1447_v9 = vsel %vm1269_vm3, %v1416_v58, %v1418_v4 }
 0x184   : >> { %1915 = vrot.lane.b32.xlu0 %v3852_v5, %s3768_s6 }
 0x185   : >> { %v1412_v59 = vpop.permute.xlu1 %1411  ;;  %v1420_v63 = vpop.permute.xlu0 %1419 }
 0x186   : >> { %v1445_v60 = vsel %vm1269_vm3, %v1412_v59, %v1414_v54  ;;  %v1448_v6 = vsel %vm1269_vm3, %v1418_v4, %v1420_v63 }
 0x187   : >> { %1931 = vrot.lane.b32.xlu1 %v3882_v11, %s3768_s6  ;;  %1487 = vmatpush1.bf16.msra.mxu0 %v1445_v60 }
 0x188   : >> { %1929 = vrot.lane.b32.xlu0 %v3889_v13, %s3768_s6  ;;  %1527 = vmatprep.subr.bf16.mxu1 %v1448_v6 }
 0x189   : >> { %1528 = vmatpush1.bf16.msra.mxu1 %v1447_v9  ;;  %v1426_v10 = vpop.permute.xlu1 %1425  ;;  %v1424_v5 = vpop.permute.xlu0 %1423 }
 0x18a   : >> { %v1450_v1 = vsel %vm1269_vm3, %v1424_v5, %v1426_v10 }
 0x18b   : >> { %1925 = vrot.lane.b32.xlu1 %v3867_v8, %s3768_s6  ;;  %1488 = vmatprep.subr.bf16.mxu0 %v1450_v1 }
 0x18c   : >> { %1933 = vrot.lane.b32.xlu0 %v3913_v17, %s3768_s6 }
 0x18d   : >> { %v1430_v11 = vpop.permute.xlu1 %1429  ;;  %v1428_v24 = vpop.permute.xlu0 %1427 }
 0x18e   : >> { %v1452_v13 = vsel %vm1269_vm3, %v1428_v24, %v1430_v11  ;;  %v1451_v25 = vsel %vm1269_vm3, %v1426_v10, %v1428_v24 }
 0x18f   : >> { %1939 = vrot.lane.b32.xlu1 %v3907_v16, %s3768_s6  ;;  %1529 = vmatprep.subr.bf16.mxu1 %v1452_v13 }
 0x190   : >> { %1937 = vrot.lane.b32.xlu0 %v3886_v12, %s3768_s6  ;;  %1530 = vmatpush1.bf16.msra.mxu1 %v1451_v25  ;;  %v3448_v25 = vld [vmem:[%s4999_s1 + $0xc] sm:$0x3] }
 0x191   : >> { %v1432_v8 = vpop.permute.xlu1 %1431  ;;  %v1422_v26 = vpop.permute.xlu0 %1421 }
 0x192   : >> { %v1449_v27 = vsel %vm1269_vm3, %v1422_v26, %v1424_v5 }
 0x193   : >> { %1943 = vrot.lane.b32.xlu1 %v3933_v21, %s3768_s6  ;;  %1489 = vmatpush1.bf16.msra.mxu0 %v1449_v27 }
 0x194   : >> { %1941 = vrot.lane.b32.xlu0 %v3896_v14, %s3768_s6 }
 0x195   : >> { %v1436_v16 = vpop.permute.xlu1 %1435  ;;  %v1434_v17 = vpop.permute.xlu0 %1433 }
 0x196   : >> { %v1453_v28 = vsel %vm1269_vm3, %v1432_v8, %v1434_v17  ;;  %v1454_v12 = vsel %vm1269_vm3, %v1434_v17, %v1436_v16 }
 0x197   : >> { %1945 = vrot.lane.b32.xlu1 %v3930_v20, %s3768_s6  ;;  %3444 = vmatprep.subr.msk.bf16.mxu0 %vm371_vm0, %v1454_v12  ;;  %v1473_v21 = vsel %vm371_vm0, %v1453_v28, 0  ;;  %v4475_v28 = vld [vmem:[%s3846_s14 + $0x8] ss:$20 sps:$4 sm:$0xff]  }
 0x198   : >> { %1935 = vrot.lane.b32.xlu0 %v3902_v15, %s3768_s6  ;;  %1491 = vmatpush1.bf16.msra.mxu0 %v1473_v21  ;;  %v4482_v21 = vld [vmem:[%s3846_s14 + $0x4] ss:$20 sps:$4 sm:$0xff]  }
 0x199   : >> { %v1440_v29 = vpop.permute.xlu1 %1439  ;;  %v1438_v14 = vpop.permute.xlu0 %1437 }
 0x19a   : >> { %v1455_v32 = vsel %vm1269_vm3, %v1436_v16, %v1438_v14  ;;  %v1456_v33 = vsel %vm1269_vm3, %v1438_v14, %v1440_v29 }
 0x19b   : >> { %1949 = vrot.lane.b32.xlu1 %v3943_v30, %s3768_s6  ;;  %3446 = vmatprep.subr.msk.bf16.mxu1 %vm371_vm0, %v1456_v33  ;;  %v1479_v15 = vsel %vm371_vm0, %v1455_v32, 0  ;;  %v4488_v33 = vld [vmem:[%s3846_s14 + $0x10] ss:$20 sps:$4 sm:$0xff]  }
 0x19c   : >> { %1947 = vrot.lane.b32.xlu0 %v3953_v34, %s3768_s6  ;;  %1532 = vmatpush1.bf16.msra.mxu1 %v1479_v15  ;;  %v4493_v15 = vld [vmem:[%s3846_s14 + $0xc] ss:$20 sps:$4 sm:$0xff]  }
 0x19d   : >> { %v1577_v43 = vpop.permute.xlu1 %1576  ;;  %3445 = vmatmul.mubr.msk.bf16.vlgmr.msra.gmra.mrb[0].mxu0 %vm367_vm1, %v3443_v35  ;;  %v1575_v46 = vpop.permute.xlu0 %1574 }
 0x19e   : >> { %1688 = vmatprep.mubr.bf16.mxu0 %v3764_v3  ;;  %v1614_v48 = vsel %vm1612_vm4, %v1575_v46, %v1577_v43 }
 0x19f   : >> { %1953 = vrot.lane.b32.xlu1 %v3961_v36, %s3768_s6  ;;  %1656 = vmatprep.subr.bf16.mxu0 %v1614_v48 }
 0x1a0   : >> { %1951 = vrot.lane.b32.xlu0 %v3977_v40, %s3768_s6  ;;  %3447 = vmatmul.mubr.msk.bf16.vlgmr.msra.gmra.mrb[0].mxu1 %vm367_vm1, %v3443_v35 }
 0x1a1   : >> { %v1581_v49 = vpop.permute.xlu1 %1580  ;;  %v1579_v51 = vpop.permute.xlu0 %1578  ;;  %1729 = vmatprep.mubr.bf16.mxu1 %v3764_v3 }
 0x1a2   : >> { %v1616_v54 = vsel %vm1612_vm4, %v1579_v51, %v1581_v49  ;;  %v1615_v56 = vsel %vm1612_vm4, %v1577_v43, %v1579_v51  ;;  %v4504_v49 = vld [vmem:[%s3846_s14] ss:$20 sps:$4 sm:$0xff]  }
 0x1a3   : >> { %2091 = vrot.lane.b32.xlu1 %v3981_v41, %s3768_s6  ;;  %1697 = vmatprep.subr.bf16.mxu1 %v1616_v54 }
 0x1a4   : >> { %2089 = vrot.lane.b32.xlu0 %v3946_v31, %s3768_s6  ;;  %1698 = vmatpush1.bf16.msra.mxu1 %v1615_v56 }
 0x1a5   : >> { %v1585_v36 = vpop.permute.xlu1 %1584  ;;  %v1573_v57 = vpop.permute.xlu0 %1572 }
 0x1a6   : >> { %v1613_v4 = vsel %vm1612_vm4, %v1573_v57, %v1575_v46  ;;  %v4498_v46 = vld [vmem:[%s3846_s14 + $0x2c] ss:$20 sps:$4 sm:$0xff]  }
 0x1a7   : >> { %2095 = vrot.lane.b32.xlu1 %v4017_v52, %s3768_s6  ;;  %1657 = vmatpush1.bf16.msra.mxu0 %v1613_v4  ;;  %v4516_v4 = vld [vmem:[%s3846_s14 + $0x30] ss:$20 sps:$4 sm:$0xff]  }
 0x1a8   : >> { %2093 = vrot.lane.b32.xlu0 %v3969_v38, %s3768_s6 }
 0x1a9   : >> { %v1589_v41 = vpop.permute.xlu1 %1588 }
 0x1aa   : >> { %v1587_v58 = vpop.permute.xlu0 %1586 }
 0x1ab   : >> { %2099 = vrot.lane.b32.xlu1 %v3972_v39, %s3768_s6  ;;  %v1618_v31 = vsel %vm1612_vm4, %v1585_v36, %v1587_v58  ;;  %v1619_v39 = vsel %vm1612_vm4, %v1587_v58, %v1589_v41 }
 0x1ac   : >> { %2087 = vrot.lane.b32.xlu0 %v3964_v37, %s3768_s6  ;;  %1658 = vmatprep.subr.bf16.mxu0 %v1618_v31 }
 0x1ad   : >> { %v1583_v7 = vpop.permute.xlu1 %1582 }
 0x1ae   : >> { %v1617_v59 = vsel %vm1612_vm4, %v1583_v7, %v1585_v36  ;;  %v1591_v60 = vpop.permute.xlu0 %1590  ;;  %v4510_v36 = vld [vmem:[%s3846_s14 + $0x34] ss:$20 sps:$4 sm:$0xff]  }
 0x1af   : >> { %2103 = vrot.lane.b32.xlu1 %v3994_v44, %s3768_s6  ;;  %1659 = vmatpush1.bf16.msra.mxu0 %v1617_v59  ;;  %v1620_v38 = vsel %vm1612_vm4, %v1589_v41, %v1591_v60  ;;  %v4522_v7 = vld [vmem:[%s3846_s14 + $0x28] ss:$20 sps:$4 sm:$0xff]   ;;  %v4528_v60 = vld [vmem:[%s3846_s14 + $0x38] ss:$20 sps:$4 sm:$0xff]  }
 0x1b0   : >> { %2101 = vrot.lane.b32.xlu0 %v4005_v47, %s3768_s6  ;;  %1699 = vmatprep.subr.bf16.mxu1 %v1620_v38 }
 0x1b1   : >> { %1700 = vmatpush1.bf16.msra.mxu1 %v1619_v39  ;;  %v1597_v52 = vpop.permute.xlu1 %1596 }
 0x1b2   : >> { %v1595_v37 = vpop.permute.xlu0 %1594 }
 0x1b3   : >> { %2097 = vrot.lane.b32.xlu1 %v3986_v42, %s3768_s6  ;;  %v1622_v63 = vsel %vm1612_vm4, %v1595_v37, %v1597_v52 }
 0x1b4   : >> { %2105 = vrot.lane.b32.xlu0 %v4055_v61, %s3768_s6  ;;  %1660 = vmatprep.subr.bf16.mxu0 %v1622_v63 }
 0x1b5   : >> { %v1601_v44 = vpop.permute.xlu1 %1600 }
 0x1b6   : >> { %v1599_v6 = vpop.permute.xlu0 %1598 }
 0x1b7   : >> { %2111 = vrot.lane.b32.xlu1 %v4028_v55, %s3768_s6  ;;  %v1624_v47 = vsel %vm1612_vm4, %v1599_v6, %v1601_v44  ;;  %v1623_v9 = vsel %vm1612_vm4, %v1597_v52, %v1599_v6  ;;  %v4533_v52 = vld [vmem:[%s3846_s14 + $0x58] ss:$20 sps:$4 sm:$0xff]   ;;  %v4540_v44 = vld [vmem:[%s3846_s14 + $0x54] ss:$20 sps:$4 sm:$0xff]  }
 0x1b8   : >> { %2109 = vrot.lane.b32.xlu0 %v3997_v45, %s3768_s6  ;;  %1701 = vmatprep.subr.bf16.mxu1 %v1624_v47 }
 0x1b9   : >> { %1702 = vmatpush1.bf16.msra.mxu1 %v1623_v9  ;;  %v1603_v42 = vpop.permute.xlu1 %1602 }
 0x1ba   : >> { %v1593_v10 = vpop.permute.xlu0 %1592 }
 0x1bb   : >> { %v1621_v5 = vsel %vm1612_vm4, %v1593_v10, %v1595_v37  ;;  %2115 = vrot.lane.b32.xlu1 %v4065_v62, %s3768_s6  ;;  %v4551_v10 = vld [vmem:[%s3846_s14 + $0x5c] ss:$20 sps:$4 sm:$0xff]  }
 0x1bc   : >> { %2113 = vrot.lane.b32.xlu0 %v4020_v53, %s3768_s6  ;;  %1661 = vmatpush1.bf16.msra.mxu0 %v1621_v5 }
 0x1bd   : >> { %v1607_v55 = vpop.permute.xlu1 %1606 }
 0x1be   : >> { %v1605_v61 = vpop.permute.xlu0 %1604 }
 0x1bf   : >> { %v1625_v1 = vsel %vm1612_vm4, %v1603_v42, %v1605_v61  ;;  %2117 = vrot.lane.b32.xlu1 %v4072_v0, %s3768_s6  ;;  %v1626_v45 = vsel %vm1612_vm4, %v1605_v61, %v1607_v55  ;;  %v4546_v42 = vld [vmem:[%s3846_s14 + $0x60] ss:$20 sps:$4 sm:$0xff]  }
 0x1c0   : >> { %2107 = vrot.lane.b32.xlu0 %v4010_v50, %s3768_s6  ;;  %3449 = vmatprep.subr.msk.bf16.mxu0 %vm371_vm0, %v1626_v45  ;;  %v1645_v62 = vsel %vm371_vm0, %v1625_v1, 0  ;;  %v4560_v45 = vld [vmem:[%s3846_s14 + $0x50] ss:$20 sps:$4 sm:$0xff]  }
 0x1c1   : >> { %1663 = vmatpush1.bf16.msra.mxu0 %v1645_v62  ;;  %v1611_v11 = vpop.permute.xlu1 %1610 }
 0x1c2   : >> { %v1609_v53 = vpop.permute.xlu0 %1608 }
 0x1c3   : >> { %v1627_v24 = vsel %vm1612_vm4, %v1607_v55, %v1609_v53  ;;  %2121 = vrot.lane.b32.xlu1 %v4079_v18, %s3768_s6  ;;  %v1628_v13 = vsel %vm1612_vm4, %v1609_v53, %v1611_v11 }
 0x1c4   : >> { %2119 = vrot.lane.b32.xlu0 %v4083_v19, %s3768_s6  ;;  %3451 = vmatprep.subr.msk.bf16.mxu1 %vm371_vm0, %v1628_v13  ;;  %v1651_v50 = vsel %vm371_vm0, %v1627_v24, 0 }
 0x1c5   : >> { %1704 = vmatpush1.bf16.msra.mxu1 %v1651_v50  ;;  %v1749_v8 = vpop.permute.xlu1 %1748  ;;  %3450 = vmatmul.mubr.msk.bf16.vlgmr.msra.gmra.mrb[0].mxu0 %vm367_vm1, %v3448_v25 }
 0x1c6   : >> { %v1747_v26 = vpop.permute.xlu0 %1746  ;;  %1859 = vmatprep.mubr.bf16.mxu0 %v3764_v3 }
 0x1c7   : >> { %2125 = vrot.lane.b32.xlu1 %v4088_v22, %s3768_s6  ;;  %v1785_v27 = vsel %vm1612_vm4, %v1747_v26, %v1749_v8 }
 0x1c8   : >> { %2123 = vrot.lane.b32.xlu0 %v4092_v23, %s3768_s6  ;;  %1827 = vmatprep.subr.bf16.mxu0 %v1785_v27  ;;  %v4580_v27 = vld [vmem:[%s3846_s14 + $0x88] ss:$20 sps:$4 sm:$0x3f]  }
 0x1c9   : >> { %v1753_v16 = vpop.permute.xlu1 %1752  ;;  %3452 = vmatmul.mubr.msk.bf16.vlgmr.msra.gmra.mrb[0].mxu1 %vm367_vm1, %v3448_v25  ;;  %v3453_v25 = vld [vmem:[%s4999_s1 + $0xe] sm:$0x3] }
 0x1ca   : >> { %v1751_v17 = vpop.permute.xlu0 %1750  ;;  %1900 = vmatprep.mubr.bf16.mxu1 %v3764_v3 }
 0x1cb   : >> { %2262 = vrot.lane.b32.xlu1 %v4475_v28, %s3769_s15  ;;  %v1787_v22 = vsel %vm1612_vm4, %v1751_v17, %v1753_v16  ;;  %v1786_v12 = vsel %vm1612_vm4, %v1749_v8, %v1751_v17 }
 0x1cc   : >> { %2260 = vrot.lane.b32.xlu0 %v4482_v21, %s3769_s15  ;;  %1868 = vmatprep.subr.bf16.mxu1 %v1787_v22 }
 0x1cd   : >> { %1869 = vmatpush1.bf16.msra.mxu1 %v1786_v12  ;;  %v1757_v29 = vpop.permute.xlu1 %1756  ;;  %v4590_v12 = vld [vmem:[%s3846_s14 + $0xa8] ss:$20 sps:$4 sm:$0xff]  }
 0x1ce   : >> { %v1745_v14 = vpop.permute.xlu0 %1744 }
 0x1cf   : >> { %v1784_v32 = vsel %vm1612_vm4, %v1745_v14, %v1747_v26  ;;  %2266 = vrot.lane.b32.xlu1 %v4488_v33, %s3769_s15 }
 0x1d0   : >> { %2264 = vrot.lane.b32.xlu0 %v4493_v15, %s3769_s15  ;;  %1828 = vmatpush1.bf16.msra.mxu0 %v1784_v32  ;;  %v4597_v32 = vld [vmem:[%s3846_s14 + $0xa4] ss:$20 sps:$4 sm:$0xff]  }
 0x1d1   : >> { %v1761_v35 = vpop.permute.xlu1 %1760 }
 0x1d2   : >> { %v1759_v43 = vpop.permute.xlu0 %1758 }
 0x1d3   : >> { %2270 = vrot.lane.b32.xlu1 %v4498_v46, %s3769_s15  ;;  %v1789_v48 = vsel %vm1612_vm4, %v1757_v29, %v1759_v43  ;;  %v1790_v41 = vsel %vm1612_vm4, %v1759_v43, %v1761_v35 }
 0x1d4   : >> { %2258 = vrot.lane.b32.xlu0 %v4504_v49, %s3769_s15  ;;  %1829 = vmatprep.subr.bf16.mxu0 %v1789_v48 }
 0x1d5   : >> { %v1755_v51 = vpop.permute.xlu1 %1754 }
 0x1d6   : >> { %v1788_v54 = vsel %vm1612_vm4, %v1755_v51, %v1757_v29  ;;  %v1763_v56 = vpop.permute.xlu0 %1762  ;;  %v4603_v51 = vld [vmem:[%s3846_s14 + $0xb0] ss:$20 sps:$4 sm:$0xff]  }
 0x1d7   : >> { %2274 = vrot.lane.b32.xlu1 %v4510_v36, %s3769_s15  ;;  %1830 = vmatpush1.bf16.msra.mxu0 %v1788_v54  ;;  %v1791_v57 = vsel %vm1612_vm4, %v1761_v35, %v1763_v56  ;;  %v4608_v54 = vld [vmem:[%s3846_s14 + $0xac] ss:$20 sps:$4 sm:$0xff]  }
 0x1d8   : >> { %2272 = vrot.lane.b32.xlu0 %v4516_v4, %s3769_s15  ;;  %1870 = vmatprep.subr.bf16.mxu1 %v1791_v57 }
 0x1d9   : >> { %1871 = vmatpush1.bf16.msra.mxu1 %v1790_v41  ;;  %v1769_v58 = vpop.permute.xlu1 %1768  ;;  %v4613_v41 = vld [vmem:[%s3846_s14 + $0xcc] ss:$20 sps:$4 sm:$0xff]  }
 0x1da   : >> { %v1767_v31 = vpop.permute.xlu0 %1766 }
 0x1db   : >> { %2268 = vrot.lane.b32.xlu1 %v4522_v7, %s3769_s15  ;;  %v1793_v59 = vsel %vm1612_vm4, %v1767_v31, %v1769_v58 }
 0x1dc   : >> { %2276 = vrot.lane.b32.xlu0 %v4528_v60, %s3769_s15  ;;  %1831 = vmatprep.subr.bf16.mxu0 %v1793_v59 }
 0x1dd   : >> { %v1773_v38 = vpop.permute.xlu1 %1772 }
 0x1de   : >> { %v1771_v39 = vpop.permute.xlu0 %1770 }
 0x1df   : >> { %2282 = vrot.lane.b32.xlu1 %v4533_v52, %s3769_s15  ;;  %v1795_v37 = vsel %vm1612_vm4, %v1771_v39, %v1773_v38  ;;  %v1794_v63 = vsel %vm1612_vm4, %v1769_v58, %v1771_v39 }
 0x1e0   : >> { %2280 = vrot.lane.b32.xlu0 %v4540_v44, %s3769_s15  ;;  %1872 = vmatprep.subr.bf16.mxu1 %v1795_v37  ;;  %v4625_v37 = vld [vmem:[%s3846_s14 + $0xd4] ss:$20 sps:$4 sm:$0xff]  }
 0x1e1   : >> { %1873 = vmatpush1.bf16.msra.mxu1 %v1794_v63  ;;  %v1775_v6 = vpop.permute.xlu1 %1774 }
 0x1e2   : >> { %v1765_v47 = vpop.permute.xlu0 %1764 }
 0x1e3   : >> { %v1792_v9 = vsel %vm1612_vm4, %v1765_v47, %v1767_v31  ;;  %2286 = vrot.lane.b32.xlu1 %v4546_v42, %s3769_s15  ;;  %v4619_v31 = vld [vmem:[%s3846_s14 + $0xa0] ss:$20 sps:$4 sm:$0xff]  }
 0x1e4   : >> { %2284 = vrot.lane.b32.xlu0 %v4551_v10, %s3769_s15  ;;  %1832 = vmatpush1.bf16.msra.mxu0 %v1792_v9 }
 0x1e5   : >> { %v1779_v5 = vpop.permute.xlu1 %1778 }
 0x1e6   : >> { %v1777_v55 = vpop.permute.xlu0 %1776 }
 0x1e7   : >> { %v1796_v61 = vsel %vm1612_vm4, %v1775_v6, %v1777_v55  ;;  %2288 = vrot.lane.b32.xlu1 %v3930_v20, %s3769_s15  ;;  %v1797_v1 = vsel %vm1612_vm4, %v1777_v55, %v1779_v5  ;;  %v4631_v6 = vld [vmem:[%s3846_s14 + $0xd0] ss:$20 sps:$4 sm:$0xff]   ;;  %v4637_v55 = vld [vmem:[%s3846_s14 + $0xc8] ss:$20 sps:$4 sm:$0xff]  }
 0x1e8   : >> { %2278 = vrot.lane.b32.xlu0 %v4560_v45, %s3769_s15  ;;  %3454 = vmatprep.subr.msk.bf16.mxu0 %vm371_vm0, %v1797_v1  ;;  %v1816_v62 = vsel %vm371_vm0, %v1796_v61, 0  ;;  %v4643_v1 = vld [vmem:[%s3846_s14 + $0xd8] ss:$20 sps:$4 sm:$0xff]  }
 0x1e9   : >> { %1834 = vmatpush1.bf16.msra.mxu0 %v1816_v62  ;;  %v1783_v11 = vpop.permute.xlu1 %1782 }
 0x1ea   : >> { %v1781_v53 = vpop.permute.xlu0 %1780 }
 0x1eb   : >> { %v1798_v24 = vsel %vm1612_vm4, %v1779_v5, %v1781_v53  ;;  %2292 = vrot.lane.b32.xlu1 %v3943_v30, %s3769_s15  ;;  %v1799_v13 = vsel %vm1612_vm4, %v1781_v53, %v1783_v11  ;;  %v4648_v53 = vld [vmem:[%s3846_s14 + $0xf8] ss:$20 sps:$4 sm:$0xff]  }
 0x1ec   : >> { %2290 = vrot.lane.b32.xlu0 %v3953_v34, %s3769_s15  ;;  %3456 = vmatprep.subr.msk.bf16.mxu1 %vm371_vm0, %v1799_v13  ;;  %v1822_v50 = vsel %vm371_vm0, %v1798_v24, 0 }
 0x1ed   : >> { %1875 = vmatpush1.bf16.msra.mxu1 %v1822_v50  ;;  %v1920_v8 = vpop.permute.xlu1 %1919  ;;  %3455 = vmatmul.mubr.msk.bf16.vlgmr.msra.gmra.mrb[0].mxu0 %vm367_vm1, %v3453_v25  ;;  %v4655_v50 = vld [vmem:[%s3846_s14 + $0xf4] ss:$20 sps:$4 sm:$0xff]  }
 0x1ee   : >> { %v1918_v26 = vpop.permute.xlu0 %1917  ;;  %2031 = vmatprep.mubr.bf16.mxu0 %v3764_v3 }
 0x1ef   : >> { %2296 = vrot.lane.b32.xlu1 %v4580_v27, %s3769_s15  ;;  %v1957_v16 = vsel %vm1955_vm5, %v1918_v26, %v1920_v8 }
 0x1f0   : >> { %2294 = vrot.lane.b32.xlu0 %v3977_v40, %s3769_s15  ;;  %1999 = vmatprep.subr.bf16.mxu0 %v1957_v16  ;;  %v4661_v16 = vld [vmem:[%s3846_s14 + $0x100] ss:$20 sps:$4 sm:$0xff]  }
 0x1f1   : >> { %v1924_v17 = vpop.permute.xlu1 %1923  ;;  %3457 = vmatmul.mubr.msk.bf16.vlgmr.msra.gmra.mrb[0].mxu1 %vm367_vm1, %v3453_v25 }
 0x1f2   : >> { %v1922_v22 = vpop.permute.xlu0 %1921  ;;  %2072 = vmatprep.mubr.bf16.mxu1 %v3764_v3 }
 0x1f3   : >> { %2434 = vrot.lane.b32.xlu1 %v4590_v12, %s3769_s15  ;;  %v1959_v29 = vsel %vm1955_vm5, %v1922_v22, %v1924_v17  ;;  %v1958_v14 = vsel %vm1955_vm5, %v1920_v8, %v1922_v22  ;;  %v4666_v17 = vld [vmem:[%s3846_s14 + $0xfc] ss:$20 sps:$4 sm:$0xff]  }
 0x1f4   : >> { %2432 = vrot.lane.b32.xlu0 %v4597_v32, %s3769_s15  ;;  %2040 = vmatprep.subr.bf16.mxu1 %v1959_v29 }
 0x1f5   : >> { %2041 = vmatpush1.bf16.msra.mxu1 %v1958_v14  ;;  %v1928_v35 = vpop.permute.xlu1 %1927 }
 0x1f6   : >> { %v1916_v43 = vpop.permute.xlu0 %1915 }
 0x1f7   : >> { %v1956_v48 = vsel %vm1955_vm5, %v1916_v43, %v1918_v26  ;;  %2438 = vrot.lane.b32.xlu1 %v4603_v51, %s3769_s15  ;;  %v4675_v43 = vld [vmem:[%s3846_s14 + $0xf0] ss:$20 sps:$4 sm:$0xff]  }
 0x1f8   : >> { %2436 = vrot.lane.b32.xlu0 %v4608_v54, %s3769_s15  ;;  %2000 = vmatpush1.bf16.msra.mxu0 %v1956_v48 }
 0x1f9   : >> { %v1932_v56 = vpop.permute.xlu1 %1931 }
 0x1fa   : >> { %v1930_v57 = vpop.permute.xlu0 %1929 }
 0x1fb   : >> { %2442 = vrot.lane.b32.xlu1 %v4613_v41, %s3769_s15  ;;  %v1961_v58 = vsel %vm1955_vm5, %v1928_v35, %v1930_v57  ;;  %v1962_v47 = vsel %vm1955_vm5, %v1930_v57, %v1932_v56 }
 0x1fc   : >> { %2430 = vrot.lane.b32.xlu0 %v4619_v31, %s3769_s15  ;;  %2001 = vmatprep.subr.bf16.mxu0 %v1961_v58 }
 0x1fd   : >> { %v1926_v59 = vpop.permute.xlu1 %1925 }
 0x1fe   : >> { %v1960_v38 = vsel %vm1955_vm5, %v1926_v59, %v1928_v35  ;;  %v1934_v39 = vpop.permute.xlu0 %1933 }
 0x1ff   : >> { %2446 = vrot.lane.b32.xlu1 %v4625_v37, %s3769_s15  ;;  %2002 = vmatpush1.bf16.msra.mxu0 %v1960_v38  ;;  %v1963_v63 = vsel %vm1955_vm5, %v1932_v56, %v1934_v39  ;;  %v3458_v39 = vld [vmem:[%s4999_s1 + $0x10] sm:$0x3] }
 0x200   : >> { %2444 = vrot.lane.b32.xlu0 %v4631_v6, %s3769_s15  ;;  %2042 = vmatprep.subr.bf16.mxu1 %v1963_v63 }
 0x201   : >> { %2043 = vmatpush1.bf16.msra.mxu1 %v1962_v47  ;;  %v1940_v9 = vpop.permute.xlu1 %1939 }
 0x202   : >> { %v1938_v5 = vpop.permute.xlu0 %1937 }
 0x203   : >> { %2440 = vrot.lane.b32.xlu1 %v4637_v55, %s3769_s15  ;;  %v1965_v61 = vsel %vm1955_vm5, %v1938_v5, %v1940_v9 }
 0x204   : >> { %2448 = vrot.lane.b32.xlu0 %v4643_v1, %s3769_s15  ;;  %2003 = vmatprep.subr.bf16.mxu0 %v1965_v61 }
 0x205   : >> { %v1944_v62 = vpop.permute.xlu1 %1943 }
 0x206   : >> { %v1942_v11 = vpop.permute.xlu0 %1941 }
 0x207   : >> { %2454 = vrot.lane.b32.xlu1 %v4648_v53, %s3769_s15  ;;  %v1967_v24 = vsel %vm1955_vm5, %v1942_v11, %v1944_v62  ;;  %v1966_v13 = vsel %vm1955_vm5, %v1940_v9, %v1942_v11  ;;  %v4695_v9 = vld [vmem:[%s3846_s14 + $0x128] ss:$20 sps:$4 sm:$0x3f]  }
 0x208   : >> { %2452 = vrot.lane.b32.xlu0 %v4655_v50, %s3769_s15  ;;  %2044 = vmatprep.subr.bf16.mxu1 %v1967_v24 }
 0x209   : >> { %2045 = vmatpush1.bf16.msra.mxu1 %v1966_v13  ;;  %v1946_v25 = vpop.permute.xlu1 %1945 }
 0x20a   : >> { %v1936_v8 = vpop.permute.xlu0 %1935 }
 0x20b   : >> { %v1964_v26 = vsel %vm1955_vm5, %v1936_v8, %v1938_v5  ;;  %2458 = vrot.lane.b32.xlu1 %v4661_v16, %s3769_s15 }
 0x20c   : >> { %2456 = vrot.lane.b32.xlu0 %v4666_v17, %s3769_s15  ;;  %2004 = vmatpush1.bf16.msra.mxu0 %v1964_v26 }
 0x20d   : >> { %v1950_v22 = vpop.permute.xlu1 %1949 }
 0x20e   : >> { %v1948_v29 = vpop.permute.xlu0 %1947 }
 0x20f   : >> { %v1968_v14 = vsel %vm1955_vm5, %v1946_v25, %v1948_v29  ;;  %2460 = vrot.lane.b32.xlu1 %v4072_v0, %s3769_s15  ;;  %v1969_v35 = vsel %vm1955_vm5, %v1948_v29, %v1950_v22 }
 0x210   : >> { %2450 = vrot.lane.b32.xlu0 %v4675_v43, %s3769_s15  ;;  %3459 = vmatprep.subr.msk.bf16.mxu0 %vm371_vm0, %v1969_v35  ;;  %v1988_v48 = vsel %vm371_vm0, %v1968_v14, 0 }
 0x211   : >> { %2006 = vmatpush1.bf16.msra.mxu0 %v1988_v48  ;;  %v1954_v56 = vpop.permute.xlu1 %1953 }
 0x212   : >> { %v1952_v57 = vpop.permute.xlu0 %1951 }
 0x213   : >> { %v1970_v58 = vsel %vm1955_vm5, %v1950_v22, %v1952_v57  ;;  %2464 = vrot.lane.b32.xlu1 %v4079_v18, %s3769_s15  ;;  %v1971_v59 = vsel %vm1955_vm5, %v1952_v57, %v1954_v56 }
 0x214   : >> { %2462 = vrot.lane.b32.xlu0 %v4083_v19, %s3769_s15  ;;  %3461 = vmatprep.subr.msk.bf16.mxu1 %vm371_vm0, %v1971_v59  ;;  %v1994_v38 = vsel %vm371_vm0, %v1970_v58, 0 }
 0x215   : >> { %2047 = vmatpush1.bf16.msra.mxu1 %v1994_v38  ;;  %v2092_v63 = vpop.permute.xlu1 %2091  ;;  %3460 = vmatmul.mubr.msk.bf16.vlgmr.msra.gmra.mrb[0].mxu0 %vm367_vm1, %v3458_v39 }
 0x216   : >> { %v2090_v47 = vpop.permute.xlu0 %2089  ;;  %2202 = vmatprep.mubr.bf16.mxu0 %v3764_v3 }
 0x217   : >> { %2468 = vrot.lane.b32.xlu1 %v4695_v9, %s3769_s15  ;;  %v2128_v5 = vsel %vm1955_vm5, %v2090_v47, %v2092_v63 }
 0x218   : >> { %2466 = vrot.lane.b32.xlu0 %v4092_v23, %s3769_s15  ;;  %2170 = vmatprep.subr.bf16.mxu0 %v2128_v5  ;;  %s3507_s15 = sshll.u32 %s3761_s12, 4  ;;  %s270_s12 = sadd.s32 1, %s3761_s12  }
 0x219   : >> { %v2096_v61 = vpop.permute.xlu1 %2095  ;;  %3462 = vmatmul.mubr.msk.bf16.vlgmr.msra.gmra.mrb[0].mxu1 %vm367_vm1, %v3458_v39  ;;  %s3116_s16 = scalar_lea.vmem %s3818_s26, %s3507_s15  ;;  %s3134_s17 = scalar_lea.vmem %s3823_s29, %s3507_s15 }
 0x21a   : >> { %v2094_v62 = vpop.permute.xlu0 %2093  ;;  %2243 = vmatprep.mubr.bf16.mxu1 %v3764_v3  ;;  %p267_p4 = scmp.ge.s32.totalorder %s270_s12, 2  }
 0x21b   : >> { %2605 = vrot.lane.b32.xlu1 %v4475_v28, %s3770_s21  ;;  %v2130_v11 = vsel %vm1955_vm5, %v2094_v62, %v2096_v61  ;;  %v2129_v24 = vsel %vm1955_vm5, %v2092_v63, %v2094_v62 }
 0x21c   : >> { %2603 = vrot.lane.b32.xlu0 %v4482_v21, %s3770_s21  ;;  %2211 = vmatprep.subr.bf16.mxu1 %v2130_v11 }
 0x21d   : >> { %2212 = vmatpush1.bf16.msra.mxu1 %v2129_v24  ;;  %v2100_v13 = vpop.permute.xlu1 %2099 }
 0x21e   : >> { %v2088_v25 = vpop.permute.xlu0 %2087 }
 0x21f   : >> { %v2127_v8 = vsel %vm1955_vm5, %v2088_v25, %v2090_v47  ;;  %2609 = vrot.lane.b32.xlu1 %v4488_v33, %s3770_s21 }
 0x220   : >> { %2607 = vrot.lane.b32.xlu0 %v4493_v15, %s3770_s21  ;;  %2171 = vmatpush1.bf16.msra.mxu0 %v2127_v8 }
 0x221   : >> { %v2104_v26 = vpop.permute.xlu1 %2103 }
 0x222   : >> { %v2102_v22 = vpop.permute.xlu0 %2101 }
 0x223   : >> { %2613 = vrot.lane.b32.xlu1 %v4498_v46, %s3770_s21  ;;  %v2132_v29 = vsel %vm1955_vm5, %v2100_v13, %v2102_v22  ;;  %v2133_v57 = vsel %vm1955_vm5, %v2102_v22, %v2104_v26 }
 0x224   : >> { %2601 = vrot.lane.b32.xlu0 %v4504_v49, %s3770_s21  ;;  %2172 = vmatprep.subr.bf16.mxu0 %v2132_v29 }
 0x225   : >> { %v2098_v14 = vpop.permute.xlu1 %2097 }
 0x226   : >> { %v2131_v35 = vsel %vm1955_vm5, %v2098_v14, %v2100_v13  ;;  %v2106_v48 = vpop.permute.xlu0 %2105 }
 0x227   : >> { %2617 = vrot.lane.b32.xlu1 %v4510_v36, %s3770_s21  ;;  %2173 = vmatpush1.bf16.msra.mxu0 %v2131_v35  ;;  %v2134_v56 = vsel %vm1955_vm5, %v2104_v26, %v2106_v48 }
 0x228   : >> { %2615 = vrot.lane.b32.xlu0 %v4516_v4, %s3770_s21  ;;  %2213 = vmatprep.subr.bf16.mxu1 %v2134_v56  ;;  %v3463_v56 = vld [vmem:[%s4999_s1 + $0x12] sm:$0x3] }
 0x229   : >> { %2214 = vmatpush1.bf16.msra.mxu1 %v2133_v57  ;;  %v2112_v58 = vpop.permute.xlu1 %2111 }
 0x22a   : >> { %v2110_v59 = vpop.permute.xlu0 %2109 }
 0x22b   : >> { %2611 = vrot.lane.b32.xlu1 %v4522_v7, %s3770_s21  ;;  %v2136_v38 = vsel %vm1955_vm5, %v2110_v59, %v2112_v58 }
 0x22c   : >> { %2619 = vrot.lane.b32.xlu0 %v4528_v60, %s3770_s21  ;;  %2174 = vmatprep.subr.bf16.mxu0 %v2136_v38 }
 0x22d   : >> { %v2116_v39 = vpop.permute.xlu1 %2115 }
 0x22e   : >> { %v2114_v63 = vpop.permute.xlu0 %2113 }
 0x22f   : >> { %2625 = vrot.lane.b32.xlu1 %v4533_v52, %s3770_s21  ;;  %v2138_v47 = vsel %vm1955_vm5, %v2114_v63, %v2116_v39  ;;  %v2137_v5 = vsel %vm1955_vm5, %v2112_v58, %v2114_v63 }
 0x230   : >> { %2623 = vrot.lane.b32.xlu0 %v4540_v44, %s3770_s21  ;;  %2215 = vmatprep.subr.bf16.mxu1 %v2138_v47 }
 0x231   : >> { %2216 = vmatpush1.bf16.msra.mxu1 %v2137_v5  ;;  %v2118_v61 = vpop.permute.xlu1 %2117 }
 0x232   : >> { %v2108_v62 = vpop.permute.xlu0 %2107 }
 0x233   : >> { %v2135_v11 = vsel %vm1955_vm5, %v2108_v62, %v2110_v59  ;;  %2629 = vrot.lane.b32.xlu1 %v4546_v42, %s3770_s21 }
 0x234   : >> { %2627 = vrot.lane.b32.xlu0 %v4551_v10, %s3770_s21  ;;  %2175 = vmatpush1.bf16.msra.mxu0 %v2135_v11 }
 0x235   : >> { %v2122_v24 = vpop.permute.xlu1 %2121 }
 0x236   : >> { %v2120_v13 = vpop.permute.xlu0 %2119 }
 0x237   : >> { %v2139_v25 = vsel %vm1955_vm5, %v2118_v61, %v2120_v13  ;;  %2631 = vrot.lane.b32.xlu1 %v3930_v20, %s3770_s21  ;;  %v2140_v8 = vsel %vm1955_vm5, %v2120_v13, %v2122_v24 }
 0x238   : >> { %2621 = vrot.lane.b32.xlu0 %v4560_v45, %s3770_s21  ;;  %3464 = vmatprep.subr.msk.bf16.mxu0 %vm371_vm0, %v2140_v8  ;;  %v2159_v26 = vsel %vm371_vm0, %v2139_v25, 0 }
 0x239   : >> { %2177 = vmatpush1.bf16.msra.mxu0 %v2159_v26  ;;  %v2126_v22 = vpop.permute.xlu1 %2125 }
 0x23a   : >> { %v2124_v29 = vpop.permute.xlu0 %2123 }
 0x23b   : >> { %v2141_v14 = vsel %vm1955_vm5, %v2122_v24, %v2124_v29  ;;  %2635 = vrot.lane.b32.xlu1 %v3943_v30, %s3770_s21  ;;  %v2142_v35 = vsel %vm1955_vm5, %v2124_v29, %v2126_v22 }
 0x23c   : >> { %2633 = vrot.lane.b32.xlu0 %v3953_v34, %s3770_s21  ;;  %3466 = vmatprep.subr.msk.bf16.mxu1 %vm371_vm0, %v2142_v35  ;;  %v2165_v48 = vsel %vm371_vm0, %v2141_v14, 0 }
 0x23d   : >> { %2218 = vmatpush1.bf16.msra.mxu1 %v2165_v48  ;;  %v2263_v57 = vpop.permute.xlu1 %2262  ;;  %3465 = vmatmul.mubr.msk.bf16.vlgmr.msra.gmra.mrb[0].mxu0 %vm367_vm1, %v3463_v56 }
 0x23e   : >> { %v2261_v58 = vpop.permute.xlu0 %2260  ;;  %2374 = vmatprep.mubr.bf16.mxu0 %v3764_v3 }
 0x23f   : >> { %2639 = vrot.lane.b32.xlu1 %v4580_v27, %s3770_s21  ;;  %v2300_v59 = vsel %vm2298_vm6, %v2261_v58, %v2263_v57 }
 0x240   : >> { %2637 = vrot.lane.b32.xlu0 %v3977_v40, %s3770_s21  ;;  %2342 = vmatprep.subr.bf16.mxu0 %v2300_v59 }
 0x241   : >> { %v2267_v38 = vpop.permute.xlu1 %2266  ;;  %3467 = vmatmul.mubr.msk.bf16.vlgmr.msra.gmra.mrb[0].mxu1 %vm367_vm1, %v3463_v56 }
 0x242   : >> { %v2265_v39 = vpop.permute.xlu0 %2264  ;;  %2415 = vmatprep.mubr.bf16.mxu1 %v3764_v3 }
 0x243   : >> { %v2301_v63 = vsel %vm2298_vm6, %v2263_v57, %v2265_v39  ;;  %2777 = vrot.lane.b32.xlu1 %v4590_v12, %s3770_s21  ;;  %v2302_v47 = vsel %vm2298_vm6, %v2265_v39, %v2267_v38 }
 0x244   : >> { %2775 = vrot.lane.b32.xlu0 %v4597_v32, %s3770_s21  ;;  %2383 = vmatprep.subr.bf16.mxu1 %v2302_v47 }
 0x245   : >> { %2384 = vmatpush1.bf16.msra.mxu1 %v2301_v63  ;;  %v2271_v5 = vpop.permute.xlu1 %2270 }
 0x246   : >> { %v2259_v61 = vpop.permute.xlu0 %2258 }
 0x247   : >> { %v2299_v62 = vsel %vm2298_vm6, %v2259_v61, %v2261_v58  ;;  %2781 = vrot.lane.b32.xlu1 %v4603_v51, %s3770_s21 }
 0x248   : >> { %2779 = vrot.lane.b32.xlu0 %v4608_v54, %s3770_s21  ;;  %2343 = vmatpush1.bf16.msra.mxu0 %v2299_v62 }
 0x249   : >> { %v2275_v11 = vpop.permute.xlu1 %2274 }
 0x24a   : >> { %v2273_v12 = vpop.permute.xlu0 %2272 }
 0x24b   : >> { %2785 = vrot.lane.b32.xlu1 %v4613_v41, %s3770_s21  ;;  %v2304_v32 = vsel %vm2298_vm6, %v2271_v5, %v2273_v12  ;;  %v2305_v54 = vsel %vm2298_vm6, %v2273_v12, %v2275_v11 }
 0x24c   : >> { %2773 = vrot.lane.b32.xlu0 %v4619_v31, %s3770_s21  ;;  %2344 = vmatprep.subr.bf16.mxu0 %v2304_v32 }
 0x24d   : >> { %v2269_v24 = vpop.permute.xlu1 %2268 }
 0x24e   : >> { %v2303_v13 = vsel %vm2298_vm6, %v2269_v24, %v2271_v5  ;;  %v2277_v25 = vpop.permute.xlu0 %2276 }
 0x24f   : >> { %2789 = vrot.lane.b32.xlu1 %v4625_v37, %s3770_s21  ;;  %2345 = vmatpush1.bf16.msra.mxu0 %v2303_v13  ;;  %v2306_v51 = vsel %vm2298_vm6, %v2275_v11, %v2277_v25 }
 0x250   : >> { %2787 = vrot.lane.b32.xlu0 %v4631_v6, %s3770_s21  ;;  %2385 = vmatprep.subr.bf16.mxu1 %v2306_v51 }
 0x251   : >> { %2386 = vmatpush1.bf16.msra.mxu1 %v2305_v54  ;;  %v2283_v41 = vpop.permute.xlu1 %2282 }
 0x252   : >> { %v2281_v31 = vpop.permute.xlu0 %2280 }
 0x253   : >> { %2783 = vrot.lane.b32.xlu1 %v4637_v55, %s3770_s21  ;;  %v2308_v8 = vsel %vm2298_vm6, %v2281_v31, %v2283_v41 }
 0x254   : >> { %2791 = vrot.lane.b32.xlu0 %v4643_v1, %s3770_s21  ;;  %2346 = vmatprep.subr.bf16.mxu0 %v2308_v8 }
 0x255   : >> { %v2287_v37 = vpop.permute.xlu1 %2286 }
 0x256   : >> { %v2285_v26 = vpop.permute.xlu0 %2284 }
 0x257   : >> { %v2309_v22 = vsel %vm2298_vm6, %v2283_v41, %v2285_v26  ;;  %2797 = vrot.lane.b32.xlu1 %v4648_v53, %s3770_s21  ;;  %v2310_v6 = vsel %vm2298_vm6, %v2285_v26, %v2287_v37 }
 0x258   : >> { %2795 = vrot.lane.b32.xlu0 %v4655_v50, %s3770_s21  ;;  %2387 = vmatprep.subr.bf16.mxu1 %v2310_v6 }
 0x259   : >> { %2388 = vmatpush1.bf16.msra.mxu1 %v2309_v22  ;;  %v2289_v55 = vpop.permute.xlu1 %2288 }
 0x25a   : >> { %v2279_v29 = vpop.permute.xlu0 %2278 }
 0x25b   : >> { %v2307_v14 = vsel %vm2298_vm6, %v2279_v29, %v2281_v31  ;;  %2801 = vrot.lane.b32.xlu1 %v4661_v16, %s3770_s21 }
 0x25c   : >> { %2799 = vrot.lane.b32.xlu0 %v4666_v17, %s3770_s21  ;;  %2347 = vmatpush1.bf16.msra.mxu0 %v2307_v14 }
 0x25d   : >> { %v2293_v1 = vpop.permute.xlu1 %2292 }
 0x25e   : >> { %v2291_v53 = vpop.permute.xlu0 %2290 }
 0x25f   : >> { %v2311_v35 = vsel %vm2298_vm6, %v2289_v55, %v2291_v53  ;;  %v2312_v48 = vsel %vm2298_vm6, %v2291_v53, %v2293_v1  ;;  %2803 = vrot.lane.b32.xlu1 %v4072_v0, %s3770_s21  ;;  %v3468_v0 = vld [vmem:[%s4999_s1 + $0x14] sm:$0x3] }
 0x260   : >> { %v2331_v50 = vsel %vm371_vm0, %v2311_v35, 0  ;;  %2793 = vrot.lane.b32.xlu0 %v4675_v43, %s3770_s21  ;;  %3469 = vmatprep.subr.msk.bf16.mxu0 %vm371_vm0, %v2312_v48 }
 0x261   : >> { %2349 = vmatpush1.bf16.msra.mxu0 %v2331_v50  ;;  %v2297_v16 = vpop.permute.xlu1 %2296 }
 0x262   : >> { %v2295_v17 = vpop.permute.xlu0 %2294 }
 0x263   : >> { %v2313_v56 = vsel %vm2298_vm6, %v2293_v1, %v2295_v17  ;;  %v2314_v57 = vsel %vm2298_vm6, %v2295_v17, %v2297_v16  ;;  %2807 = vrot.lane.b32.xlu1 %v4079_v18, %s3770_s21 }
 0x264   : >> { %v2337_v58 = vsel %vm371_vm0, %v2313_v56, 0  ;;  %2805 = vrot.lane.b32.xlu0 %v4083_v19, %s3770_s21  ;;  %3471 = vmatprep.subr.msk.bf16.mxu1 %vm371_vm0, %v2314_v57 }
 0x265   : >> { %2390 = vmatpush1.bf16.msra.mxu1 %v2337_v58  ;;  %v2435_v43 = vpop.permute.xlu1 %2434  ;;  %3470 = vmatmul.mubr.msk.bf16.vlgmr.msra.gmra.mrb[0].mxu0 %vm367_vm1, %v3468_v0 }
 0x266   : >> { %v2433_v59 = vpop.permute.xlu0 %2432  ;;  %2545 = vmatprep.mubr.bf16.mxu0 %v3764_v3 }
 0x267   : >> { %2811 = vrot.lane.b32.xlu1 %v4695_v9, %s3770_s21  ;;  %v2471_v18 = vsel %vm2298_vm6, %v2433_v59, %v2435_v43 }
 0x268   : >> { %2809 = vrot.lane.b32.xlu0 %v4092_v23, %s3770_s21  ;;  %2513 = vmatprep.subr.bf16.mxu0 %v2471_v18 }
 0x269   : >> { %v2439_v19 = vpop.permute.xlu1 %2438  ;;  %3472 = vmatmul.mubr.msk.bf16.vlgmr.msra.gmra.mrb[0].mxu1 %vm367_vm1, %v3468_v0 }
 0x26a   : >> { %v2437_v38 = vpop.permute.xlu0 %2436  ;;  %2586 = vmatprep.mubr.bf16.mxu1 %v3764_v3 }
 0x26b   : >> { %v2472_v39 = vsel %vm2298_vm6, %v2435_v43, %v2437_v38  ;;  %2948 = vrot.lane.b32.xlu1 %v4475_v28, %s3771_s25  ;;  %v2473_v9 = vsel %vm2298_vm6, %v2437_v38, %v2439_v19 }
 0x26c   : >> { %2946 = vrot.lane.b32.xlu0 %v4482_v21, %s3771_s25  ;;  %2554 = vmatprep.subr.bf16.mxu1 %v2473_v9 }
 0x26d   : >> { %2555 = vmatpush1.bf16.msra.mxu1 %v2472_v39  ;;  %v2443_v23 = vpop.permute.xlu1 %2442 }
 0x26e   : >> { %v2431_v63 = vpop.permute.xlu0 %2430 }
 0x26f   : >> { %v2470_v47 = vsel %vm2298_vm6, %v2431_v63, %v2433_v59  ;;  %2952 = vrot.lane.b32.xlu1 %v4488_v33, %s3771_s25 }
 0x270   : >> { %2950 = vrot.lane.b32.xlu0 %v4493_v15, %s3771_s25  ;;  %2514 = vmatpush1.bf16.msra.mxu0 %v2470_v47 }
 0x271   : >> { %v2447_v5 = vpop.permute.xlu1 %2446 }
 0x272   : >> { %v2445_v28 = vpop.permute.xlu0 %2444 }
 0x273   : >> { %2956 = vrot.lane.b32.xlu1 %v4498_v46, %s3771_s25  ;;  %v2475_v21 = vsel %vm2298_vm6, %v2443_v23, %v2445_v28  ;;  %v2476_v15 = vsel %vm2298_vm6, %v2445_v28, %v2447_v5 }
 0x274   : >> { %2944 = vrot.lane.b32.xlu0 %v4504_v49, %s3771_s25  ;;  %2515 = vmatprep.subr.bf16.mxu0 %v2475_v21 }
 0x275   : >> { %v2441_v61 = vpop.permute.xlu1 %2440 }
 0x276   : >> { %v2474_v62 = vsel %vm2298_vm6, %v2441_v61, %v2443_v23  ;;  %v2449_v11 = vpop.permute.xlu0 %2448 }
 0x277   : >> { %2960 = vrot.lane.b32.xlu1 %v4510_v36, %s3771_s25  ;;  %2516 = vmatpush1.bf16.msra.mxu0 %v2474_v62  ;;  %v2477_v33 = vsel %vm2298_vm6, %v2447_v5, %v2449_v11  ;;  %v3478_v62 = vld [vmem:[%s4999_s1 + $0x18] sm:$0x3] }
 0x278   : >> { %2958 = vrot.lane.b32.xlu0 %v4516_v4, %s3771_s25  ;;  %2556 = vmatprep.subr.bf16.mxu1 %v2477_v33 }
 0x279   : >> { %2557 = vmatpush1.bf16.msra.mxu1 %v2476_v15  ;;  %v2455_v46 = vpop.permute.xlu1 %2454 }
 0x27a   : >> { %v2453_v49 = vpop.permute.xlu0 %2452 }
 0x27b   : >> { %2954 = vrot.lane.b32.xlu1 %v4522_v7, %s3771_s25  ;;  %v2479_v12 = vsel %vm2298_vm6, %v2453_v49, %v2455_v46 }
 0x27c   : >> { %2962 = vrot.lane.b32.xlu0 %v4528_v60, %s3771_s25  ;;  %2517 = vmatprep.subr.bf16.mxu0 %v2479_v12 }
 0x27d   : >> { %v2459_v36 = vpop.permute.xlu1 %2458 }
 0x27e   : >> { %v2457_v32 = vpop.permute.xlu0 %2456 }
 0x27f   : >> { %v2480_v24 = vsel %vm2298_vm6, %v2455_v46, %v2457_v32  ;;  %2968 = vrot.lane.b32.xlu1 %v4533_v52, %s3771_s25  ;;  %v2481_v4 = vsel %vm2298_vm6, %v2457_v32, %v2459_v36 }
 0x280   : >> { %2966 = vrot.lane.b32.xlu0 %v4540_v44, %s3771_s25  ;;  %2558 = vmatprep.subr.bf16.mxu1 %v2481_v4 }
 0x281   : >> { %2559 = vmatpush1.bf16.msra.mxu1 %v2480_v24  ;;  %v2461_v7 = vpop.permute.xlu1 %2460 }
 0x282   : >> { %v2451_v13 = vpop.permute.xlu0 %2450 }
 0x283   : >> { %v2478_v25 = vsel %vm2298_vm6, %v2451_v13, %v2453_v49  ;;  %2972 = vrot.lane.b32.xlu1 %v4546_v42, %s3771_s25 }
 0x284   : >> { %2970 = vrot.lane.b32.xlu0 %v4551_v10, %s3771_s25  ;;  %2518 = vmatpush1.bf16.msra.mxu0 %v2478_v25 }
 0x285   : >> { %v2465_v60 = vpop.permute.xlu1 %2464 }
 0x286   : >> { %v2463_v52 = vpop.permute.xlu0 %2462 }
 0x287   : >> { %v2482_v51 = vsel %vm2298_vm6, %v2461_v7, %v2463_v52  ;;  %v2483_v54 = vsel %vm2298_vm6, %v2463_v52, %v2465_v60  ;;  %2974 = vrot.lane.b32.xlu1 %v3930_v20, %s3771_s25  ;;  %v3473_v20 = vld [vmem:[%s4999_s1 + $0x16] sm:$0x3] }
 0x288   : >> { %v2502_v44 = vsel %vm371_vm0, %v2482_v51, 0  ;;  %2964 = vrot.lane.b32.xlu0 %v4560_v45, %s3771_s25  ;;  %3474 = vmatprep.subr.msk.bf16.mxu0 %vm371_vm0, %v2483_v54 }
 0x289   : >> { %2520 = vmatpush1.bf16.msra.mxu0 %v2502_v44  ;;  %v2469_v42 = vpop.permute.xlu1 %2468 }
 0x28a   : >> { %v2467_v10 = vpop.permute.xlu0 %2466 }
 0x28b   : >> { %v2484_v41 = vsel %vm2298_vm6, %v2465_v60, %v2467_v10  ;;  %v2485_v31 = vsel %vm2298_vm6, %v2467_v10, %v2469_v42  ;;  %2978 = vrot.lane.b32.xlu1 %v3943_v30, %s3771_s25 }
 0x28c   : >> { %v2508_v8 = vsel %vm371_vm0, %v2484_v41, 0  ;;  %2976 = vrot.lane.b32.xlu0 %v3953_v34, %s3771_s25  ;;  %3476 = vmatprep.subr.msk.bf16.mxu1 %vm371_vm0, %v2485_v31 }
 0x28d   : >> { %2561 = vmatpush1.bf16.msra.mxu1 %v2508_v8  ;;  %v2606_v45 = vpop.permute.xlu1 %2605  ;;  %3475 = vmatmul.mubr.msk.bf16.vlgmr.msra.gmra.mrb[0].mxu0 %vm367_vm1, %v3473_v20 }
 0x28e   : >> { %v2604_v37 = vpop.permute.xlu0 %2603  ;;  %2717 = vmatprep.mubr.bf16.mxu0 %v3764_v3 }
 0x28f   : >> { %2982 = vrot.lane.b32.xlu1 %v4580_v27, %s3771_s25  ;;  %v2643_v30 = vsel %vm2641_vm7, %v2604_v37, %v2606_v45 }
 0x290   : >> { %2980 = vrot.lane.b32.xlu0 %v3977_v40, %s3771_s25  ;;  %2685 = vmatprep.subr.bf16.mxu0 %v2643_v30 }
 0x291   : >> { %v2610_v34 = vpop.permute.xlu1 %2609  ;;  %3477 = vmatmul.mubr.msk.bf16.vlgmr.msra.gmra.mrb[0].mxu1 %vm367_vm1, %v3473_v20 }
 0x292   : >> { %v2608_v26 = vpop.permute.xlu0 %2607  ;;  %2758 = vmatprep.mubr.bf16.mxu1 %v3764_v3 }
 0x293   : >> { %v2644_v22 = vsel %vm2641_vm7, %v2606_v45, %v2608_v26  ;;  %v2645_v6 = vsel %vm2641_vm7, %v2608_v26, %v2610_v34 }
 0x294   : >> { %2726 = vmatprep.subr.bf16.mxu1 %v2645_v6 }
 0x295   : >> { %2727 = vmatpush1.bf16.msra.mxu1 %v2644_v22  ;;  %v2614_v55 = vpop.permute.xlu1 %2613 }
 0x296   : >> { %v2602_v27 = vpop.permute.xlu0 %2601 }
 0x297   : >> { %v2642_v29 = vsel %vm2641_vm7, %v2602_v27, %v2604_v37 }
 0x298   : >> { %2686 = vmatpush1.bf16.msra.mxu0 %v2642_v29 }
 0x299   : >> { %v2618_v14 = vpop.permute.xlu1 %2617 }
 0x29a   : >> { %v2616_v40 = vpop.permute.xlu0 %2615 }
 0x29b   : >> { %v2647_v1 = vsel %vm2641_vm7, %v2614_v55, %v2616_v40  ;;  %v2648_v16 = vsel %vm2641_vm7, %v2616_v40, %v2618_v14 }
 0x29c   : >> { %2687 = vmatprep.subr.bf16.mxu0 %v2647_v1 }
 0x29d   : >> { %v2612_v53 = vpop.permute.xlu1 %2611 }
 0x29e   : >> { %v2646_v35 = vsel %vm2641_vm7, %v2612_v53, %v2614_v55  ;;  %v2620_v48 = vpop.permute.xlu0 %2619 }
 0x29f   : >> { %2688 = vmatpush1.bf16.msra.mxu0 %v2646_v35  ;;  %v2649_v50 = vsel %vm2641_vm7, %v2618_v14, %v2620_v48  ;;  %v3483_v35 = vld [vmem:[%s4999_s1 + $0x1a] sm:$0x3] }
 0x2a0   : >> { %2728 = vmatprep.subr.bf16.mxu1 %v2649_v50 }
 0x2a1   : >> { %2729 = vmatpush1.bf16.msra.mxu1 %v2648_v16  ;;  %v2626_v17 = vpop.permute.xlu1 %2625 }
 0x2a2   : >> { %v2624_v56 = vpop.permute.xlu0 %2623 }
 0x2a3   : >> { %v2651_v57 = vsel %vm2641_vm7, %v2624_v56, %v2626_v17 }
 0x2a4   : >> { %2689 = vmatprep.subr.bf16.mxu0 %v2651_v57 }
 0x2a5   : >> { %v2630_v58 = vpop.permute.xlu1 %2629 }
 0x2a6   : >> { %v2628_v0 = vpop.permute.xlu0 %2627 }
 0x2a7   : >> { %v2652_v43 = vsel %vm2641_vm7, %v2626_v17, %v2628_v0  ;;  %v2653_v59 = vsel %vm2641_vm7, %v2628_v0, %v2630_v58 }
 0x2a8   : >> { %2730 = vmatprep.subr.bf16.mxu1 %v2653_v59 }
 0x2a9   : >> { %2731 = vmatpush1.bf16.msra.mxu1 %v2652_v43  ;;  %v2632_v18 = vpop.permute.xlu1 %2631 }
 0x2aa   : >> { %v2622_v19 = vpop.permute.xlu0 %2621 }
 0x2ab   : >> { %v2650_v38 = vsel %vm2641_vm7, %v2622_v19, %v2624_v56 }
 0x2ac   : >> { %2690 = vmatpush1.bf16.msra.mxu0 %v2650_v38 }
 0x2ad   : >> { %v2636_v39 = vpop.permute.xlu1 %2635 }
 0x2ae   : >> { %v2634_v9 = vpop.permute.xlu0 %2633 }
 0x2af   : >> { %v2654_v23 = vsel %vm2641_vm7, %v2632_v18, %v2634_v9  ;;  %v2655_v63 = vsel %vm2641_vm7, %v2634_v9, %v2636_v39 }
 0x2b0   : >> { %v2674_v47 = vsel %vm371_vm0, %v2654_v23, 0  ;;  %3479 = vmatprep.subr.msk.bf16.mxu0 %vm371_vm0, %v2655_v63 }
 0x2b1   : >> { %2692 = vmatpush1.bf16.msra.mxu0 %v2674_v47  ;;  %v2640_v5 = vpop.permute.xlu1 %2639 }
 0x2b2   : >> { %v2638_v28 = vpop.permute.xlu0 %2637 }
 0x2b3   : >> { %v2656_v21 = vsel %vm2641_vm7, %v2636_v39, %v2638_v28  ;;  %v2657_v61 = vsel %vm2641_vm7, %v2638_v28, %v2640_v5 }
 0x2b4   : >> { %v2680_v11 = vsel %vm371_vm0, %v2656_v21, 0  ;;  %3481 = vmatprep.subr.msk.bf16.mxu1 %vm371_vm0, %v2657_v61  ;;  %3480 = vmatmul.mubr.msk.bf16.vlgmr.msra.gmra.mrb[0].mxu0 %vm367_vm1, %v3478_v62 }
 0x2b5   : >> { %2733 = vmatpush1.bf16.msra.mxu1 %v2680_v11  ;;  %v2778_v33 = vpop.permute.xlu1 %2777  ;;  %2888 = vmatprep.mubr.bf16.mxu0 %v3764_v3 }
 0x2b6   : >> { %v2776_v15 = vpop.permute.xlu0 %2775 }
 0x2b7   : >> { %v2814_v46 = vsel %vm2641_vm7, %v2776_v15, %v2778_v33 }
 0x2b8   : >> { %2856 = vmatprep.subr.bf16.mxu0 %v2814_v46  ;;  %3482 = vmatmul.mubr.msk.bf16.vlgmr.msra.gmra.mrb[0].mxu1 %vm367_vm1, %v3478_v62 }
 0x2b9   : >> { %v2782_v49 = vpop.permute.xlu1 %2781  ;;  %2929 = vmatprep.mubr.bf16.mxu1 %v3764_v3 }
 0x2ba   : >> { %v2780_v12 = vpop.permute.xlu0 %2779 }
 0x2bb   : >> { %v2815_v36 = vsel %vm2641_vm7, %v2778_v33, %v2780_v12  ;;  %v2816_v32 = vsel %vm2641_vm7, %v2780_v12, %v2782_v49 }
 0x2bc   : >> { %2897 = vmatprep.subr.bf16.mxu1 %v2816_v32 }
 0x2bd   : >> { %2898 = vmatpush1.bf16.msra.mxu1 %v2815_v36  ;;  %v2786_v24 = vpop.permute.xlu1 %2785 }
 0x2be   : >> { %v2774_v4 = vpop.permute.xlu0 %2773 }
 0x2bf   : >> { %v2813_v7 = vsel %vm2641_vm7, %v2774_v4, %v2776_v15 }
 0x2c0   : >> { %2857 = vmatpush1.bf16.msra.mxu0 %v2813_v7 }
 0x2c1   : >> { %v2790_v13 = vpop.permute.xlu1 %2789 }
 0x2c2   : >> { %v2788_v25 = vpop.permute.xlu0 %2787 }
 0x2c3   : >> { %v2818_v60 = vsel %vm2641_vm7, %v2786_v24, %v2788_v25  ;;  %v2819_v42 = vsel %vm2641_vm7, %v2788_v25, %v2790_v13 }
 0x2c4   : >> { %2858 = vmatprep.subr.bf16.mxu0 %v2818_v60 }
 0x2c5   : >> { %v2784_v52 = vpop.permute.xlu1 %2783 }
 0x2c6   : >> { %v2817_v51 = vsel %vm2641_vm7, %v2784_v52, %v2786_v24  ;;  %v2792_v54 = vpop.permute.xlu0 %2791 }
 0x2c7   : >> { %2859 = vmatpush1.bf16.msra.mxu0 %v2817_v51  ;;  %v2820_v44 = vsel %vm2641_vm7, %v2790_v13, %v2792_v54  ;;  %v3488_v13 = vld [vmem:[%s4999_s1 + $0x1c] sm:$0x3] }
 0x2c8   : >> { %2899 = vmatprep.subr.bf16.mxu1 %v2820_v44 }
 0x2c9   : >> { %2900 = vmatpush1.bf16.msra.mxu1 %v2819_v42  ;;  %v2798_v10 = vpop.permute.xlu1 %2797 }
 0x2ca   : >> { %v2796_v41 = vpop.permute.xlu0 %2795 }
 0x2cb   : >> { %v2822_v31 = vsel %vm2641_vm7, %v2796_v41, %v2798_v10 }
 0x2cc   : >> { %2860 = vmatprep.subr.bf16.mxu0 %v2822_v31  ;;  %v3117_v31 = vld [vmem:[%s3116_s16] sm:$0xff] }
 0x2cd   : >> { %v2802_v8 = vpop.permute.xlu1 %2801 }
 0x2ce   : >> { %v2800_v20 = vpop.permute.xlu0 %2799 }
 0x2cf   : >> { %v2823_v45 = vsel %vm2641_vm7, %v2798_v10, %v2800_v20  ;;  %v2824_v37 = vsel %vm2641_vm7, %v2800_v20, %v2802_v8 }
 0x2d0   : >> { %2901 = vmatprep.subr.bf16.mxu1 %v2824_v37 }
 0x2d1   : >> { %2902 = vmatpush1.bf16.msra.mxu1 %v2823_v45  ;;  %v2804_v30 = vpop.permute.xlu1 %2803 }
 0x2d2   : >> { %v2794_v34 = vpop.permute.xlu0 %2793 }
 0x2d3   : >> { %v2821_v26 = vsel %vm2641_vm7, %v2794_v34, %v2796_v41 }
 0x2d4   : >> { %2861 = vmatpush1.bf16.msra.mxu0 %v2821_v26  ;;  %v3772_v26 = vmov 1983009808  }
 0x2d5   : >> { %v2808_v22 = vpop.permute.xlu1 %2807 }
 0x2d6   : >> { %v2806_v6 = vpop.permute.xlu0 %2805 }
 0x2d7   : >> { %v2825_v55 = vsel %vm2641_vm7, %v2804_v30, %v2806_v6  ;;  %v2826_v27 = vsel %vm2641_vm7, %v2806_v6, %v2808_v22  ;;  %v3160_v6 = vlaneseq }
 0x2d8   : >> { %v2845_v29 = vsel %vm371_vm0, %v2825_v55, 0  ;;  %3484 = vmatprep.subr.msk.bf16.mxu0 %vm371_vm0, %v2826_v27 }
 0x2d9   : >> { %2863 = vmatpush1.bf16.msra.mxu0 %v2845_v29  ;;  %v2812_v14 = vpop.permute.xlu1 %2811  ;;  %v3118_v29 = vld [vmem:[%s3116_s16 + $0x8] sm:$0xff] }
 0x2da   : >> { %v2810_v40 = vpop.permute.xlu0 %2809 }
 0x2db   : >> { %v2827_v1 = vsel %vm2641_vm7, %v2808_v22, %v2810_v40  ;;  %v2828_v53 = vsel %vm2641_vm7, %v2810_v40, %v2812_v14  ;;  %v3158_v22 = vunpack.c.l.s4 %v3772_v26 }
 0x2dc   : >> { %v2851_v48 = vsel %vm371_vm0, %v2827_v1, 0  ;;  %3486 = vmatprep.subr.msk.bf16.mxu1 %vm371_vm0, %v2828_v53  ;;  %3485 = vmatmul.mubr.msk.bf16.vlgmr.msra.gmra.mrb[0].mxu0 %vm367_vm1, %v3483_v35  ;;  %v3773_v53 = vmov 0.0  }
 0x2dd   : >> { %2904 = vmatpush1.bf16.msra.mxu1 %v2851_v48  ;;  %v2949_v50 = vpop.permute.xlu1 %2948  ;;  %3060 = vmatprep.mubr.bf16.mxu0 %v3764_v3 }
 0x2de   : >> { %v2947_v16 = vpop.permute.xlu0 %2946 }
 0x2df   : >> { %v2986_v17 = vsel %vm2984_vm8, %v2947_v16, %v2949_v50 }
 0x2e0   : >> { %3028 = vmatprep.subr.bf16.mxu0 %v2986_v17  ;;  %3487 = vmatmul.mubr.msk.bf16.vlgmr.msra.gmra.mrb[0].mxu1 %vm367_vm1, %v3483_v35 }
 0x2e1   : >> { %v2953_v56 = vpop.permute.xlu1 %2952  ;;  %3101 = vmatprep.mubr.bf16.mxu1 %v3764_v3 }
 0x2e2   : >> { %v2951_v57 = vpop.permute.xlu0 %2950 }
 0x2e3   : >> { %v2987_v58 = vsel %vm2984_vm8, %v2949_v50, %v2951_v57  ;;  %v2988_v0 = vsel %vm2984_vm8, %v2951_v57, %v2953_v56  ;;  %v3159_v50 = vunpack.c.0.s8 %v3158_v22 }
 0x2e4   : >> { %3069 = vmatprep.subr.bf16.mxu1 %v2988_v0 }
 0x2e5   : >> { %3070 = vmatpush1.bf16.msra.mxu1 %v2987_v58  ;;  %v2957_v43 = vpop.permute.xlu1 %2956 }
 0x2e6   : >> { %v2945_v59 = vpop.permute.xlu0 %2944 }
 0x2e7   : >> { %v2985_v18 = vsel %vm2984_vm8, %v2945_v59, %v2947_v16  ;;  %v3161_v16 = vshrl.u32 %v3160_v6, 7 }
 0x2e8   : >> { %3029 = vmatpush1.bf16.msra.mxu0 %v2985_v18 }
 0x2e9   : >> { %v2961_v19 = vpop.permute.xlu1 %2960  ;;  %v3162_v0 = vsub.s32 %v3159_v50, %v3161_v16 }
 0x2ea   : >> { %v2959_v38 = vpop.permute.xlu0 %2958 }
 0x2eb   : >> { %v2990_v39 = vsel %vm2984_vm8, %v2957_v43, %v2959_v38  ;;  %v2991_v47 = vsel %vm2984_vm8, %v2959_v38, %v2961_v19 }
 0x2ec   : >> { %3030 = vmatprep.subr.bf16.mxu0 %v2990_v39 }
 0x2ed   : >> { %v2955_v9 = vpop.permute.xlu1 %2954 }
 0x2ee   : >> { %v2989_v3 = vsel %vm2984_vm8, %v2955_v9, %v2957_v43  ;;  %v2963_v23 = vpop.permute.xlu0 %2962 }
 0x2ef   : >> { %3031 = vmatpush1.bf16.msra.mxu0 %v2989_v3  ;;  %v2992_v63 = vsel %vm2984_vm8, %v2961_v19, %v2963_v23 }
 0x2f0   : >> { %3071 = vmatprep.subr.bf16.mxu1 %v2992_v63 }
 0x2f1   : >> { %3072 = vmatpush1.bf16.msra.mxu1 %v2991_v47  ;;  %v2969_v5 = vpop.permute.xlu1 %2968 }
 0x2f2   : >> { %v2967_v28 = vpop.permute.xlu0 %2966 }
 0x2f3   : >> { %v2994_v21 = vsel %vm2984_vm8, %v2967_v28, %v2969_v5 }
 0x2f4   : >> { %3032 = vmatprep.subr.bf16.mxu0 %v2994_v21 }
 0x2f5   : >> { %v2973_v61 = vpop.permute.xlu1 %2972 }
 0x2f6   : >> { %v2971_v62 = vpop.permute.xlu0 %2970 }
 0x2f7   : >> { %v2995_v11 = vsel %vm2984_vm8, %v2969_v5, %v2971_v62  ;;  %v2996_v33 = vsel %vm2984_vm8, %v2971_v62, %v2973_v61 }
 0x2f8   : >> { %3073 = vmatprep.subr.bf16.mxu1 %v2996_v33 }
 0x2f9   : >> { %3074 = vmatpush1.bf16.msra.mxu1 %v2995_v11  ;;  %v2975_v15 = vpop.permute.xlu1 %2974 }
 0x2fa   : >> { %v2965_v46 = vpop.permute.xlu0 %2964 }
 0x2fb   : >> { %v2993_v49 = vsel %vm2984_vm8, %v2965_v46, %v2967_v28 }
 0x2fc   : >> { %3033 = vmatpush1.bf16.msra.mxu0 %v2993_v49 }
 0x2fd   : >> { %v2979_v12 = vpop.permute.xlu1 %2978 }
 0x2fe   : >> { %v2977_v36 = vpop.permute.xlu0 %2976 }
 0x2ff   : >> { %v2997_v32 = vsel %vm2984_vm8, %v2975_v15, %v2977_v36  ;;  %v2998_v24 = vsel %vm2984_vm8, %v2977_v36, %v2979_v12 }
 0x300   : >> { %v3017_v4 = vsel %vm371_vm0, %v2997_v32, 0  ;;  %3489 = vmatprep.subr.msk.bf16.mxu0 %vm371_vm0, %v2998_v24 }
 0x301   : >> { %3035 = vmatpush1.bf16.msra.mxu0 %v3017_v4  ;;  %v2983_v7 = vpop.permute.xlu1 %2982 }
 0x302   : >> { %v2981_v25 = vpop.permute.xlu0 %2980 }
 0x303   : >> { %v2999_v60 = vsel %vm2984_vm8, %v2979_v12, %v2981_v25  ;;  %v3000_v52 = vsel %vm2984_vm8, %v2981_v25, %v2983_v7 }
 0x304   : >> { %v3023_v51 = vsel %vm371_vm0, %v2999_v60, 0  ;;  %3490 = vmatmul.mubr.msk.bf16.vlgmr.msra.gmra.mrb[0].mxu0 %vm367_vm1, %v3488_v13  ;;  %3491 = vmatprep.subr.msk.bf16.mxu1 %vm371_vm0, %v3000_v52 }
 0x305   : >> { %3076 = vmatpush1.bf16.msra.mxu1 %v3023_v51 }
 0x308   : >> { %3492 = vmatmul.mubr.msk.bf16.vlgmr.msra.gmra.mrb[0].mxu1 %vm367_vm1, %v3488_v13 }
 0x3d7   : >> { %v3062_v54 = vpop.f32.mrb[0].mxu0 }
 0x3d8   : >> { %v3510_v44 = vadd.f32 %v3062_v54, %v3835_v2  ;;  %v3064_v42 = vpop.f32.mrb[1].mxu0 }
 0x3d9   : >> { %v3511_v10 = vadd.f32 %v3064_v42, %v3835_v2  ;;  %v3066_v41 = vpop.f32.mrb[2].mxu0 }
 0x3da   : >> { %v3067_v8 = vpop.f32.mrb[3].mxu0 }
 0x3db   : >> { %v3123_v20 = vcombine.low %v3510_v44, %v3511_v10  ;;  %v3103_v45 = vpop.f32.mrb[0].mxu1 }
 0x3dc   : >> { %v3512_v37 = vadd.f32 %v3103_v45, %v3835_v2  ;;  %v3105_v30 = vpop.f32.mrb[1].mxu1 }
 0x3dd   : >> { %v3127_v34 = vadd.f32 %v3123_v20, %v3117_v31  ;;  %v3513_v55 = vadd.f32 %v3105_v30, %v3835_v2  ;;  %v3107_v27 = vpop.f32.mrb[2].mxu1 }
 0x3de   : >> { %v3108_v14 = vpop.f32.mrb[3].mxu1 }
 0x3df   : >> { %vm3129_vm9 = vcmp.gt.f32.partialorder %v3127_v34, 1.0  ;;  %v3124_v40 = vcombine.low %v3512_v37, %v3513_v55 }
 0x3e0   : >> { %v3131_v1 = vsel %vm3129_vm9, 0.0, %v3127_v34  ;;  %v3496_v35 = vsel %vm3129_vm9, 1.0, %v3773_v53 }
 0x3e1   : >> { %3135 = vst [vmem:[%s3134_s17] sm:$0xff] %v3131_v1  ;;  %v3143_v48 = vcombine.high %v3496_v35, %v3496_v35  ;;  %v3128_v17 = vadd.f32 %v3124_v40, %v3118_v29 }
 0x3e3   : >> { %vm3130_vm10 = vcmp.gt.f32.partialorder %v3128_v17, 1.0  ;;  %v3498_v58 = vpack.c.bf16 %v3143_v48, %v3496_v35 }
 0x3e4   : >> { %v3132_v56 = vsel %vm3130_vm10, 0.0, %v3128_v17  ;;  %v3497_v57 = vsel %vm3130_vm10, 1.0, %v3773_v53 }
 0x3e5   : >> { %3136 = vst [vmem:[%s3134_s17 + $0x8] sm:$0xff] %v3132_v56  ;;  %v3144_v43 = vcombine.high %v3497_v57, %v3497_v57  ;;  %v3163_v18 = vrot.slane %v3498_v58, %v3162_v0 }
 0x3e7   : >> { %v3499_v59 = vpack.c.bf16 %v3144_v43, %v3497_v57  ;;  %269 = sbr.rel (!%p267_p4) target bundleno = 135 (0x87), region = 107 }
 0x3e9   : >> { %v3170_v19 = vrot.slane %v3499_v59, %v3162_v0 }
 0x3eb   : >> { %v3171_v38 = vcombine.low %v3163_v18, %v3170_v19 }
 0x3ed   : >> { %3175 = vst [vmem:[%s3174_s20] sm:$0xff] %v3171_v38 }
 0x3ee PF: > { %s16_s18 = sadd.s32 1, %s3757_s18  }
 0x3ef   : > { %p13_p5 = scmp.ge.s32.totalorder %s16_s18, 4  }
 0x3f1   :  { %15 = sbr.rel (!%p13_p5) target bundleno = 1 (0x1), region = 118 }

// kernel: closed_call.40
= control target key start
LH: loop header
LB: loop body
LE: loop exit
PB: predicated region body
PF: predicated region fallthrough
CT: control target
= control target key end

     0   :  { %v7517_v36 = vmov 1966171168   ;;  %v720_v38 = vlaneseq  ;;  %vm4262_vm0 = vcmask 130048   ;;  %vm5607_vm2 = vcmask 435200   ;;  %s9851_s1 = inlined_call_operand.vmem [shape: bf16[2704,512], index: 1, kind: input, shape index: {}]   ;;  %s9852_s0 = inlined_call_operand.vmem [shape: bf16[2,2704], index: 0, kind: input, shape index: {}]   ;;  %s9853_s3 = inlined_call_operand.vmem [shape: bf16[512,54], index: 3, kind: input, shape index: {}]   ;;  %s9854_s2 = inlined_call_operand.vmem [shape: f32[1,512], index: 2, kind: input, shape index: {}]   ;;  %s9855_s5 = inlined_call_operand.vmem [shape: f32[2,512], index: 5, kind: input, shape index: {}]   ;;  %s9856_s8 = inlined_call_operand.vmem [shape: f32[2,512], index: 8, kind: output, shape index: {0}]   ;;  %s9857_s6 = inlined_call_operand.vmem [shape: f32[2,54], index: 6, kind: input, shape index: {}]   ;;  %s9858_s4 = inlined_call_operand.vmem [shape: f32[1,54], index: 4, kind: input, shape index: {}]   ;;  %s9859_s7 = inlined_call_operand.vmem [shape: f32[2,54], index: 7, kind: input, shape index: {}]   ;;  %s9860_s9 = inlined_call_operand.vmem [shape: f32[2,54], index: 9, kind: output, shape index: {1}]   ;;  %s9861_s10 = inlined_call_operand.vmem [shape: f32[2,54], index: 10, kind: output, shape index: {2}]  }
   0x1   :  { %v6466_v0 = vld [vmem:[%s9851_s1 + $0x4] ss:$16 sps:$4 sm:$0xff]   ;;  %v6468_v1 = vld [vmem:[%s9851_s1 + $0xc] ss:$16 sps:$4 sm:$0xff]   ;;  %v6470_v2 = vld [vmem:[%s9851_s1] ss:$16 sps:$4 sm:$0xff]   ;;  %v718_v37 = vunpack.c.l.s4 %v7517_v36 }
   0x2   :  { %4266 = vmatprep.subr.bf16.mxu0 %v6466_v0  ;;  %v6471_v3 = vld [vmem:[%s9851_s1 + $0x8] ss:$16 sps:$4 sm:$0xff]   ;;  %4717 = vmatprep.subr.bf16.mxu1 %v6468_v1  ;;  %v6472_v4 = vld [vmem:[%s9851_s1 + $0x24] ss:$16 sps:$4 sm:$0xff]   ;;  %v6474_v5 = vld [vmem:[%s9851_s1 + $0x2c] ss:$16 sps:$4 sm:$0xff]  }
   0x3   :  { %4267 = vmatpush1.bf16.msra.mxu0 %v6470_v2  ;;  %4718 = vmatpush1.bf16.msra.mxu1 %v6471_v3  ;;  %v6476_v6 = vld [vmem:[%s9851_s1 + $0x20] ss:$16 sps:$4 sm:$0xff]   ;;  %v6477_v7 = vld [vmem:[%s9851_s1 + $0x28] ss:$16 sps:$4 sm:$0xff]   ;;  %v6478_v8 = vld [vmem:[%s9851_s1 + $0x44] ss:$16 sps:$4 sm:$0xff]   ;;  %v719_v42 = vunpack.c.0.s8 %v718_v37 }
   0x4   :  { %4268 = vmatprep.subr.bf16.mxu0 %v6472_v4  ;;  %4719 = vmatprep.subr.bf16.mxu1 %v6474_v5  ;;  %v6480_v9 = vld [vmem:[%s9851_s1 + $0x4c] ss:$16 sps:$4 sm:$0xff]   ;;  %v6482_v10 = vld [vmem:[%s9851_s1 + $0x40] ss:$16 sps:$4 sm:$0xff]   ;;  %v6483_v11 = vld [vmem:[%s9851_s1 + $0x48] ss:$16 sps:$4 sm:$0xff]  }
   0x5   :  { %v6484_v12 = vld [vmem:[%s9851_s1 + $0x64] ss:$16 sps:$4 sm:$0xff]   ;;  %v6486_v13 = vld [vmem:[%s9851_s1 + $0x6c] ss:$16 sps:$4 sm:$0xff]   ;;  %v6488_v14 = vld [vmem:[%s9851_s1 + $0x60] ss:$16 sps:$4 sm:$0xff]  }
   0x6   :  { %v6489_v15 = vld [vmem:[%s9851_s1 + $0x68] ss:$16 sps:$4 sm:$0xff]   ;;  %v6490_v16 = vld [vmem:[%s9851_s1 + $0x84] ss:$16 sps:$4 sm:$0xff]   ;;  %v6492_v17 = vld [vmem:[%s9851_s1 + $0x8c] ss:$16 sps:$4 sm:$0xff]  }
   0x7   :  { %4269 = vmatpush1.bf16.msra.mxu0 %v6476_v6  ;;  %4720 = vmatpush1.bf16.msra.mxu1 %v6477_v7  ;;  %v6494_v18 = vld [vmem:[%s9851_s1 + $0x80] ss:$16 sps:$4 sm:$0xff]   ;;  %v6495_v19 = vld [vmem:[%s9851_s1 + $0x88] ss:$16 sps:$4 sm:$0xff]   ;;  %v6496_v20 = vld [vmem:[%s9851_s1 + $0xa4] ss:$16 sps:$4 sm:$0xff]  }
   0x8   :  { %4270 = vmatprep.subr.bf16.mxu0 %v6478_v8  ;;  %4721 = vmatprep.subr.bf16.mxu1 %v6480_v9  ;;  %v6498_v21 = vld [vmem:[%s9851_s1 + $0xac] ss:$16 sps:$4 sm:$0xff]   ;;  %v6500_v22 = vld [vmem:[%s9851_s1 + $0xa0] ss:$16 sps:$4 sm:$0xff]   ;;  %v6501_v23 = vld [vmem:[%s9851_s1 + $0xa8] ss:$16 sps:$4 sm:$0xff]  }
   0x9   :  { %v6502_v24 = vld [vmem:[%s9851_s1 + $0xc4] ss:$16 sps:$4 sm:$0xff]   ;;  %v6504_v25 = vld [vmem:[%s9851_s1 + $0xcc] ss:$16 sps:$4 sm:$0xff]   ;;  %v6506_v26 = vld [vmem:[%s9851_s1 + $0xc0] ss:$16 sps:$4 sm:$0xff]  }
   0xa   :  { %v6507_v27 = vld [vmem:[%s9851_s1 + $0xc8] ss:$16 sps:$4 sm:$0xff]   ;;  %v6508_v28 = vld [vmem:[%s9851_s1 + $0xe4] ss:$16 sps:$4 sm:$0xff]   ;;  %v6510_v29 = vld [vmem:[%s9851_s1 + $0xec] ss:$16 sps:$4 sm:$0xff]  }
   0xb   :  { %4271 = vmatpush1.bf16.msra.mxu0 %v6482_v10  ;;  %4722 = vmatpush1.bf16.msra.mxu1 %v6483_v11  ;;  %v6512_v30 = vld [vmem:[%s9851_s1 + $0xe0] ss:$16 sps:$4 sm:$0xff]   ;;  %v6513_v31 = vld [vmem:[%s9851_s1 + $0xe8] ss:$16 sps:$4 sm:$0xff]   ;;  %v6514_v32 = vld [vmem:[%s9851_s1 + $0x104] ss:$16 sps:$4 sm:$0xff]  }
   0xc   :  { %4272 = vmatprep.subr.bf16.mxu0 %v6484_v12  ;;  %4723 = vmatprep.subr.bf16.mxu1 %v6486_v13  ;;  %v6516_v33 = vld [vmem:[%s9851_s1 + $0x10c] ss:$16 sps:$4 sm:$0xff]   ;;  %v6518_v34 = vld [vmem:[%s9851_s1 + $0x100] ss:$16 sps:$4 sm:$0xff]   ;;  %v6519_v35 = vld [vmem:[%s9851_s1 + $0x108] ss:$16 sps:$4 sm:$0xff]  }
   0xd   :  { %v6520_v39 = vld [vmem:[%s9851_s1 + $0x124] ss:$16 sps:$4 sm:$0xff]   ;;  %v6522_v40 = vld [vmem:[%s9851_s1 + $0x12c] ss:$16 sps:$4 sm:$0xff]   ;;  %v6524_v41 = vld [vmem:[%s9851_s1 + $0x120] ss:$16 sps:$4 sm:$0xff]  }
   0xe   :  { %v7692_v43 = vshrl.u32 %v720_v38, 7  ;;  %v6525_v44 = vld [vmem:[%s9851_s1 + $0x128] ss:$16 sps:$4 sm:$0xff]   ;;  %v6526_v45 = vld [vmem:[%s9851_s1 + $0x144] ss:$16 sps:$4 sm:$0xff]  }
   0xf   :  { %4273 = vmatpush1.bf16.msra.mxu0 %v6488_v14  ;;  %4724 = vmatpush1.bf16.msra.mxu1 %v6489_v15  ;;  %v6528_v46 = vld [vmem:[%s9851_s1 + $0x14c] ss:$16 sps:$4 sm:$0xff]   ;;  %v6530_v47 = vld [vmem:[%s9851_s1 + $0x140] ss:$16 sps:$4 sm:$0xff]   ;;  %v6531_v48 = vld [vmem:[%s9851_s1 + $0x148] ss:$16 sps:$4 sm:$0xff]  }
  0x10   :  { %4274 = vmatprep.subr.bf16.mxu0 %v6490_v16  ;;  %4725 = vmatprep.subr.bf16.mxu1 %v6492_v17  ;;  %v7710_v49 = vsub.s32 %v719_v42, %v7692_v43  ;;  %v6532_v50 = vld [vmem:[%s9851_s1 + $0x164] ss:$16 sps:$4 sm:$0xff]   ;;  %v6534_v51 = vld [vmem:[%s9851_s1 + $0x16c] ss:$16 sps:$4 sm:$0xff]   ;;  %v6536_v53 = vld [vmem:[%s9851_s1 + $0x160] ss:$16 sps:$4 sm:$0xff]  }
  0x11   :  { %v7721_v52 = vld [vmem:[%s9852_s0] sm:$0xff]  ;;  %v6537_v55 = vld [vmem:[%s9851_s1 + $0x168] ss:$16 sps:$4 sm:$0xff]   ;;  %v6540_v57 = vld [vmem:[%s9851_s1 + $0x18c] ss:$16 sps:$4 sm:$0xff]  }
  0x12   :  { %v723_v54 = vrot.slane %v7721_v52, %v7710_v49  ;;  %v6538_v56 = vld [vmem:[%s9851_s1 + $0x184] ss:$16 sps:$4 sm:$0xff]   ;;  %v6542_v59 = vld [vmem:[%s9851_s1 + $0x180] ss:$16 sps:$4 sm:$0xff]   ;;  %v6543_v61 = vld [vmem:[%s9851_s1 + $0x188] ss:$16 sps:$4 sm:$0xff]  }
  0x13   :  { %4275 = vmatpush1.bf16.msra.mxu0 %v6494_v18  ;;  %4726 = vmatpush1.bf16.msra.mxu1 %v6495_v19  ;;  %v6544_v62 = vld [vmem:[%s9851_s1 + $0x1a4] ss:$16 sps:$4 sm:$0xff]   ;;  %v6546_v63 = vld [vmem:[%s9851_s1 + $0x1ac] ss:$16 sps:$4 sm:$0xff]   ;;  %v6548_v0 = vld [vmem:[%s9851_s1 + $0x1a0] ss:$16 sps:$4 sm:$0xff]  }
  0x14   :  { %4276 = vmatprep.subr.bf16.mxu0 %v6496_v20  ;;  %4727 = vmatprep.subr.bf16.mxu1 %v6498_v21  ;;  %v731_v58 = vcombine.high %v723_v54, %v723_v54  ;;  %v6549_v1 = vld [vmem:[%s9851_s1 + $0x1a8] ss:$16 sps:$4 sm:$0xff]   ;;  %v6550_v2 = vld [vmem:[%s9851_s1 + $0x1c4] ss:$16 sps:$4 sm:$0xff]   ;;  %v6552_v3 = vld [vmem:[%s9851_s1 + $0x1cc] ss:$16 sps:$4 sm:$0xff]   ;;  %v7790_v13 = vrot.slane %v723_v54, %v7710_v49 }
  0x15   :  { %v6554_v4 = vld [vmem:[%s9851_s1 + $0x1c0] ss:$16 sps:$4 sm:$0xff]   ;;  %v6555_v5 = vld [vmem:[%s9851_s1 + $0x1c8] ss:$16 sps:$4 sm:$0xff]   ;;  %v6556_v6 = vld [vmem:[%s9851_s1 + $0x1e4] ss:$16 sps:$4 sm:$0xff]  }
  0x16   :  { %v753_v60 = vrot.slane %v731_v58, %v7710_v49  ;;  %v6558_v7 = vld [vmem:[%s9851_s1 + $0x1ec] ss:$16 sps:$4 sm:$0xff]   ;;  %v6560_v8 = vld [vmem:[%s9851_s1 + $0x1e0] ss:$16 sps:$4 sm:$0xff]   ;;  %v6561_v9 = vld [vmem:[%s9851_s1 + $0x1e8] ss:$16 sps:$4 sm:$0xff]  }
  0x17   :  { %4277 = vmatpush1.bf16.msra.mxu0 %v6500_v22  ;;  %4728 = vmatpush1.bf16.msra.mxu1 %v6501_v23  ;;  %v6564_v10 = vld [vmem:[%s9851_s1 + $0x204] ss:$16 sps:$4 sm:$0xff]   ;;  %v6567_v11 = vld [vmem:[%s9851_s1 + $0x20c] ss:$16 sps:$4 sm:$0xff]   ;;  %v6562_v12 = vld [vmem:[%s9851_s1 + $0x200] ss:$16 sps:$4 sm:$0xff]  }
  0x18   :  { %4278 = vmatprep.subr.bf16.mxu0 %v6502_v24  ;;  %4729 = vmatprep.subr.bf16.mxu1 %v6504_v25  ;;  %v6565_v14 = vld [vmem:[%s9851_s1 + $0x208] ss:$16 sps:$4 sm:$0xff]   ;;  %v6570_v15 = vld [vmem:[%s9851_s1 + $0x224] ss:$16 sps:$4 sm:$0xff]   ;;  %v6573_v16 = vld [vmem:[%s9851_s1 + $0x22c] ss:$16 sps:$4 sm:$0xff]   ;;  %v763_v17 = vcombine.high %v753_v60, %v753_v60 }
  0x19   :  { %4298 = vmatprep.mubr.bf16.mxu0 %v753_v60  ;;  %4749 = vmatprep.mubr.bf16.mxu1 %v753_v60  ;;  %v6568_v18 = vld [vmem:[%s9851_s1 + $0x220] ss:$16 sps:$4 sm:$0xff]   ;;  %v6571_v19 = vld [vmem:[%s9851_s1 + $0x228] ss:$16 sps:$4 sm:$0xff]   ;;  %v6576_v20 = vld [vmem:[%s9851_s1 + $0x244] ss:$16 sps:$4 sm:$0xff]  }
  0x1a   :  { %v6579_v21 = vld [vmem:[%s9851_s1 + $0x24c] ss:$16 sps:$4 sm:$0xff]   ;;  %v6574_v22 = vld [vmem:[%s9851_s1 + $0x240] ss:$16 sps:$4 sm:$0xff]   ;;  %v6577_v23 = vld [vmem:[%s9851_s1 + $0x248] ss:$16 sps:$4 sm:$0xff]  }
  0x1b   :  { %4279 = vmatpush1.bf16.msra.mxu0 %v6506_v26  ;;  %4730 = vmatpush1.bf16.msra.mxu1 %v6507_v27  ;;  %v6582_v24 = vld [vmem:[%s9851_s1 + $0x264] ss:$16 sps:$4 sm:$0xff]   ;;  %v6585_v25 = vld [vmem:[%s9851_s1 + $0x26c] ss:$16 sps:$4 sm:$0xff]   ;;  %v6580_v26 = vld [vmem:[%s9851_s1 + $0x260] ss:$16 sps:$4 sm:$0xff]  }
  0x1c   :  { %4280 = vmatprep.subr.bf16.mxu0 %v6508_v28  ;;  %4731 = vmatprep.subr.bf16.mxu1 %v6510_v29  ;;  %v6583_v27 = vld [vmem:[%s9851_s1 + $0x268] ss:$16 sps:$4 sm:$0xff]   ;;  %v6588_v28 = vld [vmem:[%s9851_s1 + $0x284] ss:$16 sps:$4 sm:$0xff]   ;;  %v6591_v29 = vld [vmem:[%s9851_s1 + $0x28c] ss:$16 sps:$4 sm:$0xff]  }
  0x1d   :  { %v6600_v36 = vld [vmem:[%s9851_s1 + $0x2c4] ss:$16 sps:$4 sm:$0xff]   ;;  %v6603_v37 = vld [vmem:[%s9851_s1 + $0x2cc] ss:$16 sps:$4 sm:$0xff]   ;;  %v6598_v38 = vld [vmem:[%s9851_s1 + $0x2c0] ss:$16 sps:$4 sm:$0xff]  }
  0x1e   :  { %v6604_v42 = vld [vmem:[%s9851_s1 + $0x2e0] ss:$16 sps:$4 sm:$0xff]   ;;  %v6619_v54 = vld [vmem:[%s9851_s1 + $0x328] ss:$16 sps:$4 sm:$0xff]   ;;  %v6633_v60 = vld [vmem:[%s9851_s1 + $0x36c] ss:$16 sps:$4 sm:$0xff]  }
  0x1f   :  { %4281 = vmatpush1.bf16.msra.mxu0 %v6512_v30  ;;  %4732 = vmatpush1.bf16.msra.mxu1 %v6513_v31  ;;  %v6586_v30 = vld [vmem:[%s9851_s1 + $0x280] ss:$16 sps:$4 sm:$0xff]   ;;  %v6589_v31 = vld [vmem:[%s9851_s1 + $0x288] ss:$16 sps:$4 sm:$0xff]  }
  0x20   :  { %4282 = vmatprep.subr.bf16.mxu0 %v6514_v32  ;;  %4733 = vmatprep.subr.bf16.mxu1 %v6516_v33  ;;  %v6594_v32 = vld [vmem:[%s9851_s1 + $0x2a4] ss:$16 sps:$4 sm:$0xff]   ;;  %v6597_v33 = vld [vmem:[%s9851_s1 + $0x2ac] ss:$16 sps:$4 sm:$0xff]   ;;  %v6625_v58 = vld [vmem:[%s9851_s1 + $0x348] ss:$16 sps:$4 sm:$0xff]  }
  0x23   :  { %4283 = vmatpush1.bf16.msra.mxu0 %v6518_v34  ;;  %4734 = vmatpush1.bf16.msra.mxu1 %v6519_v35  ;;  %v6592_v34 = vld [vmem:[%s9851_s1 + $0x2a0] ss:$16 sps:$4 sm:$0xff]   ;;  %v6595_v35 = vld [vmem:[%s9851_s1 + $0x2a8] ss:$16 sps:$4 sm:$0xff]  }
  0x24   :  { %4284 = vmatprep.subr.bf16.mxu0 %v6520_v39  ;;  %4735 = vmatprep.subr.bf16.mxu1 %v6522_v40  ;;  %v6601_v39 = vld [vmem:[%s9851_s1 + $0x2c8] ss:$16 sps:$4 sm:$0xff]   ;;  %v6606_v40 = vld [vmem:[%s9851_s1 + $0x2e4] ss:$16 sps:$4 sm:$0xff]  }
  0x27   :  { %4285 = vmatpush1.bf16.msra.mxu0 %v6524_v41  ;;  %4736 = vmatpush1.bf16.msra.mxu1 %v6525_v44  ;;  %v6609_v41 = vld [vmem:[%s9851_s1 + $0x2ec] ss:$16 sps:$4 sm:$0xff]   ;;  %v6607_v44 = vld [vmem:[%s9851_s1 + $0x2e8] ss:$16 sps:$4 sm:$0xff]  }
  0x28   :  { %4286 = vmatprep.subr.bf16.mxu0 %v6526_v45  ;;  %4737 = vmatprep.subr.bf16.mxu1 %v6528_v46  ;;  %v6612_v45 = vld [vmem:[%s9851_s1 + $0x304] ss:$16 sps:$4 sm:$0xff]   ;;  %v6615_v46 = vld [vmem:[%s9851_s1 + $0x30c] ss:$16 sps:$4 sm:$0xff]  }
  0x2b   :  { %4287 = vmatpush1.bf16.msra.mxu0 %v6530_v47  ;;  %4738 = vmatpush1.bf16.msra.mxu1 %v6531_v48  ;;  %v6610_v47 = vld [vmem:[%s9851_s1 + $0x300] ss:$16 sps:$4 sm:$0xff]   ;;  %v6613_v48 = vld [vmem:[%s9851_s1 + $0x308] ss:$16 sps:$4 sm:$0xff]  }
  0x2c   :  { %4288 = vmatprep.subr.bf16.mxu0 %v6532_v50  ;;  %4739 = vmatprep.subr.bf16.mxu1 %v6534_v51  ;;  %v6618_v50 = vld [vmem:[%s9851_s1 + $0x324] ss:$16 sps:$4 sm:$0xff]   ;;  %v6621_v51 = vld [vmem:[%s9851_s1 + $0x32c] ss:$16 sps:$4 sm:$0xff]  }
  0x2f   :  { %4289 = vmatpush1.bf16.msra.mxu0 %v6536_v53  ;;  %4740 = vmatpush1.bf16.msra.mxu1 %v6537_v55  ;;  %v6616_v53 = vld [vmem:[%s9851_s1 + $0x320] ss:$16 sps:$4 sm:$0xff]   ;;  %v6624_v55 = vld [vmem:[%s9851_s1 + $0x344] ss:$16 sps:$4 sm:$0xff]  }
  0x30   :  { %4290 = vmatprep.subr.bf16.mxu0 %v6538_v56  ;;  %4741 = vmatprep.subr.bf16.mxu1 %v6540_v57  ;;  %v6627_v56 = vld [vmem:[%s9851_s1 + $0x34c] ss:$16 sps:$4 sm:$0xff]   ;;  %v6622_v57 = vld [vmem:[%s9851_s1 + $0x340] ss:$16 sps:$4 sm:$0xff]  }
  0x33   :  { %4291 = vmatpush1.bf16.msra.mxu0 %v6542_v59  ;;  %4742 = vmatpush1.bf16.msra.mxu1 %v6543_v61  ;;  %v6630_v59 = vld [vmem:[%s9851_s1 + $0x364] ss:$16 sps:$4 sm:$0xff]   ;;  %v6628_v61 = vld [vmem:[%s9851_s1 + $0x360] ss:$16 sps:$4 sm:$0xff]  }
  0x34   :  { %4292 = vmatprep.subr.bf16.mxu0 %v6544_v62  ;;  %4743 = vmatprep.subr.bf16.mxu1 %v6546_v63  ;;  %v6631_v62 = vld [vmem:[%s9851_s1 + $0x368] ss:$16 sps:$4 sm:$0xff]   ;;  %v6636_v63 = vld [vmem:[%s9851_s1 + $0x384] ss:$16 sps:$4 sm:$0xff]  }
  0x37   :  { %4293 = vmatpush1.bf16.msra.mxu0 %v6548_v0  ;;  %4744 = vmatpush1.bf16.msra.mxu1 %v6549_v1  ;;  %v6639_v0 = vld [vmem:[%s9851_s1 + $0x38c] ss:$16 sps:$4 sm:$0xff]   ;;  %v6634_v1 = vld [vmem:[%s9851_s1 + $0x380] ss:$16 sps:$4 sm:$0xff]  }
  0x38   :  { %4294 = vmatprep.subr.bf16.mxu0 %v6550_v2  ;;  %4745 = vmatprep.subr.bf16.mxu1 %v6552_v3  ;;  %v6637_v2 = vld [vmem:[%s9851_s1 + $0x388] ss:$16 sps:$4 sm:$0xff]   ;;  %v6642_v3 = vld [vmem:[%s9851_s1 + $0x3a4] ss:$16 sps:$4 sm:$0xff]  }
  0x3b   :  { %4295 = vmatpush1.bf16.msra.mxu0 %v6554_v4  ;;  %4746 = vmatpush1.bf16.msra.mxu1 %v6555_v5  ;;  %v6645_v4 = vld [vmem:[%s9851_s1 + $0x3ac] ss:$16 sps:$4 sm:$0xff]   ;;  %v6640_v5 = vld [vmem:[%s9851_s1 + $0x3a0] ss:$16 sps:$4 sm:$0xff]  }
  0x3c   :  { %4296 = vmatprep.subr.bf16.mxu0 %v6556_v6  ;;  %4747 = vmatprep.subr.bf16.mxu1 %v6558_v7  ;;  %v6643_v6 = vld [vmem:[%s9851_s1 + $0x3a8] ss:$16 sps:$4 sm:$0xff]   ;;  %v6648_v7 = vld [vmem:[%s9851_s1 + $0x3c4] ss:$16 sps:$4 sm:$0xff]  }
  0x3f   :  { %4297 = vmatpush1.bf16.msra.mxu0 %v6560_v8  ;;  %4748 = vmatpush1.bf16.msra.mxu1 %v6561_v9  ;;  %v6651_v8 = vld [vmem:[%s9851_s1 + $0x3cc] ss:$16 sps:$4 sm:$0xff]   ;;  %v716_v9 = vcombine.high %v7721_v52, %v7721_v52 }
  0x40   :  { %4307 = vmatprep.subr.bf16.mxu0 %v6564_v10  ;;  %4758 = vmatprep.subr.bf16.mxu1 %v6567_v11  ;;  %v6646_v10 = vld [vmem:[%s9851_s1 + $0x3c0] ss:$16 sps:$4 sm:$0xff]   ;;  %v6649_v11 = vld [vmem:[%s9851_s1 + $0x3c8] ss:$16 sps:$4 sm:$0xff]   ;;  %v6657_v52 = vld [vmem:[%s9851_s1 + $0x3ec] ss:$16 sps:$4 sm:$0xff]  }
  0x42   :  { %4299 = vmatmul.mubr.bf16.vlgmr.msra.gmra.mrb[0].mxu0 %v7790_v13  ;;  %4750 = vmatmul.mubr.bf16.vlgmr.msra.gmra.mrb[0].mxu1 %v7790_v13 }
  0x43   :  { %4308 = vmatpush1.bf16.msra.mxu0 %v6562_v12  ;;  %4759 = vmatpush1.bf16.msra.mxu1 %v6565_v14  ;;  %v6654_v12 = vld [vmem:[%s9851_s1 + $0x3e4] ss:$16 sps:$4 sm:$0xff]   ;;  %v7974_v14 = vrot.slane %v716_v9, %v7710_v49  ;;  %v6733_v9 = vld [vmem:[%s9851_s1 + $0x588] ss:$16 sps:$4 sm:$0xff]  }
  0x44   :  { %4309 = vmatprep.subr.bf16.mxu0 %v6570_v15  ;;  %4760 = vmatprep.subr.bf16.mxu1 %v6573_v16  ;;  %v6652_v15 = vld [vmem:[%s9851_s1 + $0x3e0] ss:$16 sps:$4 sm:$0xff]   ;;  %v6655_v16 = vld [vmem:[%s9851_s1 + $0x3e8] ss:$16 sps:$4 sm:$0xff]  }
  0x45   :  { %4339 = vmatprep.mubr.bf16.mxu0 %v763_v17  ;;  %4790 = vmatprep.mubr.bf16.mxu1 %v763_v17  ;;  %v6660_v17 = vld [vmem:[%s9851_s1 + $0x404] ss:$16 sps:$4 sm:$0xff]  }
  0x47   :  { %4310 = vmatpush1.bf16.msra.mxu0 %v6568_v18  ;;  %4761 = vmatpush1.bf16.msra.mxu1 %v6571_v19  ;;  %v6663_v18 = vld [vmem:[%s9851_s1 + $0x40c] ss:$16 sps:$4 sm:$0xff]   ;;  %v732_v19 = vcombine.high %v7974_v14, %v7974_v14 }
  0x48   :  { %4311 = vmatprep.subr.bf16.mxu0 %v6576_v20  ;;  %4762 = vmatprep.subr.bf16.mxu1 %v6579_v21  ;;  %v6658_v20 = vld [vmem:[%s9851_s1 + $0x400] ss:$16 sps:$4 sm:$0xff]   ;;  %v761_v21 = vcombine.high %v7790_v13, %v7790_v13 }
  0x49   :  { %v6664_v13 = vld [vmem:[%s9851_s1 + $0x420] ss:$16 sps:$4 sm:$0xff]  }
  0x4b   :  { %4312 = vmatpush1.bf16.msra.mxu0 %v6574_v22  ;;  %4763 = vmatpush1.bf16.msra.mxu1 %v6577_v23  ;;  %v6661_v22 = vld [vmem:[%s9851_s1 + $0x408] ss:$16 sps:$4 sm:$0xff]   ;;  %v6666_v23 = vld [vmem:[%s9851_s1 + $0x424] ss:$16 sps:$4 sm:$0xff]  }
  0x4c   :  { %4313 = vmatprep.subr.bf16.mxu0 %v6582_v24  ;;  %4764 = vmatprep.subr.bf16.mxu1 %v6585_v25  ;;  %v6669_v24 = vld [vmem:[%s9851_s1 + $0x42c] ss:$16 sps:$4 sm:$0xff]   ;;  %v8005_v25 = vrot.slane %v732_v19, %v7710_v49  ;;  %v6750_v19 = vld [vmem:[%s9851_s1 + $0x5e4] ss:$16 sps:$4 sm:$0xff]  }
  0x4f   :  { %4314 = vmatpush1.bf16.msra.mxu0 %v6580_v26  ;;  %4765 = vmatpush1.bf16.msra.mxu1 %v6583_v27  ;;  %v6667_v26 = vld [vmem:[%s9851_s1 + $0x428] ss:$16 sps:$4 sm:$0xff]   ;;  %v6672_v27 = vld [vmem:[%s9851_s1 + $0x444] ss:$16 sps:$4 sm:$0xff]  }
  0x50   :  { %4315 = vmatprep.subr.bf16.mxu0 %v6588_v28  ;;  %4766 = vmatprep.subr.bf16.mxu1 %v6591_v29  ;;  %v6675_v28 = vld [vmem:[%s9851_s1 + $0x44c] ss:$16 sps:$4 sm:$0xff]   ;;  %v6670_v29 = vld [vmem:[%s9851_s1 + $0x440] ss:$16 sps:$4 sm:$0xff]  }
  0x53   :  { %4316 = vmatpush1.bf16.msra.mxu0 %v6586_v30  ;;  %4767 = vmatpush1.bf16.msra.mxu1 %v6589_v31  ;;  %v6673_v30 = vld [vmem:[%s9851_s1 + $0x448] ss:$16 sps:$4 sm:$0xff]   ;;  %v6678_v31 = vld [vmem:[%s9851_s1 + $0x464] ss:$16 sps:$4 sm:$0xff]  }
  0x54   :  { %4317 = vmatprep.subr.bf16.mxu0 %v6594_v32  ;;  %4768 = vmatprep.subr.bf16.mxu1 %v6597_v33  ;;  %v6681_v32 = vld [vmem:[%s9851_s1 + $0x46c] ss:$16 sps:$4 sm:$0xff]   ;;  %v6676_v33 = vld [vmem:[%s9851_s1 + $0x460] ss:$16 sps:$4 sm:$0xff]  }
  0x57   :  { %4318 = vmatpush1.bf16.msra.mxu0 %v6592_v34  ;;  %4769 = vmatpush1.bf16.msra.mxu1 %v6595_v35  ;;  %v6679_v34 = vld [vmem:[%s9851_s1 + $0x468] ss:$16 sps:$4 sm:$0xff]   ;;  %v6684_v35 = vld [vmem:[%s9851_s1 + $0x484] ss:$16 sps:$4 sm:$0xff]  }
  0x58   :  { %4319 = vmatprep.subr.bf16.mxu0 %v6600_v36  ;;  %4770 = vmatprep.subr.bf16.mxu1 %v6603_v37  ;;  %v6687_v36 = vld [vmem:[%s9851_s1 + $0x48c] ss:$16 sps:$4 sm:$0xff]   ;;  %v6682_v37 = vld [vmem:[%s9851_s1 + $0x480] ss:$16 sps:$4 sm:$0xff]  }
  0x5b   :  { %4320 = vmatpush1.bf16.msra.mxu0 %v6598_v38  ;;  %4771 = vmatpush1.bf16.msra.mxu1 %v6601_v39  ;;  %v6685_v38 = vld [vmem:[%s9851_s1 + $0x488] ss:$16 sps:$4 sm:$0xff]   ;;  %v6690_v39 = vld [vmem:[%s9851_s1 + $0x4a4] ss:$16 sps:$4 sm:$0xff]  }
  0x5c   :  { %4321 = vmatprep.subr.bf16.mxu0 %v6606_v40  ;;  %4772 = vmatprep.subr.bf16.mxu1 %v6609_v41  ;;  %v6693_v40 = vld [vmem:[%s9851_s1 + $0x4ac] ss:$16 sps:$4 sm:$0xff]   ;;  %v6688_v41 = vld [vmem:[%s9851_s1 + $0x4a0] ss:$16 sps:$4 sm:$0xff]  }
  0x5f   :  { %4322 = vmatpush1.bf16.msra.mxu0 %v6604_v42  ;;  %4773 = vmatpush1.bf16.msra.mxu1 %v6607_v44  ;;  %v6691_v42 = vld [vmem:[%s9851_s1 + $0x4a8] ss:$16 sps:$4 sm:$0xff]   ;;  %v6696_v44 = vld [vmem:[%s9851_s1 + $0x4c4] ss:$16 sps:$4 sm:$0xff]  }
  0x60   :  { %4323 = vmatprep.subr.bf16.mxu0 %v6612_v45  ;;  %4774 = vmatprep.subr.bf16.mxu1 %v6615_v46  ;;  %v6699_v45 = vld [vmem:[%s9851_s1 + $0x4cc] ss:$16 sps:$4 sm:$0xff]   ;;  %v6694_v46 = vld [vmem:[%s9851_s1 + $0x4c0] ss:$16 sps:$4 sm:$0xff]  }
  0x63   :  { %4324 = vmatpush1.bf16.msra.mxu0 %v6610_v47  ;;  %4775 = vmatpush1.bf16.msra.mxu1 %v6613_v48  ;;  %v6697_v47 = vld [vmem:[%s9851_s1 + $0x4c8] ss:$16 sps:$4 sm:$0xff]   ;;  %v6702_v48 = vld [vmem:[%s9851_s1 + $0x4e4] ss:$16 sps:$4 sm:$0xff]  }
  0x64   :  { %4325 = vmatprep.subr.bf16.mxu0 %v6618_v50  ;;  %4776 = vmatprep.subr.bf16.mxu1 %v6621_v51  ;;  %v6705_v50 = vld [vmem:[%s9851_s1 + $0x4ec] ss:$16 sps:$4 sm:$0xff]   ;;  %v6700_v51 = vld [vmem:[%s9851_s1 + $0x4e0] ss:$16 sps:$4 sm:$0xff]  }
  0x67   :  { %4326 = vmatpush1.bf16.msra.mxu0 %v6616_v53  ;;  %4777 = vmatpush1.bf16.msra.mxu1 %v6619_v54  ;;  %v6703_v53 = vld [vmem:[%s9851_s1 + $0x4e8] ss:$16 sps:$4 sm:$0xff]   ;;  %v6708_v54 = vld [vmem:[%s9851_s1 + $0x504] ss:$16 sps:$4 sm:$0xff]  }
  0x68   :  { %4327 = vmatprep.subr.bf16.mxu0 %v6624_v55  ;;  %4778 = vmatprep.subr.bf16.mxu1 %v6627_v56  ;;  %v6711_v55 = vld [vmem:[%s9851_s1 + $0x50c] ss:$16 sps:$4 sm:$0xff]   ;;  %v6706_v56 = vld [vmem:[%s9851_s1 + $0x500] ss:$16 sps:$4 sm:$0xff]  }
  0x6b   :  { %4328 = vmatpush1.bf16.msra.mxu0 %v6622_v57  ;;  %4779 = vmatpush1.bf16.msra.mxu1 %v6625_v58  ;;  %v6709_v57 = vld [vmem:[%s9851_s1 + $0x508] ss:$16 sps:$4 sm:$0xff]   ;;  %v6714_v58 = vld [vmem:[%s9851_s1 + $0x524] ss:$16 sps:$4 sm:$0xff]  }
  0x6c   :  { %4329 = vmatprep.subr.bf16.mxu0 %v6630_v59  ;;  %4780 = vmatprep.subr.bf16.mxu1 %v6633_v60  ;;  %v6717_v59 = vld [vmem:[%s9851_s1 + $0x52c] ss:$16 sps:$4 sm:$0xff]   ;;  %v6712_v60 = vld [vmem:[%s9851_s1 + $0x520] ss:$16 sps:$4 sm:$0xff]  }
  0x6f   :  { %4330 = vmatpush1.bf16.msra.mxu0 %v6628_v61  ;;  %4781 = vmatpush1.bf16.msra.mxu1 %v6631_v62  ;;  %v6715_v61 = vld [vmem:[%s9851_s1 + $0x528] ss:$16 sps:$4 sm:$0xff]   ;;  %v6720_v62 = vld [vmem:[%s9851_s1 + $0x544] ss:$16 sps:$4 sm:$0xff]  }
  0x70   :  { %4331 = vmatprep.subr.bf16.mxu0 %v6636_v63  ;;  %4782 = vmatprep.subr.bf16.mxu1 %v6639_v0  ;;  %v6723_v63 = vld [vmem:[%s9851_s1 + $0x54c] ss:$16 sps:$4 sm:$0xff]   ;;  %v6718_v0 = vld [vmem:[%s9851_s1 + $0x540] ss:$16 sps:$4 sm:$0xff]  }
  0x73   :  { %4332 = vmatpush1.bf16.msra.mxu0 %v6634_v1  ;;  %4783 = vmatpush1.bf16.msra.mxu1 %v6637_v2  ;;  %v6721_v1 = vld [vmem:[%s9851_s1 + $0x548] ss:$16 sps:$4 sm:$0xff]   ;;  %v6726_v2 = vld [vmem:[%s9851_s1 + $0x564] ss:$16 sps:$4 sm:$0xff]  }
  0x74   :  { %4333 = vmatprep.subr.bf16.mxu0 %v6642_v3  ;;  %4784 = vmatprep.subr.bf16.mxu1 %v6645_v4  ;;  %v6729_v3 = vld [vmem:[%s9851_s1 + $0x56c] ss:$16 sps:$4 sm:$0xff]   ;;  %v6724_v4 = vld [vmem:[%s9851_s1 + $0x560] ss:$16 sps:$4 sm:$0xff]  }
  0x77   :  { %4334 = vmatpush1.bf16.msra.mxu0 %v6640_v5  ;;  %4785 = vmatpush1.bf16.msra.mxu1 %v6643_v6  ;;  %v6727_v5 = vld [vmem:[%s9851_s1 + $0x568] ss:$16 sps:$4 sm:$0xff]   ;;  %v6732_v6 = vld [vmem:[%s9851_s1 + $0x584] ss:$16 sps:$4 sm:$0xff]  }
  0x78   :  { %4335 = vmatprep.subr.bf16.mxu0 %v6648_v7  ;;  %4786 = vmatprep.subr.bf16.mxu1 %v6651_v8  ;;  %v6735_v7 = vld [vmem:[%s9851_s1 + $0x58c] ss:$16 sps:$4 sm:$0xff]   ;;  %v6730_v8 = vld [vmem:[%s9851_s1 + $0x580] ss:$16 sps:$4 sm:$0xff]  }
  0x7b   :  { %4336 = vmatpush1.bf16.msra.mxu0 %v6646_v10  ;;  %4787 = vmatpush1.bf16.msra.mxu1 %v6649_v11  ;;  %v6738_v10 = vld [vmem:[%s9851_s1 + $0x5a4] ss:$16 sps:$4 sm:$0xff]   ;;  %v6741_v11 = vld [vmem:[%s9851_s1 + $0x5ac] ss:$16 sps:$4 sm:$0xff]  }
  0x7c   :  { %4337 = vmatprep.subr.bf16.mxu0 %v6654_v12  ;;  %4788 = vmatprep.subr.bf16.mxu1 %v6657_v52  ;;  %v6736_v12 = vld [vmem:[%s9851_s1 + $0x5a0] ss:$16 sps:$4 sm:$0xff]   ;;  %v6739_v52 = vld [vmem:[%s9851_s1 + $0x5a8] ss:$16 sps:$4 sm:$0xff]  }
  0x7f   :  { %4338 = vmatpush1.bf16.msra.mxu0 %v6652_v15  ;;  %4789 = vmatpush1.bf16.msra.mxu1 %v6655_v16  ;;  %v6744_v15 = vld [vmem:[%s9851_s1 + $0x5c4] ss:$16 sps:$4 sm:$0xff]   ;;  %v6747_v16 = vld [vmem:[%s9851_s1 + $0x5cc] ss:$16 sps:$4 sm:$0xff]  }
  0x80   :  { %4348 = vmatprep.subr.bf16.mxu0 %v6660_v17  ;;  %4799 = vmatprep.subr.bf16.mxu1 %v6663_v18  ;;  %v6742_v17 = vld [vmem:[%s9851_s1 + $0x5c0] ss:$16 sps:$4 sm:$0xff]   ;;  %v6745_v18 = vld [vmem:[%s9851_s1 + $0x5c8] ss:$16 sps:$4 sm:$0xff]  }
  0x82   :  { %4340 = vmatmul.mubr.bf16.vlgmr.msra.gmra.mrb[0].mxu0 %v761_v21  ;;  %4791 = vmatmul.mubr.bf16.vlgmr.msra.gmra.mrb[0].mxu1 %v761_v21  ;;  %v6748_v21 = vld [vmem:[%s9851_s1 + $0x5e0] ss:$16 sps:$4 sm:$0xff]  }
  0x83   :  { %4349 = vmatpush1.bf16.msra.mxu0 %v6658_v20  ;;  %4800 = vmatpush1.bf16.msra.mxu1 %v6661_v22  ;;  %v6753_v20 = vld [vmem:[%s9851_s1 + $0x5ec] ss:$16 sps:$4 sm:$0xff]   ;;  %v6751_v22 = vld [vmem:[%s9851_s1 + $0x5e8] ss:$16 sps:$4 sm:$0xff]  }
  0x84   :  { %4350 = vmatprep.subr.bf16.mxu0 %v6666_v23  ;;  %4801 = vmatprep.subr.bf16.mxu1 %v6669_v24  ;;  %v6757_v23 = vld [vmem:[%s9851_s1 + $0x604] ss:$16 sps:$4 sm:$0xff]   ;;  %v6760_v24 = vld [vmem:[%s9851_s1 + $0x60c] ss:$16 sps:$4 sm:$0xff]  }
  0x85   :  { %4380 = vmatprep.mubr.bf16.mxu0 %v8005_v25  ;;  %4831 = vmatprep.mubr.bf16.mxu1 %v8005_v25 }
  0x87   :  { %4351 = vmatpush1.bf16.msra.mxu0 %v6664_v13  ;;  %4802 = vmatpush1.bf16.msra.mxu1 %v6667_v26  ;;  %v6755_v13 = vld [vmem:[%s9851_s1 + $0x600] ss:$16 sps:$4 sm:$0xff]   ;;  %v8194_v26 = vrot.slane %v7974_v14, %v7710_v49  ;;  %v764_v14 = vcombine.high %v8005_v25, %v8005_v25  ;;  %v6769_v25 = vld [vmem:[%s9851_s1 + $0x644] ss:$16 sps:$4 sm:$0xff]  }
  0x88   :  { %4352 = vmatprep.subr.bf16.mxu0 %v6672_v27  ;;  %4803 = vmatprep.subr.bf16.mxu1 %v6675_v28  ;;  %v6758_v27 = vld [vmem:[%s9851_s1 + $0x608] ss:$16 sps:$4 sm:$0xff]   ;;  %v6763_v28 = vld [vmem:[%s9851_s1 + $0x624] ss:$16 sps:$4 sm:$0xff]  }
  0x8b   :  { %4353 = vmatpush1.bf16.msra.mxu0 %v6670_v29  ;;  %4804 = vmatpush1.bf16.msra.mxu1 %v6673_v30  ;;  %v6766_v29 = vld [vmem:[%s9851_s1 + $0x62c] ss:$16 sps:$4 sm:$0xff]   ;;  %v6761_v30 = vld [vmem:[%s9851_s1 + $0x620] ss:$16 sps:$4 sm:$0xff]  }
  0x8c   :  { %4354 = vmatprep.subr.bf16.mxu0 %v6678_v31  ;;  %4805 = vmatprep.subr.bf16.mxu1 %v6681_v32  ;;  %v6764_v31 = vld [vmem:[%s9851_s1 + $0x628] ss:$16 sps:$4 sm:$0xff]   ;;  %v6772_v32 = vld [vmem:[%s9851_s1 + $0x64c] ss:$16 sps:$4 sm:$0xff]  }
  0x8f   :  { %4355 = vmatpush1.bf16.msra.mxu0 %v6676_v33  ;;  %4806 = vmatpush1.bf16.msra.mxu1 %v6679_v34  ;;  %v6767_v33 = vld [vmem:[%s9851_s1 + $0x640] ss:$16 sps:$4 sm:$0xff]   ;;  %v6770_v34 = vld [vmem:[%s9851_s1 + $0x648] ss:$16 sps:$4 sm:$0xff]  }
  0x90   :  { %4356 = vmatprep.subr.bf16.mxu0 %v6684_v35  ;;  %4807 = vmatprep.subr.bf16.mxu1 %v6687_v36  ;;  %v6775_v35 = vld [vmem:[%s9851_s1 + $0x664] ss:$16 sps:$4 sm:$0xff]   ;;  %v6778_v36 = vld [vmem:[%s9851_s1 + $0x66c] ss:$16 sps:$4 sm:$0xff]  }
  0x93   :  { %4357 = vmatpush1.bf16.msra.mxu0 %v6682_v37  ;;  %4808 = vmatpush1.bf16.msra.mxu1 %v6685_v38  ;;  %v6773_v37 = vld [vmem:[%s9851_s1 + $0x660] ss:$16 sps:$4 sm:$0xff]   ;;  %v6776_v38 = vld [vmem:[%s9851_s1 + $0x668] ss:$16 sps:$4 sm:$0xff]  }
  0x94   :  { %4358 = vmatprep.subr.bf16.mxu0 %v6690_v39  ;;  %4809 = vmatprep.subr.bf16.mxu1 %v6693_v40  ;;  %v6781_v39 = vld [vmem:[%s9851_s1 + $0x684] ss:$16 sps:$4 sm:$0xff]   ;;  %v6784_v40 = vld [vmem:[%s9851_s1 + $0x68c] ss:$16 sps:$4 sm:$0xff]  }
  0x97   :  { %4359 = vmatpush1.bf16.msra.mxu0 %v6688_v41  ;;  %4810 = vmatpush1.bf16.msra.mxu1 %v6691_v42  ;;  %v6779_v41 = vld [vmem:[%s9851_s1 + $0x680] ss:$16 sps:$4 sm:$0xff]   ;;  %v6782_v42 = vld [vmem:[%s9851_s1 + $0x688] ss:$16 sps:$4 sm:$0xff]  }
  0x98   :  { %4360 = vmatprep.subr.bf16.mxu0 %v6696_v44  ;;  %4811 = vmatprep.subr.bf16.mxu1 %v6699_v45  ;;  %v6787_v44 = vld [vmem:[%s9851_s1 + $0x6a4] ss:$16 sps:$4 sm:$0xff]   ;;  %v6790_v45 = vld [vmem:[%s9851_s1 + $0x6ac] ss:$16 sps:$4 sm:$0xff]  }
  0x9b   :  { %4361 = vmatpush1.bf16.msra.mxu0 %v6694_v46  ;;  %4812 = vmatpush1.bf16.msra.mxu1 %v6697_v47  ;;  %v6785_v46 = vld [vmem:[%s9851_s1 + $0x6a0] ss:$16 sps:$4 sm:$0xff]   ;;  %v6788_v47 = vld [vmem:[%s9851_s1 + $0x6a8] ss:$16 sps:$4 sm:$0xff]  }
  0x9c   :  { %4362 = vmatprep.subr.bf16.mxu0 %v6702_v48  ;;  %4813 = vmatprep.subr.bf16.mxu1 %v6705_v50  ;;  %v6793_v48 = vld [vmem:[%s9851_s1 + $0x6c4] ss:$16 sps:$4 sm:$0xff]   ;;  %v6796_v50 = vld [vmem:[%s9851_s1 + $0x6cc] ss:$16 sps:$4 sm:$0xff]  }
  0x9f   :  { %4363 = vmatpush1.bf16.msra.mxu0 %v6700_v51  ;;  %4814 = vmatpush1.bf16.msra.mxu1 %v6703_v53  ;;  %v6791_v51 = vld [vmem:[%s9851_s1 + $0x6c0] ss:$16 sps:$4 sm:$0xff]   ;;  %v6794_v53 = vld [vmem:[%s9851_s1 + $0x6c8] ss:$16 sps:$4 sm:$0xff]  }
  0xa0   :  { %4364 = vmatprep.subr.bf16.mxu0 %v6708_v54  ;;  %4815 = vmatprep.subr.bf16.mxu1 %v6711_v55  ;;  %v6799_v54 = vld [vmem:[%s9851_s1 + $0x6e4] ss:$16 sps:$4 sm:$0xff]   ;;  %v6802_v55 = vld [vmem:[%s9851_s1 + $0x6ec] ss:$16 sps:$4 sm:$0xff]  }
  0xa3   :  { %4365 = vmatpush1.bf16.msra.mxu0 %v6706_v56  ;;  %4816 = vmatpush1.bf16.msra.mxu1 %v6709_v57  ;;  %v6797_v56 = vld [vmem:[%s9851_s1 + $0x6e0] ss:$16 sps:$4 sm:$0xff]   ;;  %v6800_v57 = vld [vmem:[%s9851_s1 + $0x6e8] ss:$16 sps:$4 sm:$0xff]  }
  0xa4   :  { %4366 = vmatprep.subr.bf16.mxu0 %v6714_v58  ;;  %4817 = vmatprep.subr.bf16.mxu1 %v6717_v59  ;;  %v6805_v58 = vld [vmem:[%s9851_s1 + $0x704] ss:$16 sps:$4 sm:$0xff]   ;;  %v6808_v59 = vld [vmem:[%s9851_s1 + $0x70c] ss:$16 sps:$4 sm:$0xff]  }
  0xa7   :  { %4367 = vmatpush1.bf16.msra.mxu0 %v6712_v60  ;;  %4818 = vmatpush1.bf16.msra.mxu1 %v6715_v61  ;;  %v6803_v60 = vld [vmem:[%s9851_s1 + $0x700] ss:$16 sps:$4 sm:$0xff]   ;;  %v6806_v61 = vld [vmem:[%s9851_s1 + $0x708] ss:$16 sps:$4 sm:$0xff]  }
  0xa8   :  { %4368 = vmatprep.subr.bf16.mxu0 %v6720_v62  ;;  %4819 = vmatprep.subr.bf16.mxu1 %v6723_v63  ;;  %v6811_v62 = vld [vmem:[%s9851_s1 + $0x724] ss:$16 sps:$4 sm:$0xff]   ;;  %v6814_v63 = vld [vmem:[%s9851_s1 + $0x72c] ss:$16 sps:$4 sm:$0xff]  }
  0xab   :  { %4369 = vmatpush1.bf16.msra.mxu0 %v6718_v0  ;;  %4820 = vmatpush1.bf16.msra.mxu1 %v6721_v1  ;;  %v6809_v0 = vld [vmem:[%s9851_s1 + $0x720] ss:$16 sps:$4 sm:$0xff]   ;;  %v6812_v1 = vld [vmem:[%s9851_s1 + $0x728] ss:$16 sps:$4 sm:$0xff]  }
  0xac   :  { %4370 = vmatprep.subr.bf16.mxu0 %v6726_v2  ;;  %4821 = vmatprep.subr.bf16.mxu1 %v6729_v3  ;;  %v6817_v2 = vld [vmem:[%s9851_s1 + $0x744] ss:$16 sps:$4 sm:$0xff]   ;;  %v6820_v3 = vld [vmem:[%s9851_s1 + $0x74c] ss:$16 sps:$4 sm:$0xff]  }
  0xaf   :  { %4371 = vmatpush1.bf16.msra.mxu0 %v6724_v4  ;;  %4822 = vmatpush1.bf16.msra.mxu1 %v6727_v5  ;;  %v6815_v4 = vld [vmem:[%s9851_s1 + $0x740] ss:$16 sps:$4 sm:$0xff]   ;;  %v6818_v5 = vld [vmem:[%s9851_s1 + $0x748] ss:$16 sps:$4 sm:$0xff]  }
  0xb0   :  { %4372 = vmatprep.subr.bf16.mxu0 %v6732_v6  ;;  %4823 = vmatprep.subr.bf16.mxu1 %v6735_v7  ;;  %v6823_v6 = vld [vmem:[%s9851_s1 + $0x764] ss:$16 sps:$4 sm:$0xff]   ;;  %v6826_v7 = vld [vmem:[%s9851_s1 + $0x76c] ss:$16 sps:$4 sm:$0xff]  }
  0xb3   :  { %4373 = vmatpush1.bf16.msra.mxu0 %v6730_v8  ;;  %4824 = vmatpush1.bf16.msra.mxu1 %v6733_v9  ;;  %v6821_v8 = vld [vmem:[%s9851_s1 + $0x760] ss:$16 sps:$4 sm:$0xff]   ;;  %v6824_v9 = vld [vmem:[%s9851_s1 + $0x768] ss:$16 sps:$4 sm:$0xff]  }
  0xb4   :  { %4374 = vmatprep.subr.bf16.mxu0 %v6738_v10  ;;  %4825 = vmatprep.subr.bf16.mxu1 %v6741_v11  ;;  %v6829_v10 = vld [vmem:[%s9851_s1 + $0x784] ss:$16 sps:$4 sm:$0xff]   ;;  %v6832_v11 = vld [vmem:[%s9851_s1 + $0x78c] ss:$16 sps:$4 sm:$0xff]  }
  0xb7   :  { %4375 = vmatpush1.bf16.msra.mxu0 %v6736_v12  ;;  %4826 = vmatpush1.bf16.msra.mxu1 %v6739_v52  ;;  %v6827_v12 = vld [vmem:[%s9851_s1 + $0x780] ss:$16 sps:$4 sm:$0xff]   ;;  %v6830_v52 = vld [vmem:[%s9851_s1 + $0x788] ss:$16 sps:$4 sm:$0xff]  }
  0xb8   :  { %4376 = vmatprep.subr.bf16.mxu0 %v6744_v15  ;;  %4827 = vmatprep.subr.bf16.mxu1 %v6747_v16  ;;  %v6835_v15 = vld [vmem:[%s9851_s1 + $0x7a4] ss:$16 sps:$4 sm:$0xff]   ;;  %v6838_v16 = vld [vmem:[%s9851_s1 + $0x7ac] ss:$16 sps:$4 sm:$0xff]  }
  0xbb   :  { %4377 = vmatpush1.bf16.msra.mxu0 %v6742_v17  ;;  %4828 = vmatpush1.bf16.msra.mxu1 %v6745_v18  ;;  %v6833_v17 = vld [vmem:[%s9851_s1 + $0x7a0] ss:$16 sps:$4 sm:$0xff]   ;;  %v6836_v18 = vld [vmem:[%s9851_s1 + $0x7a8] ss:$16 sps:$4 sm:$0xff]  }
  0xbc   :  { %4378 = vmatprep.subr.bf16.mxu0 %v6750_v19  ;;  %4829 = vmatprep.subr.bf16.mxu1 %v6753_v20  ;;  %v6841_v19 = vld [vmem:[%s9851_s1 + $0x7c4] ss:$16 sps:$4 sm:$0xff]   ;;  %v6844_v20 = vld [vmem:[%s9851_s1 + $0x7cc] ss:$16 sps:$4 sm:$0xff]  }
  0xbf   :  { %4379 = vmatpush1.bf16.msra.mxu0 %v6748_v21  ;;  %4830 = vmatpush1.bf16.msra.mxu1 %v6751_v22  ;;  %v8368_v21 = vld.sshfl [vmem:[%s9852_s0 + $0x8] sm:$0xff pattern:$0x75316420]  ;;  %v6839_v22 = vld [vmem:[%s9851_s1 + $0x7c0] ss:$16 sps:$4 sm:$0xff]  }
  0xc0   :  { %4389 = vmatprep.subr.bf16.mxu0 %v6757_v23  ;;  %4840 = vmatprep.subr.bf16.mxu1 %v6760_v24  ;;  %v6842_v23 = vld [vmem:[%s9851_s1 + $0x7c8] ss:$16 sps:$4 sm:$0xff]   ;;  %v6847_v24 = vld [vmem:[%s9851_s1 + $0x7e4] ss:$16 sps:$4 sm:$0xff]  }
  0xc2   :  { %4381 = vmatmul.mubr.bf16.vlgmr.msra.gmra.mrb[0].mxu0 %v8194_v26  ;;  %4832 = vmatmul.mubr.bf16.vlgmr.msra.gmra.mrb[0].mxu1 %v8194_v26 }
  0xc3   :  { %4390 = vmatpush1.bf16.msra.mxu0 %v6755_v13  ;;  %4841 = vmatpush1.bf16.msra.mxu1 %v6758_v27  ;;  %v6850_v13 = vld [vmem:[%s9851_s1 + $0x7ec] ss:$16 sps:$4 sm:$0xff]   ;;  %v6845_v27 = vld [vmem:[%s9851_s1 + $0x7e0] ss:$16 sps:$4 sm:$0xff]  }
  0xc4   :  { %4391 = vmatprep.subr.bf16.mxu0 %v6763_v28  ;;  %4842 = vmatprep.subr.bf16.mxu1 %v6766_v29  ;;  %v6848_v28 = vld [vmem:[%s9851_s1 + $0x7e8] ss:$16 sps:$4 sm:$0xff]   ;;  %v6853_v29 = vld [vmem:[%s9851_s1 + $0x804] ss:$16 sps:$4 sm:$0xff]  }
  0xc5   :  { %4421 = vmatprep.mubr.bf16.mxu0 %v764_v14  ;;  %4872 = vmatprep.mubr.bf16.mxu1 %v764_v14  ;;  %v6856_v14 = vld [vmem:[%s9851_s1 + $0x80c] ss:$16 sps:$4 sm:$0xff]  }
  0xc7   :  { %4392 = vmatpush1.bf16.msra.mxu0 %v6761_v30  ;;  %4843 = vmatpush1.bf16.msra.mxu1 %v6764_v31  ;;  %v780_v30 = vcombine.high %v8368_v21, %v8368_v21  ;;  %v762_v31 = vcombine.high %v8194_v26, %v8194_v26  ;;  %v6862_v26 = vld [vmem:[%s9851_s1 + $0x82c] ss:$16 sps:$4 sm:$0xff]  }
  0xc8   :  { %4393 = vmatprep.subr.bf16.mxu0 %v6769_v25  ;;  %4844 = vmatprep.subr.bf16.mxu1 %v6772_v32  ;;  %v6851_v25 = vld [vmem:[%s9851_s1 + $0x800] ss:$16 sps:$4 sm:$0xff]   ;;  %v6854_v32 = vld [vmem:[%s9851_s1 + $0x808] ss:$16 sps:$4 sm:$0xff]  }
  0xcb   :  { %4394 = vmatpush1.bf16.msra.mxu0 %v6767_v33  ;;  %4845 = vmatpush1.bf16.msra.mxu1 %v6770_v34  ;;  %v6859_v33 = vld [vmem:[%s9851_s1 + $0x824] ss:$16 sps:$4 sm:$0xff]   ;;  %v8411_v34 = vrot.slane %v780_v30, %v7710_v49 }
  0xcc   :  { %4395 = vmatprep.subr.bf16.mxu0 %v6775_v35  ;;  %4846 = vmatprep.subr.bf16.mxu1 %v6778_v36  ;;  %v6857_v35 = vld [vmem:[%s9851_s1 + $0x820] ss:$16 sps:$4 sm:$0xff]   ;;  %v6860_v36 = vld [vmem:[%s9851_s1 + $0x828] ss:$16 sps:$4 sm:$0xff]   ;;  %v6943_v30 = vld [vmem:[%s9851_s1 + $0x9e4] ss:$16 sps:$4 sm:$0xff]  }
  0xcf   :  { %4396 = vmatpush1.bf16.msra.mxu0 %v6773_v37  ;;  %4847 = vmatpush1.bf16.msra.mxu1 %v6776_v38  ;;  %v6865_v37 = vld [vmem:[%s9851_s1 + $0x844] ss:$16 sps:$4 sm:$0xff]   ;;  %v6868_v38 = vld [vmem:[%s9851_s1 + $0x84c] ss:$16 sps:$4 sm:$0xff]  }
  0xd0   :  { %4397 = vmatprep.subr.bf16.mxu0 %v6781_v39  ;;  %4848 = vmatprep.subr.bf16.mxu1 %v6784_v40  ;;  %v6863_v39 = vld [vmem:[%s9851_s1 + $0x840] ss:$16 sps:$4 sm:$0xff]   ;;  %v6866_v40 = vld [vmem:[%s9851_s1 + $0x848] ss:$16 sps:$4 sm:$0xff]  }
  0xd3   :  { %4398 = vmatpush1.bf16.msra.mxu0 %v6779_v41  ;;  %4849 = vmatpush1.bf16.msra.mxu1 %v6782_v42  ;;  %v6871_v41 = vld [vmem:[%s9851_s1 + $0x864] ss:$16 sps:$4 sm:$0xff]   ;;  %v6874_v42 = vld [vmem:[%s9851_s1 + $0x86c] ss:$16 sps:$4 sm:$0xff]  }
  0xd4   :  { %4399 = vmatprep.subr.bf16.mxu0 %v6787_v44  ;;  %4850 = vmatprep.subr.bf16.mxu1 %v6790_v45  ;;  %v6869_v44 = vld [vmem:[%s9851_s1 + $0x860] ss:$16 sps:$4 sm:$0xff]   ;;  %v6872_v45 = vld [vmem:[%s9851_s1 + $0x868] ss:$16 sps:$4 sm:$0xff]  }
  0xd7   :  { %4400 = vmatpush1.bf16.msra.mxu0 %v6785_v46  ;;  %4851 = vmatpush1.bf16.msra.mxu1 %v6788_v47  ;;  %v6877_v46 = vld [vmem:[%s9851_s1 + $0x884] ss:$16 sps:$4 sm:$0xff]   ;;  %v6880_v47 = vld [vmem:[%s9851_s1 + $0x88c] ss:$16 sps:$4 sm:$0xff]  }
  0xd8   :  { %4401 = vmatprep.subr.bf16.mxu0 %v6793_v48  ;;  %4852 = vmatprep.subr.bf16.mxu1 %v6796_v50  ;;  %v6875_v48 = vld [vmem:[%s9851_s1 + $0x880] ss:$16 sps:$4 sm:$0xff]   ;;  %v6878_v50 = vld [vmem:[%s9851_s1 + $0x888] ss:$16 sps:$4 sm:$0xff]  }
  0xdb   :  { %4402 = vmatpush1.bf16.msra.mxu0 %v6791_v51  ;;  %4853 = vmatpush1.bf16.msra.mxu1 %v6794_v53  ;;  %v6883_v51 = vld [vmem:[%s9851_s1 + $0x8a4] ss:$16 sps:$4 sm:$0xff]   ;;  %v6886_v53 = vld [vmem:[%s9851_s1 + $0x8ac] ss:$16 sps:$4 sm:$0xff]  }
  0xdc   :  { %4403 = vmatprep.subr.bf16.mxu0 %v6799_v54  ;;  %4854 = vmatprep.subr.bf16.mxu1 %v6802_v55  ;;  %v6881_v54 = vld [vmem:[%s9851_s1 + $0x8a0] ss:$16 sps:$4 sm:$0xff]   ;;  %v6884_v55 = vld [vmem:[%s9851_s1 + $0x8a8] ss:$16 sps:$4 sm:$0xff]  }
  0xdf   :  { %4404 = vmatpush1.bf16.msra.mxu0 %v6797_v56  ;;  %4855 = vmatpush1.bf16.msra.mxu1 %v6800_v57  ;;  %v6889_v56 = vld [vmem:[%s9851_s1 + $0x8c4] ss:$16 sps:$4 sm:$0xff]   ;;  %v6892_v57 = vld [vmem:[%s9851_s1 + $0x8cc] ss:$16 sps:$4 sm:$0xff]  }
  0xe0   :  { %4405 = vmatprep.subr.bf16.mxu0 %v6805_v58  ;;  %4856 = vmatprep.subr.bf16.mxu1 %v6808_v59  ;;  %v6887_v58 = vld [vmem:[%s9851_s1 + $0x8c0] ss:$16 sps:$4 sm:$0xff]   ;;  %v6890_v59 = vld [vmem:[%s9851_s1 + $0x8c8] ss:$16 sps:$4 sm:$0xff]  }
  0xe3   :  { %4406 = vmatpush1.bf16.msra.mxu0 %v6803_v60  ;;  %4857 = vmatpush1.bf16.msra.mxu1 %v6806_v61  ;;  %v6895_v60 = vld [vmem:[%s9851_s1 + $0x8e4] ss:$16 sps:$4 sm:$0xff]   ;;  %v6898_v61 = vld [vmem:[%s9851_s1 + $0x8ec] ss:$16 sps:$4 sm:$0xff]  }
  0xe4   :  { %4407 = vmatprep.subr.bf16.mxu0 %v6811_v62  ;;  %4858 = vmatprep.subr.bf16.mxu1 %v6814_v63  ;;  %v6893_v62 = vld [vmem:[%s9851_s1 + $0x8e0] ss:$16 sps:$4 sm:$0xff]   ;;  %v6896_v63 = vld [vmem:[%s9851_s1 + $0x8e8] ss:$16 sps:$4 sm:$0xff]  }
  0xe7   :  { %4408 = vmatpush1.bf16.msra.mxu0 %v6809_v0  ;;  %4859 = vmatpush1.bf16.msra.mxu1 %v6812_v1  ;;  %v6901_v0 = vld [vmem:[%s9851_s1 + $0x904] ss:$16 sps:$4 sm:$0xff]   ;;  %v6904_v1 = vld [vmem:[%s9851_s1 + $0x90c] ss:$16 sps:$4 sm:$0xff]  }
  0xe8   :  { %4409 = vmatprep.subr.bf16.mxu0 %v6817_v2  ;;  %4860 = vmatprep.subr.bf16.mxu1 %v6820_v3  ;;  %v6899_v2 = vld [vmem:[%s9851_s1 + $0x900] ss:$16 sps:$4 sm:$0xff]   ;;  %v6902_v3 = vld [vmem:[%s9851_s1 + $0x908] ss:$16 sps:$4 sm:$0xff]  }
  0xeb   :  { %4410 = vmatpush1.bf16.msra.mxu0 %v6815_v4  ;;  %4861 = vmatpush1.bf16.msra.mxu1 %v6818_v5  ;;  %v6907_v4 = vld [vmem:[%s9851_s1 + $0x924] ss:$16 sps:$4 sm:$0xff]   ;;  %v6910_v5 = vld [vmem:[%s9851_s1 + $0x92c] ss:$16 sps:$4 sm:$0xff]  }
  0xec   :  { %4411 = vmatprep.subr.bf16.mxu0 %v6823_v6  ;;  %4862 = vmatprep.subr.bf16.mxu1 %v6826_v7  ;;  %v6905_v6 = vld [vmem:[%s9851_s1 + $0x920] ss:$16 sps:$4 sm:$0xff]   ;;  %v6908_v7 = vld [vmem:[%s9851_s1 + $0x928] ss:$16 sps:$4 sm:$0xff]  }
  0xef   :  { %4412 = vmatpush1.bf16.msra.mxu0 %v6821_v8  ;;  %4863 = vmatpush1.bf16.msra.mxu1 %v6824_v9  ;;  %v6913_v8 = vld [vmem:[%s9851_s1 + $0x944] ss:$16 sps:$4 sm:$0xff]   ;;  %v6916_v9 = vld [vmem:[%s9851_s1 + $0x94c] ss:$16 sps:$4 sm:$0xff]  }
  0xf0   :  { %4413 = vmatprep.subr.bf16.mxu0 %v6829_v10  ;;  %4864 = vmatprep.subr.bf16.mxu1 %v6832_v11  ;;  %v6911_v10 = vld [vmem:[%s9851_s1 + $0x940] ss:$16 sps:$4 sm:$0xff]   ;;  %v6914_v11 = vld [vmem:[%s9851_s1 + $0x948] ss:$16 sps:$4 sm:$0xff]  }
  0xf3   :  { %4414 = vmatpush1.bf16.msra.mxu0 %v6827_v12  ;;  %4865 = vmatpush1.bf16.msra.mxu1 %v6830_v52  ;;  %v6919_v12 = vld [vmem:[%s9851_s1 + $0x964] ss:$16 sps:$4 sm:$0xff]   ;;  %v6922_v52 = vld [vmem:[%s9851_s1 + $0x96c] ss:$16 sps:$4 sm:$0xff]  }
  0xf4   :  { %4415 = vmatprep.subr.bf16.mxu0 %v6835_v15  ;;  %4866 = vmatprep.subr.bf16.mxu1 %v6838_v16  ;;  %v6917_v15 = vld [vmem:[%s9851_s1 + $0x960] ss:$16 sps:$4 sm:$0xff]   ;;  %v6920_v16 = vld [vmem:[%s9851_s1 + $0x968] ss:$16 sps:$4 sm:$0xff]  }
  0xf7   :  { %4416 = vmatpush1.bf16.msra.mxu0 %v6833_v17  ;;  %4867 = vmatpush1.bf16.msra.mxu1 %v6836_v18  ;;  %v6925_v17 = vld [vmem:[%s9851_s1 + $0x984] ss:$16 sps:$4 sm:$0xff]   ;;  %v6928_v18 = vld [vmem:[%s9851_s1 + $0x98c] ss:$16 sps:$4 sm:$0xff]  }
  0xf8   :  { %4417 = vmatprep.subr.bf16.mxu0 %v6841_v19  ;;  %4868 = vmatprep.subr.bf16.mxu1 %v6844_v20  ;;  %v6923_v19 = vld [vmem:[%s9851_s1 + $0x980] ss:$16 sps:$4 sm:$0xff]   ;;  %v6926_v20 = vld [vmem:[%s9851_s1 + $0x988] ss:$16 sps:$4 sm:$0xff]  }
  0xfb   :  { %4418 = vmatpush1.bf16.msra.mxu0 %v6839_v22  ;;  %4869 = vmatpush1.bf16.msra.mxu1 %v6842_v23  ;;  %v6931_v22 = vld [vmem:[%s9851_s1 + $0x9a4] ss:$16 sps:$4 sm:$0xff]   ;;  %v6934_v23 = vld [vmem:[%s9851_s1 + $0x9ac] ss:$16 sps:$4 sm:$0xff]  }
  0xfc   :  { %4419 = vmatprep.subr.bf16.mxu0 %v6847_v24  ;;  %4870 = vmatprep.subr.bf16.mxu1 %v6850_v13  ;;  %v6929_v24 = vld [vmem:[%s9851_s1 + $0x9a0] ss:$16 sps:$4 sm:$0xff]   ;;  %v6932_v13 = vld [vmem:[%s9851_s1 + $0x9a8] ss:$16 sps:$4 sm:$0xff]  }
  0xff   :  { %4420 = vmatpush1.bf16.msra.mxu0 %v6845_v27  ;;  %4871 = vmatpush1.bf16.msra.mxu1 %v6848_v28  ;;  %v6937_v27 = vld [vmem:[%s9851_s1 + $0x9c4] ss:$16 sps:$4 sm:$0xff]   ;;  %v6940_v28 = vld [vmem:[%s9851_s1 + $0x9cc] ss:$16 sps:$4 sm:$0xff]  }
 0x100   :  { %4430 = vmatprep.subr.bf16.mxu0 %v6853_v29  ;;  %4881 = vmatprep.subr.bf16.mxu1 %v6856_v14  ;;  %v6935_v29 = vld [vmem:[%s9851_s1 + $0x9c0] ss:$16 sps:$4 sm:$0xff]   ;;  %v6938_v14 = vld [vmem:[%s9851_s1 + $0x9c8] ss:$16 sps:$4 sm:$0xff]  }
 0x102   :  { %4422 = vmatmul.mubr.bf16.vlgmr.msra.gmra.mrb[0].mxu0 %v762_v31  ;;  %4873 = vmatmul.mubr.bf16.vlgmr.msra.gmra.mrb[0].mxu1 %v762_v31  ;;  %v6946_v31 = vld [vmem:[%s9851_s1 + $0x9ec] ss:$16 sps:$4 sm:$0xff]  }
 0x103   :  { %4431 = vmatpush1.bf16.msra.mxu0 %v6851_v25  ;;  %4882 = vmatpush1.bf16.msra.mxu1 %v6854_v32  ;;  %v6941_v25 = vld [vmem:[%s9851_s1 + $0x9e0] ss:$16 sps:$4 sm:$0xff]   ;;  %v6944_v32 = vld [vmem:[%s9851_s1 + $0x9e8] ss:$16 sps:$4 sm:$0xff]  }
 0x104   :  { %4432 = vmatprep.subr.bf16.mxu0 %v6859_v33  ;;  %4883 = vmatprep.subr.bf16.mxu1 %v6862_v26  ;;  %v6949_v33 = vld [vmem:[%s9851_s1 + $0xa04] ss:$16 sps:$4 sm:$0xff]   ;;  %v6952_v26 = vld [vmem:[%s9851_s1 + $0xa0c] ss:$16 sps:$4 sm:$0xff]  }
 0x105   :  { %4462 = vmatprep.mubr.bf16.mxu0 %v8411_v34  ;;  %4913 = vmatprep.mubr.bf16.mxu1 %v8411_v34 }
 0x107   :  { %4433 = vmatpush1.bf16.msra.mxu0 %v6857_v35  ;;  %4884 = vmatpush1.bf16.msra.mxu1 %v6860_v36  ;;  %v8597_v35 = vrot.slane %v8368_v21, %v7710_v49  ;;  %v6947_v36 = vld [vmem:[%s9851_s1 + $0xa00] ss:$16 sps:$4 sm:$0xff]   ;;  %v6958_v21 = vld [vmem:[%s9851_s1 + $0xa2c] ss:$16 sps:$4 sm:$0xff]  }
 0x108   :  { %4434 = vmatprep.subr.bf16.mxu0 %v6865_v37  ;;  %4885 = vmatprep.subr.bf16.mxu1 %v6868_v38  ;;  %v6950_v37 = vld [vmem:[%s9851_s1 + $0xa08] ss:$16 sps:$4 sm:$0xff]   ;;  %v6955_v38 = vld [vmem:[%s9851_s1 + $0xa24] ss:$16 sps:$4 sm:$0xff]  }
 0x10b   :  { %4435 = vmatpush1.bf16.msra.mxu0 %v6863_v39  ;;  %4886 = vmatpush1.bf16.msra.mxu1 %v6866_v40  ;;  %v812_v39 = vcombine.high %v8411_v34, %v8411_v34  ;;  %v6953_v40 = vld [vmem:[%s9851_s1 + $0xa20] ss:$16 sps:$4 sm:$0xff]   ;;  %v6961_v34 = vld [vmem:[%s9851_s1 + $0xa44] ss:$16 sps:$4 sm:$0xff]  }
 0x10c   :  { %4436 = vmatprep.subr.bf16.mxu0 %v6871_v41  ;;  %4887 = vmatprep.subr.bf16.mxu1 %v6874_v42  ;;  %v6956_v41 = vld [vmem:[%s9851_s1 + $0xa28] ss:$16 sps:$4 sm:$0xff]   ;;  %v6964_v42 = vld [vmem:[%s9851_s1 + $0xa4c] ss:$16 sps:$4 sm:$0xff]  }
 0x10f   :  { %4437 = vmatpush1.bf16.msra.mxu0 %v6869_v44  ;;  %4888 = vmatpush1.bf16.msra.mxu1 %v6872_v45  ;;  %v6959_v44 = vld [vmem:[%s9851_s1 + $0xa40] ss:$16 sps:$4 sm:$0xff]   ;;  %v6962_v45 = vld [vmem:[%s9851_s1 + $0xa48] ss:$16 sps:$4 sm:$0xff]  }
 0x110   :  { %4438 = vmatprep.subr.bf16.mxu0 %v6877_v46  ;;  %4889 = vmatprep.subr.bf16.mxu1 %v6880_v47  ;;  %v6967_v46 = vld [vmem:[%s9851_s1 + $0xa64] ss:$16 sps:$4 sm:$0xff]   ;;  %v6970_v47 = vld [vmem:[%s9851_s1 + $0xa6c] ss:$16 sps:$4 sm:$0xff]  }
 0x113   :  { %4439 = vmatpush1.bf16.msra.mxu0 %v6875_v48  ;;  %4890 = vmatpush1.bf16.msra.mxu1 %v6878_v50  ;;  %v6965_v48 = vld [vmem:[%s9851_s1 + $0xa60] ss:$16 sps:$4 sm:$0xff]   ;;  %v6968_v50 = vld [vmem:[%s9851_s1 + $0xa68] ss:$16 sps:$4 sm:$0xff]  }
 0x114   :  { %4440 = vmatprep.subr.bf16.mxu0 %v6883_v51  ;;  %4891 = vmatprep.subr.bf16.mxu1 %v6886_v53  ;;  %v6973_v51 = vld [vmem:[%s9851_s1 + $0xa84] ss:$16 sps:$4 sm:$0xff]   ;;  %v6976_v53 = vld [vmem:[%s9851_s1 + $0xa8c] ss:$16 sps:$4 sm:$0xff]  }
 0x117   :  { %4441 = vmatpush1.bf16.msra.mxu0 %v6881_v54  ;;  %4892 = vmatpush1.bf16.msra.mxu1 %v6884_v55  ;;  %v6971_v54 = vld [vmem:[%s9851_s1 + $0xa80] ss:$16 sps:$4 sm:$0xff]   ;;  %v6974_v55 = vld [vmem:[%s9851_s1 + $0xa88] ss:$16 sps:$4 sm:$0xff]  }
 0x118   :  { %4442 = vmatprep.subr.bf16.mxu0 %v6889_v56  ;;  %4893 = vmatprep.subr.bf16.mxu1 %v6892_v57  ;;  %v6979_v56 = vld [vmem:[%s9851_s1 + $0xaa4] ss:$16 sps:$4 sm:$0xff]   ;;  %v6982_v57 = vld [vmem:[%s9851_s1 + $0xaac] ss:$16 sps:$4 sm:$0xff]  }
 0x11b   :  { %4443 = vmatpush1.bf16.msra.mxu0 %v6887_v58  ;;  %4894 = vmatpush1.bf16.msra.mxu1 %v6890_v59  ;;  %v6977_v58 = vld [vmem:[%s9851_s1 + $0xaa0] ss:$16 sps:$4 sm:$0xff]   ;;  %v6980_v59 = vld [vmem:[%s9851_s1 + $0xaa8] ss:$16 sps:$4 sm:$0xff]  }
 0x11c   :  { %4444 = vmatprep.subr.bf16.mxu0 %v6895_v60  ;;  %4895 = vmatprep.subr.bf16.mxu1 %v6898_v61  ;;  %v6985_v60 = vld [vmem:[%s9851_s1 + $0xac4] ss:$16 sps:$4 sm:$0xff]   ;;  %v6988_v61 = vld [vmem:[%s9851_s1 + $0xacc] ss:$16 sps:$4 sm:$0xff]  }
 0x11f   :  { %4445 = vmatpush1.bf16.msra.mxu0 %v6893_v62  ;;  %4896 = vmatpush1.bf16.msra.mxu1 %v6896_v63  ;;  %v6983_v62 = vld [vmem:[%s9851_s1 + $0xac0] ss:$16 sps:$4 sm:$0xff]   ;;  %v6986_v63 = vld [vmem:[%s9851_s1 + $0xac8] ss:$16 sps:$4 sm:$0xff]  }
 0x120   :  { %4446 = vmatprep.subr.bf16.mxu0 %v6901_v0  ;;  %4897 = vmatprep.subr.bf16.mxu1 %v6904_v1  ;;  %v6991_v0 = vld [vmem:[%s9851_s1 + $0xae4] ss:$16 sps:$4 sm:$0xff]   ;;  %v6994_v1 = vld [vmem:[%s9851_s1 + $0xaec] ss:$16 sps:$4 sm:$0xff]  }
 0x123   :  { %4447 = vmatpush1.bf16.msra.mxu0 %v6899_v2  ;;  %4898 = vmatpush1.bf16.msra.mxu1 %v6902_v3  ;;  %v6989_v2 = vld [vmem:[%s9851_s1 + $0xae0] ss:$16 sps:$4 sm:$0xff]   ;;  %v6992_v3 = vld [vmem:[%s9851_s1 + $0xae8] ss:$16 sps:$4 sm:$0xff]  }
 0x124   :  { %4448 = vmatprep.subr.bf16.mxu0 %v6907_v4  ;;  %4899 = vmatprep.subr.bf16.mxu1 %v6910_v5  ;;  %v6997_v4 = vld [vmem:[%s9851_s1 + $0xb04] ss:$16 sps:$4 sm:$0xff]   ;;  %v7000_v5 = vld [vmem:[%s9851_s1 + $0xb0c] ss:$16 sps:$4 sm:$0xff]  }
 0x127   :  { %4449 = vmatpush1.bf16.msra.mxu0 %v6905_v6  ;;  %4900 = vmatpush1.bf16.msra.mxu1 %v6908_v7  ;;  %v6995_v6 = vld [vmem:[%s9851_s1 + $0xb00] ss:$16 sps:$4 sm:$0xff]   ;;  %v6998_v7 = vld [vmem:[%s9851_s1 + $0xb08] ss:$16 sps:$4 sm:$0xff]  }
 0x128   :  { %4450 = vmatprep.subr.bf16.mxu0 %v6913_v8  ;;  %4901 = vmatprep.subr.bf16.mxu1 %v6916_v9  ;;  %v7003_v8 = vld [vmem:[%s9851_s1 + $0xb24] ss:$16 sps:$4 sm:$0xff]   ;;  %v7006_v9 = vld [vmem:[%s9851_s1 + $0xb2c] ss:$16 sps:$4 sm:$0xff]  }
 0x12b   :  { %4451 = vmatpush1.bf16.msra.mxu0 %v6911_v10  ;;  %4902 = vmatpush1.bf16.msra.mxu1 %v6914_v11  ;;  %v7001_v10 = vld [vmem:[%s9851_s1 + $0xb20] ss:$16 sps:$4 sm:$0xff]   ;;  %v7004_v11 = vld [vmem:[%s9851_s1 + $0xb28] ss:$16 sps:$4 sm:$0xff]  }
 0x12c   :  { %4452 = vmatprep.subr.bf16.mxu0 %v6919_v12  ;;  %4903 = vmatprep.subr.bf16.mxu1 %v6922_v52  ;;  %v7009_v12 = vld [vmem:[%s9851_s1 + $0xb44] ss:$16 sps:$4 sm:$0xff]   ;;  %v7012_v52 = vld [vmem:[%s9851_s1 + $0xb4c] ss:$16 sps:$4 sm:$0xff]  }
 0x12f   :  { %4453 = vmatpush1.bf16.msra.mxu0 %v6917_v15  ;;  %4904 = vmatpush1.bf16.msra.mxu1 %v6920_v16  ;;  %v7007_v15 = vld [vmem:[%s9851_s1 + $0xb40] ss:$16 sps:$4 sm:$0xff]   ;;  %v7010_v16 = vld [vmem:[%s9851_s1 + $0xb48] ss:$16 sps:$4 sm:$0xff]  }
 0x130   :  { %4454 = vmatprep.subr.bf16.mxu0 %v6925_v17  ;;  %4905 = vmatprep.subr.bf16.mxu1 %v6928_v18  ;;  %v7015_v17 = vld [vmem:[%s9851_s1 + $0xb64] ss:$16 sps:$4 sm:$0xff]   ;;  %v7018_v18 = vld [vmem:[%s9851_s1 + $0xb6c] ss:$16 sps:$4 sm:$0xff]  }
 0x133   :  { %4455 = vmatpush1.bf16.msra.mxu0 %v6923_v19  ;;  %4906 = vmatpush1.bf16.msra.mxu1 %v6926_v20  ;;  %v7013_v19 = vld [vmem:[%s9851_s1 + $0xb60] ss:$16 sps:$4 sm:$0xff]   ;;  %v7016_v20 = vld [vmem:[%s9851_s1 + $0xb68] ss:$16 sps:$4 sm:$0xff]  }
 0x134   :  { %4456 = vmatprep.subr.bf16.mxu0 %v6931_v22  ;;  %4907 = vmatprep.subr.bf16.mxu1 %v6934_v23  ;;  %v7021_v22 = vld [vmem:[%s9851_s1 + $0xb84] ss:$16 sps:$4 sm:$0xff]   ;;  %v7024_v23 = vld [vmem:[%s9851_s1 + $0xb8c] ss:$16 sps:$4 sm:$0xff]  }
 0x137   :  { %4457 = vmatpush1.bf16.msra.mxu0 %v6929_v24  ;;  %4908 = vmatpush1.bf16.msra.mxu1 %v6932_v13  ;;  %v7019_v24 = vld [vmem:[%s9851_s1 + $0xb80] ss:$16 sps:$4 sm:$0xff]   ;;  %v7022_v13 = vld [vmem:[%s9851_s1 + $0xb88] ss:$16 sps:$4 sm:$0xff]  }
 0x138   :  { %4458 = vmatprep.subr.bf16.mxu0 %v6937_v27  ;;  %4909 = vmatprep.subr.bf16.mxu1 %v6940_v28  ;;  %v7027_v27 = vld [vmem:[%s9851_s1 + $0xba4] ss:$16 sps:$4 sm:$0xff]   ;;  %v7030_v28 = vld [vmem:[%s9851_s1 + $0xbac] ss:$16 sps:$4 sm:$0xff]  }
 0x13b   :  { %4459 = vmatpush1.bf16.msra.mxu0 %v6935_v29  ;;  %4910 = vmatpush1.bf16.msra.mxu1 %v6938_v14  ;;  %v7025_v29 = vld [vmem:[%s9851_s1 + $0xba0] ss:$16 sps:$4 sm:$0xff]   ;;  %v7028_v14 = vld [vmem:[%s9851_s1 + $0xba8] ss:$16 sps:$4 sm:$0xff]  }
 0x13c   :  { %4460 = vmatprep.subr.bf16.mxu0 %v6943_v30  ;;  %4911 = vmatprep.subr.bf16.mxu1 %v6946_v31  ;;  %v7033_v30 = vld [vmem:[%s9851_s1 + $0xbc4] ss:$16 sps:$4 sm:$0xff]   ;;  %v7036_v31 = vld [vmem:[%s9851_s1 + $0xbcc] ss:$16 sps:$4 sm:$0xff]  }
 0x13f   :  { %4461 = vmatpush1.bf16.msra.mxu0 %v6941_v25  ;;  %4912 = vmatpush1.bf16.msra.mxu1 %v6944_v32  ;;  %v7515_v25 = vld [vmem:[%s9852_s0 + $0x8] sm:$0xff] }
 0x140   :  { %4471 = vmatprep.subr.bf16.mxu0 %v6949_v33  ;;  %4922 = vmatprep.subr.bf16.mxu1 %v6952_v26  ;;  %v765_v32 = vcombine.high %v7515_v25, %v7515_v25  ;;  %v7031_v33 = vld [vmem:[%s9851_s1 + $0xbc0] ss:$16 sps:$4 sm:$0xff]   ;;  %v7034_v26 = vld [vmem:[%s9851_s1 + $0xbc8] ss:$16 sps:$4 sm:$0xff]  }
 0x141   :  { %v7115_v25 = vld [vmem:[%s9851_s1 + $0xd80] ss:$16 sps:$4 sm:$0xff]  }
 0x142   :  { %4463 = vmatmul.mubr.bf16.vlgmr.msra.gmra.mrb[0].mxu0 %v8597_v35  ;;  %4914 = vmatmul.mubr.bf16.vlgmr.msra.gmra.mrb[0].mxu1 %v8597_v35 }
 0x143   :  { %4472 = vmatpush1.bf16.msra.mxu0 %v6947_v36  ;;  %4923 = vmatpush1.bf16.msra.mxu1 %v6950_v37  ;;  %v7039_v36 = vld [vmem:[%s9851_s1 + $0xbe4] ss:$16 sps:$4 sm:$0xff]   ;;  %v7042_v37 = vld [vmem:[%s9851_s1 + $0xbec] ss:$16 sps:$4 sm:$0xff]  }
 0x144   :  { %4473 = vmatprep.subr.bf16.mxu0 %v6955_v38  ;;  %4924 = vmatprep.subr.bf16.mxu1 %v6958_v21  ;;  %v8787_v38 = vrot.slane %v765_v32, %v7710_v49  ;;  %v7037_v21 = vld [vmem:[%s9851_s1 + $0xbe0] ss:$16 sps:$4 sm:$0xff]   ;;  %v7118_v32 = vld [vmem:[%s9851_s1 + $0xd88] ss:$16 sps:$4 sm:$0xff]  }
 0x145   :  { %4503 = vmatprep.mubr.bf16.mxu0 %v812_v39  ;;  %4954 = vmatprep.mubr.bf16.mxu1 %v812_v39  ;;  %v7040_v39 = vld [vmem:[%s9851_s1 + $0xbe8] ss:$16 sps:$4 sm:$0xff]  }
 0x147   :  { %4474 = vmatpush1.bf16.msra.mxu0 %v6953_v40  ;;  %4925 = vmatpush1.bf16.msra.mxu1 %v6956_v41  ;;  %v7045_v40 = vld [vmem:[%s9851_s1 + $0xc04] ss:$16 sps:$4 sm:$0xff]   ;;  %v7048_v41 = vld [vmem:[%s9851_s1 + $0xc0c] ss:$16 sps:$4 sm:$0xff]  }
 0x148   :  { %4475 = vmatprep.subr.bf16.mxu0 %v6961_v34  ;;  %4926 = vmatprep.subr.bf16.mxu1 %v6964_v42  ;;  %v781_v34 = vcombine.high %v8787_v38, %v8787_v38  ;;  %v810_v42 = vcombine.high %v8597_v35, %v8597_v35  ;;  %v7054_v35 = vld [vmem:[%s9851_s1 + $0xc2c] ss:$16 sps:$4 sm:$0xff]  }
 0x14b   :  { %4476 = vmatpush1.bf16.msra.mxu0 %v6959_v44  ;;  %4927 = vmatpush1.bf16.msra.mxu1 %v6962_v45  ;;  %v7043_v44 = vld [vmem:[%s9851_s1 + $0xc00] ss:$16 sps:$4 sm:$0xff]   ;;  %v7046_v45 = vld [vmem:[%s9851_s1 + $0xc08] ss:$16 sps:$4 sm:$0xff]  }
 0x14c   :  { %4477 = vmatprep.subr.bf16.mxu0 %v6967_v46  ;;  %4928 = vmatprep.subr.bf16.mxu1 %v6970_v47  ;;  %v7051_v46 = vld [vmem:[%s9851_s1 + $0xc24] ss:$16 sps:$4 sm:$0xff]   ;;  %v8818_v47 = vrot.slane %v781_v34, %v7710_v49 }
 0x14d   :  { %v7135_v34 = vld [vmem:[%s9851_s1 + $0xde4] ss:$16 sps:$4 sm:$0xff]  }
 0x14f   :  { %4478 = vmatpush1.bf16.msra.mxu0 %v6965_v48  ;;  %4929 = vmatpush1.bf16.msra.mxu1 %v6968_v50  ;;  %v7049_v48 = vld [vmem:[%s9851_s1 + $0xc20] ss:$16 sps:$4 sm:$0xff]   ;;  %v7052_v50 = vld [vmem:[%s9851_s1 + $0xc28] ss:$16 sps:$4 sm:$0xff]  }
 0x150   :  { %4479 = vmatprep.subr.bf16.mxu0 %v6973_v51  ;;  %4930 = vmatprep.subr.bf16.mxu1 %v6976_v53  ;;  %v7057_v51 = vld [vmem:[%s9851_s1 + $0xc44] ss:$16 sps:$4 sm:$0xff]   ;;  %v7060_v53 = vld [vmem:[%s9851_s1 + $0xc4c] ss:$16 sps:$4 sm:$0xff]  }
 0x153   :  { %4480 = vmatpush1.bf16.msra.mxu0 %v6971_v54  ;;  %4931 = vmatpush1.bf16.msra.mxu1 %v6974_v55  ;;  %v7055_v54 = vld [vmem:[%s9851_s1 + $0xc40] ss:$16 sps:$4 sm:$0xff]   ;;  %v7058_v55 = vld [vmem:[%s9851_s1 + $0xc48] ss:$16 sps:$4 sm:$0xff]  }
 0x154   :  { %4481 = vmatprep.subr.bf16.mxu0 %v6979_v56  ;;  %4932 = vmatprep.subr.bf16.mxu1 %v6982_v57  ;;  %v7063_v56 = vld [vmem:[%s9851_s1 + $0xc64] ss:$16 sps:$4 sm:$0xff]   ;;  %v7066_v57 = vld [vmem:[%s9851_s1 + $0xc6c] ss:$16 sps:$4 sm:$0xff]  }
 0x157   :  { %4482 = vmatpush1.bf16.msra.mxu0 %v6977_v58  ;;  %4933 = vmatpush1.bf16.msra.mxu1 %v6980_v59  ;;  %v7061_v58 = vld [vmem:[%s9851_s1 + $0xc60] ss:$16 sps:$4 sm:$0xff]   ;;  %v7064_v59 = vld [vmem:[%s9851_s1 + $0xc68] ss:$16 sps:$4 sm:$0xff]  }
 0x158   :  { %4483 = vmatprep.subr.bf16.mxu0 %v6985_v60  ;;  %4934 = vmatprep.subr.bf16.mxu1 %v6988_v61  ;;  %v7069_v60 = vld [vmem:[%s9851_s1 + $0xc84] ss:$16 sps:$4 sm:$0xff]   ;;  %v7072_v61 = vld [vmem:[%s9851_s1 + $0xc8c] ss:$16 sps:$4 sm:$0xff]  }
 0x15b   :  { %4484 = vmatpush1.bf16.msra.mxu0 %v6983_v62  ;;  %4935 = vmatpush1.bf16.msra.mxu1 %v6986_v63  ;;  %v7067_v62 = vld [vmem:[%s9851_s1 + $0xc80] ss:$16 sps:$4 sm:$0xff]   ;;  %v7070_v63 = vld [vmem:[%s9851_s1 + $0xc88] ss:$16 sps:$4 sm:$0xff]  }
 0x15c   :  { %4485 = vmatprep.subr.bf16.mxu0 %v6991_v0  ;;  %4936 = vmatprep.subr.bf16.mxu1 %v6994_v1  ;;  %v7075_v0 = vld [vmem:[%s9851_s1 + $0xca4] ss:$16 sps:$4 sm:$0xff]   ;;  %v7078_v1 = vld [vmem:[%s9851_s1 + $0xcac] ss:$16 sps:$4 sm:$0xff]  }
 0x15f   :  { %4486 = vmatpush1.bf16.msra.mxu0 %v6989_v2  ;;  %4937 = vmatpush1.bf16.msra.mxu1 %v6992_v3  ;;  %v7073_v2 = vld [vmem:[%s9851_s1 + $0xca0] ss:$16 sps:$4 sm:$0xff]   ;;  %v7076_v3 = vld [vmem:[%s9851_s1 + $0xca8] ss:$16 sps:$4 sm:$0xff]  }
 0x160   :  { %4487 = vmatprep.subr.bf16.mxu0 %v6997_v4  ;;  %4938 = vmatprep.subr.bf16.mxu1 %v7000_v5  ;;  %v7081_v4 = vld [vmem:[%s9851_s1 + $0xcc4] ss:$16 sps:$4 sm:$0xff]   ;;  %v7084_v5 = vld [vmem:[%s9851_s1 + $0xccc] ss:$16 sps:$4 sm:$0xff]  }
 0x163   :  { %4488 = vmatpush1.bf16.msra.mxu0 %v6995_v6  ;;  %4939 = vmatpush1.bf16.msra.mxu1 %v6998_v7  ;;  %v7079_v6 = vld [vmem:[%s9851_s1 + $0xcc0] ss:$16 sps:$4 sm:$0xff]   ;;  %v7082_v7 = vld [vmem:[%s9851_s1 + $0xcc8] ss:$16 sps:$4 sm:$0xff]  }
 0x164   :  { %4489 = vmatprep.subr.bf16.mxu0 %v7003_v8  ;;  %4940 = vmatprep.subr.bf16.mxu1 %v7006_v9  ;;  %v7087_v8 = vld [vmem:[%s9851_s1 + $0xce4] ss:$16 sps:$4 sm:$0xff]   ;;  %v7090_v9 = vld [vmem:[%s9851_s1 + $0xcec] ss:$16 sps:$4 sm:$0xff]  }
 0x167   :  { %4490 = vmatpush1.bf16.msra.mxu0 %v7001_v10  ;;  %4941 = vmatpush1.bf16.msra.mxu1 %v7004_v11  ;;  %v7085_v10 = vld [vmem:[%s9851_s1 + $0xce0] ss:$16 sps:$4 sm:$0xff]   ;;  %v7088_v11 = vld [vmem:[%s9851_s1 + $0xce8] ss:$16 sps:$4 sm:$0xff]  }
 0x168   :  { %4491 = vmatprep.subr.bf16.mxu0 %v7009_v12  ;;  %4942 = vmatprep.subr.bf16.mxu1 %v7012_v52  ;;  %v7093_v12 = vld [vmem:[%s9851_s1 + $0xd04] ss:$16 sps:$4 sm:$0xff]   ;;  %v7096_v52 = vld [vmem:[%s9851_s1 + $0xd0c] ss:$16 sps:$4 sm:$0xff]  }
 0x16b   :  { %4492 = vmatpush1.bf16.msra.mxu0 %v7007_v15  ;;  %4943 = vmatpush1.bf16.msra.mxu1 %v7010_v16  ;;  %v7091_v15 = vld [vmem:[%s9851_s1 + $0xd00] ss:$16 sps:$4 sm:$0xff]   ;;  %v7094_v16 = vld [vmem:[%s9851_s1 + $0xd08] ss:$16 sps:$4 sm:$0xff]  }
 0x16c   :  { %4493 = vmatprep.subr.bf16.mxu0 %v7015_v17  ;;  %4944 = vmatprep.subr.bf16.mxu1 %v7018_v18  ;;  %v7099_v17 = vld [vmem:[%s9851_s1 + $0xd24] ss:$16 sps:$4 sm:$0xff]   ;;  %v7102_v18 = vld [vmem:[%s9851_s1 + $0xd2c] ss:$16 sps:$4 sm:$0xff]  }
 0x16f   :  { %4494 = vmatpush1.bf16.msra.mxu0 %v7013_v19  ;;  %4945 = vmatpush1.bf16.msra.mxu1 %v7016_v20  ;;  %v7097_v19 = vld [vmem:[%s9851_s1 + $0xd20] ss:$16 sps:$4 sm:$0xff]   ;;  %v7100_v20 = vld [vmem:[%s9851_s1 + $0xd28] ss:$16 sps:$4 sm:$0xff]  }
 0x170   :  { %4495 = vmatprep.subr.bf16.mxu0 %v7021_v22  ;;  %4946 = vmatprep.subr.bf16.mxu1 %v7024_v23  ;;  %v7105_v22 = vld [vmem:[%s9851_s1 + $0xd44] ss:$16 sps:$4 sm:$0xff]   ;;  %v7108_v23 = vld [vmem:[%s9851_s1 + $0xd4c] ss:$16 sps:$4 sm:$0xff]  }
 0x173   :  { %4496 = vmatpush1.bf16.msra.mxu0 %v7019_v24  ;;  %4947 = vmatpush1.bf16.msra.mxu1 %v7022_v13  ;;  %v7103_v24 = vld [vmem:[%s9851_s1 + $0xd40] ss:$16 sps:$4 sm:$0xff]   ;;  %v7106_v13 = vld [vmem:[%s9851_s1 + $0xd48] ss:$16 sps:$4 sm:$0xff]  }
 0x174   :  { %4497 = vmatprep.subr.bf16.mxu0 %v7027_v27  ;;  %4948 = vmatprep.subr.bf16.mxu1 %v7030_v28  ;;  %v7111_v27 = vld [vmem:[%s9851_s1 + $0xd64] ss:$16 sps:$4 sm:$0xff]   ;;  %v7114_v28 = vld [vmem:[%s9851_s1 + $0xd6c] ss:$16 sps:$4 sm:$0xff]  }
 0x177   :  { %4498 = vmatpush1.bf16.msra.mxu0 %v7025_v29  ;;  %4949 = vmatpush1.bf16.msra.mxu1 %v7028_v14  ;;  %v7109_v29 = vld [vmem:[%s9851_s1 + $0xd60] ss:$16 sps:$4 sm:$0xff]   ;;  %v7112_v14 = vld [vmem:[%s9851_s1 + $0xd68] ss:$16 sps:$4 sm:$0xff]  }
 0x178   :  { %4499 = vmatprep.subr.bf16.mxu0 %v7033_v30  ;;  %4950 = vmatprep.subr.bf16.mxu1 %v7036_v31  ;;  %v7117_v30 = vld [vmem:[%s9851_s1 + $0xd84] ss:$16 sps:$4 sm:$0xff]   ;;  %v7120_v31 = vld [vmem:[%s9851_s1 + $0xd8c] ss:$16 sps:$4 sm:$0xff]  }
 0x17b   :  { %4500 = vmatpush1.bf16.msra.mxu0 %v7031_v33  ;;  %4951 = vmatpush1.bf16.msra.mxu1 %v7034_v26  ;;  %v7123_v33 = vld [vmem:[%s9851_s1 + $0xda4] ss:$16 sps:$4 sm:$0xff]   ;;  %v7126_v26 = vld [vmem:[%s9851_s1 + $0xdac] ss:$16 sps:$4 sm:$0xff]  }
 0x17c   :  { %4501 = vmatprep.subr.bf16.mxu0 %v7039_v36  ;;  %4952 = vmatprep.subr.bf16.mxu1 %v7042_v37  ;;  %v7121_v36 = vld [vmem:[%s9851_s1 + $0xda0] ss:$16 sps:$4 sm:$0xff]   ;;  %v7124_v37 = vld [vmem:[%s9851_s1 + $0xda8] ss:$16 sps:$4 sm:$0xff]  }
 0x17f   :  { %4502 = vmatpush1.bf16.msra.mxu0 %v7037_v21  ;;  %4953 = vmatpush1.bf16.msra.mxu1 %v7040_v39  ;;  %v7129_v21 = vld [vmem:[%s9851_s1 + $0xdc4] ss:$16 sps:$4 sm:$0xff]   ;;  %v7132_v39 = vld [vmem:[%s9851_s1 + $0xdcc] ss:$16 sps:$4 sm:$0xff]  }
 0x180   :  { %4512 = vmatprep.subr.bf16.mxu0 %v7045_v40  ;;  %4963 = vmatprep.subr.bf16.mxu1 %v7048_v41  ;;  %v7127_v40 = vld [vmem:[%s9851_s1 + $0xdc0] ss:$16 sps:$4 sm:$0xff]   ;;  %v7130_v41 = vld [vmem:[%s9851_s1 + $0xdc8] ss:$16 sps:$4 sm:$0xff]  }
 0x182   :  { %4504 = vmatmul.mubr.bf16.vlgmr.msra.gmra.mrb[0].mxu0 %v810_v42  ;;  %4955 = vmatmul.mubr.bf16.vlgmr.msra.gmra.mrb[0].mxu1 %v810_v42  ;;  %v7138_v42 = vld [vmem:[%s9851_s1 + $0xdec] ss:$16 sps:$4 sm:$0xff]  }
 0x183   :  { %4513 = vmatpush1.bf16.msra.mxu0 %v7043_v44  ;;  %4964 = vmatpush1.bf16.msra.mxu1 %v7046_v45  ;;  %v7133_v44 = vld [vmem:[%s9851_s1 + $0xde0] ss:$16 sps:$4 sm:$0xff]   ;;  %v7136_v45 = vld [vmem:[%s9851_s1 + $0xde8] ss:$16 sps:$4 sm:$0xff]  }
 0x184   :  { %4514 = vmatprep.subr.bf16.mxu0 %v7051_v46  ;;  %4965 = vmatprep.subr.bf16.mxu1 %v7054_v35  ;;  %v7142_v46 = vld [vmem:[%s9851_s1 + $0xe04] ss:$16 sps:$4 sm:$0xff]   ;;  %v7145_v35 = vld [vmem:[%s9851_s1 + $0xe0c] ss:$16 sps:$4 sm:$0xff]  }
 0x185   :  { %4544 = vmatprep.mubr.bf16.mxu0 %v8818_v47  ;;  %4995 = vmatprep.mubr.bf16.mxu1 %v8818_v47 }
 0x187   :  { %4515 = vmatpush1.bf16.msra.mxu0 %v7049_v48  ;;  %4966 = vmatpush1.bf16.msra.mxu1 %v7052_v50  ;;  %v9004_v48 = vrot.slane %v8787_v38, %v7710_v49  ;;  %v7140_v50 = vld [vmem:[%s9851_s1 + $0xe00] ss:$16 sps:$4 sm:$0xff]   ;;  %v7151_v38 = vld [vmem:[%s9851_s1 + $0xe2c] ss:$16 sps:$4 sm:$0xff]  }
 0x188   :  { %4516 = vmatprep.subr.bf16.mxu0 %v7057_v51  ;;  %4967 = vmatprep.subr.bf16.mxu1 %v7060_v53  ;;  %v7143_v51 = vld [vmem:[%s9851_s1 + $0xe08] ss:$16 sps:$4 sm:$0xff]   ;;  %v7148_v53 = vld [vmem:[%s9851_s1 + $0xe24] ss:$16 sps:$4 sm:$0xff]  }
 0x18b   :  { %4517 = vmatpush1.bf16.msra.mxu0 %v7055_v54  ;;  %4968 = vmatpush1.bf16.msra.mxu1 %v7058_v55  ;;  %v813_v54 = vcombine.high %v8818_v47, %v8818_v47  ;;  %v7146_v55 = vld [vmem:[%s9851_s1 + $0xe20] ss:$16 sps:$4 sm:$0xff]   ;;  %v7154_v47 = vld [vmem:[%s9851_s1 + $0xe44] ss:$16 sps:$4 sm:$0xff]  }
 0x18c   :  { %4518 = vmatprep.subr.bf16.mxu0 %v7063_v56  ;;  %4969 = vmatprep.subr.bf16.mxu1 %v7066_v57  ;;  %v7149_v56 = vld [vmem:[%s9851_s1 + $0xe28] ss:$16 sps:$4 sm:$0xff]   ;;  %v7157_v57 = vld [vmem:[%s9851_s1 + $0xe4c] ss:$16 sps:$4 sm:$0xff]  }
 0x18f   :  { %4519 = vmatpush1.bf16.msra.mxu0 %v7061_v58  ;;  %4970 = vmatpush1.bf16.msra.mxu1 %v7064_v59  ;;  %v7152_v58 = vld [vmem:[%s9851_s1 + $0xe40] ss:$16 sps:$4 sm:$0xff]   ;;  %v7155_v59 = vld [vmem:[%s9851_s1 + $0xe48] ss:$16 sps:$4 sm:$0xff]  }
 0x190   :  { %4520 = vmatprep.subr.bf16.mxu0 %v7069_v60  ;;  %4971 = vmatprep.subr.bf16.mxu1 %v7072_v61  ;;  %v7160_v60 = vld [vmem:[%s9851_s1 + $0xe64] ss:$16 sps:$4 sm:$0xff]   ;;  %v7163_v61 = vld [vmem:[%s9851_s1 + $0xe6c] ss:$16 sps:$4 sm:$0xff]  }
 0x193   :  { %4521 = vmatpush1.bf16.msra.mxu0 %v7067_v62  ;;  %4972 = vmatpush1.bf16.msra.mxu1 %v7070_v63  ;;  %v7158_v62 = vld [vmem:[%s9851_s1 + $0xe60] ss:$16 sps:$4 sm:$0xff]   ;;  %v7161_v63 = vld [vmem:[%s9851_s1 + $0xe68] ss:$16 sps:$4 sm:$0xff]  }
 0x194   :  { %4522 = vmatprep.subr.bf16.mxu0 %v7075_v0  ;;  %4973 = vmatprep.subr.bf16.mxu1 %v7078_v1  ;;  %v7166_v0 = vld [vmem:[%s9851_s1 + $0xe84] ss:$16 sps:$4 sm:$0xff]   ;;  %v7169_v1 = vld [vmem:[%s9851_s1 + $0xe8c] ss:$16 sps:$4 sm:$0xff]  }
 0x197   :  { %4523 = vmatpush1.bf16.msra.mxu0 %v7073_v2  ;;  %4974 = vmatpush1.bf16.msra.mxu1 %v7076_v3  ;;  %v7164_v2 = vld [vmem:[%s9851_s1 + $0xe80] ss:$16 sps:$4 sm:$0xff]   ;;  %v7167_v3 = vld [vmem:[%s9851_s1 + $0xe88] ss:$16 sps:$4 sm:$0xff]  }
 0x198   :  { %4524 = vmatprep.subr.bf16.mxu0 %v7081_v4  ;;  %4975 = vmatprep.subr.bf16.mxu1 %v7084_v5  ;;  %v7172_v4 = vld [vmem:[%s9851_s1 + $0xea4] ss:$16 sps:$4 sm:$0xff]   ;;  %v7175_v5 = vld [vmem:[%s9851_s1 + $0xeac] ss:$16 sps:$4 sm:$0xff]  }
 0x19b   :  { %4525 = vmatpush1.bf16.msra.mxu0 %v7079_v6  ;;  %4976 = vmatpush1.bf16.msra.mxu1 %v7082_v7  ;;  %v7170_v6 = vld [vmem:[%s9851_s1 + $0xea0] ss:$16 sps:$4 sm:$0xff]   ;;  %v7173_v7 = vld [vmem:[%s9851_s1 + $0xea8] ss:$16 sps:$4 sm:$0xff]  }
 0x19c   :  { %4526 = vmatprep.subr.bf16.mxu0 %v7087_v8  ;;  %4977 = vmatprep.subr.bf16.mxu1 %v7090_v9  ;;  %v7178_v8 = vld [vmem:[%s9851_s1 + $0xec4] ss:$16 sps:$4 sm:$0xff]   ;;  %v7181_v9 = vld [vmem:[%s9851_s1 + $0xecc] ss:$16 sps:$4 sm:$0xff]  }
 0x19f   :  { %4527 = vmatpush1.bf16.msra.mxu0 %v7085_v10  ;;  %4978 = vmatpush1.bf16.msra.mxu1 %v7088_v11  ;;  %v7176_v10 = vld [vmem:[%s9851_s1 + $0xec0] ss:$16 sps:$4 sm:$0xff]   ;;  %v7179_v11 = vld [vmem:[%s9851_s1 + $0xec8] ss:$16 sps:$4 sm:$0xff]  }
 0x1a0   :  { %4528 = vmatprep.subr.bf16.mxu0 %v7093_v12  ;;  %4979 = vmatprep.subr.bf16.mxu1 %v7096_v52  ;;  %v7184_v12 = vld [vmem:[%s9851_s1 + $0xee4] ss:$16 sps:$4 sm:$0xff]   ;;  %v7187_v52 = vld [vmem:[%s9851_s1 + $0xeec] ss:$16 sps:$4 sm:$0xff]  }
 0x1a3   :  { %4529 = vmatpush1.bf16.msra.mxu0 %v7091_v15  ;;  %4980 = vmatpush1.bf16.msra.mxu1 %v7094_v16  ;;  %v7182_v15 = vld [vmem:[%s9851_s1 + $0xee0] ss:$16 sps:$4 sm:$0xff]   ;;  %v7185_v16 = vld [vmem:[%s9851_s1 + $0xee8] ss:$16 sps:$4 sm:$0xff]  }
 0x1a4   :  { %4530 = vmatprep.subr.bf16.mxu0 %v7099_v17  ;;  %4981 = vmatprep.subr.bf16.mxu1 %v7102_v18  ;;  %v7190_v17 = vld [vmem:[%s9851_s1 + $0xf04] ss:$16 sps:$4 sm:$0xff]   ;;  %v7193_v18 = vld [vmem:[%s9851_s1 + $0xf0c] ss:$16 sps:$4 sm:$0xff]  }
 0x1a7   :  { %4531 = vmatpush1.bf16.msra.mxu0 %v7097_v19  ;;  %4982 = vmatpush1.bf16.msra.mxu1 %v7100_v20  ;;  %v7188_v19 = vld [vmem:[%s9851_s1 + $0xf00] ss:$16 sps:$4 sm:$0xff]   ;;  %v7191_v20 = vld [vmem:[%s9851_s1 + $0xf08] ss:$16 sps:$4 sm:$0xff]  }
 0x1a8   :  { %4532 = vmatprep.subr.bf16.mxu0 %v7105_v22  ;;  %4983 = vmatprep.subr.bf16.mxu1 %v7108_v23  ;;  %v7196_v22 = vld [vmem:[%s9851_s1 + $0xf24] ss:$16 sps:$4 sm:$0xff]   ;;  %v7199_v23 = vld [vmem:[%s9851_s1 + $0xf2c] ss:$16 sps:$4 sm:$0xff]  }
 0x1ab   :  { %4533 = vmatpush1.bf16.msra.mxu0 %v7103_v24  ;;  %4984 = vmatpush1.bf16.msra.mxu1 %v7106_v13  ;;  %v7194_v24 = vld [vmem:[%s9851_s1 + $0xf20] ss:$16 sps:$4 sm:$0xff]   ;;  %v7197_v13 = vld [vmem:[%s9851_s1 + $0xf28] ss:$16 sps:$4 sm:$0xff]  }
 0x1ac   :  { %4534 = vmatprep.subr.bf16.mxu0 %v7111_v27  ;;  %4985 = vmatprep.subr.bf16.mxu1 %v7114_v28  ;;  %v7202_v27 = vld [vmem:[%s9851_s1 + $0xf44] ss:$16 sps:$4 sm:$0xff]   ;;  %v7205_v28 = vld [vmem:[%s9851_s1 + $0xf4c] ss:$16 sps:$4 sm:$0xff]  }
 0x1af   :  { %4535 = vmatpush1.bf16.msra.mxu0 %v7109_v29  ;;  %4986 = vmatpush1.bf16.msra.mxu1 %v7112_v14  ;;  %v7200_v29 = vld [vmem:[%s9851_s1 + $0xf40] ss:$16 sps:$4 sm:$0xff]   ;;  %v7203_v14 = vld [vmem:[%s9851_s1 + $0xf48] ss:$16 sps:$4 sm:$0xff]  }
 0x1b0   :  { %4536 = vmatprep.subr.bf16.mxu0 %v7117_v30  ;;  %4987 = vmatprep.subr.bf16.mxu1 %v7120_v31  ;;  %v7208_v30 = vld [vmem:[%s9851_s1 + $0xf64] ss:$16 sps:$4 sm:$0xff]   ;;  %v7211_v31 = vld [vmem:[%s9851_s1 + $0xf6c] ss:$16 sps:$4 sm:$0xff]  }
 0x1b3   :  { %4537 = vmatpush1.bf16.msra.mxu0 %v7115_v25  ;;  %4988 = vmatpush1.bf16.msra.mxu1 %v7118_v32  ;;  %v7206_v25 = vld [vmem:[%s9851_s1 + $0xf60] ss:$16 sps:$4 sm:$0xff]   ;;  %v7209_v32 = vld [vmem:[%s9851_s1 + $0xf68] ss:$16 sps:$4 sm:$0xff]  }
 0x1b4   :  { %4538 = vmatprep.subr.bf16.mxu0 %v7123_v33  ;;  %4989 = vmatprep.subr.bf16.mxu1 %v7126_v26  ;;  %v7214_v33 = vld [vmem:[%s9851_s1 + $0xf84] ss:$16 sps:$4 sm:$0xff]   ;;  %v7217_v26 = vld [vmem:[%s9851_s1 + $0xf8c] ss:$16 sps:$4 sm:$0xff]  }
 0x1b7   :  { %4539 = vmatpush1.bf16.msra.mxu0 %v7121_v36  ;;  %4990 = vmatpush1.bf16.msra.mxu1 %v7124_v37  ;;  %v7212_v36 = vld [vmem:[%s9851_s1 + $0xf80] ss:$16 sps:$4 sm:$0xff]   ;;  %v7215_v37 = vld [vmem:[%s9851_s1 + $0xf88] ss:$16 sps:$4 sm:$0xff]  }
 0x1b8   :  { %4540 = vmatprep.subr.bf16.mxu0 %v7129_v21  ;;  %4991 = vmatprep.subr.bf16.mxu1 %v7132_v39  ;;  %v7220_v21 = vld [vmem:[%s9851_s1 + $0xfa4] ss:$16 sps:$4 sm:$0xff]   ;;  %v7223_v39 = vld [vmem:[%s9851_s1 + $0xfac] ss:$16 sps:$4 sm:$0xff]  }
 0x1bb   :  { %4541 = vmatpush1.bf16.msra.mxu0 %v7127_v40  ;;  %4992 = vmatpush1.bf16.msra.mxu1 %v7130_v41  ;;  %v7218_v40 = vld [vmem:[%s9851_s1 + $0xfa0] ss:$16 sps:$4 sm:$0xff]   ;;  %v7221_v41 = vld [vmem:[%s9851_s1 + $0xfa8] ss:$16 sps:$4 sm:$0xff]  }
 0x1bc   :  { %4542 = vmatprep.subr.bf16.mxu0 %v7135_v34  ;;  %4993 = vmatprep.subr.bf16.mxu1 %v7138_v42  ;;  %v7226_v34 = vld [vmem:[%s9851_s1 + $0xfc4] ss:$16 sps:$4 sm:$0xff]   ;;  %v7229_v42 = vld [vmem:[%s9851_s1 + $0xfcc] ss:$16 sps:$4 sm:$0xff]  }
 0x1bf   :  { %4543 = vmatpush1.bf16.msra.mxu0 %v7133_v44  ;;  %4994 = vmatpush1.bf16.msra.mxu1 %v7136_v45  ;;  %v9181_v44 = vld [vmem:[%s9852_s0 + $0x10] sm:$0x3f] }
 0x1c0   :  { %4553 = vmatprep.subr.bf16.mxu0 %v7142_v46  ;;  %5004 = vmatprep.subr.bf16.mxu1 %v7145_v35  ;;  %v7224_v45 = vld [vmem:[%s9851_s1 + $0xfc0] ss:$16 sps:$4 sm:$0xff]   ;;  %v7227_v46 = vld [vmem:[%s9851_s1 + $0xfc8] ss:$16 sps:$4 sm:$0xff]   ;;  %v7232_v35 = vld [vmem:[%s9851_s1 + $0xfe4] ss:$16 sps:$4 sm:$0xff]  }
 0x1c2   :  { %4545 = vmatmul.mubr.bf16.vlgmr.msra.gmra.mrb[0].mxu0 %v9004_v48  ;;  %4996 = vmatmul.mubr.bf16.vlgmr.msra.gmra.mrb[0].mxu1 %v9004_v48 }
 0x1c3   :  { %4554 = vmatpush1.bf16.msra.mxu0 %v7140_v50  ;;  %5005 = vmatpush1.bf16.msra.mxu1 %v7143_v51  ;;  %v7235_v50 = vld [vmem:[%s9851_s1 + $0xfec] ss:$16 sps:$4 sm:$0xff]   ;;  %v9197_v51 = vrot.slane %v9181_v44, %v7710_v49 }
 0x1c4   :  { %4555 = vmatprep.subr.bf16.mxu0 %v7148_v53  ;;  %5006 = vmatprep.subr.bf16.mxu1 %v7151_v38  ;;  %v7230_v53 = vld [vmem:[%s9851_s1 + $0xfe0] ss:$16 sps:$4 sm:$0xff]   ;;  %v7233_v38 = vld [vmem:[%s9851_s1 + $0xfe8] ss:$16 sps:$4 sm:$0xff]  }
 0x1c5   :  { %4585 = vmatprep.mubr.bf16.mxu0 %v813_v54  ;;  %5036 = vmatprep.mubr.bf16.mxu1 %v813_v54  ;;  %v7238_v54 = vld [vmem:[%s9851_s1 + $0x1004] ss:$16 sps:$4 sm:$0xff]  }
 0x1c7   :  { %4556 = vmatpush1.bf16.msra.mxu0 %v7146_v55  ;;  %5007 = vmatpush1.bf16.msra.mxu1 %v7149_v56  ;;  %v7241_v55 = vld [vmem:[%s9851_s1 + $0x100c] ss:$16 sps:$4 sm:$0xff]   ;;  %v829_v56 = vcombine.high %v9197_v51, %v9197_v51 }
 0x1c8   :  { %4557 = vmatprep.subr.bf16.mxu0 %v7154_v47  ;;  %5008 = vmatprep.subr.bf16.mxu1 %v7157_v57  ;;  %v811_v47 = vcombine.high %v9004_v48, %v9004_v48  ;;  %v7236_v57 = vld [vmem:[%s9851_s1 + $0x1000] ss:$16 sps:$4 sm:$0xff]   ;;  %v7247_v48 = vld [vmem:[%s9851_s1 + $0x102c] ss:$16 sps:$4 sm:$0xff]  }
 0x1cb   :  { %4558 = vmatpush1.bf16.msra.mxu0 %v7152_v58  ;;  %5009 = vmatpush1.bf16.msra.mxu1 %v7155_v59  ;;  %v7239_v58 = vld [vmem:[%s9851_s1 + $0x1008] ss:$16 sps:$4 sm:$0xff]   ;;  %v7244_v59 = vld [vmem:[%s9851_s1 + $0x1024] ss:$16 sps:$4 sm:$0xff]  }
 0x1cc   :  { %4559 = vmatprep.subr.bf16.mxu0 %v7160_v60  ;;  %5010 = vmatprep.subr.bf16.mxu1 %v7163_v61  ;;  %v9228_v60 = vrot.slane %v829_v56, %v7710_v49  ;;  %v7242_v61 = vld [vmem:[%s9851_s1 + $0x1020] ss:$16 sps:$4 sm:$0xff]   ;;  %v7323_v56 = vld [vmem:[%s9851_s1 + $0x11c8] ss:$16 sps:$4 sm:$0xff]  }
 0x1cf   :  { %4560 = vmatpush1.bf16.msra.mxu0 %v7158_v62  ;;  %5011 = vmatpush1.bf16.msra.mxu1 %v7161_v63  ;;  %v7245_v62 = vld [vmem:[%s9851_s1 + $0x1028] ss:$16 sps:$4 sm:$0xff]   ;;  %v7250_v63 = vld [vmem:[%s9851_s1 + $0x1044] ss:$16 sps:$4 sm:$0xff]  }
 0x1d0   :  { %4561 = vmatprep.subr.bf16.mxu0 %v7166_v0  ;;  %5012 = vmatprep.subr.bf16.mxu1 %v7169_v1  ;;  %v7253_v0 = vld [vmem:[%s9851_s1 + $0x104c] ss:$16 sps:$4 sm:$0xff]   ;;  %v7248_v1 = vld [vmem:[%s9851_s1 + $0x1040] ss:$16 sps:$4 sm:$0xff]  }
 0x1d3   :  { %4562 = vmatpush1.bf16.msra.mxu0 %v7164_v2  ;;  %5013 = vmatpush1.bf16.msra.mxu1 %v7167_v3  ;;  %v7251_v2 = vld [vmem:[%s9851_s1 + $0x1048] ss:$16 sps:$4 sm:$0xff]   ;;  %v7256_v3 = vld [vmem:[%s9851_s1 + $0x1064] ss:$16 sps:$4 sm:$0xff]  }
 0x1d4   :  { %4563 = vmatprep.subr.bf16.mxu0 %v7172_v4  ;;  %5014 = vmatprep.subr.bf16.mxu1 %v7175_v5  ;;  %v7259_v4 = vld [vmem:[%s9851_s1 + $0x106c] ss:$16 sps:$4 sm:$0xff]   ;;  %v7254_v5 = vld [vmem:[%s9851_s1 + $0x1060] ss:$16 sps:$4 sm:$0xff]  }
 0x1d7   :  { %4564 = vmatpush1.bf16.msra.mxu0 %v7170_v6  ;;  %5015 = vmatpush1.bf16.msra.mxu1 %v7173_v7  ;;  %v7257_v6 = vld [vmem:[%s9851_s1 + $0x1068] ss:$16 sps:$4 sm:$0xff]   ;;  %v7262_v7 = vld [vmem:[%s9851_s1 + $0x1084] ss:$16 sps:$4 sm:$0xff]  }
 0x1d8   :  { %4565 = vmatprep.subr.bf16.mxu0 %v7178_v8  ;;  %5016 = vmatprep.subr.bf16.mxu1 %v7181_v9  ;;  %v7265_v8 = vld [vmem:[%s9851_s1 + $0x108c] ss:$16 sps:$4 sm:$0xff]   ;;  %v7260_v9 = vld [vmem:[%s9851_s1 + $0x1080] ss:$16 sps:$4 sm:$0xff]  }
 0x1db   :  { %4566 = vmatpush1.bf16.msra.mxu0 %v7176_v10  ;;  %5017 = vmatpush1.bf16.msra.mxu1 %v7179_v11  ;;  %v7263_v10 = vld [vmem:[%s9851_s1 + $0x1088] ss:$16 sps:$4 sm:$0xff]   ;;  %v7268_v11 = vld [vmem:[%s9851_s1 + $0x10a4] ss:$16 sps:$4 sm:$0xff]  }
 0x1dc   :  { %4567 = vmatprep.subr.bf16.mxu0 %v7184_v12  ;;  %5018 = vmatprep.subr.bf16.mxu1 %v7187_v52  ;;  %v7271_v12 = vld [vmem:[%s9851_s1 + $0x10ac] ss:$16 sps:$4 sm:$0xff]   ;;  %v7266_v52 = vld [vmem:[%s9851_s1 + $0x10a0] ss:$16 sps:$4 sm:$0xff]  }
 0x1df   :  { %4568 = vmatpush1.bf16.msra.mxu0 %v7182_v15  ;;  %5019 = vmatpush1.bf16.msra.mxu1 %v7185_v16  ;;  %v7269_v15 = vld [vmem:[%s9851_s1 + $0x10a8] ss:$16 sps:$4 sm:$0xff]   ;;  %v7274_v16 = vld [vmem:[%s9851_s1 + $0x10c4] ss:$16 sps:$4 sm:$0xff]  }
 0x1e0   :  { %4569 = vmatprep.subr.bf16.mxu0 %v7190_v17  ;;  %5020 = vmatprep.subr.bf16.mxu1 %v7193_v18  ;;  %v7277_v17 = vld [vmem:[%s9851_s1 + $0x10cc] ss:$16 sps:$4 sm:$0xff]   ;;  %v7272_v18 = vld [vmem:[%s9851_s1 + $0x10c0] ss:$16 sps:$4 sm:$0xff]  }
 0x1e3   :  { %4570 = vmatpush1.bf16.msra.mxu0 %v7188_v19  ;;  %5021 = vmatpush1.bf16.msra.mxu1 %v7191_v20  ;;  %v7275_v19 = vld [vmem:[%s9851_s1 + $0x10c8] ss:$16 sps:$4 sm:$0xff]   ;;  %v7280_v20 = vld [vmem:[%s9851_s1 + $0x10e4] ss:$16 sps:$4 sm:$0xff]  }
 0x1e4   :  { %4571 = vmatprep.subr.bf16.mxu0 %v7196_v22  ;;  %5022 = vmatprep.subr.bf16.mxu1 %v7199_v23  ;;  %v7283_v22 = vld [vmem:[%s9851_s1 + $0x10ec] ss:$16 sps:$4 sm:$0xff]   ;;  %v7278_v23 = vld [vmem:[%s9851_s1 + $0x10e0] ss:$16 sps:$4 sm:$0xff]  }
 0x1e7   :  { %4572 = vmatpush1.bf16.msra.mxu0 %v7194_v24  ;;  %5023 = vmatpush1.bf16.msra.mxu1 %v7197_v13  ;;  %v7281_v24 = vld [vmem:[%s9851_s1 + $0x10e8] ss:$16 sps:$4 sm:$0xff]   ;;  %v7286_v13 = vld [vmem:[%s9851_s1 + $0x1104] ss:$16 sps:$4 sm:$0xff]  }
 0x1e8   :  { %4573 = vmatprep.subr.bf16.mxu0 %v7202_v27  ;;  %5024 = vmatprep.subr.bf16.mxu1 %v7205_v28  ;;  %v7289_v27 = vld [vmem:[%s9851_s1 + $0x110c] ss:$16 sps:$4 sm:$0xff]   ;;  %v7284_v28 = vld [vmem:[%s9851_s1 + $0x1100] ss:$16 sps:$4 sm:$0xff]  }
 0x1eb   :  { %4574 = vmatpush1.bf16.msra.mxu0 %v7200_v29  ;;  %5025 = vmatpush1.bf16.msra.mxu1 %v7203_v14  ;;  %v7287_v29 = vld [vmem:[%s9851_s1 + $0x1108] ss:$16 sps:$4 sm:$0xff]   ;;  %v7292_v14 = vld [vmem:[%s9851_s1 + $0x1124] ss:$16 sps:$4 sm:$0xff]  }
 0x1ec   :  { %4575 = vmatprep.subr.bf16.mxu0 %v7208_v30  ;;  %5026 = vmatprep.subr.bf16.mxu1 %v7211_v31  ;;  %v7295_v30 = vld [vmem:[%s9851_s1 + $0x112c] ss:$16 sps:$4 sm:$0xff]   ;;  %v7290_v31 = vld [vmem:[%s9851_s1 + $0x1120] ss:$16 sps:$4 sm:$0xff]  }
 0x1ef   :  { %4576 = vmatpush1.bf16.msra.mxu0 %v7206_v25  ;;  %5027 = vmatpush1.bf16.msra.mxu1 %v7209_v32  ;;  %v7293_v25 = vld [vmem:[%s9851_s1 + $0x1128] ss:$16 sps:$4 sm:$0xff]   ;;  %v7298_v32 = vld [vmem:[%s9851_s1 + $0x1144] ss:$16 sps:$4 sm:$0xff]  }
 0x1f0   :  { %4577 = vmatprep.subr.bf16.mxu0 %v7214_v33  ;;  %5028 = vmatprep.subr.bf16.mxu1 %v7217_v26  ;;  %v7301_v33 = vld [vmem:[%s9851_s1 + $0x114c] ss:$16 sps:$4 sm:$0xff]   ;;  %v7296_v26 = vld [vmem:[%s9851_s1 + $0x1140] ss:$16 sps:$4 sm:$0xff]  }
 0x1f3   :  { %4578 = vmatpush1.bf16.msra.mxu0 %v7212_v36  ;;  %5029 = vmatpush1.bf16.msra.mxu1 %v7215_v37  ;;  %v7299_v36 = vld [vmem:[%s9851_s1 + $0x1148] ss:$16 sps:$4 sm:$0xff]   ;;  %v7304_v37 = vld [vmem:[%s9851_s1 + $0x1164] ss:$16 sps:$4 sm:$0xff]  }
 0x1f4   :  { %4579 = vmatprep.subr.bf16.mxu0 %v7220_v21  ;;  %5030 = vmatprep.subr.bf16.mxu1 %v7223_v39  ;;  %v7307_v21 = vld [vmem:[%s9851_s1 + $0x116c] ss:$16 sps:$4 sm:$0xff]   ;;  %v7302_v39 = vld [vmem:[%s9851_s1 + $0x1160] ss:$16 sps:$4 sm:$0xff]  }
 0x1f7   :  { %4580 = vmatpush1.bf16.msra.mxu0 %v7218_v40  ;;  %5031 = vmatpush1.bf16.msra.mxu1 %v7221_v41  ;;  %v7305_v40 = vld [vmem:[%s9851_s1 + $0x1168] ss:$16 sps:$4 sm:$0xff]   ;;  %v7310_v41 = vld [vmem:[%s9851_s1 + $0x1184] ss:$16 sps:$4 sm:$0xff]  }
 0x1f8   :  { %4581 = vmatprep.subr.bf16.mxu0 %v7226_v34  ;;  %5032 = vmatprep.subr.bf16.mxu1 %v7229_v42  ;;  %v7313_v34 = vld [vmem:[%s9851_s1 + $0x118c] ss:$16 sps:$4 sm:$0xff]   ;;  %v7308_v42 = vld [vmem:[%s9851_s1 + $0x1180] ss:$16 sps:$4 sm:$0xff]  }
 0x1fb   :  { %4582 = vmatpush1.bf16.msra.mxu0 %v7224_v45  ;;  %5033 = vmatpush1.bf16.msra.mxu1 %v7227_v46  ;;  %v7311_v45 = vld [vmem:[%s9851_s1 + $0x1188] ss:$16 sps:$4 sm:$0xff]   ;;  %v7316_v46 = vld [vmem:[%s9851_s1 + $0x11a4] ss:$16 sps:$4 sm:$0xff]  }
 0x1fc   :  { %4583 = vmatprep.subr.bf16.mxu0 %v7232_v35  ;;  %5034 = vmatprep.subr.bf16.mxu1 %v7235_v50  ;;  %v7319_v35 = vld [vmem:[%s9851_s1 + $0x11ac] ss:$16 sps:$4 sm:$0xff]   ;;  %v7314_v50 = vld [vmem:[%s9851_s1 + $0x11a0] ss:$16 sps:$4 sm:$0xff]  }
 0x1ff   :  { %4584 = vmatpush1.bf16.msra.mxu0 %v7230_v53  ;;  %5035 = vmatpush1.bf16.msra.mxu1 %v7233_v38  ;;  %v7317_v53 = vld [vmem:[%s9851_s1 + $0x11a8] ss:$16 sps:$4 sm:$0xff]   ;;  %v7322_v38 = vld [vmem:[%s9851_s1 + $0x11c4] ss:$16 sps:$4 sm:$0xff]  }
 0x200   :  { %4594 = vmatprep.subr.bf16.mxu0 %v7238_v54  ;;  %5045 = vmatprep.subr.bf16.mxu1 %v7241_v55  ;;  %v7325_v54 = vld [vmem:[%s9851_s1 + $0x11cc] ss:$16 sps:$4 sm:$0xff]   ;;  %v7320_v55 = vld [vmem:[%s9851_s1 + $0x11c0] ss:$16 sps:$4 sm:$0xff]  }
 0x202   :  { %4586 = vmatmul.mubr.bf16.vlgmr.msra.gmra.mrb[0].mxu0 %v811_v47  ;;  %5037 = vmatmul.mubr.bf16.vlgmr.msra.gmra.mrb[0].mxu1 %v811_v47  ;;  %v7328_v47 = vld [vmem:[%s9851_s1 + $0x11e4] ss:$16 sps:$4 sm:$0xff]  }
 0x203   :  { %4595 = vmatpush1.bf16.msra.mxu0 %v7236_v57  ;;  %5046 = vmatpush1.bf16.msra.mxu1 %v7239_v58  ;;  %v7331_v57 = vld [vmem:[%s9851_s1 + $0x11ec] ss:$16 sps:$4 sm:$0xff]   ;;  %v7326_v58 = vld [vmem:[%s9851_s1 + $0x11e0] ss:$16 sps:$4 sm:$0xff]  }
 0x204   :  { %4596 = vmatprep.subr.bf16.mxu0 %v7244_v59  ;;  %5047 = vmatprep.subr.bf16.mxu1 %v7247_v48  ;;  %v7329_v59 = vld [vmem:[%s9851_s1 + $0x11e8] ss:$16 sps:$4 sm:$0xff]   ;;  %v7335_v48 = vld [vmem:[%s9851_s1 + $0x1204] ss:$16 sps:$4 sm:$0xff]  }
 0x205   :  { %4626 = vmatprep.mubr.bf16.mxu0 %v9228_v60  ;;  %5077 = vmatprep.mubr.bf16.mxu1 %v9228_v60 }
 0x207   :  { %4597 = vmatpush1.bf16.msra.mxu0 %v7242_v61  ;;  %5048 = vmatpush1.bf16.msra.mxu1 %v7245_v62  ;;  %v7338_v61 = vld [vmem:[%s9851_s1 + $0x120c] ss:$16 sps:$4 sm:$0xff]   ;;  %v7333_v62 = vld [vmem:[%s9851_s1 + $0x1200] ss:$16 sps:$4 sm:$0xff]  }
 0x208   :  { %4598 = vmatprep.subr.bf16.mxu0 %v7250_v63  ;;  %5049 = vmatprep.subr.bf16.mxu1 %v7253_v0  ;;  %v7336_v63 = vld [vmem:[%s9851_s1 + $0x1208] ss:$16 sps:$4 sm:$0xff]   ;;  %v9420_v0 = vrot.slane %v9197_v51, %v7710_v49  ;;  %v7339_v51 = vld [vmem:[%s9851_s1 + $0x1220] ss:$16 sps:$4 sm:$0xff]  }
 0x20b   :  { %4599 = vmatpush1.bf16.msra.mxu0 %v7248_v1  ;;  %5050 = vmatpush1.bf16.msra.mxu1 %v7251_v2  ;;  %v7341_v1 = vld [vmem:[%s9851_s1 + $0x1224] ss:$16 sps:$4 sm:$0xff]   ;;  %v7344_v2 = vld [vmem:[%s9851_s1 + $0x122c] ss:$16 sps:$4 sm:$0xff]  }
 0x20c   :  { %4600 = vmatprep.subr.bf16.mxu0 %v7256_v3  ;;  %5051 = vmatprep.subr.bf16.mxu1 %v7259_v4  ;;  %v860_v3 = vcombine.high %v9228_v60, %v9228_v60  ;;  %v7342_v4 = vld [vmem:[%s9851_s1 + $0x1228] ss:$16 sps:$4 sm:$0xff]   ;;  %v7347_v60 = vld [vmem:[%s9851_s1 + $0x1244] ss:$16 sps:$4 sm:$0xff]  }
 0x20f   :  { %4601 = vmatpush1.bf16.msra.mxu0 %v7254_v5  ;;  %5052 = vmatpush1.bf16.msra.mxu1 %v7257_v6  ;;  %v7350_v5 = vld [vmem:[%s9851_s1 + $0x124c] ss:$16 sps:$4 sm:$0xff]   ;;  %v7345_v6 = vld [vmem:[%s9851_s1 + $0x1240] ss:$16 sps:$4 sm:$0xff]  }
 0x210   :  { %4602 = vmatprep.subr.bf16.mxu0 %v7262_v7  ;;  %5053 = vmatprep.subr.bf16.mxu1 %v7265_v8  ;;  %v7348_v7 = vld [vmem:[%s9851_s1 + $0x1248] ss:$16 sps:$4 sm:$0xff]   ;;  %v7353_v8 = vld [vmem:[%s9851_s1 + $0x1264] ss:$16 sps:$4 sm:$0xff]  }
 0x213   :  { %4603 = vmatpush1.bf16.msra.mxu0 %v7260_v9  ;;  %5054 = vmatpush1.bf16.msra.mxu1 %v7263_v10  ;;  %v7356_v9 = vld [vmem:[%s9851_s1 + $0x126c] ss:$16 sps:$4 sm:$0xff]   ;;  %v7351_v10 = vld [vmem:[%s9851_s1 + $0x1260] ss:$16 sps:$4 sm:$0xff]  }
 0x214   :  { %4604 = vmatprep.subr.bf16.mxu0 %v7268_v11  ;;  %5055 = vmatprep.subr.bf16.mxu1 %v7271_v12  ;;  %v7354_v11 = vld [vmem:[%s9851_s1 + $0x1268] ss:$16 sps:$4 sm:$0xff]   ;;  %v7359_v12 = vld [vmem:[%s9851_s1 + $0x1284] ss:$16 sps:$4 sm:$0xff]  }
 0x217   :  { %4605 = vmatpush1.bf16.msra.mxu0 %v7266_v52  ;;  %5056 = vmatpush1.bf16.msra.mxu1 %v7269_v15  ;;  %v7362_v52 = vld [vmem:[%s9851_s1 + $0x128c] ss:$16 sps:$4 sm:$0xff]   ;;  %v7357_v15 = vld [vmem:[%s9851_s1 + $0x1280] ss:$16 sps:$4 sm:$0xff]  }
 0x218   :  { %4606 = vmatprep.subr.bf16.mxu0 %v7274_v16  ;;  %5057 = vmatprep.subr.bf16.mxu1 %v7277_v17  ;;  %v7360_v16 = vld [vmem:[%s9851_s1 + $0x1288] ss:$16 sps:$4 sm:$0xff]   ;;  %v7365_v17 = vld [vmem:[%s9851_s1 + $0x12a4] ss:$16 sps:$4 sm:$0xff]  }
 0x21b   :  { %4607 = vmatpush1.bf16.msra.mxu0 %v7272_v18  ;;  %5058 = vmatpush1.bf16.msra.mxu1 %v7275_v19  ;;  %v7368_v18 = vld [vmem:[%s9851_s1 + $0x12ac] ss:$16 sps:$4 sm:$0xff]   ;;  %v7363_v19 = vld [vmem:[%s9851_s1 + $0x12a0] ss:$16 sps:$4 sm:$0xff]  }
 0x21c   :  { %4608 = vmatprep.subr.bf16.mxu0 %v7280_v20  ;;  %5059 = vmatprep.subr.bf16.mxu1 %v7283_v22  ;;  %v7366_v20 = vld [vmem:[%s9851_s1 + $0x12a8] ss:$16 sps:$4 sm:$0xff]   ;;  %v7371_v22 = vld [vmem:[%s9851_s1 + $0x12c4] ss:$16 sps:$4 sm:$0xff]  }
 0x21f   :  { %4609 = vmatpush1.bf16.msra.mxu0 %v7278_v23  ;;  %5060 = vmatpush1.bf16.msra.mxu1 %v7281_v24  ;;  %v7374_v23 = vld [vmem:[%s9851_s1 + $0x12cc] ss:$16 sps:$4 sm:$0xff]   ;;  %v7369_v24 = vld [vmem:[%s9851_s1 + $0x12c0] ss:$16 sps:$4 sm:$0xff]  }
 0x220   :  { %4610 = vmatprep.subr.bf16.mxu0 %v7286_v13  ;;  %5061 = vmatprep.subr.bf16.mxu1 %v7289_v27  ;;  %v7372_v13 = vld [vmem:[%s9851_s1 + $0x12c8] ss:$16 sps:$4 sm:$0xff]   ;;  %v7377_v27 = vld [vmem:[%s9851_s1 + $0x12e4] ss:$16 sps:$4 sm:$0xff]  }
 0x223   :  { %4611 = vmatpush1.bf16.msra.mxu0 %v7284_v28  ;;  %5062 = vmatpush1.bf16.msra.mxu1 %v7287_v29  ;;  %v7380_v28 = vld [vmem:[%s9851_s1 + $0x12ec] ss:$16 sps:$4 sm:$0xff]   ;;  %v7375_v29 = vld [vmem:[%s9851_s1 + $0x12e0] ss:$16 sps:$4 sm:$0xff]  }
 0x224   :  { %4612 = vmatprep.subr.bf16.mxu0 %v7292_v14  ;;  %5063 = vmatprep.subr.bf16.mxu1 %v7295_v30  ;;  %v7378_v14 = vld [vmem:[%s9851_s1 + $0x12e8] ss:$16 sps:$4 sm:$0xff]   ;;  %v7383_v30 = vld [vmem:[%s9851_s1 + $0x1304] ss:$16 sps:$4 sm:$0xff]  }
 0x227   :  { %4613 = vmatpush1.bf16.msra.mxu0 %v7290_v31  ;;  %5064 = vmatpush1.bf16.msra.mxu1 %v7293_v25  ;;  %v7386_v31 = vld [vmem:[%s9851_s1 + $0x130c] ss:$16 sps:$4 sm:$0xff]   ;;  %v7381_v25 = vld [vmem:[%s9851_s1 + $0x1300] ss:$16 sps:$4 sm:$0xff]  }
 0x228   :  { %4614 = vmatprep.subr.bf16.mxu0 %v7298_v32  ;;  %5065 = vmatprep.subr.bf16.mxu1 %v7301_v33  ;;  %v7384_v32 = vld [vmem:[%s9851_s1 + $0x1308] ss:$16 sps:$4 sm:$0xff]   ;;  %v7389_v33 = vld [vmem:[%s9851_s1 + $0x1324] ss:$16 sps:$4 sm:$0xff]  }
 0x22b   :  { %4615 = vmatpush1.bf16.msra.mxu0 %v7296_v26  ;;  %5066 = vmatpush1.bf16.msra.mxu1 %v7299_v36  ;;  %v7392_v26 = vld [vmem:[%s9851_s1 + $0x132c] ss:$16 sps:$4 sm:$0xff]   ;;  %v7387_v36 = vld [vmem:[%s9851_s1 + $0x1320] ss:$16 sps:$4 sm:$0xff]  }
 0x22c   :  { %4616 = vmatprep.subr.bf16.mxu0 %v7304_v37  ;;  %5067 = vmatprep.subr.bf16.mxu1 %v7307_v21  ;;  %v7390_v37 = vld [vmem:[%s9851_s1 + $0x1328] ss:$16 sps:$4 sm:$0xff]   ;;  %v7395_v21 = vld [vmem:[%s9851_s1 + $0x1344] ss:$16 sps:$4 sm:$0xff]  }
 0x22f   :  { %4617 = vmatpush1.bf16.msra.mxu0 %v7302_v39  ;;  %5068 = vmatpush1.bf16.msra.mxu1 %v7305_v40  ;;  %v7398_v39 = vld [vmem:[%s9851_s1 + $0x134c] ss:$16 sps:$4 sm:$0xff]   ;;  %v7393_v40 = vld [vmem:[%s9851_s1 + $0x1340] ss:$16 sps:$4 sm:$0xff]  }
 0x230   :  { %4618 = vmatprep.subr.bf16.mxu0 %v7310_v41  ;;  %5069 = vmatprep.subr.bf16.mxu1 %v7313_v34  ;;  %v7396_v41 = vld [vmem:[%s9851_s1 + $0x1348] ss:$16 sps:$4 sm:$0xff]   ;;  %v7401_v34 = vld [vmem:[%s9851_s1 + $0x1364] ss:$16 sps:$4 sm:$0xff]  }
 0x233   :  { %4619 = vmatpush1.bf16.msra.mxu0 %v7308_v42  ;;  %5070 = vmatpush1.bf16.msra.mxu1 %v7311_v45  ;;  %v7404_v42 = vld [vmem:[%s9851_s1 + $0x136c] ss:$16 sps:$4 sm:$0xff]   ;;  %v7399_v45 = vld [vmem:[%s9851_s1 + $0x1360] ss:$16 sps:$4 sm:$0xff]  }
 0x234   :  { %4620 = vmatprep.subr.bf16.mxu0 %v7316_v46  ;;  %5071 = vmatprep.subr.bf16.mxu1 %v7319_v35  ;;  %v7402_v46 = vld [vmem:[%s9851_s1 + $0x1368] ss:$16 sps:$4 sm:$0xff]   ;;  %v7407_v35 = vld [vmem:[%s9851_s1 + $0x1384] ss:$16 sps:$4 sm:$0xff]  }
 0x237   :  { %4621 = vmatpush1.bf16.msra.mxu0 %v7314_v50  ;;  %5072 = vmatpush1.bf16.msra.mxu1 %v7317_v53  ;;  %v7410_v50 = vld [vmem:[%s9851_s1 + $0x138c] ss:$16 sps:$4 sm:$0xff]   ;;  %v7405_v53 = vld [vmem:[%s9851_s1 + $0x1380] ss:$16 sps:$4 sm:$0xff]  }
 0x238   :  { %4622 = vmatprep.subr.bf16.mxu0 %v7322_v38  ;;  %5073 = vmatprep.subr.bf16.mxu1 %v7325_v54  ;;  %v7408_v38 = vld [vmem:[%s9851_s1 + $0x1388] ss:$16 sps:$4 sm:$0xff]   ;;  %v7413_v54 = vld [vmem:[%s9851_s1 + $0x13a4] ss:$16 sps:$4 sm:$0xff]  }
 0x23b   :  { %4623 = vmatpush1.bf16.msra.mxu0 %v7320_v55  ;;  %5074 = vmatpush1.bf16.msra.mxu1 %v7323_v56  ;;  %v7416_v55 = vld [vmem:[%s9851_s1 + $0x13ac] ss:$16 sps:$4 sm:$0xff]   ;;  %v7411_v56 = vld [vmem:[%s9851_s1 + $0x13a0] ss:$16 sps:$4 sm:$0xff]  }
 0x23c   :  { %4624 = vmatprep.subr.bf16.mxu0 %v7328_v47  ;;  %5075 = vmatprep.subr.bf16.mxu1 %v7331_v57  ;;  %v7414_v47 = vld [vmem:[%s9851_s1 + $0x13a8] ss:$16 sps:$4 sm:$0xff]   ;;  %v7419_v57 = vld [vmem:[%s9851_s1 + $0x13c4] ss:$16 sps:$4 sm:$0xff]  }
 0x23f   :  { %4625 = vmatpush1.bf16.msra.mxu0 %v7326_v58  ;;  %5076 = vmatpush1.bf16.msra.mxu1 %v7329_v59  ;;  %v7422_v58 = vld [vmem:[%s9851_s1 + $0x13cc] ss:$16 sps:$4 sm:$0xff]   ;;  %v814_v59 = vcombine.high %v9181_v44, %v9181_v44 }
 0x240   :  { %4635 = vmatprep.subr.bf16.mxu0 %v7335_v48  ;;  %5086 = vmatprep.subr.bf16.mxu1 %v7338_v61  ;;  %v7417_v48 = vld [vmem:[%s9851_s1 + $0x13c0] ss:$16 sps:$4 sm:$0xff]   ;;  %v7420_v61 = vld [vmem:[%s9851_s1 + $0x13c8] ss:$16 sps:$4 sm:$0xff]   ;;  %v7428_v44 = vld [vmem:[%s9851_s1 + $0x13ec] ss:$16 sps:$4 sm:$0xff]  }
 0x242   :  { %4627 = vmatmul.mubr.bf16.vlgmr.msra.gmra.mrb[0].mxu0 %v9420_v0  ;;  %5078 = vmatmul.mubr.bf16.vlgmr.msra.gmra.mrb[0].mxu1 %v9420_v0 }
 0x243   :  { %4636 = vmatpush1.bf16.msra.mxu0 %v7333_v62  ;;  %5087 = vmatpush1.bf16.msra.mxu1 %v7336_v63  ;;  %v7425_v62 = vld [vmem:[%s9851_s1 + $0x13e4] ss:$16 sps:$4 sm:$0xff]   ;;  %v9603_v63 = vrot.slane %v814_v59, %v7710_v49  ;;  %v7498_v59 = vld [vmem:[%s9853_s3 + $0x98] sm:$0xff]  }
 0x244   :  { %4637 = vmatprep.subr.bf16.mxu0 %v7341_v1  ;;  %5088 = vmatprep.subr.bf16.mxu1 %v7344_v2  ;;  %v7423_v1 = vld [vmem:[%s9851_s1 + $0x13e0] ss:$16 sps:$4 sm:$0xff]   ;;  %v7426_v2 = vld [vmem:[%s9851_s1 + $0x13e8] ss:$16 sps:$4 sm:$0xff]  }
 0x245   :  { %4667 = vmatprep.mubr.bf16.mxu0 %v860_v3  ;;  %5118 = vmatprep.mubr.bf16.mxu1 %v860_v3  ;;  %v7431_v3 = vld [vmem:[%s9851_s1 + $0x1404] ss:$16 sps:$4 sm:$0xff]  }
 0x247   :  { %4638 = vmatpush1.bf16.msra.mxu0 %v7339_v51  ;;  %5089 = vmatpush1.bf16.msra.mxu1 %v7342_v4  ;;  %v7434_v51 = vld [vmem:[%s9851_s1 + $0x140c] ss:$16 sps:$4 sm:$0xff]   ;;  %v830_v4 = vcombine.high %v9603_v63, %v9603_v63 }
 0x248   :  { %4639 = vmatprep.subr.bf16.mxu0 %v7347_v60  ;;  %5090 = vmatprep.subr.bf16.mxu1 %v7350_v5  ;;  %v859_v60 = vcombine.high %v9420_v0, %v9420_v0  ;;  %v7429_v5 = vld [vmem:[%s9851_s1 + $0x1400] ss:$16 sps:$4 sm:$0xff]   ;;  %v7440_v0 = vld [vmem:[%s9851_s1 + $0x142c] ss:$16 sps:$4 sm:$0xff]  }
 0x24b   :  { %4640 = vmatpush1.bf16.msra.mxu0 %v7345_v6  ;;  %5091 = vmatpush1.bf16.msra.mxu1 %v7348_v7  ;;  %v7432_v6 = vld [vmem:[%s9851_s1 + $0x1408] ss:$16 sps:$4 sm:$0xff]   ;;  %v7437_v7 = vld [vmem:[%s9851_s1 + $0x1424] ss:$16 sps:$4 sm:$0xff]  }
 0x24c   :  { %4641 = vmatprep.subr.bf16.mxu0 %v7353_v8  ;;  %5092 = vmatprep.subr.bf16.mxu1 %v7356_v9  ;;  %v858_v8 = vrot.slane %v830_v4, %v7710_v49  ;;  %v7435_v9 = vld [vmem:[%s9851_s1 + $0x1420] ss:$16 sps:$4 sm:$0xff]  }
 0x24d   :  { %v7508_v4 = vld [vmem:[%s9853_s3 + $0x30] sm:$0xff]  }
 0x24f   :  { %4642 = vmatpush1.bf16.msra.mxu0 %v7351_v10  ;;  %5093 = vmatpush1.bf16.msra.mxu1 %v7354_v11  ;;  %v7438_v10 = vld [vmem:[%s9851_s1 + $0x1428] ss:$16 sps:$4 sm:$0xff]   ;;  %v7443_v11 = vld [vmem:[%s9851_s1 + $0x1444] ss:$16 sps:$4 sm:$0xff]  }
 0x250   :  { %4643 = vmatprep.subr.bf16.mxu0 %v7359_v12  ;;  %5094 = vmatprep.subr.bf16.mxu1 %v7362_v52  ;;  %v7446_v12 = vld [vmem:[%s9851_s1 + $0x144c] ss:$16 sps:$4 sm:$0xff]   ;;  %v7441_v52 = vld [vmem:[%s9851_s1 + $0x1440] ss:$16 sps:$4 sm:$0xff]  }
 0x253   :  { %4644 = vmatpush1.bf16.msra.mxu0 %v7357_v15  ;;  %5095 = vmatpush1.bf16.msra.mxu1 %v7360_v16  ;;  %v7444_v15 = vld [vmem:[%s9851_s1 + $0x1448] ss:$16 sps:$4 sm:$0xff]   ;;  %v7449_v16 = vld [vmem:[%s9851_s1 + $0x1464] ss:$16 sps:$4 sm:$0xff]  }
 0x254   :  { %4645 = vmatprep.subr.bf16.mxu0 %v7365_v17  ;;  %5096 = vmatprep.subr.bf16.mxu1 %v7368_v18  ;;  %v7452_v17 = vld [vmem:[%s9851_s1 + $0x146c] ss:$16 sps:$4 sm:$0xff]   ;;  %v7447_v18 = vld [vmem:[%s9851_s1 + $0x1460] ss:$16 sps:$4 sm:$0xff]  }
 0x257   :  { %4646 = vmatpush1.bf16.msra.mxu0 %v7363_v19  ;;  %5097 = vmatpush1.bf16.msra.mxu1 %v7366_v20  ;;  %v7450_v19 = vld [vmem:[%s9851_s1 + $0x1468] ss:$16 sps:$4 sm:$0xff]   ;;  %v7455_v20 = vld [vmem:[%s9851_s1 + $0x1484] ss:$16 sps:$4 sm:$0xff]  }
 0x258   :  { %4647 = vmatprep.subr.bf16.mxu0 %v7371_v22  ;;  %5098 = vmatprep.subr.bf16.mxu1 %v7374_v23  ;;  %v7458_v22 = vld [vmem:[%s9851_s1 + $0x148c] ss:$16 sps:$4 sm:$0xff]   ;;  %v7453_v23 = vld [vmem:[%s9851_s1 + $0x1480] ss:$16 sps:$4 sm:$0xff]  }
 0x25b   :  { %4648 = vmatpush1.bf16.msra.mxu0 %v7369_v24  ;;  %5099 = vmatpush1.bf16.msra.mxu1 %v7372_v13  ;;  %v7456_v24 = vld [vmem:[%s9851_s1 + $0x1488] ss:$16 sps:$4 sm:$0xff]   ;;  %v7461_v13 = vld [vmem:[%s9851_s1 + $0x14a4] ss:$16 sps:$4 sm:$0xff]  }
 0x25c   :  { %4649 = vmatprep.subr.bf16.mxu0 %v7377_v27  ;;  %5100 = vmatprep.subr.bf16.mxu1 %v7380_v28  ;;  %v7464_v27 = vld [vmem:[%s9851_s1 + $0x14ac] ss:$16 sps:$4 sm:$0xff]   ;;  %v7459_v28 = vld [vmem:[%s9851_s1 + $0x14a0] ss:$16 sps:$4 sm:$0xff]  }
 0x25f   :  { %4650 = vmatpush1.bf16.msra.mxu0 %v7375_v29  ;;  %5101 = vmatpush1.bf16.msra.mxu1 %v7378_v14  ;;  %v7462_v29 = vld [vmem:[%s9851_s1 + $0x14a8] ss:$16 sps:$4 sm:$0xff]   ;;  %v7467_v14 = vld [vmem:[%s9851_s1 + $0x14c4] ss:$16 sps:$4 sm:$0xff]  }
 0x260   :  { %4651 = vmatprep.subr.bf16.mxu0 %v7383_v30  ;;  %5102 = vmatprep.subr.bf16.mxu1 %v7386_v31  ;;  %v7470_v30 = vld [vmem:[%s9851_s1 + $0x14cc] ss:$16 sps:$4 sm:$0xff]   ;;  %v7465_v31 = vld [vmem:[%s9851_s1 + $0x14c0] ss:$16 sps:$4 sm:$0xff]  }
 0x263   :  { %4652 = vmatpush1.bf16.msra.mxu0 %v7381_v25  ;;  %5103 = vmatpush1.bf16.msra.mxu1 %v7384_v32  ;;  %v7468_v25 = vld [vmem:[%s9851_s1 + $0x14c8] ss:$16 sps:$4 sm:$0xff]   ;;  %v7473_v32 = vld [vmem:[%s9851_s1 + $0x14e4] ss:$16 sps:$4 sm:$0xff]  }
 0x264   :  { %4653 = vmatprep.subr.bf16.mxu0 %v7389_v33  ;;  %5104 = vmatprep.subr.bf16.mxu1 %v7392_v26  ;;  %v7476_v33 = vld [vmem:[%s9851_s1 + $0x14ec] ss:$16 sps:$4 sm:$0xff]   ;;  %v7471_v26 = vld [vmem:[%s9851_s1 + $0x14e0] ss:$16 sps:$4 sm:$0xff]  }
 0x267   :  { %4654 = vmatpush1.bf16.msra.mxu0 %v7387_v36  ;;  %5105 = vmatpush1.bf16.msra.mxu1 %v7390_v37  ;;  %v7474_v36 = vld [vmem:[%s9851_s1 + $0x14e8] ss:$16 sps:$4 sm:$0xff]   ;;  %v7479_v37 = vld [vmem:[%s9851_s1 + $0x1504] ss:$16 sps:$4 sm:$0xff]  }
 0x268   :  { %4655 = vmatprep.subr.bf16.mxu0 %v7395_v21  ;;  %5106 = vmatprep.subr.bf16.mxu1 %v7398_v39  ;;  %v7482_v21 = vld [vmem:[%s9851_s1 + $0x150c] ss:$16 sps:$4 sm:$0xff]   ;;  %v7477_v39 = vld [vmem:[%s9851_s1 + $0x1500] ss:$16 sps:$4 sm:$0xff]  }
 0x26b   :  { %4656 = vmatpush1.bf16.msra.mxu0 %v7393_v40  ;;  %5107 = vmatpush1.bf16.msra.mxu1 %v7396_v41  ;;  %v7480_v40 = vld [vmem:[%s9851_s1 + $0x1508] ss:$16 sps:$4 sm:$0xff]   ;;  %v7483_v41 = vld [vmem:[%s9853_s3 + $0x40] sm:$0xff]  }
 0x26c   :  { %4657 = vmatprep.subr.bf16.mxu0 %v7401_v34  ;;  %5108 = vmatprep.subr.bf16.mxu1 %v7404_v42  ;;  %v7485_v34 = vld [vmem:[%s9853_s3 + $0xc0] sm:$0xff]   ;;  %v844_v42 = vrot.slane %v9603_v63, %v7710_v49  ;;  %v7489_v49 = vld [vmem:[%s9853_s3 + $0xc8] sm:$0xff]  }
 0x26d   :  { %v7503_v63 = vld [vmem:[%s9853_s3 + $0x68] sm:$0xff]  }
 0x26f   :  { %4658 = vmatpush1.bf16.msra.mxu0 %v7399_v45  ;;  %5109 = vmatpush1.bf16.msra.mxu1 %v7402_v46  ;;  %v7484_v45 = vld [vmem:[%s9853_s3] sm:$0xff]  }
 0x270   :  { %4659 = vmatprep.subr.bf16.mxu0 %v7407_v35  ;;  %5110 = vmatprep.subr.bf16.mxu1 %v7410_v50  ;;  %v7486_v46 = vld [vmem:[%s9853_s3 + $0x80] sm:$0xff]   ;;  %v7487_v35 = vld [vmem:[%s9853_s3 + $0x48] sm:$0xff]  }
 0x271   :  { %v7488_v50 = vld [vmem:[%s9853_s3 + $0x8] sm:$0xff]  }
 0x273   :  { %4660 = vmatpush1.bf16.msra.mxu0 %v7405_v53  ;;  %5111 = vmatpush1.bf16.msra.mxu1 %v7408_v38  ;;  %v7490_v53 = vld [vmem:[%s9853_s3 + $0x88] sm:$0xff]   ;;  %v7491_v38 = vld [vmem:[%s9853_s3 + $0x50] sm:$0xff]  }
 0x274   :  { %4661 = vmatprep.subr.bf16.mxu0 %v7413_v54  ;;  %5112 = vmatprep.subr.bf16.mxu1 %v7416_v55  ;;  %v7493_v54 = vld [vmem:[%s9853_s3 + $0xd0] sm:$0xff]  }
 0x275   :  { %v7492_v55 = vld [vmem:[%s9853_s3 + $0x10] sm:$0xff]  }
 0x277   :  { %4662 = vmatpush1.bf16.msra.mxu0 %v7411_v56  ;;  %5113 = vmatpush1.bf16.msra.mxu1 %v7414_v47  ;;  %v7494_v56 = vld [vmem:[%s9853_s3 + $0x90] sm:$0xff]   ;;  %v7495_v47 = vld [vmem:[%s9853_s3 + $0x58] sm:$0xff]  }
 0x278   :  { %4663 = vmatprep.subr.bf16.mxu0 %v7419_v57  ;;  %5114 = vmatprep.subr.bf16.mxu1 %v7422_v58  ;;  %v7496_v57 = vld [vmem:[%s9853_s3 + $0x18] sm:$0xff]  }
 0x279   :  { %v7497_v58 = vld [vmem:[%s9853_s3 + $0xd8] sm:$0xff]  }
 0x27b   :  { %4664 = vmatpush1.bf16.msra.mxu0 %v7417_v48  ;;  %5115 = vmatpush1.bf16.msra.mxu1 %v7420_v61  ;;  %v7499_v48 = vld [vmem:[%s9853_s3 + $0x60] sm:$0xff]  }
 0x27c   :  { %4665 = vmatprep.subr.bf16.mxu0 %v7425_v62  ;;  %5116 = vmatprep.subr.bf16.mxu1 %v7428_v44  ;;  %v7500_v61 = vld [vmem:[%s9853_s3 + $0x20] sm:$0xff]  }
 0x27d   :  { %v7501_v62 = vld [vmem:[%s9853_s3 + $0xe0] sm:$0xff]  }
 0x27e   :  { %v7502_v44 = vld [vmem:[%s9853_s3 + $0xa0] sm:$0xff]  }
 0x27f   :  { %4666 = vmatpush1.bf16.msra.mxu0 %v7423_v1  ;;  %5117 = vmatpush1.bf16.msra.mxu1 %v7426_v2  ;;  %v7504_v1 = vld [vmem:[%s9853_s3 + $0x28] sm:$0xff]  }
 0x280   :  { %4676 = vmatprep.subr.bf16.mxu0 %v7431_v3  ;;  %5127 = vmatprep.subr.bf16.mxu1 %v7434_v51  ;;  %v7505_v2 = vld [vmem:[%s9853_s3 + $0xe8] sm:$0xff]   ;;  %v7507_v51 = vld [vmem:[%s9853_s3 + $0x70] sm:$0xff]  }
 0x281   :  { %v7506_v3 = vld [vmem:[%s9853_s3 + $0xa8] sm:$0xff]  }
 0x282   :  { %4668 = vmatmul.mubr.bf16.vlgmr.msra.gmra.mrb[0].mxu0 %v859_v60  ;;  %5119 = vmatmul.mubr.bf16.vlgmr.msra.gmra.mrb[0].mxu1 %v859_v60  ;;  %v7509_v60 = vld [vmem:[%s9853_s3 + $0xf0] sm:$0xff]  }
 0x283   :  { %4677 = vmatpush1.bf16.msra.mxu0 %v7429_v5  ;;  %5128 = vmatpush1.bf16.msra.mxu1 %v7432_v6  ;;  %v7511_v5 = vld [vmem:[%s9853_s3 + $0x78] sm:$0xff]   ;;  %v7510_v6 = vld [vmem:[%s9853_s3 + $0xb0] sm:$0xff]  }
 0x284   :  { %4678 = vmatprep.subr.bf16.mxu0 %v7437_v7  ;;  %5129 = vmatprep.subr.bf16.mxu1 %v7440_v0  ;;  %v7513_v7 = vld [vmem:[%s9853_s3 + $0xf8] sm:$0xff]  }
 0x285   :  { %6302 = vmatprep.mubr.msk.bf16.mxu0 %vm4262_vm0, %v858_v8  ;;  %6303 = vmatprep.mubr.msk.bf16.mxu1 %vm4262_vm0, %v858_v8  ;;  %v7512_v0 = vld [vmem:[%s9853_s3 + $0x38] sm:$0xff]  }
 0x286   :  { %v7514_v8 = vld [vmem:[%s9853_s3 + $0xb8] sm:$0xff]  }
 0x287   :  { %4679 = vmatpush1.bf16.msra.mxu0 %v7435_v9  ;;  %5130 = vmatpush1.bf16.msra.mxu1 %v7438_v10  ;;  %v5195_v9 = vsub.s32 0, %v7692_v43  ;;  %v5199_v10 = vsub.s32 1, %v7692_v43 }
 0x288   :  { %4680 = vmatprep.subr.bf16.mxu0 %v7443_v11  ;;  %5131 = vmatprep.subr.bf16.mxu1 %v7446_v12  ;;  %v5203_v11 = vsub.s32 2, %v7692_v43  ;;  %v5207_v12 = vsub.s32 3, %v7692_v43 }
 0x28b   :  { %4681 = vmatpush1.bf16.msra.mxu0 %v7441_v52  ;;  %5132 = vmatpush1.bf16.msra.mxu1 %v7444_v15  ;;  %v5191_v52 = vld [vmem:[%s9854_s2] sm:$0xf]  ;;  %v7518_v15 = vmov 1983009808  }
 0x28c   :  { %4682 = vmatprep.subr.bf16.mxu0 %v7449_v16  ;;  %5133 = vmatprep.subr.bf16.mxu1 %v7452_v17  ;;  %v5175_v16 = vunpack.c.l.s4 %v7518_v15  ;;  %v5196_v17 = vrot.slane %v5191_v52, %v5195_v9 }
 0x28f   :  { %4683 = vmatpush1.bf16.msra.mxu0 %v7447_v18  ;;  %5134 = vmatpush1.bf16.msra.mxu1 %v7450_v19  ;;  %v5200_v18 = vrot.slane %v5191_v52, %v5199_v10  ;;  %v5204_v19 = vrot.slane %v5191_v52, %v5203_v11 }
 0x290   :  { %4684 = vmatprep.subr.bf16.mxu0 %v7455_v20  ;;  %5135 = vmatprep.subr.bf16.mxu1 %v7458_v22  ;;  %v5208_v20 = vrot.slane %v5191_v52, %v5207_v12  ;;  %v5176_v22 = vunpack.c.0.s8 %v5175_v16 }
 0x293   :  { %4685 = vmatpush1.bf16.msra.mxu0 %v7453_v23  ;;  %5136 = vmatpush1.bf16.msra.mxu1 %v7456_v24  ;;  %v5209_v23 = vcombine.low %v5196_v17, %v5200_v18  ;;  %v5210_v24 = vcombine.low %v5204_v19, %v5208_v20 }
 0x294   :  { %4686 = vmatprep.subr.bf16.mxu0 %v7461_v13  ;;  %5137 = vmatprep.subr.bf16.mxu1 %v7464_v27 }
 0x297   :  { %4687 = vmatpush1.bf16.msra.mxu0 %v7459_v28  ;;  %5138 = vmatpush1.bf16.msra.mxu1 %v7462_v29  ;;  %v5179_v28 = vsub.s32 %v5176_v22, %v7692_v43 }
 0x298   :  { %4688 = vmatprep.subr.bf16.mxu0 %v7467_v14  ;;  %5139 = vmatprep.subr.bf16.mxu1 %v7470_v30 }
 0x29b   :  { %4689 = vmatpush1.bf16.msra.mxu0 %v7465_v31  ;;  %5140 = vmatpush1.bf16.msra.mxu1 %v7468_v25  ;;  %v5217_v25 = vrot.slane %v5209_v23, %v5179_v28 }
 0x29c   :  { %4690 = vmatprep.subr.bf16.mxu0 %v7473_v32  ;;  %5141 = vmatprep.subr.bf16.mxu1 %v7476_v33  ;;  %v5224_v32 = vrot.slane %v5210_v24, %v5179_v28 }
 0x29f   :  { %4691 = vmatpush1.bf16.msra.mxu0 %v7471_v26  ;;  %5142 = vmatpush1.bf16.msra.mxu1 %v7474_v36 }
 0x2a0   :  { %4692 = vmatprep.subr.bf16.mxu0 %v7479_v37  ;;  %5143 = vmatprep.subr.bf16.mxu1 %v7482_v21 }
 0x2a3   :  { %4693 = vmatpush1.bf16.msra.mxu0 %v7477_v39  ;;  %5144 = vmatpush1.bf16.msra.mxu1 %v7480_v40  ;;  %v36_v40 = vld [vmem:[%s9855_s5] sm:$0xff] }
 0x2a4   :  { %6339 = vmatprep.subr.bf16.mxu0 %v7483_v41  ;;  %6361 = vmatprep.subr.bf16.mxu1 %v7485_v34  ;;  %v5225_v34 = vcombine.low %v5217_v25, %v5224_v32 }
 0x2a6   :  { %4709 = vmatmul.mubr.bf16.vlgmr.msra.gmra.mrb[0].mxu0 %v844_v42  ;;  %5160 = vmatmul.mubr.bf16.vlgmr.msra.gmra.mrb[0].mxu1 %v844_v42 }
 0x2a7   :  { %6340 = vmatpush3.bf16.msra.mxu0 %v7484_v45  ;;  %6362 = vmatpush3.bf16.msra.mxu1 %v7486_v46  ;;  %v7519_v46 = vmov 0.0  }
 0x2a8   :  { %6341 = vmatprep.subr.bf16.mxu0 %v7487_v35  ;;  %6363 = vmatprep.subr.bf16.mxu1 %v7489_v49 }
 0x2ab   :  { %6342 = vmatpush3.bf16.msra.mxu0 %v7488_v50  ;;  %6364 = vmatpush3.bf16.msra.mxu1 %v7490_v53 }
 0x2ac   :  { %6343 = vmatprep.subr.bf16.mxu0 %v7491_v38  ;;  %6365 = vmatprep.subr.bf16.mxu1 %v7493_v54 }
 0x2af   :  { %6344 = vmatpush3.bf16.msra.mxu0 %v7492_v55  ;;  %6366 = vmatpush3.bf16.msra.mxu1 %v7494_v56 }
 0x2b0   :  { %6345 = vmatprep.subr.bf16.mxu0 %v7495_v47  ;;  %6367 = vmatprep.subr.bf16.mxu1 %v7497_v58 }
 0x2b3   :  { %6346 = vmatpush3.bf16.msra.mxu0 %v7496_v57  ;;  %6368 = vmatpush3.bf16.msra.mxu1 %v7498_v59 }
 0x2b4   :  { %6347 = vmatprep.subr.bf16.mxu0 %v7499_v48  ;;  %6369 = vmatprep.subr.bf16.mxu1 %v7501_v62 }
 0x2b7   :  { %6348 = vmatpush3.bf16.msra.mxu0 %v7500_v61  ;;  %6370 = vmatpush3.bf16.msra.mxu1 %v7502_v44 }
 0x2b8   :  { %6349 = vmatprep.subr.bf16.mxu0 %v7503_v63  ;;  %6371 = vmatprep.subr.bf16.mxu1 %v7505_v2 }
 0x2bb   :  { %6350 = vmatpush3.bf16.msra.mxu0 %v7504_v1  ;;  %6372 = vmatpush3.bf16.msra.mxu1 %v7506_v3  ;;  %v5231_v3 = vld [vmem:[%s9857_s6] sm:$0x3] }
 0x2bc   :  { %6351 = vmatprep.subr.bf16.mxu0 %v7507_v51  ;;  %6373 = vmatprep.subr.bf16.mxu1 %v7509_v60  ;;  %v6337_v60 = vld [vmem:[%s9858_s4] ss:$0 sm:$0xff] }
 0x2bf   :  { %6352 = vmatpush3.bf16.msra.mxu0 %v7508_v4  ;;  %6374 = vmatpush3.bf16.msra.mxu1 %v7510_v6 }
 0x2c0   :  { %6353 = vmatprep.subr.bf16.mxu0 %v7511_v5  ;;  %6375 = vmatprep.subr.bf16.mxu1 %v7513_v7  ;;  %v5609_v7 = vld [vmem:[%s9859_s7] sm:$0x3] }
 0x2c3   :  { %6354 = vmatpush3.bf16.msra.mxu0 %v7512_v0  ;;  %6376 = vmatpush3.bf16.msra.mxu1 %v7514_v8 }
 0x379   :  { %v4710_v13 = vpop.f32.mrb[0].mxu0  ;;  %v5161_v27 = vpop.f32.mrb[0].mxu1 }
 0x37a   :  { %v4712_v29 = vpop.f32.mrb[1].mxu0  ;;  %v5163_v14 = vpop.f32.mrb[1].mxu1 }
 0x37b   :  { %v5172_v30 = vcombine.low %v4710_v13, %v4712_v29  ;;  %v5173_v31 = vcombine.low %v5161_v27, %v5163_v14  ;;  %v4714_v33 = vpop.f32.mrb[2].mxu0  ;;  %v5165_v26 = vpop.f32.mrb[2].mxu1 }
 0x37c   :  { %v4715_v36 = vpop.f32.mrb[3].mxu0  ;;  %v5166_v37 = vpop.f32.mrb[3].mxu1 }
 0x37d   :  { %v5180_v21 = vrot.slane %v5172_v30, %v5179_v28  ;;  %v5187_v39 = vrot.slane %v5173_v31, %v5179_v28 }
 0x37f   :  { %v5188_v41 = vcombine.low %v5180_v21, %v5187_v39 }
 0x381   :  { %v5190_v42 = vadd.f32 %v5188_v41, %v36_v40 }
 0x383   :  { %v5227_v43 = vadd.f32 %v5225_v34, %v5190_v42 }
 0x385   :  { %vm5228_vm1 = vcmp.gt.f32.partialorder %v5227_v43, 1.0 }
 0x386   :  { %v5229_v45 = vsel %vm5228_vm1, 0.0, %v5227_v43  ;;  %v6304_v35 = vsel %vm5228_vm1, 1.0, %v7519_v46 }
 0x387   :  { %5230 = vst [vmem:[%s9856_s8] sm:$0xff] %v5229_v45  ;;  %v5242_v49 = vrot.slane %v6304_v35, %v5179_v28  ;;  %v5235_v50 = vcombine.high %v6304_v35, %v6304_v35 }
 0x389   :  { %v5250_v53 = vcombine.high %v5242_v49, %v5242_v49  ;;  %v5249_v38 = vrot.slane %v5235_v50, %v5179_v28  ;;  %v5256_v56 = vpack.c.bf16 %v5242_v49, %v5242_v49 }
 0x38b   :  { %v5257_v54 = vpack.c.bf16 %v5250_v53, %v5250_v53  ;;  %v5251_v55 = vcombine.high %v5249_v38, %v5249_v38  ;;  %v5258_v57 = vpack.c.bf16 %v5249_v38, %v5249_v38 }
 0x38d   :  { %5548 = vmatprep.mubr.bf16.mxu0 %v5257_v54  ;;  %v5259_v47 = vpack.c.bf16 %v5251_v55, %v5251_v55 }
 0x38e   :  { %5549 = vmatmul.mubr.bf16.vlgmr.msra.gmra.mrb[4].mxu0 %v5256_v56 }
 0x38f   :  { %5588 = vmatprep.mubr.bf16.mxu1 %v5259_v47 }
 0x390   :  { %5589 = vmatmul.mubr.bf16.vlgmr.msra.gmra.mrb[4].mxu1 %v5258_v57 }
 0x461   :  { %v6355_v58 = vpop.f32.mrb[4].mxu0 }
 0x462   :  { %v6356_v59 = vpop.f32.mrb[5].mxu0 }
 0x463   :  { %v6357_v48 = vadd.f32 %v6356_v59, %v6355_v58  ;;  %v6358_v61 = vpop.f32.mrb[6].mxu0  ;;  %v6377_v62 = vpop.f32.mrb[4].mxu1 }
 0x464   :  { %v6359_v44 = vpop.f32.mrb[7].mxu0  ;;  %v6378_v63 = vpop.f32.mrb[5].mxu1 }
 0x465   :  { %v6379_v1 = vadd.f32 %v6378_v63, %v6377_v62  ;;  %v6380_v2 = vpop.f32.mrb[6].mxu1 }
 0x466   :  { %v6381_v51 = vpop.f32.mrb[7].mxu1 }
 0x467   :  { %v5591_v4 = vadd.f32 %v6379_v1, %v6357_v48 }
 0x469   :  { %v5596_v5 = vadd.f32 %v5591_v4, %v5231_v3 }
 0x46b   :  { %v5604_v6 = vadd.f32 %v6337_v60, %v5596_v5 }
 0x46d   :  { %vm5605_vm3 = vcmp.gt.f32.partialorder %v5604_v6, 1.0 }
 0x46e   :  { %v5606_v0 = vsel %vm5605_vm3, 0.0, %v5604_v6  ;;  %v6338_v8 = vsel %vm5605_vm3, 1.0, %v7519_v46 }
 0x46f   :  { %5608 = vst.msk [vmem:[%s9860_s9] sm:$0x3] %vm5607_vm2, %v5606_v0  ;;  %v5612_v9 = vadd.f32 %v6338_v8, %v5609_v7 }
 0x471   :  { %5613 = vst.msk [vmem:[%s9861_s10] sm:$0x3] %vm5607_vm2, %v5612_v9 }

</bundles_post_ra>
